<compile_context>
chip_gen: v5e
topology: v5e:2x2
jax: 0.10.0
libtpu: 0.0.40
codegen_flags: <defaults>
</compile_context>

<pallas_src>
import functools

import jax
import jax.numpy as jnp
from jax.experimental import pallas as pl
from jax.experimental.pallas import tpu as pltpu


# --------------------------------------------------------------------------
# Pallas kernels
# --------------------------------------------------------------------------
def _gemm_bias_act_kernel(x_ref, w_ref, b_ref, o_ref, *, relu):
    """out = act(x @ w + b); bf16 at the MXU, f32 accumulate/epilogue."""
    acc = jnp.dot(x_ref[...].astype(jnp.bfloat16), w_ref[...],
                  preferred_element_type=jnp.float32)
    acc = acc + b_ref[...]
    if relu:
        acc = jnp.maximum(acc, 0.0)
    o_ref[...] = acc.astype(o_ref.dtype)


def _pick_row_block(m):
    """Split rows into 2 blocks (keeps both v7x TensorCores busy) when the
    halves stay sublane-aligned; otherwise one whole-array block."""
    if m % 16 == 0:
        return m // 2, 2
    return m, 1


def pallas_linear(x, w_bf16, b, relu=True):
    """x: (M, K) f32, w: (K, N) bf16, b: (N,) f32 -> (M, N) f32."""
    m, k = x.shape
    n = w_bf16.shape[1]
    mb, grid_m = _pick_row_block(m)
    return pl.pallas_call(
        functools.partial(_gemm_bias_act_kernel, relu=relu),
        out_shape=jax.ShapeDtypeStruct((m, n), jnp.float32),
        grid=(grid_m,),
        in_specs=[
            pl.BlockSpec((mb, k), lambda i: (i, 0)),
            pl.BlockSpec((k, n), lambda i: (0, 0)),
            pl.BlockSpec((1, n), lambda i: (0, 0)),
        ],
        out_specs=pl.BlockSpec((mb, n), lambda i: (i, 0)),
        compiler_params=pltpu.CompilerParams(
            dimension_semantics=("parallel",)),
    )(x, w_bf16, b.reshape(1, n))


def _rn_fc_head_kernel(tok_ref, flat_ref,
                       g1i_ref, g1j_ref, ci_ref, cj_ref,
                       g2w_ref, g2b_ref, f1w_ref, f1b_ref, f2w_ref, f2b_ref,
                       fcw_ref, fcb_ref,
                       w1r_ref, w1f_ref, b1_ref, w2_ref, b2_ref, w3_ref, b3_ref,
                       out_ref, *, n_obj, g_hidden):
    """Fused RN branch + FC branch + final MLP for one batch element."""
    f32, bf16 = jnp.float32, jnp.bfloat16

    t = tok_ref[0]                                   # (n_obj, 24) f32
    tb = t.astype(bf16)

    # ---- RN branch ----
    # g layer 1, decomposed over pair members: coord embedding + bias folded
    # into ci/cj constants (computed once in the wrapper from the weights).
    a_i = jnp.dot(tb, g1i_ref[...], preferred_element_type=f32) + ci_ref[...]
    a_j = jnp.dot(tb, g1j_ref[...], preferred_element_type=f32) + cj_ref[...]
    h1 = jnp.maximum(a_i[:, None, :] + a_j[None, :, :], 0.0)   # (n,n,H)
    h1 = h1.reshape(n_obj * n_obj, g_hidden)                   # (n*n, H)

    g2 = jnp.dot(h1.astype(bf16), g2w_ref[...],
                 preferred_element_type=f32) + g2b_ref[...]
    g2 = jnp.maximum(g2, 0.0)                                  # (n*n, H)

    pooled = jnp.sum(g2, axis=0, keepdims=True)                # (1, H)

    f1 = jnp.maximum(
        jnp.dot(pooled.astype(bf16), f1w_ref[...],
                preferred_element_type=f32) + f1b_ref[...], 0.0)
    rn_x = jnp.maximum(
        jnp.dot(f1.astype(bf16), f2w_ref[...],
                preferred_element_type=f32) + f2b_ref[...], 0.0)   # (1, 64)

    # ---- FC branch ----
    fc_x = jnp.maximum(
        jnp.dot(flat_ref[0].astype(bf16), fcw_ref[...],
                preferred_element_type=f32) + fcb_ref[...], 0.0)   # (1, 64)

    # ---- final MLP: Linear(128,64) on cat([rn_x, fc_x]) == split weights ----
    z1 = (jnp.dot(rn_x.astype(bf16), w1r_ref[...], preferred_element_type=f32)
          + jnp.dot(fc_x.astype(bf16), w1f_ref[...], preferred_element_type=f32)
          + b1_ref[...])
    z1 = jnp.maximum(z1, 0.0)                                   # (1, 64)
    z2 = jnp.maximum(
        jnp.dot(z1.astype(bf16), w2_ref[...],
                preferred_element_type=f32) + b2_ref[...], 0.0)  # (1, 32)
    logits = jnp.dot(z2.astype(bf16), w3_ref[...],
                     preferred_element_type=f32) + b3_ref[...]   # (1, 2)
    out_ref[0] = logits.astype(out_ref.dtype)


# --------------------------------------------------------------------------
# Plain-JAX glue: NHWC im2col (matches PyTorch conv with padding & stride)
# --------------------------------------------------------------------------
def im2col_nhwc(x, kh, kw, stride, pad):
    """x: (B, H, W, C) -> (B*Ho*Wo, kh*kw*C); patch flatten order (kh, kw, C)."""
    b, h, w, c = x.shape
    xp = jnp.pad(x, ((0, 0), (pad, pad), (pad, pad), (0, 0)))
    ho = (h + 2 * pad - kh) // stride + 1
    wo = (w + 2 * pad - kw) // stride + 1
    patches = []
    for i in range(kh):
        for j in range(kw):
            patches.append(
                xp[:, i:i + stride * ho:stride, j:j + stride * wo:stride, :])
    cols = jnp.concatenate(patches, axis=-1)          # (B, Ho, Wo, kh*kw*C)
    return cols.reshape(b * ho * wo, kh * kw * c), ho, wo


def conv_w_matrix(w):
    """PyTorch conv weight (Cout, Cin, kh, kw) -> (kh*kw*Cin, Cout) bf16,
    matching the NHWC im2col patch order."""
    cout = w.shape[0]
    return jnp.transpose(w, (2, 3, 1, 0)).reshape(-1, cout).astype(jnp.bfloat16)


def make_coords(h, w):
    ys = jnp.linspace(-1.0, 1.0, h)
    xs = jnp.linspace(-1.0, 1.0, w)
    yy, xx = jnp.meshgrid(ys, xs, indexing="ij")
    return jnp.stack([yy.ravel(), xx.ravel()], axis=-1).astype(jnp.float32)


# --------------------------------------------------------------------------
# Parameters (deterministic init; shapes implied by the module)
# --------------------------------------------------------------------------
def init_params():
    key = jax.random.PRNGKey(42)
    ks = jax.random.split(key, 16)
    s = 0.05

    def rnd(k, shape):
        return jax.random.normal(k, shape, dtype=jnp.float32) * s

    p = {
        # cnn: 3 -> 12 -> 24 channels, two stride-2 3x3 convs, 32x32 -> 8x8
        "conv1_w": rnd(ks[0], (12, 3, 3, 3)),
        "conv1_b": jnp.zeros((12,), jnp.float32),
        "conv2_w": rnd(ks[1], (24, 12, 3, 3)),
        "conv2_b": jnp.zeros((24,), jnp.float32),
        # RN: objects = 64 positions x (24 feat + 2 coords);
        #     g: 52 -> 64 -> 64 (ReLU), sum over pairs; f: 64 -> 64 -> 64 (ReLU)
        "g1_w": rnd(ks[2], (52, 64)), "g1_b": jnp.zeros((64,), jnp.float32),
        "g2_w": rnd(ks[3], (64, 64)), "g2_b": jnp.zeros((64,), jnp.float32),
        "f1_w": rnd(ks[4], (64, 64)), "f1_b": jnp.zeros((64,), jnp.float32),
        "f2_w": rnd(ks[5], (64, 64)), "f2_b": jnp.zeros((64,), jnp.float32),
        # FC branch: flatten(24*8*8=1536) -> 64 (ReLU)
        "fc_w": rnd(ks[6], (1536, 64)), "fc_b": jnp.zeros((64,), jnp.float32),
        # final: Linear(128,64)+ReLU -> Linear(64,32)+ReLU -> Linear(32,2)
        "fin1_w": rnd(ks[7], (128, 64)), "fin1_b": jnp.zeros((64,), jnp.float32),
        "fin2_w": rnd(ks[8], (64, 32)),  "fin2_b": jnp.zeros((32,), jnp.float32),
        "fin3_w": rnd(ks[9], (32, 2)),   "fin3_b": jnp.zeros((2,), jnp.float32),
    }
    return p


# --------------------------------------------------------------------------
# Forward pass
# --------------------------------------------------------------------------
def cnn_rn_fc_forward(images_nchw, params):
    B = images_nchw.shape[0]
    x = jnp.transpose(images_nchw, (0, 2, 3, 1))                 # NHWC once

    # ---- cnn: two stride-2 3x3 convs + ReLU, NHWC end-to-end ----
    cols1, ho1, wo1 = im2col_nhwc(x, 3, 3, 2, 1)                 # (B*256, 27)
    y1 = pallas_linear(cols1, conv_w_matrix(params["conv1_w"]),
                       params["conv1_b"], relu=True)             # (B*256, 12)
    x1 = y1.reshape(B, ho1, wo1, 12)                             # no transpose

    cols2, ho2, wo2 = im2col_nhwc(x1, 3, 3, 2, 1)                # (B*64, 108)
    y2 = pallas_linear(cols2, conv_w_matrix(params["conv2_w"]),
                       params["conv2_b"], relu=True)             # (B*64, 24)

    n_obj = ho2 * wo2                                            # 64 objects
    d_feat = 24
    gh = 64
    tokens = y2.reshape(B, n_obj, d_feat)                        # (B, 64, 24)
    flat = y2.reshape(B, 1, n_obj * d_feat)                      # (B, 1, 1536)

    # ---- prepare RN / FC / final weights (static; constant-folded by XLA) ----
    bf = lambda a: a.astype(jnp.bfloat16)
    coords = make_coords(ho2, wo2)                               # (64, 2)
    g1_w, g1_b = params["g1_w"], params["g1_b"]
    g1_w_i, g1_w_j = g1_w[:26], g1_w[26:]                        # pair halves
    g1_wf_i, g1_wc_i = g1_w_i[:d_feat], g1_w_i[d_feat:]
    g1_wf_j, g1_wc_j = g1_w_j[:d_feat], g1_w_j[d_feat:]
    cemb_i = coords @ g1_wc_i + g1_b                             # bias folded
    cemb_j = coords @ g1_wc_j

    tok_spec = pl.BlockSpec((1, n_obj, d_feat), lambda b: (b, 0, 0))
    flat_spec = pl.BlockSpec((1, 1, n_obj * d_feat), lambda b: (b, 0, 0))
    out_spec = pl.BlockSpec((1, 1, 2), lambda b: (b, 0, 0))

    def full2(shape):
        return pl.BlockSpec(shape, lambda b: (0, 0))

    logits = pl.pallas_call(
        functools.partial(_rn_fc_head_kernel, n_obj=n_obj, g_hidden=gh),
        out_shape=jax.ShapeDtypeStruct((B, 1, 2), jnp.float32),
        grid=(B,),
        in_specs=[
            tok_spec, flat_spec,
            full2((d_feat, gh)), full2((d_feat, gh)),            # g1 feat i/j
            full2((n_obj, gh)), full2((n_obj, gh)),              # coord emb i/j
            full2((gh, gh)), full2((1, gh)),                     # g2
            full2((gh, 64)), full2((1, 64)),                     # f1
            full2((64, 64)), full2((1, 64)),                     # f2
            full2((n_obj * d_feat, 64)), full2((1, 64)),         # fc branch
            full2((64, 64)), full2((64, 64)), full2((1, 64)),    # final1 split
            full2((64, 32)), full2((1, 32)),                     # final2
            full2((32, 2)), full2((1, 2)),                       # final3
        ],
        out_specs=out_spec,
        compiler_params=pltpu.CompilerParams(
            dimension_semantics=("parallel",)),
    )(tokens, flat,
      bf(g1_wf_i), bf(g1_wf_j), cemb_i, cemb_j,
      bf(params["g2_w"]), params["g2_b"].reshape(1, gh),
      bf(params["f1_w"]), params["f1_b"].reshape(1, 64),
      bf(params["f2_w"]), params["f2_b"].reshape(1, 64),
      bf(params["fc_w"]), params["fc_b"].reshape(1, 64),
      bf(params["fin1_w"][:64]), bf(params["fin1_w"][64:]),
      params["fin1_b"].reshape(1, 64),
      bf(params["fin2_w"]), params["fin2_b"].reshape(1, 32),
      bf(params["fin3_w"]), params["fin3_b"].reshape(1, 2))

    return logits.reshape(B, 2)


# --------------------------------------------------------------------------
# Main
# --------------------------------------------------------------------------
if __name__ == "__main__":
    params = init_params()
    key = jax.random.PRNGKey(0)
    images = jax.random.normal(key, (2, 3, 32, 32), dtype=jnp.float32)  # NCHW

    fwd = jax.jit(lambda x: cnn_rn_fc_forward(x, params))
    out = jax.block_until_ready(fwd(images))

    assert out.shape == (2, 2), f"unexpected output shape {out.shape}"
    assert jnp.all(jnp.isfinite(out)), "non-finite output"
    print("KERNEL_OK")
</pallas_src>

<mosaic_0001>
module attributes {stable_mosaic.version = 11 : i64} {
  func.func @_gemm_bias_act_kernel(%arg0: i32, %arg1: memref<256x27xf32, #tpu.memory_space<vmem>>, %arg2: memref<27x12xbf16, #tpu.memory_space<vmem>>, %arg3: memref<1x12xf32, #tpu.memory_space<vmem>>, %arg4: memref<256x12xf32, #tpu.memory_space<vmem>>) attributes {dimension_semantics = [#tpu.dimension_semantics<parallel>], iteration_bounds = array<i64: 2>, scalar_prefetch = 0 : i64, scratch_operands = 0 : i64, tpu.core_type = #tpu.core_type<tc>, window_params = [{transform_indices = @transform_0, window_bounds = array<i64: 256, 27>}, {pipeline_mode = #tpu.pipeline_mode<synchronous>, transform_indices = @transform_1, window_bounds = array<i64: 27, 12>}, {pipeline_mode = #tpu.pipeline_mode<synchronous>, transform_indices = @transform_2, window_bounds = array<i64: 1, 12>}, {transform_indices = @transform_3, window_bounds = array<i64: 256, 12>}]} {
    %c0 = arith.constant 0 : index
    %c0_0 = arith.constant 0 : index
    %0 = vector.load %arg1[%c0, %c0_0] : memref<256x27xf32, #tpu.memory_space<vmem>>, vector<256x27xf32>
    %1 = arith.truncf %0 : vector<256x27xf32> to vector<256x27xbf16>
    %c0_1 = arith.constant 0 : index
    %c0_2 = arith.constant 0 : index
    %2 = vector.load %arg2[%c0_1, %c0_2] : memref<27x12xbf16, #tpu.memory_space<vmem>>, vector<27x12xbf16>
    %cst = arith.constant dense<0.000000e+00> : vector<256x12xf32>
    %3 = tpu.matmul %1, %2, %cst {dimension_numbers = #tpu.dot_dimension_numbers<[1], [0], [0], [1], [0, 0, 1, 1], [], []>} : vector<256x27xbf16>, vector<27x12xbf16>, vector<256x12xf32> -> vector<256x12xf32>
    %c0_3 = arith.constant 0 : index
    %c0_4 = arith.constant 0 : index
    %4 = vector.load %arg3[%c0_3, %c0_4] : memref<1x12xf32, #tpu.memory_space<vmem>>, vector<1x12xf32>
    %5 = vector.broadcast %4 : vector<1x12xf32> to vector<256x12xf32>
    %6 = arith.addf %3, %5 : vector<256x12xf32>
    %cst_5 = arith.constant 0.000000e+00 : f32
    %7 = vector.broadcast %cst_5 : f32 to vector<256x12xf32>
    %8 = arith.maximumf %6, %7 : vector<256x12xf32>
    %c0_6 = arith.constant 0 : index
    %c0_7 = arith.constant 0 : index
    %9 = vector.load %arg4[%c0_6, %c0_7] : memref<256x12xf32, #tpu.memory_space<vmem>>, vector<256x12xf32>
    tpu.vector_store %arg4[%c0_6, %c0_7], %8 {strides = array<i32>} : memref<256x12xf32, #tpu.memory_space<vmem>>, vector<256x12xf32>,
    return
  }
  func.func @transform_0(%arg0: i32) -> (i32, i32) {
    %c0_i32 = arith.constant 0 : i32
    %c0_i32_0 = arith.constant 0 : i32
    return %arg0, %c0_i32 : i32, i32
  }
  func.func @transform_1(%arg0: i32) -> (i32, i32) {
    %c0_i32 = arith.constant 0 : i32
    %c0_i32_0 = arith.constant 0 : i32
    %c0_i32_1 = arith.constant 0 : i32
    return %c0_i32, %c0_i32_0 : i32, i32
  }
  func.func @transform_2(%arg0: i32) -> (i32, i32) {
    %c0_i32 = arith.constant 0 : i32
    %c0_i32_0 = arith.constant 0 : i32
    %c0_i32_1 = arith.constant 0 : i32
    return %c0_i32, %c0_i32_0 : i32, i32
  }
  func.func @transform_3(%arg0: i32) -> (i32, i32) {
    %c0_i32 = arith.constant 0 : i32
    %c0_i32_0 = arith.constant 0 : i32
    return %arg0, %c0_i32 : i32, i32
  }
}

module attributes {stable_mosaic.version = 11 : i64} {
  func.func @_gemm_bias_act_kernel(%arg0: i32, %arg1: memref<64x108xf32, #tpu.memory_space<vmem>>, %arg2: memref<108x24xbf16, #tpu.memory_space<vmem>>, %arg3: memref<1x24xf32, #tpu.memory_space<vmem>>, %arg4: memref<64x24xf32, #tpu.memory_space<vmem>>) attributes {dimension_semantics = [#tpu.dimension_semantics<parallel>], iteration_bounds = array<i64: 2>, scalar_prefetch = 0 : i64, scratch_operands = 0 : i64, tpu.core_type = #tpu.core_type<tc>, window_params = [{transform_indices = @transform_0, window_bounds = array<i64: 64, 108>}, {pipeline_mode = #tpu.pipeline_mode<synchronous>, transform_indices = @transform_1, window_bounds = array<i64: 108, 24>}, {pipeline_mode = #tpu.pipeline_mode<synchronous>, transform_indices = @transform_2, window_bounds = array<i64: 1, 24>}, {transform_indices = @transform_3, window_bounds = array<i64: 64, 24>}]} {
    %c0 = arith.constant 0 : index
    %c0_0 = arith.constant 0 : index
    %0 = vector.load %arg1[%c0, %c0_0] : memref<64x108xf32, #tpu.memory_space<vmem>>, vector<64x108xf32>
    %1 = arith.truncf %0 : vector<64x108xf32> to vector<64x108xbf16>
    %c0_1 = arith.constant 0 : index
    %c0_2 = arith.constant 0 : index
    %2 = vector.load %arg2[%c0_1, %c0_2] : memref<108x24xbf16, #tpu.memory_space<vmem>>, vector<108x24xbf16>
    %cst = arith.constant dense<0.000000e+00> : vector<64x24xf32>
    %3 = tpu.matmul %1, %2, %cst {dimension_numbers = #tpu.dot_dimension_numbers<[1], [0], [0], [1], [0, 0, 1, 1], [], []>} : vector<64x108xbf16>, vector<108x24xbf16>, vector<64x24xf32> -> vector<64x24xf32>
    %c0_3 = arith.constant 0 : index
    %c0_4 = arith.constant 0 : index
    %4 = vector.load %arg3[%c0_3, %c0_4] : memref<1x24xf32, #tpu.memory_space<vmem>>, vector<1x24xf32>
    %5 = vector.broadcast %4 : vector<1x24xf32> to vector<64x24xf32>
    %6 = arith.addf %3, %5 : vector<64x24xf32>
    %cst_5 = arith.constant 0.000000e+00 : f32
    %7 = vector.broadcast %cst_5 : f32 to vector<64x24xf32>
    %8 = arith.maximumf %6, %7 : vector<64x24xf32>
    %c0_6 = arith.constant 0 : index
    %c0_7 = arith.constant 0 : index
    %9 = vector.load %arg4[%c0_6, %c0_7] : memref<64x24xf32, #tpu.memory_space<vmem>>, vector<64x24xf32>
    tpu.vector_store %arg4[%c0_6, %c0_7], %8 {strides = array<i32>} : memref<64x24xf32, #tpu.memory_space<vmem>>, vector<64x24xf32>,
    return
  }
  func.func @transform_0(%arg0: i32) -> (i32, i32) {
    %c0_i32 = arith.constant 0 : i32
    %c0_i32_0 = arith.constant 0 : i32
    return %arg0, %c0_i32 : i32, i32
  }
  func.func @transform_1(%arg0: i32) -> (i32, i32) {
    %c0_i32 = arith.constant 0 : i32
    %c0_i32_0 = arith.constant 0 : i32
    %c0_i32_1 = arith.constant 0 : i32
    return %c0_i32, %c0_i32_0 : i32, i32
  }
  func.func @transform_2(%arg0: i32) -> (i32, i32) {
    %c0_i32 = arith.constant 0 : i32
    %c0_i32_0 = arith.constant 0 : i32
    %c0_i32_1 = arith.constant 0 : i32
    return %c0_i32, %c0_i32_0 : i32, i32
  }
  func.func @transform_3(%arg0: i32) -> (i32, i32) {
    %c0_i32 = arith.constant 0 : i32
    %c0_i32_0 = arith.constant 0 : i32
    return %arg0, %c0_i32 : i32, i32
  }
}

module attributes {stable_mosaic.version = 11 : i64} {
  func.func @_rn_fc_head_kernel(%arg0: i32, %arg1: memref<1x64x24xf32, #tpu.memory_space<vmem>>, %arg2: memref<1x1x1536xf32, #tpu.memory_space<vmem>>, %arg3: memref<24x64xbf16, #tpu.memory_space<vmem>>, %arg4: memref<24x64xbf16, #tpu.memory_space<vmem>>, %arg5: memref<64x64xf32, #tpu.memory_space<vmem>>, %arg6: memref<64x64xf32, #tpu.memory_space<vmem>>, %arg7: memref<64x64xbf16, #tpu.memory_space<vmem>>, %arg8: memref<1x64xf32, #tpu.memory_space<vmem>>, %arg9: memref<64x64xbf16, #tpu.memory_space<vmem>>, %arg10: memref<1x64xf32, #tpu.memory_space<vmem>>, %arg11: memref<64x64xbf16, #tpu.memory_space<vmem>>, %arg12: memref<1x64xf32, #tpu.memory_space<vmem>>, %arg13: memref<1536x64xbf16, #tpu.memory_space<vmem>>, %arg14: memref<1x64xf32, #tpu.memory_space<vmem>>, %arg15: memref<64x64xbf16, #tpu.memory_space<vmem>>, %arg16: memref<64x64xbf16, #tpu.memory_space<vmem>>, %arg17: memref<1x64xf32, #tpu.memory_space<vmem>>, %arg18: memref<64x32xbf16, #tpu.memory_space<vmem>>, %arg19: memref<1x32xf32, #tpu.memory_space<vmem>>, %arg20: memref<32x2xbf16, #tpu.memory_space<vmem>>, %arg21: memref<1x2xf32, #tpu.memory_space<vmem>>, %arg22: memref<1x1x2xf32, #tpu.memory_space<vmem>>) attributes {dimension_semantics = [#tpu.dimension_semantics<parallel>], iteration_bounds = array<i64: 2>, scalar_prefetch = 0 : i64, scratch_operands = 0 : i64, tpu.core_type = #tpu.core_type<tc>, window_params = [{transform_indices = @transform_0, window_bounds = array<i64: 1, 64, 24>}, {transform_indices = @transform_1, window_bounds = array<i64: 1, 1, 1536>}, {pipeline_mode = #tpu.pipeline_mode<synchronous>, transform_indices = @transform_2, window_bounds = array<i64: 24, 64>}, {pipeline_mode = #tpu.pipeline_mode<synchronous>, transform_indices = @transform_3, window_bounds = array<i64: 24, 64>}, {pipeline_mode = #tpu.pipeline_mode<synchronous>, transform_indices = @transform_4, window_bounds = array<i64: 64, 64>}, {pipeline_mode = #tpu.pipeline_mode<synchronous>, transform_indices = @transform_5, window_bounds = array<i64: 64, 64>}, {pipeline_mode = #tpu.pipeline_mode<synchronous>, transform_indices = @transform_6, window_bounds = array<i64: 64, 64>}, {pipeline_mode = #tpu.pipeline_mode<synchronous>, transform_indices = @transform_7, window_bounds = array<i64: 1, 64>}, {pipeline_mode = #tpu.pipeline_mode<synchronous>, transform_indices = @transform_8, window_bounds = array<i64: 64, 64>}, {pipeline_mode = #tpu.pipeline_mode<synchronous>, transform_indices = @transform_9, window_bounds = array<i64: 1, 64>}, {pipeline_mode = #tpu.pipeline_mode<synchronous>, transform_indices = @transform_10, window_bounds = array<i64: 64, 64>}, {pipeline_mode = #tpu.pipeline_mode<synchronous>, transform_indices = @transform_11, window_bounds = array<i64: 1, 64>}, {pipeline_mode = #tpu.pipeline_mode<synchronous>, transform_indices = @transform_12, window_bounds = array<i64: 1536, 64>}, {pipeline_mode = #tpu.pipeline_mode<synchronous>, transform_indices = @transform_13, window_bounds = array<i64: 1, 64>}, {pipeline_mode = #tpu.pipeline_mode<synchronous>, transform_indices = @transform_14, window_bounds = array<i64: 64, 64>}, {pipeline_mode = #tpu.pipeline_mode<synchronous>, transform_indices = @transform_15, window_bounds = array<i64: 64, 64>}, {pipeline_mode = #tpu.pipeline_mode<synchronous>, transform_indices = @transform_16, window_bounds = array<i64: 1, 64>}, {pipeline_mode = #tpu.pipeline_mode<synchronous>, transform_indices = @transform_17, window_bounds = array<i64: 64, 32>}, {pipeline_mode = #tpu.pipeline_mode<synchronous>, transform_indices = @transform_18, window_bounds = array<i64: 1, 32>}, {pipeline_mode = #tpu.pipeline_mode<synchronous>, transform_indices = @transform_19, window_bounds = array<i64: 32, 2>}, {pipeline_mode = #tpu.pipeline_mode<synchronous>, transform_indices = @transform_20, window_bounds = array<i64: 1, 2>}, {transform_indices = @transform_21, window_bounds = array<i64: 1, 1, 2>}]} {
    %c0 = arith.constant 0 : index
    %c0_0 = arith.constant 0 : index
    %c0_1 = arith.constant 0 : index
    %0 = vector.load %arg1[%c0, %c0_0, %c0_1] : memref<1x64x24xf32, #tpu.memory_space<vmem>>, vector<1x64x24xf32>
    %1 = vector.shape_cast %0 : vector<1x64x24xf32> to vector<64x24xf32>
    %2 = arith.truncf %1 : vector<64x24xf32> to vector<64x24xbf16>
    %c0_2 = arith.constant 0 : index
    %c0_3 = arith.constant 0 : index
    %3 = vector.load %arg3[%c0_2, %c0_3] : memref<24x64xbf16, #tpu.memory_space<vmem>>, vector<24x64xbf16>
    %cst = arith.constant dense<0.000000e+00> : vector<64x64xf32>
    %4 = tpu.matmul %2, %3, %cst {dimension_numbers = #tpu.dot_dimension_numbers<[1], [0], [0], [1], [0, 0, 1, 1], [], []>} : vector<64x24xbf16>, vector<24x64xbf16>, vector<64x64xf32> -> vector<64x64xf32>
    %c0_4 = arith.constant 0 : index
    %c0_5 = arith.constant 0 : index
    %5 = vector.load %arg5[%c0_4, %c0_5] : memref<64x64xf32, #tpu.memory_space<vmem>>, vector<64x64xf32>
    %6 = arith.addf %4, %5 : vector<64x64xf32>
    %c0_6 = arith.constant 0 : index
    %c0_7 = arith.constant 0 : index
    %7 = vector.load %arg4[%c0_6, %c0_7] : memref<24x64xbf16, #tpu.memory_space<vmem>>, vector<24x64xbf16>
    %cst_8 = arith.constant dense<0.000000e+00> : vector<64x64xf32>
    %8 = tpu.matmul %2, %7, %cst_8 {dimension_numbers = #tpu.dot_dimension_numbers<[1], [0], [0], [1], [0, 0, 1, 1], [], []>} : vector<64x24xbf16>, vector<24x64xbf16>, vector<64x64xf32> -> vector<64x64xf32>
    %c0_9 = arith.constant 0 : index
    %c0_10 = arith.constant 0 : index
    %9 = vector.load %arg6[%c0_9, %c0_10] : memref<64x64xf32, #tpu.memory_space<vmem>>, vector<64x64xf32>
    %10 = arith.addf %8, %9 : vector<64x64xf32>
    %11 = vector.shape_cast %6 : vector<64x64xf32> to vector<64x1x64xf32>
    %12 = vector.shape_cast %10 : vector<64x64xf32> to vector<1x64x64xf32>
    %13 = vector.broadcast %11 : vector<64x1x64xf32> to vector<64x64x64xf32>
    %14 = vector.broadcast %12 : vector<1x64x64xf32> to vector<64x64x64xf32>
    %15 = arith.addf %13, %14 : vector<64x64x64xf32>
    %cst_11 = arith.constant 0.000000e+00 : f32
    %16 = vector.broadcast %cst_11 : f32 to vector<64x64x64xf32>
    %17 = arith.maximumf %15, %16 : vector<64x64x64xf32>
    %18 = vector.shape_cast %17 : vector<64x64x64xf32> to vector<4096x64xf32>
    %19 = arith.truncf %18 : vector<4096x64xf32> to vector<4096x64xbf16>
    %c0_12 = arith.constant 0 : index
    %c0_13 = arith.constant 0 : index
    %20 = vector.load %arg7[%c0_12, %c0_13] : memref<64x64xbf16, #tpu.memory_space<vmem>>, vector<64x64xbf16>
    %cst_14 = arith.constant dense<0.000000e+00> : vector<4096x64xf32>
    %21 = tpu.matmul %19, %20, %cst_14 {dimension_numbers = #tpu.dot_dimension_numbers<[1], [0], [0], [1], [0, 0, 1, 1], [], []>} : vector<4096x64xbf16>, vector<64x64xbf16>, vector<4096x64xf32> -> vector<4096x64xf32>
    %c0_15 = arith.constant 0 : index
    %c0_16 = arith.constant 0 : index
    %22 = vector.load %arg8[%c0_15, %c0_16] : memref<1x64xf32, #tpu.memory_space<vmem>>, vector<1x64xf32>
    %23 = vector.broadcast %22 : vector<1x64xf32> to vector<4096x64xf32>
    %24 = arith.addf %21, %23 : vector<4096x64xf32>
    %cst_17 = arith.constant 0.000000e+00 : f32
    %25 = vector.broadcast %cst_17 : f32 to vector<4096x64xf32>
    %26 = arith.maximumf %24, %25 : vector<4096x64xf32>
    %cst_18 = arith.constant dense<0.000000e+00> : vector<64xf32>
    %27 = vector.multi_reduction <add>, %26, %cst_18 [0] : vector<4096x64xf32> to vector<64xf32>
    %28 = vector.shape_cast %27 : vector<64xf32> to vector<1x64xf32>
    %29 = arith.truncf %28 : vector<1x64xf32> to vector<1x64xbf16>
    %c0_19 = arith.constant 0 : index
    %c0_20 = arith.constant 0 : index
    %30 = vector.load %arg9[%c0_19, %c0_20] : memref<64x64xbf16, #tpu.memory_space<vmem>>, vector<64x64xbf16>
    %cst_21 = arith.constant dense<0.000000e+00> : vector<1x64xf32>
    %31 = tpu.matmul %29, %30, %cst_21 {dimension_numbers = #tpu.dot_dimension_numbers<[1], [0], [0], [1], [0, 0, 1, 1], [], []>} : vector<1x64xbf16>, vector<64x64xbf16>, vector<1x64xf32> -> vector<1x64xf32>
    %c0_22 = arith.constant 0 : index
    %c0_23 = arith.constant 0 : index
    %32 = vector.load %arg10[%c0_22, %c0_23] : memref<1x64xf32, #tpu.memory_space<vmem>>, vector<1x64xf32>
    %33 = arith.addf %31, %32 : vector<1x64xf32>
    %cst_24 = arith.constant 0.000000e+00 : f32
    %34 = vector.broadcast %cst_24 : f32 to vector<1x64xf32>
    %35 = arith.maximumf %33, %34 : vector<1x64xf32>
    %36 = arith.truncf %35 : vector<1x64xf32> to vector<1x64xbf16>
    %c0_25 = arith.constant 0 : index
    %c0_26 = arith.constant 0 : index
    %37 = vector.load %arg11[%c0_25, %c0_26] : memref<64x64xbf16, #tpu.memory_space<vmem>>, vector<64x64xbf16>
    %cst_27 = arith.constant dense<0.000000e+00> : vector<1x64xf32>
    %38 = tpu.matmul %36, %37, %cst_27 {dimension_numbers = #tpu.dot_dimension_numbers<[1], [0], [0], [1], [0, 0, 1, 1], [], []>} : vector<1x64xbf16>, vector<64x64xbf16>, vector<1x64xf32> -> vector<1x64xf32>
    %c0_28 = arith.constant 0 : index
    %c0_29 = arith.constant 0 : index
    %39 = vector.load %arg12[%c0_28, %c0_29] : memref<1x64xf32, #tpu.memory_space<vmem>>, vector<1x64xf32>
    %40 = arith.addf %38, %39 : vector<1x64xf32>
    %cst_30 = arith.constant 0.000000e+00 : f32
    %41 = vector.broadcast %cst_30 : f32 to vector<1x64xf32>
    %42 = arith.maximumf %40, %41 : vector<1x64xf32>
    %c0_31 = arith.constant 0 : index
    %c0_32 = arith.constant 0 : index
    %c0_33 = arith.constant 0 : index
    %43 = vector.load %arg2[%c0_31, %c0_32, %c0_33] : memref<1x1x1536xf32, #tpu.memory_space<vmem>>, vector<1x1x1536xf32>
    %44 = vector.shape_cast %43 : vector<1x1x1536xf32> to vector<1x1536xf32>
    %45 = arith.truncf %44 : vector<1x1536xf32> to vector<1x1536xbf16>
    %c0_34 = arith.constant 0 : index
    %c0_35 = arith.constant 0 : index
    %46 = vector.load %arg13[%c0_34, %c0_35] : memref<1536x64xbf16, #tpu.memory_space<vmem>>, vector<1536x64xbf16>
    %cst_36 = arith.constant dense<0.000000e+00> : vector<1x64xf32>
    %47 = tpu.matmul %45, %46, %cst_36 {dimension_numbers = #tpu.dot_dimension_numbers<[1], [0], [0], [1], [0, 0, 1, 1], [], []>} : vector<1x1536xbf16>, vector<1536x64xbf16>, vector<1x64xf32> -> vector<1x64xf32>
    %c0_37 = arith.constant 0 : index
    %c0_38 = arith.constant 0 : index
    %48 = vector.load %arg14[%c0_37, %c0_38] : memref<1x64xf32, #tpu.memory_space<vmem>>, vector<1x64xf32>
    %49 = arith.addf %47, %48 : vector<1x64xf32>
    %cst_39 = arith.constant 0.000000e+00 : f32
    %50 = vector.broadcast %cst_39 : f32 to vector<1x64xf32>
    %51 = arith.maximumf %49, %50 : vector<1x64xf32>
    %52 = arith.truncf %42 : vector<1x64xf32> to vector<1x64xbf16>
    %c0_40 = arith.constant 0 : index
    %c0_41 = arith.constant 0 : index
    %53 = vector.load %arg15[%c0_40, %c0_41] : memref<64x64xbf16, #tpu.memory_space<vmem>>, vector<64x64xbf16>
    %cst_42 = arith.constant dense<0.000000e+00> : vector<1x64xf32>
    %54 = tpu.matmul %52, %53, %cst_42 {dimension_numbers = #tpu.dot_dimension_numbers<[1], [0], [0], [1], [0, 0, 1, 1], [], []>} : vector<1x64xbf16>, vector<64x64xbf16>, vector<1x64xf32> -> vector<1x64xf32>
    %55 = arith.truncf %51 : vector<1x64xf32> to vector<1x64xbf16>
    %c0_43 = arith.constant 0 : index
    %c0_44 = arith.constant 0 : index
    %56 = vector.load %arg16[%c0_43, %c0_44] : memref<64x64xbf16, #tpu.memory_space<vmem>>, vector<64x64xbf16>
    %cst_45 = arith.constant dense<0.000000e+00> : vector<1x64xf32>
    %57 = tpu.matmul %55, %56, %cst_45 {dimension_numbers = #tpu.dot_dimension_numbers<[1], [0], [0], [1], [0, 0, 1, 1], [], []>} : vector<1x64xbf16>, vector<64x64xbf16>, vector<1x64xf32> -> vector<1x64xf32>
    %58 = arith.addf %54, %57 : vector<1x64xf32>
    %c0_46 = arith.constant 0 : index
    %c0_47 = arith.constant 0 : index
    %59 = vector.load %arg17[%c0_46, %c0_47] : memref<1x64xf32, #tpu.memory_space<vmem>>, vector<1x64xf32>
    %60 = arith.addf %58, %59 : vector<1x64xf32>
    %cst_48 = arith.constant 0.000000e+00 : f32
    %61 = vector.broadcast %cst_48 : f32 to vector<1x64xf32>
    %62 = arith.maximumf %60, %61 : vector<1x64xf32>
    %63 = arith.truncf %62 : vector<1x64xf32> to vector<1x64xbf16>
    %c0_49 = arith.constant 0 : index
    %c0_50 = arith.constant 0 : index
    %64 = vector.load %arg18[%c0_49, %c0_50] : memref<64x32xbf16, #tpu.memory_space<vmem>>, vector<64x32xbf16>
    %cst_51 = arith.constant dense<0.000000e+00> : vector<1x32xf32>
    %65 = tpu.matmul %63, %64, %cst_51 {dimension_numbers = #tpu.dot_dimension_numbers<[1], [0], [0], [1], [0, 0, 1, 1], [], []>} : vector<1x64xbf16>, vector<64x32xbf16>, vector<1x32xf32> -> vector<1x32xf32>
    %c0_52 = arith.constant 0 : index
    %c0_53 = arith.constant 0 : index
    %66 = vector.load %arg19[%c0_52, %c0_53] : memref<1x32xf32, #tpu.memory_space<vmem>>, vector<1x32xf32>
    %67 = arith.addf %65, %66 : vector<1x32xf32>
    %cst_54 = arith.constant 0.000000e+00 : f32
    %68 = vector.broadcast %cst_54 : f32 to vector<1x32xf32>
    %69 = arith.maximumf %67, %68 : vector<1x32xf32>
    %70 = arith.truncf %69 : vector<1x32xf32> to vector<1x32xbf16>
    %c0_55 = arith.constant 0 : index
    %c0_56 = arith.constant 0 : index
    %71 = vector.load %arg20[%c0_55, %c0_56] : memref<32x2xbf16, #tpu.memory_space<vmem>>, vector<32x2xbf16>
    %cst_57 = arith.constant dense<0.000000e+00> : vector<1x2xf32>
    %72 = tpu.matmul %70, %71, %cst_57 {dimension_numbers = #tpu.dot_dimension_numbers<[1], [0], [0], [1], [0, 0, 1, 1], [], []>} : vector<1x32xbf16>, vector<32x2xbf16>, vector<1x2xf32> -> vector<1x2xf32>
    %c0_58 = arith.constant 0 : index
    %c0_59 = arith.constant 0 : index
    %73 = vector.load %arg21[%c0_58, %c0_59] : memref<1x2xf32, #tpu.memory_space<vmem>>, vector<1x2xf32>
    %74 = arith.addf %72, %73 : vector<1x2xf32>
    %c0_60 = arith.constant 0 : index
    %c0_61 = arith.constant 0 : index
    %c0_62 = arith.constant 0 : index
    %75 = vector.load %arg22[%c0_60, %c0_61, %c0_62] : memref<1x1x2xf32, #tpu.memory_space<vmem>>, vector<1x1x2xf32>
    %76 = vector.shape_cast %75 : vector<1x1x2xf32> to vector<1x2xf32>
    %77 = vector.shape_cast %74 : vector<1x2xf32> to vector<1x1x2xf32>
    tpu.vector_store %arg22[%c0_60, %c0_61, %c0_62], %77 {strides = array<i32>} : memref<1x1x2xf32, #tpu.memory_space<vmem>>, vector<1x1x2xf32>,
    return
  }
  func.func @transform_0(%arg0: i32) -> (i32, i32, i32) {
    %c0_i32 = arith.constant 0 : i32
    %c0_i32_0 = arith.constant 0 : i32
    %c0_i32_1 = arith.constant 0 : i32
    return %arg0, %c0_i32, %c0_i32_0 : i32, i32, i32
  }
  func.func @transform_1(%arg0: i32) -> (i32, i32, i32) {
    %c0_i32 = arith.constant 0 : i32
    %c0_i32_0 = arith.constant 0 : i32
    %c0_i32_1 = arith.constant 0 : i32
    return %arg0, %c0_i32, %c0_i32_0 : i32, i32, i32
  }
  func.func @transform_2(%arg0: i32) -> (i32, i32) {
    %c0_i32 = arith.constant 0 : i32
    %c0_i32_0 = arith.constant 0 : i32
    %c0_i32_1 = arith.constant 0 : i32
    return %c0_i32, %c0_i32_0 : i32, i32
  }
  func.func @transform_3(%arg0: i32) -> (i32, i32) {
    %c0_i32 = arith.constant 0 : i32
    %c0_i32_0 = arith.constant 0 : i32
    %c0_i32_1 = arith.constant 0 : i32
    return %c0_i32, %c0_i32_0 : i32, i32
  }
  func.func @transform_4(%arg0: i32) -> (i32, i32) {
    %c0_i32 = arith.constant 0 : i32
    %c0_i32_0 = arith.constant 0 : i32
    %c0_i32_1 = arith.constant 0 : i32
    return %c0_i32, %c0_i32_0 : i32, i32
  }
  func.func @transform_5(%arg0: i32) -> (i32, i32) {
    %c0_i32 = arith.constant 0 : i32
    %c0_i32_0 = arith.constant 0 : i32
    %c0_i32_1 = arith.constant 0 : i32
    return %c0_i32, %c0_i32_0 : i32, i32
  }
  func.func @transform_6(%arg0: i32) -> (i32, i32) {
    %c0_i32 = arith.constant 0 : i32
    %c0_i32_0 = arith.constant 0 : i32
    %c0_i32_1 = arith.constant 0 : i32
    return %c0_i32, %c0_i32_0 : i32, i32
  }
  func.func @transform_7(%arg0: i32) -> (i32, i32) {
    %c0_i32 = arith.constant 0 : i32
    %c0_i32_0 = arith.constant 0 : i32
    %c0_i32_1 = arith.constant 0 : i32
    return %c0_i32, %c0_i32_0 : i32, i32
  }
  func.func @transform_8(%arg0: i32) -> (i32, i32) {
    %c0_i32 = arith.constant 0 : i32
    %c0_i32_0 = arith.constant 0 : i32
    %c0_i32_1 = arith.constant 0 : i32
    return %c0_i32, %c0_i32_0 : i32, i32
  }
  func.func @transform_9(%arg0: i32) -> (i32, i32) {
    %c0_i32 = arith.constant 0 : i32
    %c0_i32_0 = arith.constant 0 : i32
    %c0_i32_1 = arith.constant 0 : i32
    return %c0_i32, %c0_i32_0 : i32, i32
  }
  func.func @transform_10(%arg0: i32) -> (i32, i32) {
    %c0_i32 = arith.constant 0 : i32
    %c0_i32_0 = arith.constant 0 : i32
    %c0_i32_1 = arith.constant 0 : i32
    return %c0_i32, %c0_i32_0 : i32, i32
  }
  func.func @transform_11(%arg0: i32) -> (i32, i32) {
    %c0_i32 = arith.constant 0 : i32
    %c0_i32_0 = arith.constant 0 : i32
    %c0_i32_1 = arith.constant 0 : i32
    return %c0_i32, %c0_i32_0 : i32, i32
  }
  func.func @transform_12(%arg0: i32) -> (i32, i32) {
    %c0_i32 = arith.constant 0 : i32
    %c0_i32_0 = arith.constant 0 : i32
    %c0_i32_1 = arith.constant 0 : i32
    return %c0_i32, %c0_i32_0 : i32, i32
  }
  func.func @transform_13(%arg0: i32) -> (i32, i32) {
    %c0_i32 = arith.constant 0 : i32
    %c0_i32_0 = arith.constant 0 : i32
    %c0_i32_1 = arith.constant 0 : i32
    return %c0_i32, %c0_i32_0 : i32, i32
  }
  func.func @transform_14(%arg0: i32) -> (i32, i32) {
    %c0_i32 = arith.constant 0 : i32
    %c0_i32_0 = arith.constant 0 : i32
    %c0_i32_1 = arith.constant 0 : i32
    return %c0_i32, %c0_i32_0 : i32, i32
  }
  func.func @transform_15(%arg0: i32) -> (i32, i32) {
    %c0_i32 = arith.constant 0 : i32
    %c0_i32_0 = arith.constant 0 : i32
    %c0_i32_1 = arith.constant 0 : i32
    return %c0_i32, %c0_i32_0 : i32, i32
  }
  func.func @transform_16(%arg0: i32) -> (i32, i32) {
    %c0_i32 = arith.constant 0 : i32
    %c0_i32_0 = arith.constant 0 : i32
    %c0_i32_1 = arith.constant 0 : i32
    return %c0_i32, %c0_i32_0 : i32, i32
  }
  func.func @transform_17(%arg0: i32) -> (i32, i32) {
    %c0_i32 = arith.constant 0 : i32
    %c0_i32_0 = arith.constant 0 : i32
    %c0_i32_1 = arith.constant 0 : i32
    return %c0_i32, %c0_i32_0 : i32, i32
  }
  func.func @transform_18(%arg0: i32) -> (i32, i32) {
    %c0_i32 = arith.constant 0 : i32
    %c0_i32_0 = arith.constant 0 : i32
    %c0_i32_1 = arith.constant 0 : i32
    return %c0_i32, %c0_i32_0 : i32, i32
  }
  func.func @transform_19(%arg0: i32) -> (i32, i32) {
    %c0_i32 = arith.constant 0 : i32
    %c0_i32_0 = arith.constant 0 : i32
    %c0_i32_1 = arith.constant 0 : i32
    return %c0_i32, %c0_i32_0 : i32, i32
  }
  func.func @transform_20(%arg0: i32) -> (i32, i32) {
    %c0_i32 = arith.constant 0 : i32
    %c0_i32_0 = arith.constant 0 : i32
    %c0_i32_1 = arith.constant 0 : i32
    return %c0_i32, %c0_i32_0 : i32, i32
  }
  func.func @transform_21(%arg0: i32) -> (i32, i32, i32) {
    %c0_i32 = arith.constant 0 : i32
    %c0_i32_0 = arith.constant 0 : i32
    %c0_i32_1 = arith.constant 0 : i32
    return %arg0, %c0_i32, %c0_i32_0 : i32, i32, i32
  }
}

</mosaic_0001>

<bundles_post_ra>
// kernel: _lambda_.3
= control target key start
LH: loop header
LB: loop body
LE: loop exit
PB: predicated region body
PF: predicated region fallthrough
CT: control target
= control target key end

     0   :  { %s590_s12 = smov 0   ;;  %s776_s0 = inlined_call_operand.vmem [shape: f32[512,27], index: 0, kind: input, shape index: {}]   ;;  %s777_s1 = inlined_call_operand.vmem [shape: bf16[27,12], index: 1, kind: input, shape index: {}]   ;;  %s778_s2 = inlined_call_operand.vmem [shape: f32[1,12], index: 2, kind: input, shape index: {}]   ;;  %s779_s3 = inlined_call_operand.vmem [shape: f32[512,12], index: 3, kind: output, shape index: {}]  }
   0x1 LB: > { %s508_s13 = sadd.s32 4294967295, %s567_s12   ;;  %p512_p0 = scmp.ge.s32.totalorder %s567_s12, 1  ;;  %s567_s12 = sphi %s590_s12, %s13_s12  }
   0x2   : > { %p138_p1 = scmp.lt.s32.totalorder %s567_s12, 3 }
   0x4   : > { %p139_p2 = pnand %p512_p0, %p138_p1 }
   0x5   : > { %s513_s18 = sshll.u32 (!%p139_p2), %s508_s13, 5 }
   0x6   : > { %142 = sbr.rel (%p139_p2) target bundleno = 219 (0xdb), region = 32  ;;  %p163_p3 = scmp.lt.s32.totalorder (!%p139_p2), %s513_s18, 63 }
   0xb   : > { %v523_v0 = vld [vmem:[%s777_s1 + $0x8] sm:$0xf]  ;;  %v544_v1 = vld [vmem:[%s777_s1 + $0x8] sm:$0x30]  ;;  %vm291_vm0 = vcmask 1044480   ;;  %vm292_vm1 = vcmask 1045504  }
   0xc   : > { %v524_v2 = vor.u32 %v544_v1, %v523_v0  ;;  %v569_v3 = vmov 65535   ;;  %s781_s18 = smov (!%p163_p3, %s513_s18), 63  ;;  %v543_v7 = vld [vmem:[%s777_s1] sm:$0xff]  ;;  %vm242_vm2 = vcmask 220160   ;;  %vm419_vm3 = vcmask 97280  }
   0xd   : > { %v293_v4 = vsel %vm291_vm0, 4294967295, %v569_v3  ;;  %s514_s21 = sshll.u32 %s781_s18, 3  ;;  %v668_v56 = vld [vmem:[%s778_s2] ss:$0 sm:$0xff] }
   0xe   : > { %v294_v5 = vsel %vm292_vm1, %v293_v4, 0  ;;  %s615_s24 = scalar_lea.vmem %s776_s0, %s514_s21  ;;  %s677_s29 = scalar_lea.vmem %s779_s3, %s514_s21 }
   0xf   : > { %v296_v6 = vand.u32 %v524_v2, %v294_v5  ;;  %v175_v8 = vld [vmem:[%s615_s24] sm:$0xff]  ;;  %v176_v9 = vld [vmem:[%s615_s24 + $0x8] sm:$0xff]  ;;  %v177_v20 = vld [vmem:[%s615_s24 + $0x10] sm:$0xff] }
  0x10   : > { %v183_v10 = vld [vmem:[%s615_s24 + $0x40] sm:$0xff]  ;;  %v207_v11 = vpack.c.bf16 %v176_v9, %v175_v8  ;;  %v184_v12 = vld [vmem:[%s615_s24 + $0x48] sm:$0xff]  ;;  %v178_v21 = vld [vmem:[%s615_s24 + $0x18] sm:$0xff] }
  0x11   : > { %304 = vmatpush.bf16.msra.mxu0 %v296_v6  ;;  %545 = vmatpush.bf16.msra.mxu1 %v296_v6  ;;  %v191_v13 = vld [vmem:[%s615_s24 + $0x80] sm:$0xff]  ;;  %v192_v14 = vld [vmem:[%s615_s24 + $0x88] sm:$0xff]  ;;  %v211_v15 = vpack.c.bf16 %v184_v12, %v183_v10  ;;  %v185_v22 = vld [vmem:[%s615_s24 + $0x50] sm:$0xff]  ;;  %v208_v28 = vpack.c.bf16 %v178_v21, %v177_v20 }
  0x12   : > { %546 = vmatpush.bf16.msra.mxu2 %v296_v6  ;;  %547 = vmatpush.bf16.msra.mxu3 %v296_v6  ;;  %v215_v16 = vpack.c.bf16 %v192_v14, %v191_v13  ;;  %v199_v17 = vld [vmem:[%s615_s24 + $0xc0] sm:$0xff]  ;;  %v200_v18 = vld [vmem:[%s615_s24 + $0xc8] sm:$0xff]  ;;  %v186_v23 = vld [vmem:[%s615_s24 + $0x58] sm:$0xff] }
  0x13   : > { %v219_v19 = vpack.c.bf16 %v200_v18, %v199_v17  ;;  %v193_v24 = vld [vmem:[%s615_s24 + $0x90] sm:$0xff]  ;;  %v194_v25 = vld [vmem:[%s615_s24 + $0x98] sm:$0xff]  ;;  %v212_v29 = vpack.c.bf16 %v186_v23, %v185_v22  ;;  %v179_v32 = vld [vmem:[%s615_s24 + $0x20] sm:$0xff] }
  0x14   : > { %v201_v26 = vld [vmem:[%s615_s24 + $0xd0] sm:$0xff]  ;;  %v202_v27 = vld [vmem:[%s615_s24 + $0xd8] sm:$0xff]  ;;  %v216_v30 = vpack.c.bf16 %v194_v25, %v193_v24  ;;  %v180_v33 = vld [vmem:[%s615_s24 + $0x28] sm:$0xff] }
  0x15   : > { %305 = vmatpush.bf16.msra.mxu0 %v543_v7  ;;  %548 = vmatpush.bf16.msra.mxu1 %v543_v7  ;;  %v220_v31 = vpack.c.bf16 %v202_v27, %v201_v26  ;;  %v187_v34 = vld [vmem:[%s615_s24 + $0x60] sm:$0xff]  ;;  %v188_v35 = vld [vmem:[%s615_s24 + $0x68] sm:$0xff]  ;;  %v209_v40 = vpack.c.bf16 %v180_v33, %v179_v32  ;;  %v181_v44 = vld [vmem:[%s615_s24 + $0x30] sm:$0xff] }
  0x16   : > { %549 = vmatpush.bf16.msra.mxu2 %v543_v7  ;;  %550 = vmatpush.bf16.msra.mxu3 %v543_v7  ;;  %v195_v36 = vld [vmem:[%s615_s24 + $0xa0] sm:$0xff]  ;;  %v196_v37 = vld [vmem:[%s615_s24 + $0xa8] sm:$0xff]  ;;  %v213_v41 = vpack.c.bf16 %v188_v35, %v187_v34  ;;  %v182_v45 = vld [vmem:[%s615_s24 + $0x38] sm:$0xff] }
  0x17   : > { %v203_v38 = vld [vmem:[%s615_s24 + $0xe0] sm:$0xff]  ;;  %v204_v39 = vld [vmem:[%s615_s24 + $0xe8] sm:$0xff]  ;;  %v217_v42 = vpack.c.bf16 %v196_v37, %v195_v36  ;;  %v189_v46 = vld [vmem:[%s615_s24 + $0x70] sm:$0xff]  ;;  %v210_v52 = vpack.c.bf16 %v182_v45, %v181_v44 }
  0x18   : > { %525 = vmatmul.msk.bf16.vlgmr.msra.gmra.mxu0 %vm242_vm2, %v207_v11  ;;  %529 = vmatmul.msk.bf16.vlgmr.msra.gmra.mxu1 %vm242_vm2, %v211_v15  ;;  %v221_v43 = vpack.c.bf16 %v204_v39, %v203_v38  ;;  %v190_v47 = vld [vmem:[%s615_s24 + $0x78] sm:$0xff]  ;;  %v197_v48 = vld [vmem:[%s615_s24 + $0xb0] sm:$0xff] }
  0x19   : > { %533 = vmatmul.msk.bf16.vlgmr.msra.gmra.mxu2 %vm242_vm2, %v215_v16  ;;  %537 = vmatmul.msk.bf16.vlgmr.msra.gmra.mxu3 %vm242_vm2, %v219_v19  ;;  %v198_v49 = vld [vmem:[%s615_s24 + $0xb8] sm:$0xff]  ;;  %v205_v50 = vld [vmem:[%s615_s24 + $0xf0] sm:$0xff]  ;;  %v214_v53 = vpack.c.bf16 %v190_v47, %v189_v46 }
  0x1a   : > { %v206_v51 = vld [vmem:[%s615_s24 + $0xf8] sm:$0xff]  ;;  %v218_v54 = vpack.c.bf16 %v198_v49, %v197_v48 }
  0x1b   : > { %v222_v55 = vpack.c.bf16 %v206_v51, %v205_v50 }
  0x28   : > { %526 = vmatmul.msk.bf16.gmra.mxu0 %vm242_vm2, %v208_v28  ;;  %530 = vmatmul.msk.bf16.gmra.mxu1 %vm242_vm2, %v212_v29 }
  0x29   : > { %534 = vmatmul.msk.bf16.gmra.mxu2 %vm242_vm2, %v216_v30  ;;  %538 = vmatmul.msk.bf16.gmra.mxu3 %vm242_vm2, %v220_v31 }
  0x38   : > { %527 = vmatmul.msk.bf16.gmra.mxu0 %vm242_vm2, %v209_v40  ;;  %531 = vmatmul.msk.bf16.gmra.mxu1 %vm242_vm2, %v213_v41 }
  0x39   : > { %535 = vmatmul.msk.bf16.gmra.mxu2 %vm242_vm2, %v217_v42  ;;  %539 = vmatmul.msk.bf16.gmra.mxu3 %vm242_vm2, %v221_v43 }
  0x48   : > { %528 = vmatmul.msk.bf16.gmra.mxu0 %vm242_vm2, %v210_v52  ;;  %532 = vmatmul.msk.bf16.gmra.mxu1 %vm242_vm2, %v214_v53 }
  0x49   : > { %536 = vmatmul.msk.bf16.gmra.mxu2 %vm242_vm2, %v218_v54  ;;  %540 = vmatmul.msk.bf16.gmra.mxu3 %vm242_vm2, %v222_v55 }
  0x95   : > { %v307_v57 = vpop.f32.mrf.mxu0  ;;  %v327_v58 = vpop.f32.mrf.mxu1 }
  0x96   : > { %v308_v59 = vadd.f32 %v668_v56, %v307_v57  ;;  %v328_v60 = vadd.f32 %v668_v56, %v327_v58 }
  0x98   : > { %v387_v61 = vmax.f32 %v308_v59, 0.0  ;;  %v395_v62 = vmax.f32 %v328_v60, 0.0 }
  0x9a   : > { %420 = vst.msk [vmem:[%s677_s29] sm:$0xff] %vm419_vm3, %v387_v61 }
  0x9b   : > { %428 = vst.msk [vmem:[%s677_s29 + $0x40] sm:$0xff] %vm419_vm3, %v395_v62 }
  0x9c   : > { %v347_v63 = vpop.f32.mrf.mxu2  ;;  %v367_v0 = vpop.f32.mrf.mxu3 }
  0x9d   : > { %v348_v1 = vadd.f32 %v668_v56, %v347_v63  ;;  %v368_v2 = vadd.f32 %v668_v56, %v367_v0  ;;  %v309_v3 = vpop.f32.mrf.mxu0  ;;  %v329_v4 = vpop.f32.mrf.mxu1 }
  0x9e   : > { %v310_v5 = vadd.f32 %v668_v56, %v309_v3  ;;  %v330_v6 = vadd.f32 %v668_v56, %v329_v4 }
  0x9f   : > { %v403_v7 = vmax.f32 %v348_v1, 0.0  ;;  %v411_v8 = vmax.f32 %v368_v2, 0.0 }
  0xa0   : > { %v388_v9 = vmax.f32 %v310_v5, 0.0  ;;  %v396_v10 = vmax.f32 %v330_v6, 0.0 }
  0xa1   : > { %436 = vst.msk [vmem:[%s677_s29 + $0x80] sm:$0xff] %vm419_vm3, %v403_v7 }
  0xa2   : > { %444 = vst.msk [vmem:[%s677_s29 + $0xc0] sm:$0xff] %vm419_vm3, %v411_v8 }
  0xa3   : > { %421 = vst.msk [vmem:[%s677_s29 + $0x8] sm:$0xff] %vm419_vm3, %v388_v9 }
  0xa4   : > { %429 = vst.msk [vmem:[%s677_s29 + $0x48] sm:$0xff] %vm419_vm3, %v396_v10  ;;  %v349_v11 = vpop.f32.mrf.mxu2  ;;  %v369_v12 = vpop.f32.mrf.mxu3 }
  0xa5   : > { %v350_v13 = vadd.f32 %v668_v56, %v349_v11  ;;  %v370_v14 = vadd.f32 %v668_v56, %v369_v12  ;;  %v312_v15 = vpop.f32.mrf.mxu0  ;;  %v332_v16 = vpop.f32.mrf.mxu1 }
  0xa6   : > { %v313_v17 = vadd.f32 %v668_v56, %v312_v15  ;;  %v333_v18 = vadd.f32 %v668_v56, %v332_v16 }
  0xa7   : > { %v404_v19 = vmax.f32 %v350_v13, 0.0  ;;  %v412_v20 = vmax.f32 %v370_v14, 0.0 }
  0xa8   : > { %v389_v21 = vmax.f32 %v313_v17, 0.0  ;;  %v397_v22 = vmax.f32 %v333_v18, 0.0 }
  0xa9   : > { %437 = vst.msk [vmem:[%s677_s29 + $0x88] sm:$0xff] %vm419_vm3, %v404_v19 }
  0xaa   : > { %445 = vst.msk [vmem:[%s677_s29 + $0xc8] sm:$0xff] %vm419_vm3, %v412_v20 }
  0xab   : > { %422 = vst.msk [vmem:[%s677_s29 + $0x10] sm:$0xff] %vm419_vm3, %v389_v21 }
  0xac   : > { %430 = vst.msk [vmem:[%s677_s29 + $0x50] sm:$0xff] %vm419_vm3, %v397_v22  ;;  %v352_v23 = vpop.f32.mrf.mxu2  ;;  %v372_v24 = vpop.f32.mrf.mxu3 }
  0xad   : > { %v353_v25 = vadd.f32 %v668_v56, %v352_v23  ;;  %v373_v26 = vadd.f32 %v668_v56, %v372_v24  ;;  %v314_v27 = vpop.f32.mrf.mxu0  ;;  %v334_v28 = vpop.f32.mrf.mxu1 }
  0xae   : > { %v315_v29 = vadd.f32 %v668_v56, %v314_v27  ;;  %v335_v30 = vadd.f32 %v668_v56, %v334_v28 }
  0xaf   : > { %v405_v31 = vmax.f32 %v353_v25, 0.0  ;;  %v413_v32 = vmax.f32 %v373_v26, 0.0 }
  0xb0   : > { %v390_v33 = vmax.f32 %v315_v29, 0.0  ;;  %v398_v34 = vmax.f32 %v335_v30, 0.0 }
  0xb1   : > { %438 = vst.msk [vmem:[%s677_s29 + $0x90] sm:$0xff] %vm419_vm3, %v405_v31 }
  0xb2   : > { %446 = vst.msk [vmem:[%s677_s29 + $0xd0] sm:$0xff] %vm419_vm3, %v413_v32 }
  0xb3   : > { %423 = vst.msk [vmem:[%s677_s29 + $0x18] sm:$0xff] %vm419_vm3, %v390_v33 }
  0xb4   : > { %431 = vst.msk [vmem:[%s677_s29 + $0x58] sm:$0xff] %vm419_vm3, %v398_v34  ;;  %v354_v35 = vpop.f32.mrf.mxu2  ;;  %v374_v36 = vpop.f32.mrf.mxu3 }
  0xb5   : > { %v355_v37 = vadd.f32 %v668_v56, %v354_v35  ;;  %v375_v38 = vadd.f32 %v668_v56, %v374_v36  ;;  %v317_v39 = vpop.f32.mrf.mxu0  ;;  %v337_v40 = vpop.f32.mrf.mxu1 }
  0xb6   : > { %v318_v41 = vadd.f32 %v668_v56, %v317_v39  ;;  %v338_v42 = vadd.f32 %v668_v56, %v337_v40 }
  0xb7   : > { %v406_v43 = vmax.f32 %v355_v37, 0.0  ;;  %v414_v44 = vmax.f32 %v375_v38, 0.0 }
  0xb8   : > { %v391_v45 = vmax.f32 %v318_v41, 0.0  ;;  %v399_v46 = vmax.f32 %v338_v42, 0.0 }
  0xb9   : > { %439 = vst.msk [vmem:[%s677_s29 + $0x98] sm:$0xff] %vm419_vm3, %v406_v43 }
  0xba   : > { %447 = vst.msk [vmem:[%s677_s29 + $0xd8] sm:$0xff] %vm419_vm3, %v414_v44 }
  0xbb   : > { %424 = vst.msk [vmem:[%s677_s29 + $0x20] sm:$0xff] %vm419_vm3, %v391_v45 }
  0xbc   : > { %432 = vst.msk [vmem:[%s677_s29 + $0x60] sm:$0xff] %vm419_vm3, %v399_v46  ;;  %v357_v47 = vpop.f32.mrf.mxu2  ;;  %v377_v48 = vpop.f32.mrf.mxu3 }
  0xbd   : > { %v358_v49 = vadd.f32 %v668_v56, %v357_v47  ;;  %v378_v50 = vadd.f32 %v668_v56, %v377_v48  ;;  %v319_v51 = vpop.f32.mrf.mxu0  ;;  %v339_v52 = vpop.f32.mrf.mxu1 }
  0xbe   : > { %v320_v53 = vadd.f32 %v668_v56, %v319_v51  ;;  %v340_v54 = vadd.f32 %v668_v56, %v339_v52 }
  0xbf   : > { %v407_v55 = vmax.f32 %v358_v49, 0.0  ;;  %v415_v57 = vmax.f32 %v378_v50, 0.0 }
  0xc0   : > { %v392_v58 = vmax.f32 %v320_v53, 0.0  ;;  %v400_v59 = vmax.f32 %v340_v54, 0.0 }
  0xc1   : > { %440 = vst.msk [vmem:[%s677_s29 + $0xa0] sm:$0xff] %vm419_vm3, %v407_v55 }
  0xc2   : > { %448 = vst.msk [vmem:[%s677_s29 + $0xe0] sm:$0xff] %vm419_vm3, %v415_v57 }
  0xc3   : > { %425 = vst.msk [vmem:[%s677_s29 + $0x28] sm:$0xff] %vm419_vm3, %v392_v58 }
  0xc4   : > { %433 = vst.msk [vmem:[%s677_s29 + $0x68] sm:$0xff] %vm419_vm3, %v400_v59  ;;  %v359_v60 = vpop.f32.mrf.mxu2  ;;  %v379_v61 = vpop.f32.mrf.mxu3 }
  0xc5   : > { %v360_v62 = vadd.f32 %v668_v56, %v359_v60  ;;  %v380_v63 = vadd.f32 %v668_v56, %v379_v61  ;;  %v322_v0 = vpop.f32.mrf.mxu0  ;;  %v342_v1 = vpop.f32.mrf.mxu1 }
  0xc6   : > { %v323_v2 = vadd.f32 %v668_v56, %v322_v0  ;;  %v343_v3 = vadd.f32 %v668_v56, %v342_v1 }
  0xc7   : > { %v408_v4 = vmax.f32 %v360_v62, 0.0  ;;  %v416_v5 = vmax.f32 %v380_v63, 0.0 }
  0xc8   : > { %v393_v6 = vmax.f32 %v323_v2, 0.0  ;;  %v401_v7 = vmax.f32 %v343_v3, 0.0 }
  0xc9   : > { %441 = vst.msk [vmem:[%s677_s29 + $0xa8] sm:$0xff] %vm419_vm3, %v408_v4 }
  0xca   : > { %449 = vst.msk [vmem:[%s677_s29 + $0xe8] sm:$0xff] %vm419_vm3, %v416_v5 }
  0xcb   : > { %426 = vst.msk [vmem:[%s677_s29 + $0x30] sm:$0xff] %vm419_vm3, %v393_v6 }
  0xcc   : > { %434 = vst.msk [vmem:[%s677_s29 + $0x70] sm:$0xff] %vm419_vm3, %v401_v7  ;;  %v362_v8 = vpop.f32.mrf.mxu2  ;;  %v382_v9 = vpop.f32.mrf.mxu3 }
  0xcd   : > { %v363_v10 = vadd.f32 %v668_v56, %v362_v8  ;;  %v383_v11 = vadd.f32 %v668_v56, %v382_v9  ;;  %v324_v12 = vpop.f32.mrf.mxu0  ;;  %v344_v13 = vpop.f32.mrf.mxu1 }
  0xce   : > { %v325_v14 = vadd.f32 %v668_v56, %v324_v12  ;;  %v345_v15 = vadd.f32 %v668_v56, %v344_v13 }
  0xcf   : > { %v409_v16 = vmax.f32 %v363_v10, 0.0  ;;  %v417_v17 = vmax.f32 %v383_v11, 0.0 }
  0xd0   : > { %v394_v18 = vmax.f32 %v325_v14, 0.0  ;;  %v402_v19 = vmax.f32 %v345_v15, 0.0 }
  0xd1   : > { %442 = vst.msk [vmem:[%s677_s29 + $0xb0] sm:$0xff] %vm419_vm3, %v409_v16 }
  0xd2   : > { %450 = vst.msk [vmem:[%s677_s29 + $0xf0] sm:$0xff] %vm419_vm3, %v417_v17 }
  0xd3   : > { %427 = vst.msk [vmem:[%s677_s29 + $0x38] sm:$0xff] %vm419_vm3, %v394_v18 }
  0xd4   : > { %435 = vst.msk [vmem:[%s677_s29 + $0x78] sm:$0xff] %vm419_vm3, %v402_v19  ;;  %v364_v20 = vpop.f32.mrf.mxu2  ;;  %v384_v21 = vpop.f32.mrf.mxu3 }
  0xd5   : > { %v365_v22 = vadd.f32 %v668_v56, %v364_v20  ;;  %v385_v23 = vadd.f32 %v668_v56, %v384_v21 }
  0xd7   : > { %v410_v24 = vmax.f32 %v365_v22, 0.0  ;;  %v418_v25 = vmax.f32 %v385_v23, 0.0 }
  0xd9   : > { %443 = vst.msk [vmem:[%s677_s29 + $0xb8] sm:$0xff] %vm419_vm3, %v410_v24 }
  0xda   : > { %451 = vst.msk [vmem:[%s677_s29 + $0xf8] sm:$0xff] %vm419_vm3, %v418_v25 }
  0xdb PF: > { %s13_s12 = sadd.s32 1, %s567_s12  }
  0xdc   : > { %p10_p4 = scmp.ge.s32.totalorder %s13_s12, 4  }
  0xde   :  { %12 = sbr.rel (!%p10_p4) target bundleno = 1 (0x1), region = 62 }

// kernel: _lambda_.4
= control target key start
LH: loop header
LB: loop body
LE: loop exit
PB: predicated region body
PF: predicated region fallthrough
CT: control target
= control target key end

     0   :  { %s473_s12 = smov 0   ;;  %s532_s0 = inlined_call_operand.vmem [shape: f32[128,108], index: 0, kind: input, shape index: {}]   ;;  %s533_s1 = inlined_call_operand.vmem [shape: bf16[108,24], index: 1, kind: input, shape index: {}]   ;;  %s534_s2 = inlined_call_operand.vmem [shape: f32[1,24], index: 2, kind: input, shape index: {}]   ;;  %s535_s3 = inlined_call_operand.vmem [shape: f32[128,24], index: 3, kind: output, shape index: {}]  }
   0x1 LB: > { %s365_s13 = sadd.s32 4294967295, %s451_s12   ;;  %p369_p0 = scmp.ge.s32.totalorder %s451_s12, 1  ;;  %s451_s12 = sphi %s473_s12, %s13_s12  }
   0x2   : > { %p138_p1 = scmp.lt.s32.totalorder %s451_s12, 3 }
   0x4   : > { %p139_p2 = pnand %p369_p0, %p138_p1 }
   0x5   : > { %s370_s20 = sshll.u32 (!%p139_p2), %s365_s13, 3 }
   0x6   : > { %142 = sbr.rel (%p139_p2) target bundleno = 189 (0xbd), region = 32  ;;  %p163_p3 = scmp.lt.s32.totalorder (!%p139_p2), %s370_s20, 15 }
   0xb   : > { %v400_v0 = vld [vmem:[%s533_s1 + $0x30] sm:$0xf]  ;;  %v414_v1 = vld [vmem:[%s533_s1 + $0x30] sm:$0x30]  ;;  %vm259_vm0 = vcmask 1045504   ;;  %v413_v4 = vld [vmem:[%s533_s1 + $0x28] sm:$0xff] }
   0xc   : > { %v401_v2 = vor.u32 %v414_v1, %v400_v0  ;;  %v412_v5 = vld [vmem:[%s533_s1 + $0x20] sm:$0xff]  ;;  %v411_v6 = vld [vmem:[%s533_s1 + $0x18] sm:$0xff]  ;;  %s537_s20 = smov (!%p163_p3, %s370_s20), 15  ;;  %v410_v7 = vld [vmem:[%s533_s1 + $0x10] sm:$0xff]  ;;  %vm246_vm1 = vcmask 883712   ;;  %vm300_vm2 = vcmask 195584  }
   0xd   : > { %s371_s27 = sshll.u32 %s537_s20, 3  ;;  %v409_v8 = vld [vmem:[%s533_s1 + $0x8] sm:$0xff]  ;;  %v408_v9 = vld [vmem:[%s533_s1] sm:$0xff] }
   0xe   : > { %v261_v3 = vsel %vm259_vm0, %v401_v2, 0  ;;  %s166_s5 = scalar_lea.vmem %s532_s0, %s371_s27  ;;  %v444_v22 = vld [vmem:[%s534_s2] ss:$0 sm:$0xff]  ;;  %s172_s13 = scalar_lea.vmem %s535_s3, %s371_s27 }
   0xf   : > { %264 = vmatpush.bf16.msra.mxu0 %v261_v3  ;;  %415 = vmatpush.bf16.msra.mxu1 %v261_v3  ;;  %v175_v10 = vld [vmem:[%s166_s5] sm:$0xff]  ;;  %v176_v11 = vld [vmem:[%s166_s5 + $0x8] sm:$0xff]  ;;  %v177_v12 = vld [vmem:[%s166_s5 + $0x10] sm:$0xff] }
  0x10   : > { %416 = vmatpush.bf16.msra.mxu2 %v261_v3  ;;  %417 = vmatpush.bf16.msra.mxu3 %v261_v3  ;;  %v178_v13 = vld [vmem:[%s166_s5 + $0x18] sm:$0xff]  ;;  %v179_v14 = vld [vmem:[%s166_s5 + $0x20] sm:$0xff]  ;;  %v180_v15 = vld [vmem:[%s166_s5 + $0x28] sm:$0xff]  ;;  %v183_v18 = vpack.c.bf16 %v176_v11, %v175_v10 }
  0x11   : > { %v181_v16 = vld [vmem:[%s166_s5 + $0x30] sm:$0xff]  ;;  %v182_v17 = vld [vmem:[%s166_s5 + $0x38] sm:$0xff]  ;;  %v184_v19 = vpack.c.bf16 %v178_v13, %v177_v12  ;;  %v185_v20 = vpack.c.bf16 %v180_v15, %v179_v14 }
  0x12   : > { %v186_v21 = vpack.c.bf16 %v182_v17, %v181_v16 }
  0x13   : > { %265 = vmatpush.bf16.msra.mxu0 %v413_v4  ;;  %418 = vmatpush.bf16.msra.mxu1 %v413_v4 }
  0x14   : > { %419 = vmatpush.bf16.msra.mxu2 %v413_v4  ;;  %420 = vmatpush.bf16.msra.mxu3 %v413_v4 }
  0x17   : > { %266 = vmatpush.bf16.msra.mxu0 %v412_v5  ;;  %421 = vmatpush.bf16.msra.mxu1 %v412_v5 }
  0x18   : > { %422 = vmatpush.bf16.msra.mxu2 %v412_v5  ;;  %423 = vmatpush.bf16.msra.mxu3 %v412_v5 }
  0x1b   : > { %267 = vmatpush.bf16.msra.mxu0 %v411_v6  ;;  %424 = vmatpush.bf16.msra.mxu1 %v411_v6 }
  0x1c   : > { %425 = vmatpush.bf16.msra.mxu2 %v411_v6  ;;  %426 = vmatpush.bf16.msra.mxu3 %v411_v6 }
  0x1f   : > { %268 = vmatpush.bf16.msra.mxu0 %v410_v7  ;;  %427 = vmatpush.bf16.msra.mxu1 %v410_v7 }
  0x20   : > { %428 = vmatpush.bf16.msra.mxu2 %v410_v7  ;;  %429 = vmatpush.bf16.msra.mxu3 %v410_v7 }
  0x23   : > { %269 = vmatpush.bf16.msra.mxu0 %v409_v8  ;;  %430 = vmatpush.bf16.msra.mxu1 %v409_v8 }
  0x24   : > { %431 = vmatpush.bf16.msra.mxu2 %v409_v8  ;;  %432 = vmatpush.bf16.msra.mxu3 %v409_v8 }
  0x27   : > { %270 = vmatpush.bf16.msra.mxu0 %v408_v9  ;;  %433 = vmatpush.bf16.msra.mxu1 %v408_v9 }
  0x28   : > { %434 = vmatpush.bf16.msra.mxu2 %v408_v9  ;;  %435 = vmatpush.bf16.msra.mxu3 %v408_v9 }
  0x2a   : > { %402 = vmatmul.msk.bf16.vlgmr.msra.gmra.mxu0 %vm246_vm1, %v183_v18  ;;  %403 = vmatmul.msk.bf16.vlgmr.msra.gmra.mxu1 %vm246_vm1, %v184_v19 }
  0x2b   : > { %404 = vmatmul.msk.bf16.vlgmr.msra.gmra.mxu2 %vm246_vm1, %v185_v20  ;;  %405 = vmatmul.msk.bf16.vlgmr.msra.gmra.mxu3 %vm246_vm1, %v186_v21 }
  0xa7   : > { %v272_v23 = vpop.f32.mrf.mxu0  ;;  %v277_v24 = vpop.f32.mrf.mxu1 }
  0xa8   : > { %v273_v25 = vadd.f32 %v444_v22, %v272_v23  ;;  %v278_v26 = vadd.f32 %v444_v22, %v277_v24 }
  0xaa   : > { %v292_v27 = vmax.f32 %v273_v25, 0.0  ;;  %v294_v28 = vmax.f32 %v278_v26, 0.0 }
  0xac   : > { %301 = vst.msk [vmem:[%s172_s13] sm:$0xff] %vm300_vm2, %v292_v27 }
  0xad   : > { %303 = vst.msk [vmem:[%s172_s13 + $0x10] sm:$0xff] %vm300_vm2, %v294_v28 }
  0xae   : > { %v282_v29 = vpop.f32.mrf.mxu2  ;;  %v287_v30 = vpop.f32.mrf.mxu3 }
  0xaf   : > { %v283_v31 = vadd.f32 %v444_v22, %v282_v29  ;;  %v288_v32 = vadd.f32 %v444_v22, %v287_v30  ;;  %v274_v33 = vpop.f32.mrf.mxu0  ;;  %v279_v34 = vpop.f32.mrf.mxu1 }
  0xb0   : > { %v275_v35 = vadd.f32 %v444_v22, %v274_v33  ;;  %v280_v36 = vadd.f32 %v444_v22, %v279_v34 }
  0xb1   : > { %v296_v37 = vmax.f32 %v283_v31, 0.0  ;;  %v298_v38 = vmax.f32 %v288_v32, 0.0 }
  0xb2   : > { %v293_v39 = vmax.f32 %v275_v35, 0.0  ;;  %v295_v40 = vmax.f32 %v280_v36, 0.0 }
  0xb3   : > { %305 = vst.msk [vmem:[%s172_s13 + $0x20] sm:$0xff] %vm300_vm2, %v296_v37 }
  0xb4   : > { %307 = vst.msk [vmem:[%s172_s13 + $0x30] sm:$0xff] %vm300_vm2, %v298_v38 }
  0xb5   : > { %302 = vst.msk [vmem:[%s172_s13 + $0x8] sm:$0xff] %vm300_vm2, %v293_v39 }
  0xb6   : > { %304 = vst.msk [vmem:[%s172_s13 + $0x18] sm:$0xff] %vm300_vm2, %v295_v40  ;;  %v284_v41 = vpop.f32.mrf.mxu2  ;;  %v289_v42 = vpop.f32.mrf.mxu3 }
  0xb7   : > { %v285_v43 = vadd.f32 %v444_v22, %v284_v41  ;;  %v290_v44 = vadd.f32 %v444_v22, %v289_v42 }
  0xb9   : > { %v297_v45 = vmax.f32 %v285_v43, 0.0  ;;  %v299_v46 = vmax.f32 %v290_v44, 0.0 }
  0xbb   : > { %306 = vst.msk [vmem:[%s172_s13 + $0x28] sm:$0xff] %vm300_vm2, %v297_v45 }
  0xbc   : > { %308 = vst.msk [vmem:[%s172_s13 + $0x38] sm:$0xff] %vm300_vm2, %v299_v46 }
  0xbd PF: > { %s13_s12 = sadd.s32 1, %s451_s12  }
  0xbe   : > { %p10_p4 = scmp.ge.s32.totalorder %s13_s12, 4  }
  0xc0   :  { %12 = sbr.rel (!%p10_p4) target bundleno = 1 (0x1), region = 62 }

// kernel: _lambda_.5
= control target key start
LH: loop header
LB: loop body
LE: loop exit
PB: predicated region body
PF: predicated region fallthrough
CT: control target
= control target key end

     0   :  { %s12613_s0 = inlined_call_operand.vmem [shape: f32[2,64,24], index: 0, kind: input, shape index: {}]   ;;  %s12614_s1 = inlined_call_operand.vmem [shape: f32[2,1,1536], index: 1, kind: input, shape index: {}]   ;;  %s12615_s2 = inlined_call_operand.vmem [shape: bf16[24,64], index: 2, kind: input, shape index: {}]   ;;  %s12616_s3 = inlined_call_operand.vmem [shape: bf16[24,64], index: 3, kind: input, shape index: {}]   ;;  %s12617_s4 = inlined_call_operand.vmem [shape: f32[64,64], index: 4, kind: input, shape index: {}]   ;;  %s12618_s5 = inlined_call_operand.vmem [shape: f32[64,64], index: 5, kind: input, shape index: {}]   ;;  %s12619_s6 = inlined_call_operand.vmem [shape: bf16[64,64], index: 6, kind: input, shape index: {}]   ;;  %s12620_s7 = inlined_call_operand.vmem [shape: f32[1,64], index: 7, kind: input, shape index: {}, may-alias: {7,9,11,13,16}]   ;;  %s12621_s8 = inlined_call_operand.vmem [shape: bf16[64,64], index: 8, kind: input, shape index: {}]   ;;  %s12622_s9 = inlined_call_operand.vmem [shape: f32[1,64], index: 9, kind: input, shape index: {}, may-alias: {7,9,11,13,16}]   ;;  %s12623_s10 = inlined_call_operand.vmem [shape: bf16[64,64], index: 10, kind: input, shape index: {}]   ;;  %s12624_s11 = inlined_call_operand.vmem [shape: f32[1,64], index: 11, kind: input, shape index: {}, may-alias: {7,9,11,13,16}]   ;;  %s12625_s12 = inlined_call_operand.vmem [shape: bf16[1536,64], index: 12, kind: input, shape index: {}]   ;;  %s12626_s13 = inlined_call_operand.vmem [shape: f32[1,64], index: 13, kind: input, shape index: {}, may-alias: {7,9,11,13,16}]   ;;  %s12627_s14 = inlined_call_operand.vmem [shape: bf16[64,64], index: 14, kind: input, shape index: {}]   ;;  %s12628_s15 = inlined_call_operand.vmem [shape: bf16[64,64], index: 15, kind: input, shape index: {}]   ;;  %s12629_s16 = inlined_call_operand.vmem [shape: f32[1,64], index: 16, kind: input, shape index: {}, may-alias: {7,9,11,13,16}]   ;;  %s12630_s17 = inlined_call_operand.vmem [shape: bf16[64,32], index: 17, kind: input, shape index: {}]   ;;  %s12631_s18 = inlined_call_operand.vmem [shape: f32[1,32], index: 18, kind: input, shape index: {}]   ;;  %s12632_s19 = inlined_call_operand.vmem [shape: bf16[32,2], index: 19, kind: input, shape index: {}]   ;;  %s12633_s20 = inlined_call_operand.vmem [shape: f32[1,2], index: 20, kind: input, shape index: {}]   ;;  %s12634_s21 = inlined_call_operand.hbm [shape: f32[2,1,2], index: 21, kind: output, shape index: {}]  }
   0x1   :  { %12650 = sst [smem:[#allocation291_spill]] %s12613_s0 }
   0x2   :  { %12651 = sst [smem:[#allocation292_spill]] %s12614_s1 }
   0x3   :  { %12652 = sst [smem:[#allocation293_spill]] %s12615_s2 }
   0x4   :  { %12653 = sst [smem:[#allocation294_spill]] %s12616_s3 }
   0x5   :  { %12654 = sst [smem:[#allocation295_spill]] %s12617_s4 }
   0x6   :  { %12655 = sst [smem:[#allocation296_spill]] %s12618_s5 }
   0x7   :  { %12656 = sst [smem:[#allocation297_spill]] %s12619_s6 }
   0x8   :  { %12657 = sst [smem:[#allocation298_spill]] %s12620_s7 }
   0x9   :  { %12658 = sst [smem:[#allocation299_spill]] %s12621_s8 }
   0xa   :  { %12659 = sst [smem:[#allocation300_spill]] %s12623_s10 }
   0xb   :  { %26 = vsyncpa [#allocation3], 0 }
   0xc   :  { %28 = vsyncpa [#allocation3 + $0x1], 0  ;;  %s8379_s2 = smov 0   ;;  %s8381_s25 = smov 0  }
   0xd   :  { %s8383_s26 = smov 0   ;;  %s8385_s27 = smov 0  }
   0xe LB: > { %12660 = sst [smem:[#allocation5_spill]] %s8255_s2  ;;  %s8400_s3 = sadd.s32 4294967295, %s8267_s27   ;;  %s8267_s27 = sphi %s8385_s27, %s13241_s27   ;;  %s8263_s26 = sphi %s8383_s26, %s13243_s26   ;;  %s8259_s25 = sphi %s8381_s25, %s13245_s25   ;;  %s8255_s2 = sphi %s8379_s2, %s13244_s2  }
   0xf   : > { %12661 = sst [smem:[#allocation6_spill]] %s8263_s26  ;;  %s7246_s28 = sadd.s32 4294967294, %s8267_s27  }
  0x10   : > { %12662 = sst [smem:[#allocation7_spill]] %s8267_s27  ;;  %s8404_s29 = sadd.s32 1, %s8267_s27  }
  0x11   : > { %12663 = sst [smem:[#allocation8_spill]] %s8404_s29  ;;  %s492_s0 = sadd.s32 1, %s8263_s26 }
  0x12   : > { %s489_s4 = ssub.s32 %s8267_s27, %s8404_s29  ;;  %p502_p0 = scmp.ne.s32.totalorder %s8263_s26, %s8259_s25 }
  0x13   : > { %p490_p1 = scmp.eq.s32.totalorder %s489_s4, 0  ;;  %p503_p2 = scmp.eq.s32.totalorder %s8400_s3, 1 }
  0x14   : > { %p508_p3 = scmp.ne.s32.totalorder %s8259_s25, %s8255_s2  ;;  %p509_p4 = scmp.eq.s32.totalorder %s7246_s28, 1 }
  0x15   : > { %s8415_s30 = scalar_select %p490_p1, %s8263_s26, %s492_s0  }
  0x16   : > { %p8417_p5 = por %p503_p2, %p502_p0  ;;  %p8421_p6 = por %p509_p4, %p508_p3 }
  0x17   : > { %12664 = sst [smem:[#allocation9_spill]] %s8415_s30  ;;  %p7249_p7 = scmp.ge.s32.totalorder %s8267_s27, 1 }
  0x18   : > { %s12666_s22 = scalar_select %p8421_p6, 1, 0 }
  0x19   : > { %p599_p8 = scmp.lt.s32.totalorder %s8267_s27, 3 }
  0x1a   : > { %12667 = sst [smem:[#allocation10_spill]] %s12666_s22 }
  0x1b   : > { %p600_p9 = pnand %p7249_p7, %p599_p8 }
  0x1d   : > { %603 = sbr.rel (%p600_p9) target bundleno = 2955 (0xb8b), region = 104 }
  0x22   : > { %s12668_s24 = sld [smem:[#allocation293_spill]]  ;;  %p662_p10 = scmp.lt.s32.totalorder %s8400_s3, 1  ;;  %vm717_vm0 = vcmask 1043456   ;;  %vm704_vm1 = vcmask 195584   ;;  %vm2310_vm2 = vcmask 523264   ;;  %vm7147_vm3 = vcmask 261120  }
  0x23   : > { %s12669_s4 = sld [smem:[#allocation294_spill]]  ;;  %vm7164_vm4 = vcmask 8192  }
  0x24   : > { %s8435_s30 = scalar_select %p662_p10, %s8400_s3, 1 }
  0x25   : > { %s12670_s2 = sld [smem:[#allocation291_spill]] }
  0x26   : > { %s8020_s26 = sshll.u32 %s8435_s30, 6  ;;  %s12671_s6 = sld [smem:[#allocation297_spill]] }
  0x27   : > { %s12672_s29 = sld [smem:[#allocation295_spill]]  ;;  %s8157_s23 = smul.u32 12, %s8435_s30 }
  0x28   : > { %v686_v0 = vld [vmem:[%s12668_s24 + $0x8] sm:$0xf]  ;;  %v8021_v8 = vld [vmem:[%s12668_s24] sm:$0xff]  ;;  %s12673_s22 = sld [smem:[#allocation296_spill]] }
  0x29   : > { %v752_v1 = vld [vmem:[%s12669_s4 + $0x8] sm:$0xf]  ;;  %v700_v2 = vunpack.c.l.b16 %v686_v0  ;;  %v8022_v9 = vld [vmem:[%s12669_s4] sm:$0xff]  ;;  %s12677_s7 = sld [smem:[#allocation298_spill]] }
  0x2a   : > { %v766_v3 = vunpack.c.l.b16 %v752_v1  ;;  %s12936_s8 = sld [smem:[#allocation299_spill]] }
  0x2b   : > { %v702_v4 = vpack.c.b16 %v700_v2, %v700_v2  ;;  %s666_s27 = scalar_lea.vmem %s12670_s2, %s8020_s26  ;;  %s13236_s10 = sld [smem:[#allocation300_spill]] }
  0x2c   : > { %v768_v5 = vpack.c.b16 %v766_v3, %v766_v3  ;;  %v672_v10 = vld [vmem:[%s666_s27] sm:$0xff]  ;;  %v673_v11 = vld [vmem:[%s666_s27 + $0x8] sm:$0xff]  ;;  %v674_v13 = vld [vmem:[%s666_s27 + $0x10] sm:$0xff] }
  0x2d   : > { %v719_v6 = vsel %vm717_vm0, %v702_v4, 0  ;;  %v680_v12 = vpack.c.bf16 %v673_v11, %v672_v10  ;;  %v675_v14 = vld [vmem:[%s666_s27 + $0x18] sm:$0xff]  ;;  %v8025_v17 = vld [vmem:[%s12671_s6 + $0x10] sm:$0xff]  ;;  %v676_v18 = vld [vmem:[%s666_s27 + $0x20] sm:$0xff] }
  0x2e   : > { %v771_v7 = vsel %vm717_vm0, %v768_v5, 0  ;;  %727 = vmatpush.bf16.msra.mxu0 %v719_v6  ;;  %v681_v15 = vpack.c.bf16 %v675_v14, %v674_v13  ;;  %v8026_v16 = vld [vmem:[%s12671_s6 + $0x18] sm:$0xff]  ;;  %v677_v19 = vld [vmem:[%s666_s27 + $0x28] sm:$0xff]  ;;  %v678_v21 = vld [vmem:[%s666_s27 + $0x30] sm:$0xff] }
  0x2f   : > { %779 = vmatpush.bf16.msra.mxu1 %v771_v7  ;;  %8146 = vmatpush.bf16.msra.mxu2 %v8026_v16  ;;  %v682_v20 = vpack.c.bf16 %v677_v19, %v676_v18  ;;  %v679_v22 = vld [vmem:[%s666_s27 + $0x38] sm:$0xff]  ;;  %v8024_v24 = vld [vmem:[%s12671_s6 + $0x8] sm:$0xff]  ;;  %v8023_v25 = vld [vmem:[%s12671_s6] sm:$0xff]  ;;  %s13237_s27 = sld [smem:[#allocation292_spill]] }
  0x30   : > { %8147 = vmatpush.bf16.msra.mxu3 %v8026_v16  ;;  %v683_v23 = vpack.c.bf16 %v679_v22, %v678_v21  ;;  %v687_v28 = vld [vmem:[%s12672_s29] sm:$0xff]  ;;  %v754_v31 = vld [vmem:[%s12673_s22 + $0x8] sm:$0xff]  ;;  %v755_v44 = vld [vmem:[%s12673_s22 + $0x10] sm:$0xff] }
  0x31   : > { %v753_v30 = vld [vmem:[%s12673_s22] sm:$0xff]  ;;  %v690_v45 = vld [vmem:[%s12672_s29 + $0x18] sm:$0xff]  ;;  %v688_v62 = vld [vmem:[%s12672_s29 + $0x8] sm:$0xff] }
  0x32   : > { %728 = vmatpush.bf16.msra.mxu0 %v8021_v8  ;;  %v756_v46 = vld [vmem:[%s12673_s22 + $0x18] sm:$0xff]  ;;  %v757_v3 = vld [vmem:[%s12673_s22 + $0x20] sm:$0xff]  ;;  %v758_v5 = vld [vmem:[%s12673_s22 + $0x28] sm:$0xff] }
  0x33   : > { %780 = vmatpush.bf16.msra.mxu1 %v8022_v9  ;;  %8149 = vmatpush.bf16.msra.mxu2 %v8025_v17  ;;  %v693_v13 = vld [vmem:[%s12672_s29 + $0x30] sm:$0xff] }
  0x34   : > { %8150 = vmatpush.bf16.msra.mxu3 %v8025_v17 }
  0x35   : > { %7256 = vmatmul.msk.bf16.vlgmr.msra.gmra.mxu0 %vm704_vm1, %v680_v12 }
  0x36   : > { %7264 = vmatmul.msk.bf16.vlgmr.msra.gmra.mxu1 %vm704_vm1, %v680_v12  ;;  %3083 = vmatpush.bf16.msrb.mxu0 %v8026_v16 }
  0x37   : > { %8145 = vmatpush.bf16.msrb.mxu1 %v8026_v16  ;;  %8152 = vmatpush.bf16.msra.mxu2 %v8024_v24 }
  0x38   : > { %8153 = vmatpush.bf16.msra.mxu3 %v8024_v24 }
  0x3a   : > { %3084 = vmatpush.bf16.msrb.mxu0 %v8025_v17 }
  0x3b   : > { %8148 = vmatpush.bf16.msrb.mxu1 %v8025_v17  ;;  %8155 = vmatpush.bf16.msra.mxu2 %v8023_v25 }
  0x3c   : > { %8156 = vmatpush.bf16.msra.mxu3 %v8023_v25 }
  0x3e   : > { %3085 = vmatpush.bf16.msrb.mxu0 %v8024_v24 }
  0x3f   : > { %8151 = vmatpush.bf16.msrb.mxu1 %v8024_v24 }
  0x42   : > { %3086 = vmatpush.bf16.msrb.mxu0 %v8023_v25 }
  0x43   : > { %8154 = vmatpush.bf16.msrb.mxu1 %v8023_v25 }
  0x45   : > { %7257 = vmatmul.msk.bf16.gmra.mxu0 %vm704_vm1, %v681_v15 }
  0x46   : > { %7265 = vmatmul.msk.bf16.gmra.mxu1 %vm704_vm1, %v681_v15 }
  0x55   : > { %7258 = vmatmul.msk.bf16.gmra.mxu0 %vm704_vm1, %v682_v20 }
  0x56   : > { %7266 = vmatmul.msk.bf16.gmra.mxu1 %vm704_vm1, %v682_v20 }
  0x65   : > { %7259 = vmatmul.msk.bf16.gmra.mxu0 %vm704_vm1, %v683_v23 }
  0x66   : > { %7267 = vmatmul.msk.bf16.gmra.mxu1 %vm704_vm1, %v683_v23 }
  0xb2   : > { %v730_v26 = vpop.f32.mrf.mxu0 }
  0xb3   : > { %v782_v27 = vpop.f32.mrf.mxu1  ;;  %v8470_v29 = vadd.f32 %v730_v26, %v687_v28 }
  0xb4   : > { %v8481_v35 = vadd.f32 %v782_v27, %v753_v30 }
  0xb5   : > { %v8479_v32 = vperm.slane %v8470_v29, 0 }
  0xb6   : > { %12674 = vst [vmem:[#allocation11_spill] sm:$0xff] %v8481_v35 }
  0xb7   : > { %v994_v37 = vadd.f32 %v8479_v32, %v8481_v35 }
  0xb9   : > { %v1506_v41 = vmax.f32 %v994_v37, 0.0 }
  0xba   : > { %v732_v33 = vpop.f32.mrf.mxu0 }
  0xbb   : > { %v784_v34 = vpop.f32.mrf.mxu1  ;;  %v8524_v2 = vadd.f32 %v732_v33, %v688_v62  ;;  %v759_v33 = vld [vmem:[%s12673_s22 + $0x30] sm:$0xff] }
  0xbc   : > { %v8483_v36 = vadd.f32 %v784_v34, %v754_v31 }
  0xbd   : > { %v823_v9 = vrot.slane %v8524_v2, 7 }
  0xbe   : > { %12675 = vst [vmem:[#allocation12_spill] sm:$0xff] %v8483_v36  ;;  %v995_v38 = vadd.f32 %v8479_v32, %v8483_v36 }
  0xbf   : > { %v8542_v12 = vperm.slane %v823_v9, 0 }
  0xc0   : > { %v1507_v42 = vmax.f32 %v995_v38, 0.0 }
  0xc2   : > { %v8489_v39 = vpop.f32.mrf.mxu0  ;;  %v2018_v43 = vpack.c.bf16 %v1507_v42, %v1506_v41  ;;  %v760_v41 = vld [vmem:[%s12673_s22 + $0x38] sm:$0xff] }
  0xc3   : > { %v787_v40 = vpop.f32.mrf.mxu1 }
  0xc4   : > { %7284 = vmatmul.msk.bf16.vlgmr.msrb.gmra.mxu0 %vm2310_vm2, %v2018_v43  ;;  %v8501_v47 = vadd.f32 %v787_v40, %v755_v44 }
  0xc6   : > { %v996_v53 = vadd.f32 %v8479_v32, %v8501_v47 }
  0xc8   : > { %v1508_v58 = vmax.f32 %v996_v53, 0.0 }
  0xca   : > { %v737_v48 = vpop.f32.mrf.mxu0 }
  0xcb   : > { %v789_v49 = vpop.f32.mrf.mxu1  ;;  %v8503_v50 = vadd.f32 %v737_v48, %v690_v45 }
  0xcc   : > { %v8505_v51 = vadd.f32 %v789_v49, %v756_v46 }
  0xcd   : > { %v837_v52 = vrot.slane %v8503_v50, 7 }
  0xce   : > { %v997_v55 = vadd.f32 %v8479_v32, %v8505_v51 }
  0xcf   : > { %v8510_v54 = vperm.slane %v837_v52, 0 }
  0xd0   : > { %v1509_v59 = vmax.f32 %v997_v55, 0.0 }
  0xd1   : > { %v1242_v60 = vadd.f32 %v8510_v54, %v8481_v35  ;;  %v1243_v61 = vadd.f32 %v8510_v54, %v8483_v36  ;;  %v1244_v15 = vadd.f32 %v8510_v54, %v8501_v47  ;;  %v1245_v16 = vadd.f32 %v8510_v54, %v8505_v51 }
  0xd2   : > { %v8514_v56 = vpop.f32.mrf.mxu0  ;;  %v2019_v63 = vpack.c.bf16 %v1509_v59, %v1508_v58 }
  0xd3   : > { %v792_v57 = vpop.f32.mrf.mxu1  ;;  %v1754_v0 = vmax.f32 %v1242_v60, 0.0  ;;  %v1755_v1 = vmax.f32 %v1243_v61, 0.0  ;;  %v1756_v26 = vmax.f32 %v1244_v15, 0.0  ;;  %v1757_v27 = vmax.f32 %v1245_v16, 0.0 }
  0xd4   : > { %7285 = vmatmul.msk.bf16.gmra.mxu0 %vm2310_vm2, %v2019_v63  ;;  %v8532_v6 = vadd.f32 %v792_v57, %v757_v3 }
  0xd5   : > { %v2142_v4 = vpack.c.bf16 %v1755_v1, %v1754_v0  ;;  %v2143_v37 = vpack.c.bf16 %v1757_v27, %v1756_v26  ;;  %v689_v0 = vld [vmem:[%s12672_s29 + $0x10] sm:$0xff] }
  0xd6   : > { %v998_v11 = vadd.f32 %v8479_v32, %v8532_v6  ;;  %v1118_v22 = vadd.f32 %v8542_v12, %v8532_v6  ;;  %v1246_v58 = vadd.f32 %v8510_v54, %v8532_v6 }
  0xd7   : > { %7408 = vmatmul.msk.bf16.vlgmr.msra.gmra.mxu2 %vm2310_vm2, %v2142_v4  ;;  %v810_v4 = vrot.slane %v8470_v29, 1 }
  0xd8   : > { %v1510_v20 = vmax.f32 %v998_v11, 0.0  ;;  %v1630_v30 = vmax.f32 %v1118_v22, 0.0 }
  0xda   : > { %v8535_v7 = vpop.f32.mrf.mxu0 }
  0xdb   : > { %v794_v8 = vpop.f32.mrf.mxu1 }
  0xdc   : > { %v8538_v10 = vadd.f32 %v794_v8, %v758_v5  ;;  %v8598_v5 = vadd.f32 %v8489_v39, %v689_v0 }
  0xde   : > { %v999_v14 = vadd.f32 %v8479_v32, %v8538_v10  ;;  %v1119_v17 = vadd.f32 %v8542_v12, %v8538_v10  ;;  %v1247_v53 = vadd.f32 %v8510_v54, %v8538_v10 }
  0xe0   : > { %v1511_v21 = vmax.f32 %v999_v14, 0.0  ;;  %v1631_v25 = vmax.f32 %v1119_v17, 0.0  ;;  %v1759_v63 = vmax.f32 %v1247_v53, 0.0  ;;  %v8609_v14 = vperm.slane %v8598_v5, 0 }
  0xe2   : > { %v745_v18 = vpop.f32.mrf.mxu0  ;;  %v2020_v24 = vpack.c.bf16 %v1511_v21, %v1510_v20  ;;  %v2080_v34 = vpack.c.bf16 %v1631_v25, %v1630_v30  ;;  %v1123_v20 = vadd.f32 %v8609_v14, %v8483_v36  ;;  %v691_v30 = vld [vmem:[%s12672_s29 + $0x20] sm:$0xff] }
  0xe3   : > { %v797_v19 = vpop.f32.mrf.mxu1  ;;  %v8557_v23 = vadd.f32 %v745_v18, %v693_v13  ;;  %v8606_v13 = vperm.slane %v810_v4, 0 }
  0xe4   : > { %7286 = vmatmul.msk.bf16.gmra.mxu0 %vm2310_vm2, %v2020_v24  ;;  %7346 = vmatmul.msk.bf16.vlgmr.msrb.gmra.mxu1 %vm2310_vm2, %v2080_v34  ;;  %v8575_v43 = vadd.f32 %v797_v19, %v759_v33  ;;  %v1122_v19 = vadd.f32 %v8609_v14, %v8481_v35  ;;  %v1635_v27 = vmax.f32 %v1123_v20, 0.0 }
  0xe5   : > { %v852_v28 = vrot.slane %v8557_v23, 1  ;;  %v1003_v39 = vadd.f32 %v8606_v13, %v8483_v36  ;;  %v1002_v17 = vadd.f32 %v8606_v13, %v8481_v35 }
  0xe6   : > { %v1000_v48 = vadd.f32 %v8479_v32, %v8575_v43  ;;  %v1120_v52 = vadd.f32 %v8542_v12, %v8575_v43  ;;  %v1248_v24 = vadd.f32 %v8510_v54, %v8575_v43  ;;  %v1634_v26 = vmax.f32 %v1122_v19, 0.0 }
  0xe7   : > { %v8561_v31 = vperm.slane %v852_v28, 0  ;;  %7409 = vmatmul.msk.bf16.gmra.mxu2 %vm2310_vm2, %v2143_v37  ;;  %v1515_v22 = vmax.f32 %v1003_v39, 0.0  ;;  %v1514_v25 = vmax.f32 %v1002_v17, 0.0  ;;  %v8629_v37 = vadd.f32 %v8514_v56, %v691_v30 }
  0xe8   : > { %v1512_v59 = vmax.f32 %v1000_v48, 0.0  ;;  %v1632_v62 = vmax.f32 %v1120_v52, 0.0  ;;  %v1760_v34 = vmax.f32 %v1248_v24, 0.0  ;;  %v1005_v56 = vadd.f32 %v8606_v13, %v8505_v51 }
  0xe9   : > { %12676 = vst [vmem:[#allocation13_spill] sm:$0xff] %v8561_v31  ;;  %v1388_v38 = vadd.f32 %v8561_v31, %v8501_v47  ;;  %v1389_v40 = vadd.f32 %v8561_v31, %v8505_v51  ;;  %v1390_v9 = vadd.f32 %v8561_v31, %v8532_v6  ;;  %v1391_v11 = vadd.f32 %v8561_v31, %v8538_v10 }
  0xea   : > { %v2022_v33 = vpack.c.bf16 %v1515_v22, %v1514_v25  ;;  %v1004_v48 = vadd.f32 %v8606_v13, %v8501_v47  ;;  %v853_v52 = vrot.slane %v8557_v23, 2  ;;  %v1006_v39 = vadd.f32 %v8606_v13, %v8532_v6 }
  0xeb   : > { %v799_v42 = vpop.f32.mrf.mxu1  ;;  %v1900_v44 = vmax.f32 %v1388_v38, 0.0  ;;  %v1901_v45 = vmax.f32 %v1389_v40, 0.0  ;;  %v1902_v15 = vmax.f32 %v1390_v9, 0.0  ;;  %v1903_v16 = vmax.f32 %v1391_v11, 0.0 }
  0xec   : > { %v8577_v46 = vadd.f32 %v799_v42, %v760_v41  ;;  %v2082_v38 = vpack.c.bf16 %v1635_v27, %v1634_v26  ;;  %v1392_v41 = vadd.f32 %v8561_v31, %v8575_v43  ;;  %v8638_v42 = vperm.slane %v8629_v37, 0 }
  0xed   : > { %v2215_v49 = vpack.c.bf16 %v1901_v45, %v1900_v44  ;;  %v2216_v18 = vpack.c.bf16 %v1903_v16, %v1902_v15  ;;  %v1007_v16 = vadd.f32 %v8606_v13, %v8538_v10  ;;  %v1126_v22 = vadd.f32 %v8609_v14, %v8532_v6 }
  0xee   : > { %v1001_v55 = vadd.f32 %v8479_v32, %v8577_v46  ;;  %v1121_v57 = vadd.f32 %v8542_v12, %v8577_v46  ;;  %v1758_v32 = vmax.f32 %v1246_v58, 0.0  ;;  %v1249_v21 = vadd.f32 %v8510_v54, %v8577_v46 }
  0xef   : > { %7481 = vmatmul.msk.bf16.vlgmr.msra.gmra.mxu3 %vm2310_vm2, %v2215_v49  ;;  %v1393_v54 = vadd.f32 %v8561_v31, %v8577_v46  ;;  %v1904_v45 = vmax.f32 %v1392_v41, 0.0  ;;  %v1125_v49 = vadd.f32 %v8609_v14, %v8505_v51  ;;  %v1517_v58 = vmax.f32 %v1005_v56, 0.0 }
  0xf0   : > { %v1513_v60 = vmax.f32 %v1001_v55, 0.0  ;;  %v1633_v61 = vmax.f32 %v1121_v57, 0.0  ;;  %v2144_v8 = vpack.c.bf16 %v1759_v63, %v1758_v32  ;;  %v1761_v28 = vmax.f32 %v1249_v21, 0.0 }
  0xf1   : > { %v1905_v44 = vmax.f32 %v1393_v54, 0.0  ;;  %v1250_v55 = vadd.f32 %v8638_v42, %v8481_v35  ;;  %v1251_v57 = vadd.f32 %v8638_v42, %v8483_v36  ;;  %v1252_v19 = vadd.f32 %v8638_v42, %v8501_v47 }
  0xf2   : > { %v2021_v1 = vpack.c.bf16 %v1513_v60, %v1512_v59  ;;  %v2081_v3 = vpack.c.bf16 %v1633_v61, %v1632_v62  ;;  %v2145_v40 = vpack.c.bf16 %v1761_v28, %v1760_v34  ;;  %v1124_v59 = vadd.f32 %v8609_v14, %v8501_v47 }
  0xf3   : > { %v2217_v53 = vpack.c.bf16 %v1905_v44, %v1904_v45  ;;  %v1516_v60 = vmax.f32 %v1004_v48, 0.0  ;;  %v8654_v61 = vperm.slane %v853_v52, 0  ;;  %v1637_v62 = vmax.f32 %v1125_v49, 0.0 }
  0xf4   : > { %7287 = vmatmul.msk.bf16.gmra.mxu0 %vm2310_vm2, %v2021_v1  ;;  %7347 = vmatmul.msk.bf16.gmra.mxu1 %vm2310_vm2, %v2081_v3  ;;  %v1762_v63 = vmax.f32 %v1250_v55, 0.0  ;;  %v1763_v0 = vmax.f32 %v1251_v57, 0.0  ;;  %v1636_v3 = vmax.f32 %v1124_v59, 0.0  ;;  %v1253_v20 = vadd.f32 %v8638_v42, %v8505_v51 }
  0xf5   : > { %v2023_v1 = vpack.c.bf16 %v1517_v58, %v1516_v60  ;;  %v1395_v9 = vadd.f32 %v8654_v61, %v8483_v36  ;;  %v1519_v21 = vmax.f32 %v1007_v16, 0.0  ;;  %v1518_v24 = vmax.f32 %v1006_v39, 0.0 }
  0xf6   : > { %v2083_v32 = vpack.c.bf16 %v1637_v62, %v1636_v3  ;;  %v2146_v4 = vpack.c.bf16 %v1763_v0, %v1762_v63  ;;  %v1764_v26 = vmax.f32 %v1252_v19, 0.0  ;;  %v1765_v27 = vmax.f32 %v1253_v20, 0.0 }
  0xf7   : > { %7410 = vmatmul.msk.bf16.gmra.mxu2 %vm2310_vm2, %v2144_v8  ;;  %v1394_v8 = vadd.f32 %v8654_v61, %v8481_v35  ;;  %v1907_v15 = vmax.f32 %v1395_v9, 0.0  ;;  %v2024_v28 = vpack.c.bf16 %v1519_v21, %v1518_v24  ;;  %v1638_v30 = vmax.f32 %v1126_v22, 0.0 }
  0xf8   : > { %v2147_v34 = vpack.c.bf16 %v1765_v27, %v1764_v26  ;;  %v1009_v44 = vadd.f32 %v8606_v13, %v8577_v46  ;;  %v1008_v56 = vadd.f32 %v8606_v13, %v8575_v43  ;;  %v1129_v48 = vadd.f32 %v8609_v14, %v8577_v46  ;;  %v8727_v26 = vld [vmem:[%s12677_s7] ss:$0 sm:$0xff] }
  0xf9   : > { %v1906_v11 = vmax.f32 %v1394_v8, 0.0  ;;  %v1255_v49 = vadd.f32 %v8638_v42, %v8538_v10  ;;  %v1254_v55 = vadd.f32 %v8638_v42, %v8532_v6  ;;  %v811_v63 = vrot.slane %v8470_v29, 2  ;;  %v8707_v8 = vpop.f32.mrf.mxu0 }
  0xfa   : > { %v1521_v52 = vmax.f32 %v1009_v44, 0.0  ;;  %v1520_v57 = vmax.f32 %v1008_v56, 0.0  ;;  %v1641_v58 = vmax.f32 %v1129_v48, 0.0  ;;  %v824_v0 = vrot.slane %v8598_v5, 1 }
  0xfb   : > { %v2218_v17 = vpack.c.bf16 %v1907_v15, %v1906_v11  ;;  %v1767_v59 = vmax.f32 %v1255_v49, 0.0  ;;  %v1766_v62 = vmax.f32 %v1254_v55, 0.0  ;;  %v1257_v20 = vadd.f32 %v8638_v42, %v8577_v46 }
  0xfc   : > { %v2025_v13 = vpack.c.bf16 %v1521_v52, %v1520_v57  ;;  %v8709_v9 = vperm.slane %v824_v0, 0  ;;  %v1256_v22 = vadd.f32 %v8638_v42, %v8575_v43  ;;  %v1400_v44 = vadd.f32 %v8654_v61, %v8575_v43 }
  0xfd   : > { %v2148_v3 = vpack.c.bf16 %v1767_v59, %v1766_v62 }
  0xfe   : > { %v1131_v19 = vadd.f32 %v8709_v9, %v8483_v36  ;;  %v1912_v57 = vmax.f32 %v1400_v44, 0.0 }
  0xff   : > { %7482 = vmatmul.msk.bf16.gmra.mxu3 %vm2310_vm2, %v2216_v18  ;;  %v1127_v18 = vadd.f32 %v8609_v14, %v8538_v10 }
 0x101   : > { %v1639_v25 = vmax.f32 %v1127_v18, 0.0  ;;  %v1130_v18 = vadd.f32 %v8709_v9, %v8481_v35 }
 0x103   : > { %v1642_v27 = vmax.f32 %v1130_v18, 0.0 }
 0x104   : > { %7288 = vmatmul.msk.bf16.gmra.mxu0 %vm2310_vm2, %v2022_v33  ;;  %7348 = vmatmul.msk.bf16.gmra.mxu1 %vm2310_vm2, %v2082_v38  ;;  %v2084_v33 = vpack.c.bf16 %v1639_v25, %v1638_v30  ;;  %v1396_v38 = vadd.f32 %v8654_v61, %v8501_v47  ;;  %v1769_v30 = vmax.f32 %v1257_v20, 0.0 }
 0x106   : > { %v1908_v54 = vmax.f32 %v1396_v38, 0.0  ;;  %v838_v38 = vrot.slane %v8629_v37, 1 }
 0x107   : > { %7411 = vmatmul.msk.bf16.gmra.mxu2 %vm2310_vm2, %v2145_v40  ;;  %v1397_v40 = vadd.f32 %v8654_v61, %v8505_v51 }
 0x108   : > { %v8738_v56 = vperm.slane %v838_v38, 0 }
 0x109   : > { %v1909_v41 = vmax.f32 %v1397_v40, 0.0 }
 0x10a   : > { %v1259_v0 = vadd.f32 %v8738_v56, %v8483_v36 }
 0x10b   : > { %v2219_v45 = vpack.c.bf16 %v1909_v41, %v1908_v54  ;;  %v1401_v41 = vadd.f32 %v8654_v61, %v8577_v46 }
 0x10c   : > { %v1771_v18 = vmax.f32 %v1259_v0, 0.0 }
 0x10d   : > { %v1913_v52 = vmax.f32 %v1401_v41, 0.0 }
 0x10f   : > { %7483 = vmatmul.msk.bf16.gmra.mxu3 %vm2310_vm2, %v2217_v53  ;;  %v1128_v53 = vadd.f32 %v8609_v14, %v8575_v43  ;;  %v1398_v14 = vadd.f32 %v8654_v61, %v8532_v6 }
 0x111   : > { %v1640_v60 = vmax.f32 %v1128_v53, 0.0  ;;  %v1910_v11 = vmax.f32 %v1398_v14, 0.0  ;;  %v1132_v14 = vadd.f32 %v8709_v9, %v8501_v47 }
 0x114   : > { %7289 = vmatmul.msk.bf16.gmra.mxu0 %vm2310_vm2, %v2023_v1  ;;  %7349 = vmatmul.msk.bf16.gmra.mxu1 %vm2310_vm2, %v2083_v32  ;;  %v2085_v1 = vpack.c.bf16 %v1641_v58, %v1640_v60  ;;  %v1399_v32 = vadd.f32 %v8654_v61, %v8538_v10  ;;  %v854_v58 = vrot.slane %v8557_v23, 3  ;;  %v1133_v61 = vadd.f32 %v8709_v9, %v8505_v51 }
 0x116   : > { %v1911_v15 = vmax.f32 %v1399_v32, 0.0  ;;  %v8757_v32 = vperm.slane %v854_v58, 0  ;;  %v1134_v58 = vadd.f32 %v8709_v9, %v8532_v6 }
 0x117   : > { %7412 = vmatmul.msk.bf16.gmra.mxu2 %vm2310_vm2, %v2146_v4  ;;  %v8705_v4 = vperm.slane %v811_v63, 0  ;;  %v2221_v63 = vpack.c.bf16 %v1913_v52, %v1912_v57  ;;  %v1260_v52 = vadd.f32 %v8738_v56, %v8501_v47 }
 0x119   : > { %v1011_v16 = vadd.f32 %v8705_v4, %v8483_v36  ;;  %v1010_v39 = vadd.f32 %v8705_v4, %v8481_v35  ;;  %v1013_v53 = vadd.f32 %v8705_v4, %v8505_v51  ;;  %v1012_v59 = vadd.f32 %v8705_v4, %v8501_v47 }
 0x11a   : > { %v1014_v44 = vadd.f32 %v8705_v4, %v8532_v6 }
 0x11b   : > { %v1523_v21 = vmax.f32 %v1011_v16, 0.0  ;;  %v1522_v25 = vmax.f32 %v1010_v39, 0.0  ;;  %v1645_v39 = vmax.f32 %v1133_v61, 0.0 }
 0x11c   : > { %v1526_v61 = vmax.f32 %v1014_v44, 0.0 }
 0x11f   : > { %7484 = vmatmul.msk.bf16.gmra.mxu3 %vm2310_vm2, %v2218_v17  ;;  %v2220_v17 = vpack.c.bf16 %v1911_v15, %v1910_v11  ;;  %v1524_v15 = vmax.f32 %v1012_v59, 0.0 }
 0x124   : > { %7290 = vmatmul.msk.bf16.gmra.mxu0 %vm2310_vm2, %v2024_v28  ;;  %7350 = vmatmul.msk.bf16.gmra.mxu1 %vm2310_vm2, %v2084_v33  ;;  %v1643_v28 = vmax.f32 %v1131_v19, 0.0  ;;  %v2026_v33 = vpack.c.bf16 %v1523_v21, %v1522_v25  ;;  %v1644_v21 = vmax.f32 %v1132_v14, 0.0  ;;  %v1646_v14 = vmax.f32 %v1134_v58, 0.0 }
 0x126   : > { %v2086_v54 = vpack.c.bf16 %v1643_v28, %v1642_v27  ;;  %v2087_v25 = vpack.c.bf16 %v1645_v39, %v1644_v21  ;;  %v1403_v28 = vadd.f32 %v8757_v32, %v8483_v36 }
 0x127   : > { %7413 = vmatmul.msk.bf16.gmra.mxu2 %vm2310_vm2, %v2147_v34  ;;  %v1768_v34 = vmax.f32 %v1256_v22, 0.0  ;;  %v1402_v22 = vadd.f32 %v8757_v32, %v8481_v35 }
 0x129   : > { %v2149_v42 = vpack.c.bf16 %v1769_v30, %v1768_v34  ;;  %v1914_v38 = vmax.f32 %v1402_v22, 0.0 }
 0x12f   : > { %7485 = vmatmul.msk.bf16.gmra.mxu3 %vm2310_vm2, %v2219_v45 }
 0x134   : > { %7291 = vmatmul.msk.bf16.gmra.mxu0 %vm2310_vm2, %v2025_v13  ;;  %7351 = vmatmul.msk.bf16.gmra.mxu1 %vm2310_vm2, %v2085_v1  ;;  %v1258_v13 = vadd.f32 %v8738_v56, %v8481_v35 }
 0x137   : > { %7414 = vmatmul.msk.bf16.gmra.mxu2 %vm2310_vm2, %v2148_v3  ;;  %v1525_v3 = vmax.f32 %v1013_v53, 0.0  ;;  %v1261_v53 = vadd.f32 %v8738_v56, %v8505_v51 }
 0x139   : > { %v2027_v19 = vpack.c.bf16 %v1525_v3, %v1524_v15  ;;  %v1404_v15 = vadd.f32 %v8757_v32, %v8501_v47 }
 0x13b   : > { %v1916_v22 = vmax.f32 %v1404_v15, 0.0  ;;  %v1407_v15 = vadd.f32 %v8757_v32, %v8538_v10 }
 0x13f   : > { %7486 = vmatmul.msk.bf16.gmra.mxu3 %vm2310_vm2, %v2220_v17  ;;  %v1770_v17 = vmax.f32 %v1258_v13, 0.0 }
 0x141   : > { %v3088_v24 = vpop.f32.mrf.mxu0  ;;  %v2150_v27 = vpack.c.bf16 %v1771_v18, %v1770_v17  ;;  %v1405_v18 = vadd.f32 %v8757_v32, %v8505_v51 }
 0x142   : > { %v3089_v40 = vadd.f32 %v8727_v26, %v3088_v24 }
 0x144   : > { %7292 = vmatmul.msk.bf16.gmra.mxu0 %vm2310_vm2, %v2026_v33  ;;  %7352 = vmatmul.msk.bf16.gmra.mxu1 %vm2310_vm2, %v2086_v54  ;;  %v4368_v48 = vmax.f32 %v3089_v40, 0.0  ;;  %v1915_v40 = vmax.f32 %v1403_v28, 0.0 }
 0x146   : > { %v4880_v60 = vsel %vm2310_vm2, %v4368_v48, 0.0 }
 0x147   : > { %7415 = vmatmul.msk.bf16.gmra.mxu2 %vm2310_vm2, %v2149_v42  ;;  %v1015_v42 = vadd.f32 %v8705_v4, %v8538_v10 }
 0x149   : > { %v3090_v45 = vpop.f32.mrf.mxu0  ;;  %v1527_v57 = vmax.f32 %v1015_v42, 0.0  ;;  %v1263_v42 = vadd.f32 %v8738_v56, %v8538_v10 }
 0x14a   : > { %v3091_v49 = vadd.f32 %v8727_v26, %v3090_v45  ;;  %v1135_v45 = vadd.f32 %v8709_v9, %v8538_v10 }
 0x14c   : > { %v4369_v55 = vmax.f32 %v3091_v49, 0.0  ;;  %v2222_v49 = vpack.c.bf16 %v1915_v40, %v1914_v38  ;;  %v1137_v40 = vadd.f32 %v8709_v9, %v8577_v46 }
 0x14e   : > { %v4881_v62 = vsel %vm2310_vm2, %v4369_v55, 0.0 }
 0x14f   : > { %v4882_v1 = vadd.f32 %v4881_v62, %v4880_v60  ;;  %7487 = vmatmul.msk.bf16.gmra.mxu3 %vm2310_vm2, %v2221_v63  ;;  %v1647_v60 = vmax.f32 %v1135_v45, 0.0  ;;  %v1772_v62 = vmax.f32 %v1260_v52, 0.0  ;;  %v1773_v63 = vmax.f32 %v1261_v53, 0.0 }
 0x150   : > { %v1136_v45 = vadd.f32 %v8709_v9, %v8575_v43  ;;  %v1649_v52 = vmax.f32 %v1137_v40, 0.0  ;;  %v1775_v53 = vmax.f32 %v1263_v42, 0.0  ;;  %v825_v9 = vrot.slane %v8598_v5, 2 }
 0x151   : > { %v3093_v11 = vpop.f32.mrf.mxu0  ;;  %v2088_v39 = vpack.c.bf16 %v1647_v60, %v1646_v14  ;;  %v2151_v17 = vpack.c.bf16 %v1773_v63, %v1772_v62  ;;  %v812_v60 = vrot.slane %v8470_v29, 3  ;;  %v1406_v14 = vadd.f32 %v8757_v32, %v8532_v6 }
 0x152   : > { %v3094_v16 = vadd.f32 %v8727_v26, %v3093_v11 }
 0x154   : > { %v4370_v20 = vmax.f32 %v3094_v16, 0.0  ;;  %7293 = vmatmul.msk.bf16.gmra.mxu0 %vm2310_vm2, %v2027_v19  ;;  %7353 = vmatmul.msk.bf16.gmra.mxu1 %vm2310_vm2, %v2087_v25 }
 0x156   : > { %v4883_v24 = vsel %vm2310_vm2, %v4370_v20, 0.0 }
 0x157   : > { %v4884_v30 = vadd.f32 %v4883_v24, %v4882_v1  ;;  %7416 = vmatmul.msk.bf16.gmra.mxu2 %vm2310_vm2, %v2150_v27  ;;  %v2028_v1 = vpack.c.bf16 %v1527_v57, %v1526_v61  ;;  %v1917_v24 = vmax.f32 %v1405_v18, 0.0  ;;  %v1017_v27 = vadd.f32 %v8705_v4, %v8577_v46 }
 0x158   : > { %v1648_v61 = vmax.f32 %v1136_v45, 0.0  ;;  %v8836_v18 = vperm.slane %v825_v9, 0 }
 0x159   : > { %v3095_v33 = vpop.f32.mrf.mxu0  ;;  %v2223_v38 = vpack.c.bf16 %v1917_v24, %v1916_v22  ;;  %v1529_v44 = vmax.f32 %v1017_v27, 0.0 }
 0x15a   : > { %v3096_v34 = vadd.f32 %v8727_v26, %v3095_v33  ;;  %v8769_v54 = vpop.f32.mrf.mxu2  ;;  %v1016_v33 = vadd.f32 %v8705_v4, %v8575_v43  ;;  %v1138_v42 = vadd.f32 %v8836_v18, %v8481_v35 }
 0x15b   : > { %12678 = vst [vmem:[#allocation14_spill] sm:$0xff] %v8769_v54 }
 0x15c   : > { %v4371_v41 = vmax.f32 %v3096_v34, 0.0  ;;  %v1528_v4 = vmax.f32 %v1016_v33, 0.0 }
 0x15e   : > { %v4885_v48 = vsel %vm2310_vm2, %v4371_v41, 0.0 }
 0x15f   : > { %v4886_v55 = vadd.f32 %v4885_v48, %v4884_v30  ;;  %7488 = vmatmul.msk.bf16.gmra.mxu3 %vm2310_vm2, %v2222_v49  ;;  %v1262_v48 = vadd.f32 %v8738_v56, %v8532_v6 }
 0x161   : > { %v3098_v59 = vpop.f32.mrf.mxu0  ;;  %v8788_v11 = vpop.f32.mrf.mxu1 }
 0x162   : > { %v3099_v13 = vadd.f32 %v8727_v26, %v3098_v59  ;;  %v8786_v0 = vpop.f32.mrf.mxu2  ;;  %v2029_v59 = vpack.c.bf16 %v1529_v44, %v1528_v4  ;;  %v1265_v44 = vadd.f32 %v8738_v56, %v8577_v46 }
 0x163   : > { %12679 = vst [vmem:[#allocation15_spill] sm:$0xff] %v8786_v0 }
 0x164   : > { %v4372_v3 = vmax.f32 %v3099_v13, 0.0  ;;  %7294 = vmatmul.msk.bf16.gmra.mxu0 %vm2310_vm2, %v2028_v1  ;;  %7354 = vmatmul.msk.bf16.gmra.mxu1 %vm2310_vm2, %v2088_v39  ;;  %v1774_v13 = vmax.f32 %v1262_v48, 0.0  ;;  %v2089_v1 = vpack.c.bf16 %v1649_v52, %v1648_v61  ;;  %v1777_v61 = vmax.f32 %v1265_v44, 0.0 }
 0x166   : > { %v4887_v16 = vsel %vm2310_vm2, %v4372_v3, 0.0  ;;  %v2152_v3 = vpack.c.bf16 %v1775_v53, %v1774_v13 }
 0x167   : > { %v4888_v19 = vadd.f32 %v4887_v16, %v4886_v55  ;;  %7417 = vmatmul.msk.bf16.gmra.mxu2 %vm2310_vm2, %v2151_v17  ;;  %v8834_v17 = vperm.slane %v812_v60, 0 }
 0x169   : > { %v3100_v20 = vpop.f32.mrf.mxu0  ;;  %v8803_v30 = vpop.f32.mrf.mxu1 }
 0x16a   : > { %v3101_v21 = vadd.f32 %v8727_v26, %v3100_v20  ;;  %v8799_v25 = vpop.f32.mrf.mxu2  ;;  %v1918_v20 = vmax.f32 %v1406_v14, 0.0 }
 0x16b   : > { %12680 = vst [vmem:[#allocation16_spill] sm:$0xff] %v8799_v25 }
 0x16c   : > { %v4373_v28 = vmax.f32 %v3101_v21, 0.0  ;;  %v1919_v21 = vmax.f32 %v1407_v15, 0.0 }
 0x16e   : > { %v4889_v34 = vsel %vm2310_vm2, %v4373_v28, 0.0  ;;  %v1019_v28 = vadd.f32 %v8834_v17, %v8483_v36  ;;  %v2224_v40 = vpack.c.bf16 %v1919_v21, %v1918_v20  ;;  %v1408_v21 = vadd.f32 %v8757_v32, %v8575_v43 }
 0x16f   : > { %v4890_v41 = vadd.f32 %v4889_v34, %v4888_v19  ;;  %7489 = vmatmul.msk.bf16.gmra.mxu3 %vm2310_vm2, %v2223_v38  ;;  %v1018_v38 = vadd.f32 %v8834_v17, %v8481_v35 }
 0x170   : > { %v1531_v48 = vmax.f32 %v1019_v28, 0.0  ;;  %v1920_v44 = vmax.f32 %v1408_v21, 0.0 }
 0x171   : > { %v3103_v49 = vpop.f32.mrf.mxu0  ;;  %v8824_v63 = vpop.f32.mrf.mxu1  ;;  %v1530_v52 = vmax.f32 %v1018_v38, 0.0 }
 0x172   : > { %v3104_v55 = vadd.f32 %v8727_v26, %v3103_v49  ;;  %v8818_v57 = vpop.f32.mrf.mxu2  ;;  %v8820_v58 = vpop.f32.mrf.mxu3  ;;  %v1264_v49 = vadd.f32 %v8738_v56, %v8575_v43  ;;  %v839_v56 = vrot.slane %v8629_v37, 2 }
 0x173   : > { %12681 = vst [vmem:[#allocation17_spill] sm:$0xff] %v8818_v57 }
 0x174   : > { %12682 = vst [vmem:[#allocation18_spill] sm:$0xff] %v8820_v58  ;;  %v4374_v62 = vmax.f32 %v3104_v55, 0.0  ;;  %7295 = vmatmul.msk.bf16.gmra.mxu0 %vm2310_vm2, %v2029_v59  ;;  %7355 = vmatmul.msk.bf16.gmra.mxu1 %vm2310_vm2, %v2089_v1  ;;  %v1650_v55 = vmax.f32 %v1138_v42, 0.0  ;;  %v1776_v1 = vmax.f32 %v1264_v49, 0.0 }
 0x176   : > { %v4891_v16 = vsel %vm2310_vm2, %v4374_v62, 0.0  ;;  %v2030_v62 = vpack.c.bf16 %v1531_v48, %v1530_v52  ;;  %v1141_v52 = vadd.f32 %v8836_v18, %v8505_v51 }
 0x177   : > { %v4892_v39 = vadd.f32 %v4891_v16, %v4890_v41  ;;  %7418 = vmatmul.msk.bf16.gmra.mxu2 %vm2310_vm2, %v2152_v3  ;;  %v1139_v41 = vadd.f32 %v8836_v18, %v8483_v36  ;;  %v2153_v16 = vpack.c.bf16 %v1777_v61, %v1776_v1 }
 0x179   : > { %v3105_v19 = vpop.f32.mrf.mxu0  ;;  %v8845_v34 = vpop.f32.mrf.mxu1  ;;  %v1651_v59 = vmax.f32 %v1139_v41, 0.0  ;;  %v1021_v41 = vadd.f32 %v8834_v17, %v8505_v51 }
 0x17a   : > { %v3106_v22 = vadd.f32 %v8727_v26, %v3105_v19  ;;  %v8839_v24 = vpop.f32.mrf.mxu2  ;;  %v8841_v27 = vpop.f32.mrf.mxu3 }
 0x17b   : > { %12683 = vst [vmem:[#allocation19_spill] sm:$0xff] %v8839_v24  ;;  %v2090_v15 = vpack.c.bf16 %v1651_v59, %v1650_v55  ;;  %v1533_v61 = vmax.f32 %v1021_v41, 0.0 }
 0x17c   : > { %12684 = vst [vmem:[#allocation20_spill] sm:$0xff] %v8841_v27  ;;  %v4375_v33 = vmax.f32 %v3106_v22, 0.0  ;;  %v8875_v22 = vperm.slane %v839_v56, 0 }
 0x17e   : > { %v4893_v45 = vsel %vm2310_vm2, %v4375_v33, 0.0  ;;  %v1267_v55 = vadd.f32 %v8875_v22, %v8483_v36 }
 0x17f   : > { %v4894_v4 = vadd.f32 %v4893_v45, %v4892_v39  ;;  %7490 = vmatmul.msk.bf16.gmra.mxu3 %vm2310_vm2, %v2224_v40  ;;  %v1409_v39 = vadd.f32 %v8757_v32, %v8577_v46  ;;  %v855_v45 = vrot.slane %v8557_v23, 4  ;;  %v1020_v32 = vadd.f32 %v8834_v17, %v8501_v47 }
 0x181   : > { %v3108_v53 = vpop.f32.mrf.mxu0  ;;  %v8864_v14 = vpop.f32.mrf.mxu1  ;;  %v1921_v33 = vmax.f32 %v1409_v39, 0.0  ;;  %v1532_v1 = vmax.f32 %v1020_v32, 0.0  ;;  %v1779_v39 = vmax.f32 %v1267_v55, 0.0 }
 0x182   : > { %v3109_v13 = vadd.f32 %v8727_v26, %v3108_v53  ;;  %v8860_v60 = vpop.f32.mrf.mxu2  ;;  %v8862_v9 = vpop.f32.mrf.mxu3  ;;  %v1266_v53 = vadd.f32 %v8875_v22, %v8481_v35 }
 0x183   : > { %12685 = vst [vmem:[#allocation21_spill] sm:$0xff] %v8860_v60  ;;  %v2225_v49 = vpack.c.bf16 %v1921_v33, %v1920_v44  ;;  %v2031_v33 = vpack.c.bf16 %v1533_v61, %v1532_v1 }
 0x184   : > { %12686 = vst [vmem:[#allocation22_spill] sm:$0xff] %v8862_v9  ;;  %v4376_v3 = vmax.f32 %v3109_v13, 0.0  ;;  %7296 = vmatmul.msk.bf16.gmra.mxu0 %vm2310_vm2, %v2030_v62  ;;  %7356 = vmatmul.msk.bf16.gmra.mxu1 %vm2310_vm2, %v2090_v15  ;;  %v1140_v62 = vadd.f32 %v8836_v18, %v8501_v47  ;;  %v1653_v15 = vmax.f32 %v1141_v52, 0.0 }
 0x186   : > { %v4895_v19 = vsel %vm2310_vm2, %v4376_v3, 0.0  ;;  %v8899_v3 = vperm.slane %v855_v45, 0 }
 0x187   : > { %v4896_v20 = vadd.f32 %v4895_v19, %v4894_v4  ;;  %7419 = vmatmul.msk.bf16.gmra.mxu2 %vm2310_vm2, %v2153_v16  ;;  %v1778_v16 = vmax.f32 %v1266_v53, 0.0 }
 0x188   : > { %v1411_v32 = vadd.f32 %v8899_v3, %v8483_v36 }
 0x189   : > { %v3110_v28 = vpop.f32.mrf.mxu0  ;;  %v8885_v4 = vpop.f32.mrf.mxu1  ;;  %v2154_v45 = vpack.c.bf16 %v1779_v39, %v1778_v16 }
 0x18a   : > { %v3111_v38 = vadd.f32 %v8727_v26, %v3110_v28  ;;  %v8878_v40 = vpop.f32.mrf.mxu2  ;;  %v8880_v42 = vpop.f32.mrf.mxu3 }
 0x18b   : > { %12687 = vst [vmem:[#allocation23_spill] sm:$0xff] %v8878_v40 }
 0x18c   : > { %12688 = vst [vmem:[#allocation24_spill] sm:$0xff] %v8880_v42  ;;  %v4377_v48 = vmax.f32 %v3111_v38, 0.0 }
 0x18e   : > { %v4897_v59 = vsel %vm2310_vm2, %v4377_v48, 0.0  ;;  %v1410_v48 = vadd.f32 %v8899_v3, %v8481_v35 }
 0x18f   : > { %v4898_v13 = vadd.f32 %v4897_v59, %v4896_v20  ;;  %7491 = vmatmul.msk.bf16.gmra.mxu3 %vm2310_vm2, %v2225_v49  ;;  %v1652_v20 = vmax.f32 %v1140_v62, 0.0  ;;  %v1923_v59 = vmax.f32 %v1411_v32, 0.0 }
 0x190   : > { %v1922_v55 = vmax.f32 %v1410_v48, 0.0  ;;  %v1142_v48 = vadd.f32 %v8836_v18, %v8532_v6 }
 0x191   : > { %v3113_v56 = vpop.f32.mrf.mxu0  ;;  %v8906_v41 = vpop.f32.mrf.mxu1  ;;  %v2091_v44 = vpack.c.bf16 %v1653_v15, %v1652_v20  ;;  %v1269_v20 = vadd.f32 %v8875_v22, %v8505_v51 }
 0x192   : > { %v3114_v19 = vadd.f32 %v8727_v26, %v3113_v56  ;;  %v8902_v21 = vpop.f32.mrf.mxu2  ;;  %v8904_v28 = vpop.f32.mrf.mxu3  ;;  %v1023_v56 = vadd.f32 %v8834_v17, %v8538_v10  ;;  %v2226_v39 = vpack.c.bf16 %v1923_v59, %v1922_v55 }
 0x193   : > { %12689 = vst [vmem:[#allocation25_spill] sm:$0xff] %v8902_v21  ;;  %v1781_v59 = vmax.f32 %v1269_v20, 0.0 }
 0x194   : > { %12690 = vst [vmem:[#allocation26_spill] sm:$0xff] %v8904_v28  ;;  %v4378_v38 = vmax.f32 %v3114_v19, 0.0  ;;  %7297 = vmatmul.msk.bf16.gmra.mxu0 %vm2310_vm2, %v2031_v33  ;;  %7357 = vmatmul.msk.bf16.gmra.mxu1 %vm2310_vm2, %v2091_v44  ;;  %v1143_v19 = vadd.f32 %v8836_v18, %v8538_v10  ;;  %v1268_v33 = vadd.f32 %v8875_v22, %v8501_v47  ;;  %v1535_v44 = vmax.f32 %v1023_v56, 0.0 }
 0x196   : > { %v4899_v49 = vsel %vm2310_vm2, %v4378_v38, 0.0  ;;  %v1780_v55 = vmax.f32 %v1268_v33, 0.0 }
 0x197   : > { %v4900_v52 = vadd.f32 %v4899_v49, %v4898_v13  ;;  %7420 = vmatmul.msk.bf16.gmra.mxu2 %vm2310_vm2, %v2154_v45  ;;  %v1022_v13 = vadd.f32 %v8834_v17, %v8532_v6 }
 0x199   : > { %v3115_v53 = vpop.f32.mrf.mxu0  ;;  %v8923_v16 = vpop.f32.mrf.mxu1  ;;  %v1534_v32 = vmax.f32 %v1022_v13, 0.0  ;;  %v1412_v13 = vadd.f32 %v8899_v3, %v8501_v47 }
 0x19a   : > { %v3116_v61 = vadd.f32 %v8727_v26, %v3115_v53  ;;  %v8917_v62 = vpop.f32.mrf.mxu2  ;;  %v8919_v1 = vpop.f32.mrf.mxu3  ;;  %v1655_v53 = vmax.f32 %v1143_v19, 0.0  ;;  %v1413_v19 = vadd.f32 %v8899_v3, %v8505_v51 }
 0x19b   : > { %12691 = vst [vmem:[#allocation27_spill] sm:$0xff] %v8917_v62  ;;  %v2032_v42 = vpack.c.bf16 %v1535_v44, %v1534_v32 }
 0x19c   : > { %12692 = vst [vmem:[#allocation28_spill] sm:$0xff] %v8919_v1  ;;  %v4379_v15 = vmax.f32 %v3116_v61, 0.0  ;;  %v1925_v32 = vmax.f32 %v1413_v19, 0.0 }
 0x19e   : > { %v4901_v38 = vsel %vm2310_vm2, %v4379_v15, 0.0  ;;  %v1654_v15 = vmax.f32 %v1142_v48, 0.0  ;;  %v1924_v48 = vmax.f32 %v1412_v13, 0.0 }
 0x19f   : > { %v4902_v45 = vadd.f32 %v4901_v38, %v4900_v52  ;;  %7492 = vmatmul.msk.bf16.gmra.mxu3 %vm2310_vm2, %v2226_v39  ;;  %v2155_v38 = vpack.c.bf16 %v1781_v59, %v1780_v55  ;;  %v1025_v55 = vadd.f32 %v8834_v17, %v8577_v46 }
 0x1a0   : > { %v2092_v39 = vpack.c.bf16 %v1655_v53, %v1654_v15  ;;  %v2227_v15 = vpack.c.bf16 %v1925_v32, %v1924_v48 }
 0x1a1   : > { %v3118_v49 = vpop.f32.mrf.mxu0  ;;  %v8942_v52 = vpop.f32.mrf.mxu1  ;;  %v1537_v13 = vmax.f32 %v1025_v55, 0.0 }
 0x1a2   : > { %v3119_v61 = vadd.f32 %v8727_v26, %v3118_v49  ;;  %v8938_v1 = vpop.f32.mrf.mxu2  ;;  %v8940_v28 = vpop.f32.mrf.mxu3 }
 0x1a3   : > { %12693 = vst [vmem:[#allocation29_spill] sm:$0xff] %v8938_v1 }
 0x1a4   : > { %12694 = vst [vmem:[#allocation30_spill] sm:$0xff] %v8940_v28  ;;  %v4380_v56 = vmax.f32 %v3119_v61, 0.0  ;;  %7298 = vmatmul.msk.bf16.gmra.mxu0 %vm2310_vm2, %v2032_v42  ;;  %7358 = vmatmul.msk.bf16.gmra.mxu1 %vm2310_vm2, %v2092_v39  ;;  %v1271_v39 = vadd.f32 %v8875_v22, %v8538_v10 }
 0x1a6   : > { %v4903_v33 = vsel %vm2310_vm2, %v4380_v56, 0.0  ;;  %v1145_v56 = vadd.f32 %v8836_v18, %v8577_v46 }
 0x1a7   : > { %v4904_v20 = vadd.f32 %v4903_v33, %v4902_v45  ;;  %7421 = vmatmul.msk.bf16.gmra.mxu2 %vm2310_vm2, %v2155_v38  ;;  %v1024_v45 = vadd.f32 %v8834_v17, %v8575_v43  ;;  %v1144_v33 = vadd.f32 %v8836_v18, %v8575_v43  ;;  %v826_v18 = vrot.slane %v8598_v5, 3 }
 0x1a8   : > { %v1657_v32 = vmax.f32 %v1145_v56, 0.0 }
 0x1a9   : > { %v3120_v44 = vpop.f32.mrf.mxu0  ;;  %v8959_v61 = vpop.f32.mrf.mxu1  ;;  %v1536_v17 = vmax.f32 %v1024_v45, 0.0 }
 0x1aa   : > { %v3121_v42 = vadd.f32 %v8727_v26, %v3120_v44  ;;  %v8953_v49 = vpop.f32.mrf.mxu2  ;;  %v8955_v53 = vpop.f32.mrf.mxu3  ;;  %v1270_v44 = vadd.f32 %v8875_v22, %v8532_v6 }
 0x1ab   : > { %12695 = vst [vmem:[#allocation31_spill] sm:$0xff] %v8953_v49  ;;  %v2033_v55 = vpack.c.bf16 %v1537_v13, %v1536_v17 }
 0x1ac   : > { %12696 = vst [vmem:[#allocation32_spill] sm:$0xff] %v8955_v53  ;;  %v4381_v59 = vmax.f32 %v3121_v42, 0.0  ;;  %v1783_v42 = vmax.f32 %v1271_v39, 0.0  ;;  %v1414_v39 = vadd.f32 %v8899_v3, %v8532_v6 }
 0x1ae   : > { %v4905_v38 = vsel %vm2310_vm2, %v4381_v59, 0.0  ;;  %v1782_v59 = vmax.f32 %v1270_v44, 0.0  ;;  %v8992_v44 = vperm.slane %v826_v18, 0 }
 0x1af   : > { %v4906_v19 = vadd.f32 %v4905_v38, %v4904_v20  ;;  %7493 = vmatmul.msk.bf16.gmra.mxu3 %vm2310_vm2, %v2227_v15  ;;  %v1656_v20 = vmax.f32 %v1144_v33, 0.0  ;;  %v813_v15 = vrot.slane %v8470_v29, 4 }
 0x1b0   : > { %v2156_v56 = vpack.c.bf16 %v1783_v42, %v1782_v59 }
 0x1b1   : > { %v3123_v48 = vpop.f32.mrf.mxu0  ;;  %v8980_v27 = vpop.f32.mrf.mxu1  ;;  %v2093_v45 = vpack.c.bf16 %v1657_v32, %v1656_v20  ;;  %v1926_v32 = vmax.f32 %v1414_v39, 0.0  ;;  %v1147_v39 = vadd.f32 %v8992_v44, %v8483_v36 }
 0x1b2   : > { %v3124_v53 = vadd.f32 %v8727_v26, %v3123_v48  ;;  %v8974_v28 = vpop.f32.mrf.mxu2  ;;  %v8976_v9 = vpop.f32.mrf.mxu3  ;;  %v1415_v48 = vadd.f32 %v8899_v3, %v8538_v10 }
 0x1b3   : > { %12697 = vst [vmem:[#allocation33_spill] sm:$0xff] %v8974_v28  ;;  %v1659_v58 = vmax.f32 %v1147_v39, 0.0 }
 0x1b4   : > { %12698 = vst [vmem:[#allocation34_spill] sm:$0xff] %v8976_v9  ;;  %v4382_v38 = vmax.f32 %v3124_v53, 0.0  ;;  %7299 = vmatmul.msk.bf16.gmra.mxu0 %vm2310_vm2, %v2033_v55  ;;  %7359 = vmatmul.msk.bf16.gmra.mxu1 %vm2310_vm2, %v2093_v45  ;;  %v8990_v53 = vperm.slane %v813_v15, 0  ;;  %v1927_v42 = vmax.f32 %v1415_v48, 0.0  ;;  %v1273_v48 = vadd.f32 %v8875_v22, %v8577_v46 }
 0x1b6   : > { %v4907_v13 = vsel %vm2310_vm2, %v4382_v38, 0.0  ;;  %v1026_v15 = vadd.f32 %v8990_v53, %v8481_v35  ;;  %v2228_v18 = vpack.c.bf16 %v1927_v42, %v1926_v32 }
 0x1b7   : > { %v4908_v33 = vadd.f32 %v4907_v13, %v4906_v19  ;;  %7422 = vmatmul.msk.bf16.gmra.mxu2 %vm2310_vm2, %v2156_v56  ;;  %v1027_v19 = vadd.f32 %v8990_v53, %v8483_v36  ;;  %v1146_v56 = vadd.f32 %v8992_v44, %v8481_v35 }
 0x1b8   : > { %v1538_v9 = vmax.f32 %v1026_v15, 0.0 }
 0x1b9   : > { %v3125_v17 = vpop.f32.mrf.mxu0  ;;  %v9001_v45 = vpop.f32.mrf.mxu1  ;;  %v1658_v42 = vmax.f32 %v1146_v56, 0.0  ;;  %v1417_v56 = vadd.f32 %v8899_v3, %v8577_v46 }
 0x1ba   : > { %v3126_v55 = vadd.f32 %v8727_v26, %v3125_v17  ;;  %v8995_v20 = vpop.f32.mrf.mxu2  ;;  %v8997_v59 = vpop.f32.mrf.mxu3  ;;  %v1539_v17 = vmax.f32 %v1027_v19, 0.0 }
 0x1bb   : > { %12699 = vst [vmem:[#allocation35_spill] sm:$0xff] %v8995_v20  ;;  %v1785_v20 = vmax.f32 %v1273_v48, 0.0  ;;  %v2094_v15 = vpack.c.bf16 %v1659_v58, %v1658_v42 }
 0x1bc   : > { %12700 = vst [vmem:[#allocation36_spill] sm:$0xff] %v8997_v59  ;;  %v4383_v38 = vmax.f32 %v3126_v55, 0.0  ;;  %v1272_v55 = vadd.f32 %v8875_v22, %v8575_v43  ;;  %v2034_v62 = vpack.c.bf16 %v1539_v17, %v1538_v9  ;;  %v840_v22 = vrot.slane %v8629_v37, 3 }
 0x1bd   : > { %v1416_v9 = vadd.f32 %v8899_v3, %v8575_v43  ;;  %v1028_v3 = vadd.f32 %v8990_v53, %v8501_v47 }
 0x1be   : > { %v4909_v13 = vsel %vm2310_vm2, %v4383_v38, 0.0  ;;  %v1784_v38 = vmax.f32 %v1272_v55, 0.0 }
 0x1bf   : > { %v4910_v59 = vadd.f32 %v4909_v13, %v4908_v33  ;;  %7494 = vmatmul.msk.bf16.gmra.mxu3 %vm2310_vm2, %v2228_v18  ;;  %v1929_v13 = vmax.f32 %v1417_v56, 0.0  ;;  %v1928_v55 = vmax.f32 %v1416_v9, 0.0 }
 0x1c0   : > { %v2157_v18 = vpack.c.bf16 %v1785_v20, %v1784_v38 }
 0x1c1   : > { %v3128_v32 = vpop.f32.mrf.mxu0  ;;  %v9020_v33 = vpop.f32.mrf.mxu1 }
 0x1c2   : > { %v3129_v28 = vadd.f32 %v8727_v26, %v3128_v32  ;;  %v9016_v49 = vpop.f32.mrf.mxu2  ;;  %v9018_v1 = vpop.f32.mrf.mxu3  ;;  %v856_v32 = vrot.slane %v8557_v23, 5 }
 0x1c3   : > { %12701 = vst [vmem:[#allocation37_spill] sm:$0xff] %v9016_v49 }
 0x1c4   : > { %12702 = vst [vmem:[#allocation38_spill] sm:$0xff] %v9018_v1  ;;  %v4384_v19 = vmax.f32 %v3129_v28, 0.0  ;;  %7300 = vmatmul.msk.bf16.gmra.mxu0 %vm2310_vm2, %v2034_v62  ;;  %7360 = vmatmul.msk.bf16.gmra.mxu1 %vm2310_vm2, %v2094_v15  ;;  %v9031_v28 = vperm.slane %v840_v22, 0  ;;  %v1149_v22 = vadd.f32 %v8992_v44, %v8505_v51 }
 0x1c6   : > { %v4911_v39 = vsel %vm2310_vm2, %v4384_v19, 0.0  ;;  %v2229_v19 = vpack.c.bf16 %v1929_v13, %v1928_v55  ;;  %v1274_v15 = vadd.f32 %v9031_v28, %v8481_v35  ;;  %v9055_v13 = vperm.slane %v856_v32, 0 }
 0x1c7   : > { %v4912_v48 = vadd.f32 %v4911_v39, %v4910_v59  ;;  %7423 = vmatmul.msk.bf16.gmra.mxu2 %vm2310_vm2, %v2157_v18  ;;  %v1029_v59 = vadd.f32 %v8990_v53, %v8505_v51  ;;  %v1275_v18 = vadd.f32 %v9031_v28, %v8483_v36 }
 0x1c8   : > { %v1786_v1 = vmax.f32 %v1274_v15, 0.0  ;;  %v1419_v15 = vadd.f32 %v9055_v13, %v8483_v36 }
 0x1c9   : > { %v3130_v62 = vpop.f32.mrf.mxu0  ;;  %v9041_v38 = vpop.f32.mrf.mxu1  ;;  %v1541_v39 = vmax.f32 %v1029_v59, 0.0 }
 0x1ca   : > { %v3131_v58 = vadd.f32 %v8727_v26, %v3130_v62  ;;  %v9034_v20 = vpop.f32.mrf.mxu2  ;;  %v9036_v17 = vpop.f32.mrf.mxu3  ;;  %v1148_v62 = vadd.f32 %v8992_v44, %v8501_v47 }
 0x1cb   : > { %12703 = vst [vmem:[#allocation39_spill] sm:$0xff] %v9034_v20  ;;  %v1787_v20 = vmax.f32 %v1275_v18, 0.0 }
 0x1cc   : > { %12704 = vst [vmem:[#allocation40_spill] sm:$0xff] %v9036_v17  ;;  %v4385_v42 = vmax.f32 %v3131_v58, 0.0  ;;  %v1540_v58 = vmax.f32 %v1028_v3, 0.0  ;;  %v1661_v17 = vmax.f32 %v1149_v22, 0.0  ;;  %v1418_v22 = vadd.f32 %v9055_v13, %v8481_v35 }
 0x1cd   : > { %v2158_v32 = vpack.c.bf16 %v1787_v20, %v1786_v1  ;;  %v1031_v20 = vadd.f32 %v8990_v53, %v8538_v10 }
 0x1ce   : > { %v4913_v56 = vsel %vm2310_vm2, %v4385_v42, 0.0  ;;  %v2035_v59 = vpack.c.bf16 %v1541_v39, %v1540_v58  ;;  %v1930_v39 = vmax.f32 %v1418_v22, 0.0 }
 0x1cf   : > { %v4914_v9 = vadd.f32 %v4913_v56, %v4912_v48  ;;  %7495 = vmatmul.msk.bf16.gmra.mxu3 %vm2310_vm2, %v2229_v19  ;;  %v1660_v48 = vmax.f32 %v1148_v62, 0.0  ;;  %v1931_v62 = vmax.f32 %v1419_v15, 0.0  ;;  %v1543_v15 = vmax.f32 %v1031_v20, 0.0 }
 0x1d1   : > { %v3133_v55 = vpop.f32.mrf.mxu0  ;;  %v9062_v19 = vpop.f32.mrf.mxu1  ;;  %v2095_v3 = vpack.c.bf16 %v1661_v17, %v1660_v48  ;;  %v2230_v48 = vpack.c.bf16 %v1931_v62, %v1930_v39 }
 0x1d2   : > { %v3134_v49 = vadd.f32 %v8727_v26, %v3133_v55  ;;  %v9058_v21 = vpop.f32.mrf.mxu2  ;;  %v9060_v40 = vpop.f32.mrf.mxu3 }
 0x1d3   : > { %12705 = vst [vmem:[#allocation41_spill] sm:$0xff] %v9058_v21 }
 0x1d4   : > { %12706 = vst [vmem:[#allocation42_spill] sm:$0xff] %v9060_v40  ;;  %v4386_v42 = vmax.f32 %v3134_v49, 0.0  ;;  %7301 = vmatmul.msk.bf16.gmra.mxu0 %vm2310_vm2, %v2035_v59  ;;  %7361 = vmatmul.msk.bf16.gmra.mxu1 %vm2310_vm2, %v2095_v3  ;;  %v1276_v3 = vadd.f32 %v9031_v28, %v8501_v47 }
 0x1d6   : > { %v4915_v18 = vsel %vm2310_vm2, %v4386_v42, 0.0  ;;  %v1151_v42 = vadd.f32 %v8992_v44, %v8538_v10 }
 0x1d7   : > { %v4916_v56 = vadd.f32 %v4915_v18, %v4914_v9  ;;  %7424 = vmatmul.msk.bf16.gmra.mxu2 %vm2310_vm2, %v2158_v32  ;;  %v1030_v9 = vadd.f32 %v8990_v53, %v8532_v6  ;;  %v1277_v32 = vadd.f32 %v9031_v28, %v8505_v51 }
 0x1d8   : > { %v1663_v62 = vmax.f32 %v1151_v42, 0.0  ;;  %v1421_v42 = vadd.f32 %v9055_v13, %v8505_v51 }
 0x1d9   : > { %v3135_v49 = vpop.f32.mrf.mxu0  ;;  %v9079_v59 = vpop.f32.mrf.mxu1  ;;  %v1789_v40 = vmax.f32 %v1277_v32, 0.0 }
 0x1da   : > { %v3136_v58 = vadd.f32 %v8727_v26, %v3135_v49  ;;  %v9073_v17 = vpop.f32.mrf.mxu2  ;;  %v9075_v1 = vpop.f32.mrf.mxu3  ;;  %v1150_v49 = vadd.f32 %v8992_v44, %v8532_v6 }
 0x1db   : > { %12707 = vst [vmem:[#allocation43_spill] sm:$0xff] %v9073_v17 }
 0x1dc   : > { %12708 = vst [vmem:[#allocation44_spill] sm:$0xff] %v9075_v1  ;;  %v4387_v55 = vmax.f32 %v3136_v58, 0.0  ;;  %v1542_v58 = vmax.f32 %v1030_v9, 0.0  ;;  %v1788_v1 = vmax.f32 %v1276_v3, 0.0  ;;  %v1420_v9 = vadd.f32 %v9055_v13, %v8501_v47 }
 0x1de   : > { %v4917_v22 = vsel %vm2310_vm2, %v4387_v55, 0.0  ;;  %v2036_v24 = vpack.c.bf16 %v1543_v15, %v1542_v58  ;;  %v1662_v55 = vmax.f32 %v1150_v49, 0.0  ;;  %v1932_v15 = vmax.f32 %v1420_v9, 0.0 }
 0x1df   : > { %v4918_v18 = vadd.f32 %v4917_v22, %v4916_v56  ;;  %7496 = vmatmul.msk.bf16.gmra.mxu3 %vm2310_vm2, %v2230_v48  ;;  %v2159_v22 = vpack.c.bf16 %v1789_v40, %v1788_v1  ;;  %v1933_v49 = vmax.f32 %v1421_v42, 0.0  ;;  %v1033_v1 = vadd.f32 %v8990_v53, %v8577_v46 }
 0x1e0   : > { %v2096_v48 = vpack.c.bf16 %v1663_v62, %v1662_v55 }
 0x1e1   : > { %v3138_v39 = vpop.f32.mrf.mxu0  ;;  %v9098_v56 = vpop.f32.mrf.mxu1  ;;  %v2231_v55 = vpack.c.bf16 %v1933_v49, %v1932_v15  ;;  %v1545_v9 = vmax.f32 %v1033_v1, 0.0 }
 0x1e2   : > { %v3139_v17 = vadd.f32 %v8727_v26, %v3138_v39  ;;  %v9094_v21 = vpop.f32.mrf.mxu2  ;;  %v9096_v60 = vpop.f32.mrf.mxu3 }
 0x1e3   : > { %12709 = vst [vmem:[#allocation45_spill] sm:$0xff] %v9094_v21 }
 0x1e4   : > { %12710 = vst [vmem:[#allocation46_spill] sm:$0xff] %v9096_v60  ;;  %v4388_v20 = vmax.f32 %v3139_v17, 0.0  ;;  %7302 = vmatmul.msk.bf16.gmra.mxu0 %vm2310_vm2, %v2036_v24  ;;  %7362 = vmatmul.msk.bf16.gmra.mxu1 %vm2310_vm2, %v2096_v48  ;;  %v1279_v48 = vadd.f32 %v9031_v28, %v8538_v10 }
 0x1e6   : > { %v4919_v3 = vsel %vm2310_vm2, %v4388_v20, 0.0  ;;  %v1153_v20 = vadd.f32 %v8992_v44, %v8577_v46 }
 0x1e7   : > { %v4920_v32 = vadd.f32 %v4919_v3, %v4918_v18  ;;  %7425 = vmatmul.msk.bf16.gmra.mxu2 %vm2310_vm2, %v2159_v22  ;;  %v1032_v18 = vadd.f32 %v8990_v53, %v8575_v43  ;;  %v1152_v3 = vadd.f32 %v8992_v44, %v8575_v43  ;;  %v827_v44 = vrot.slane %v8598_v5, 4 }
 0x1e8   : > { %v1665_v49 = vmax.f32 %v1153_v20, 0.0 }
 0x1e9   : > { %v3140_v17 = vpop.f32.mrf.mxu0  ;;  %v9115_v62 = vpop.f32.mrf.mxu1  ;;  %v1544_v53 = vmax.f32 %v1032_v18, 0.0 }
 0x1ea   : > { %v3141_v24 = vadd.f32 %v8727_v26, %v3140_v17  ;;  %v9109_v58 = vpop.f32.mrf.mxu2  ;;  %v9111_v40 = vpop.f32.mrf.mxu3  ;;  %v1278_v17 = vadd.f32 %v9031_v28, %v8532_v6 }
 0x1eb   : > { %12711 = vst [vmem:[#allocation47_spill] sm:$0xff] %v9109_v58  ;;  %v2037_v1 = vpack.c.bf16 %v1545_v9, %v1544_v53 }
 0x1ec   : > { %12712 = vst [vmem:[#allocation48_spill] sm:$0xff] %v9111_v40  ;;  %v4389_v39 = vmax.f32 %v3141_v24, 0.0  ;;  %v1791_v24 = vmax.f32 %v1279_v48, 0.0  ;;  %v1422_v48 = vadd.f32 %v9055_v13, %v8532_v6 }
 0x1ee   : > { %v4921_v22 = vsel %vm2310_vm2, %v4389_v39, 0.0  ;;  %v1790_v39 = vmax.f32 %v1278_v17, 0.0  ;;  %v9148_v17 = vperm.slane %v827_v44, 0 }
 0x1ef   : > { %v4922_v42 = vadd.f32 %v4921_v22, %v4920_v32  ;;  %7497 = vmatmul.msk.bf16.gmra.mxu3 %vm2310_vm2, %v2231_v55  ;;  %v1664_v32 = vmax.f32 %v1152_v3, 0.0  ;;  %v814_v55 = vrot.slane %v8470_v29, 5 }
 0x1f0   : > { %v2160_v20 = vpack.c.bf16 %v1791_v24, %v1790_v39 }
 0x1f1   : > { %v3143_v15 = vpop.f32.mrf.mxu0  ;;  %v9136_v21 = vpop.f32.mrf.mxu1  ;;  %v2097_v18 = vpack.c.bf16 %v1665_v49, %v1664_v32  ;;  %v1934_v49 = vmax.f32 %v1422_v48, 0.0  ;;  %v1155_v48 = vadd.f32 %v9148_v17, %v8483_v36 }
 0x1f2   : > { %v3144_v40 = vadd.f32 %v8727_v26, %v3143_v15  ;;  %v9130_v60 = vpop.f32.mrf.mxu2  ;;  %v9132_v58 = vpop.f32.mrf.mxu3  ;;  %v1423_v15 = vadd.f32 %v9055_v13, %v8538_v10 }
 0x1f3   : > { %12713 = vst [vmem:[#allocation49_spill] sm:$0xff] %v9130_v60 }
 0x1f4   : > { %12714 = vst [vmem:[#allocation50_spill] sm:$0xff] %v9132_v58  ;;  %v4390_v22 = vmax.f32 %v3144_v40, 0.0  ;;  %7303 = vmatmul.msk.bf16.gmra.mxu0 %vm2310_vm2, %v2037_v1  ;;  %7363 = vmatmul.msk.bf16.gmra.mxu1 %vm2310_vm2, %v2097_v18  ;;  %v9146_v40 = vperm.slane %v814_v55, 0  ;;  %v1935_v24 = vmax.f32 %v1423_v15, 0.0  ;;  %v1281_v15 = vadd.f32 %v9031_v28, %v8577_v46 }
 0x1f6   : > { %v4923_v9 = vsel %vm2310_vm2, %v4390_v22, 0.0  ;;  %v1034_v55 = vadd.f32 %v9146_v40, %v8481_v35  ;;  %v2232_v44 = vpack.c.bf16 %v1935_v24, %v1934_v49  ;;  %v1793_v60 = vmax.f32 %v1281_v15, 0.0 }
 0x1f7   : > { %v4924_v3 = vadd.f32 %v4923_v9, %v4922_v42  ;;  %7426 = vmatmul.msk.bf16.gmra.mxu2 %vm2310_vm2, %v2160_v20  ;;  %v1035_v42 = vadd.f32 %v9146_v40, %v8483_v36  ;;  %v1154_v20 = vadd.f32 %v9148_v17, %v8481_v35 }
 0x1f8   : > { %v1546_v58 = vmax.f32 %v1034_v55, 0.0 }
 0x1f9   : > { %v3145_v53 = vpop.f32.mrf.mxu0  ;;  %v9157_v18 = vpop.f32.mrf.mxu1  ;;  %v1666_v24 = vmax.f32 %v1154_v20, 0.0  ;;  %v1425_v20 = vadd.f32 %v9055_v13, %v8577_v46 }
 0x1fa   : > { %v3146_v1 = vadd.f32 %v8727_v26, %v3145_v53  ;;  %v9151_v32 = vpop.f32.mrf.mxu2  ;;  %v9153_v39 = vpop.f32.mrf.mxu3  ;;  %v1547_v53 = vmax.f32 %v1035_v42, 0.0 }
 0x1fb   : > { %12715 = vst [vmem:[#allocation51_spill] sm:$0xff] %v9151_v32  ;;  %v1667_v32 = vmax.f32 %v1155_v48, 0.0  ;;  %v1937_v15 = vmax.f32 %v1425_v20, 0.0 }
 0x1fc   : > { %12716 = vst [vmem:[#allocation52_spill] sm:$0xff] %v9153_v39  ;;  %v4391_v22 = vmax.f32 %v3146_v1, 0.0  ;;  %v1280_v1 = vadd.f32 %v9031_v28, %v8575_v43  ;;  %v2038_v54 = vpack.c.bf16 %v1547_v53, %v1546_v58  ;;  %v841_v28 = vrot.slane %v8629_v37, 4 }
 0x1fd   : > { %v2098_v55 = vpack.c.bf16 %v1667_v32, %v1666_v24  ;;  %v1037_v53 = vadd.f32 %v9146_v40, %v8505_v51 }
 0x1fe   : > { %v4925_v9 = vsel %vm2310_vm2, %v4391_v22, 0.0  ;;  %v1792_v22 = vmax.f32 %v1280_v1, 0.0  ;;  %v9187_v58 = vperm.slane %v841_v28, 0  ;;  %v1157_v28 = vadd.f32 %v9148_v17, %v8505_v51 }
 0x1ff   : > { %v4926_v39 = vadd.f32 %v4925_v9, %v4924_v3  ;;  %7498 = vmatmul.msk.bf16.gmra.mxu3 %vm2310_vm2, %v2232_v44 }
 0x200   : > { %v2161_v44 = vpack.c.bf16 %v1793_v60, %v1792_v22  ;;  %v9192_v60 = vld [vmem:[%s12677_s7] ss:$0 sm:$0xff]  ;;  %v1036_v22 = vadd.f32 %v9146_v40, %v8501_v47 }
 0x201   : > { %v3148_v49 = vpop.f32.mrf.mxu0  ;;  %v9176_v3 = vpop.f32.mrf.mxu1 }
 0x202   : > { %v3149_v57 = vadd.f32 %v8727_v26, %v3148_v49  ;;  %v9172_v25 = vpop.f32.mrf.mxu2  ;;  %v9174_v0 = vpop.f32.mrf.mxu3 }
 0x203   : > { %12717 = vst [vmem:[#allocation53_spill] sm:$0xff] %v9172_v25 }
 0x204   : > { %12718 = vst [vmem:[#allocation54_spill] sm:$0xff] %v9174_v0  ;;  %v4392_v42 = vmax.f32 %v3149_v57, 0.0  ;;  %7304 = vmatmul.msk.bf16.gmra.mxu0 %vm2310_vm2, %v2038_v54  ;;  %7364 = vmatmul.msk.bf16.gmra.mxu1 %vm2310_vm2, %v2098_v55  ;;  %v1424_v57 = vadd.f32 %v9055_v13, %v8575_v43  ;;  %v857_v13 = vrot.slane %v8557_v23, 6  ;;  %v1282_v55 = vadd.f32 %v9187_v58, %v8481_v35 }
 0x206   : > { %v4927_v26 = vsel %vm2310_vm2, %v4392_v42, 0.0  ;;  %v1936_v1 = vmax.f32 %v1424_v57, 0.0  ;;  %v1794_v0 = vmax.f32 %v1282_v55, 0.0 }
 0x207   : > { %v4928_v48 = vadd.f32 %v4927_v26, %v4926_v39  ;;  %7427 = vmatmul.msk.bf16.gmra.mxu2 %vm2310_vm2, %v2161_v44  ;;  %v1283_v44 = vadd.f32 %v9187_v58, %v8483_v36  ;;  %v1549_v26 = vmax.f32 %v1037_v53, 0.0 }
 0x208   : > { %v2233_v42 = vpack.c.bf16 %v1937_v15, %v1936_v1  ;;  %v9216_v15 = vperm.slane %v857_v13, 0 }
 0x209   : > { %v3150_v54 = vpop.f32.mrf.mxu0  ;;  %v9202_v24 = vpop.f32.mrf.mxu1 }
 0x20a   : > { %v3151_v32 = vadd.f32 %v9192_v60, %v3150_v54  ;;  %v9195_v9 = vpop.f32.mrf.mxu2  ;;  %v9197_v39 = vpop.f32.mrf.mxu3  ;;  %12721 = vst [vmem:[#allocation57_spill] sm:$0xff] %v9202_v24  ;;  %v1156_v54 = vadd.f32 %v9148_v17, %v8501_v47  ;;  %v1427_v55 = vadd.f32 %v9216_v15, %v8483_v36 }
 0x20b   : > { %12719 = vst [vmem:[#allocation55_spill] sm:$0xff] %v9195_v9  ;;  %v1795_v9 = vmax.f32 %v1283_v44, 0.0 }
 0x20c   : > { %12720 = vst [vmem:[#allocation56_spill] sm:$0xff] %v9197_v39  ;;  %v4393_v49 = vmax.f32 %v3151_v32, 0.0  ;;  %v1548_v32 = vmax.f32 %v1036_v22, 0.0  ;;  %v1669_v39 = vmax.f32 %v1157_v28, 0.0  ;;  %v1426_v28 = vadd.f32 %v9216_v15, %v8481_v35 }
 0x20d   : > { %v2162_v13 = vpack.c.bf16 %v1795_v9, %v1794_v0  ;;  %v1039_v9 = vadd.f32 %v9146_v40, %v8538_v10 }
 0x20e   : > { %v4929_v20 = vsel %vm2310_vm2, %v4393_v49, 0.0  ;;  %v2039_v53 = vpack.c.bf16 %v1549_v26, %v1548_v32  ;;  %v1938_v26 = vmax.f32 %v1426_v28, 0.0 }
 0x20f   : > { %v4930_v57 = vadd.f32 %v4929_v20, %v4928_v48  ;;  %7499 = vmatmul.msk.bf16.gmra.mxu3 %vm2310_vm2, %v2233_v42  ;;  %v1668_v48 = vmax.f32 %v1156_v54, 0.0  ;;  %v1939_v54 = vmax.f32 %v1427_v55, 0.0  ;;  %v1551_v55 = vmax.f32 %v1039_v9, 0.0 }
 0x211   : > { %v3153_v1 = vpop.f32.mrf.mxu0  ;;  %v9223_v42 = vpop.f32.mrf.mxu1  ;;  %v2099_v22 = vpack.c.bf16 %v1669_v39, %v1668_v48  ;;  %v2234_v48 = vpack.c.bf16 %v1939_v54, %v1938_v26 }
 0x212   : > { %v3154_v25 = vadd.f32 %v9192_v60, %v3153_v1  ;;  %v9219_v31 = vpop.f32.mrf.mxu2  ;;  %v9221_v24 = vpop.f32.mrf.mxu3  ;;  %12724 = vst [vmem:[#allocation60_spill] sm:$0xff] %v9223_v42 }
 0x213   : > { %12722 = vst [vmem:[#allocation58_spill] sm:$0xff] %v9219_v31 }
 0x214   : > { %12723 = vst [vmem:[#allocation59_spill] sm:$0xff] %v9221_v24  ;;  %v4394_v49 = vmax.f32 %v3154_v25, 0.0  ;;  %7305 = vmatmul.msk.bf16.gmra.mxu0 %vm2310_vm2, %v2039_v53  ;;  %7365 = vmatmul.msk.bf16.gmra.mxu1 %vm2310_vm2, %v2099_v22  ;;  %v1284_v22 = vadd.f32 %v9187_v58, %v8501_v47 }
 0x216   : > { %v4931_v44 = vsel %vm2310_vm2, %v4394_v49, 0.0  ;;  %v1159_v49 = vadd.f32 %v9148_v17, %v8538_v10 }
 0x217   : > { %v4932_v20 = vadd.f32 %v4931_v44, %v4930_v57  ;;  %7428 = vmatmul.msk.bf16.gmra.mxu2 %vm2310_vm2, %v2162_v13  ;;  %v1038_v57 = vadd.f32 %v9146_v40, %v8532_v6  ;;  %v1285_v13 = vadd.f32 %v9187_v58, %v8505_v51 }
 0x218   : > { %v1671_v54 = vmax.f32 %v1159_v49, 0.0  ;;  %v1429_v49 = vadd.f32 %v9216_v15, %v8505_v51 }
 0x219   : > { %v3155_v25 = vpop.f32.mrf.mxu0  ;;  %v9240_v53 = vpop.f32.mrf.mxu1  ;;  %v1797_v24 = vmax.f32 %v1285_v13, 0.0 }
 0x21a   : > { %v3156_v32 = vadd.f32 %v9192_v60, %v3155_v25  ;;  %v9234_v39 = vpop.f32.mrf.mxu2  ;;  %v9236_v0 = vpop.f32.mrf.mxu3  ;;  %12727 = vst [vmem:[#allocation63_spill] sm:$0xff] %v9240_v53  ;;  %v1158_v25 = vadd.f32 %v9148_v17, %v8532_v6 }
 0x21b   : > { %12725 = vst [vmem:[#allocation61_spill] sm:$0xff] %v9234_v39 }
 0x21c   : > { %12726 = vst [vmem:[#allocation62_spill] sm:$0xff] %v9236_v0  ;;  %v4395_v1 = vmax.f32 %v3156_v32, 0.0  ;;  %v1550_v32 = vmax.f32 %v1038_v57, 0.0  ;;  %v1796_v0 = vmax.f32 %v1284_v22, 0.0  ;;  %v1428_v57 = vadd.f32 %v9216_v15, %v8501_v47 }
 0x21e   : > { %v4933_v28 = vsel %vm2310_vm2, %v4395_v1, 0.0  ;;  %v2040_v42 = vpack.c.bf16 %v1551_v55, %v1550_v32  ;;  %v1670_v1 = vmax.f32 %v1158_v25, 0.0  ;;  %v1940_v55 = vmax.f32 %v1428_v57, 0.0 }
 0x21f   : > { %v4934_v44 = vadd.f32 %v4933_v28, %v4932_v20  ;;  %7500 = vmatmul.msk.bf16.gmra.mxu3 %vm2310_vm2, %v2234_v48  ;;  %v2163_v28 = vpack.c.bf16 %v1797_v24, %v1796_v0  ;;  %v1941_v25 = vmax.f32 %v1429_v49, 0.0  ;;  %v1041_v0 = vadd.f32 %v9146_v40, %v8577_v46 }
 0x220   : > { %v2100_v48 = vpack.c.bf16 %v1671_v54, %v1670_v1 }
 0x221   : > { %v3158_v26 = vpop.f32.mrf.mxu0  ;;  %v9259_v20 = vpop.f32.mrf.mxu1  ;;  %v2235_v1 = vpack.c.bf16 %v1941_v25, %v1940_v55  ;;  %v1553_v57 = vmax.f32 %v1041_v0, 0.0 }
 0x222   : > { %v3159_v39 = vadd.f32 %v9192_v60, %v3158_v26  ;;  %v9255_v31 = vpop.f32.mrf.mxu2  ;;  %v9257_v53 = vpop.f32.mrf.mxu3  ;;  %12730 = vst [vmem:[#allocation66_spill] sm:$0xff] %v9259_v20 }
 0x223   : > { %12728 = vst [vmem:[#allocation64_spill] sm:$0xff] %v9255_v31 }
 0x224   : > { %12729 = vst [vmem:[#allocation65_spill] sm:$0xff] %v9257_v53  ;;  %v4396_v9 = vmax.f32 %v3159_v39, 0.0  ;;  %7306 = vmatmul.msk.bf16.gmra.mxu0 %vm2310_vm2, %v2040_v42  ;;  %7366 = vmatmul.msk.bf16.gmra.mxu1 %vm2310_vm2, %v2100_v48  ;;  %v1287_v48 = vadd.f32 %v9187_v58, %v8538_v10 }
 0x226   : > { %v4935_v22 = vsel %vm2310_vm2, %v4396_v9, 0.0  ;;  %v1161_v9 = vadd.f32 %v9148_v17, %v8577_v46 }
 0x227   : > { %v4936_v13 = vadd.f32 %v4935_v22, %v4934_v44  ;;  %7429 = vmatmul.msk.bf16.gmra.mxu2 %vm2310_vm2, %v2163_v28  ;;  %v1040_v44 = vadd.f32 %v9146_v40, %v8575_v43  ;;  %v1160_v22 = vadd.f32 %v9148_v17, %v8575_v43  ;;  %v828_v17 = vrot.slane %v8598_v5, 5 }
 0x228   : > { %v1673_v25 = vmax.f32 %v1161_v9, 0.0 }
 0x229   : > { %v3160_v39 = vpop.f32.mrf.mxu0  ;;  %v9276_v54 = vpop.f32.mrf.mxu1  ;;  %v1552_v40 = vmax.f32 %v1040_v44, 0.0 }
 0x22a   : > { %v3161_v42 = vadd.f32 %v9192_v60, %v3160_v39  ;;  %v9270_v32 = vpop.f32.mrf.mxu2  ;;  %v9272_v24 = vpop.f32.mrf.mxu3  ;;  %12733 = vst [vmem:[#allocation69_spill] sm:$0xff] %v9276_v54  ;;  %v1286_v39 = vadd.f32 %v9187_v58, %v8532_v6 }
 0x22b   : > { %12731 = vst [vmem:[#allocation67_spill] sm:$0xff] %v9270_v32  ;;  %v2041_v0 = vpack.c.bf16 %v1553_v57, %v1552_v40 }
 0x22c   : > { %12732 = vst [vmem:[#allocation68_spill] sm:$0xff] %v9272_v24  ;;  %v4397_v26 = vmax.f32 %v3161_v42, 0.0  ;;  %v1799_v42 = vmax.f32 %v1287_v48, 0.0  ;;  %v1430_v48 = vadd.f32 %v9216_v15, %v8532_v6 }
 0x22e   : > { %v4937_v28 = vsel %vm2310_vm2, %v4397_v26, 0.0  ;;  %v1798_v26 = vmax.f32 %v1286_v39, 0.0  ;;  %v9309_v39 = vperm.slane %v828_v17, 0 }
 0x22f   : > { %v4938_v49 = vadd.f32 %v4937_v28, %v4936_v13  ;;  %7501 = vmatmul.msk.bf16.gmra.mxu3 %vm2310_vm2, %v2235_v1  ;;  %v1672_v13 = vmax.f32 %v1160_v22, 0.0  ;;  %v815_v1 = vrot.slane %v8470_v29, 6 }
 0x230   : > { %v2164_v9 = vpack.c.bf16 %v1799_v42, %v1798_v26 }
 0x231   : > { %v3163_v55 = vpop.f32.mrf.mxu0  ;;  %v9297_v31 = vpop.f32.mrf.mxu1  ;;  %v2101_v44 = vpack.c.bf16 %v1673_v25, %v1672_v13  ;;  %v1942_v25 = vmax.f32 %v1430_v48, 0.0  ;;  %v1163_v48 = vadd.f32 %v9309_v39, %v8483_v36 }
 0x232   : > { %v3164_v24 = vadd.f32 %v9192_v60, %v3163_v55  ;;  %v9291_v53 = vpop.f32.mrf.mxu2  ;;  %v9293_v32 = vpop.f32.mrf.mxu3  ;;  %12736 = vst [vmem:[#allocation72_spill] sm:$0xff] %v9297_v31  ;;  %v1431_v55 = vadd.f32 %v9216_v15, %v8538_v10 }
 0x233   : > { %12734 = vst [vmem:[#allocation70_spill] sm:$0xff] %v9291_v53 }
 0x234   : > { %12735 = vst [vmem:[#allocation71_spill] sm:$0xff] %v9293_v32  ;;  %v4398_v28 = vmax.f32 %v3164_v24, 0.0  ;;  %7307 = vmatmul.msk.bf16.gmra.mxu0 %vm2310_vm2, %v2041_v0  ;;  %7367 = vmatmul.msk.bf16.gmra.mxu1 %vm2310_vm2, %v2101_v44  ;;  %v9307_v24 = vperm.slane %v815_v1, 0  ;;  %v1943_v42 = vmax.f32 %v1431_v55, 0.0  ;;  %v1289_v55 = vadd.f32 %v9187_v58, %v8577_v46 }
 0x236   : > { %v4939_v57 = vsel %vm2310_vm2, %v4398_v28, 0.0  ;;  %v1042_v1 = vadd.f32 %v9307_v24, %v8481_v35  ;;  %v2236_v17 = vpack.c.bf16 %v1943_v42, %v1942_v25  ;;  %v1801_v53 = vmax.f32 %v1289_v55, 0.0 }
 0x237   : > { %v4940_v22 = vadd.f32 %v4939_v57, %v4938_v49  ;;  %7430 = vmatmul.msk.bf16.gmra.mxu2 %vm2310_vm2, %v2164_v9  ;;  %v1043_v49 = vadd.f32 %v9307_v24, %v8483_v36  ;;  %v1162_v9 = vadd.f32 %v9309_v39, %v8481_v35 }
 0x238   : > { %v1554_v32 = vmax.f32 %v1042_v1, 0.0 }
 0x239   : > { %v3165_v40 = vpop.f32.mrf.mxu0  ;;  %v9318_v44 = vpop.f32.mrf.mxu1  ;;  %v1674_v42 = vmax.f32 %v1162_v9, 0.0  ;;  %v1433_v9 = vadd.f32 %v9216_v15, %v8577_v46 }
 0x23a   : > { %v3166_v0 = vadd.f32 %v9192_v60, %v3165_v40  ;;  %v9312_v13 = vpop.f32.mrf.mxu2  ;;  %v9314_v26 = vpop.f32.mrf.mxu3  ;;  %12739 = vst [vmem:[#allocation75_spill] sm:$0xff] %v9318_v44  ;;  %v1555_v40 = vmax.f32 %v1043_v49, 0.0 }
 0x23b   : > { %12737 = vst [vmem:[#allocation73_spill] sm:$0xff] %v9312_v13  ;;  %v1675_v13 = vmax.f32 %v1163_v48, 0.0 }
 0x23c   : > { %12738 = vst [vmem:[#allocation74_spill] sm:$0xff] %v9314_v26  ;;  %v4399_v28 = vmax.f32 %v3166_v0, 0.0  ;;  %v1288_v0 = vadd.f32 %v9187_v58, %v8575_v43  ;;  %v2042_v20 = vpack.c.bf16 %v1555_v40, %v1554_v32  ;;  %v842_v58 = vrot.slane %v8629_v37, 5 }
 0x23d   : > { %v2102_v1 = vpack.c.bf16 %v1675_v13, %v1674_v42  ;;  %v1432_v32 = vadd.f32 %v9216_v15, %v8575_v43  ;;  %v1044_v15 = vadd.f32 %v9307_v24, %v8501_v47 }
 0x23e   : > { %v4941_v57 = vsel %vm2310_vm2, %v4399_v28, 0.0  ;;  %v1800_v28 = vmax.f32 %v1288_v0, 0.0 }
 0x23f   : > { %v4942_v26 = vadd.f32 %v4941_v57, %v4940_v22  ;;  %7502 = vmatmul.msk.bf16.gmra.mxu3 %vm2310_vm2, %v2236_v17  ;;  %v1945_v57 = vmax.f32 %v1433_v9, 0.0  ;;  %v1944_v0 = vmax.f32 %v1432_v32, 0.0 }
 0x240   : > { %v2165_v17 = vpack.c.bf16 %v1801_v53, %v1800_v28 }
 0x241   : > { %v3168_v25 = vpop.f32.mrf.mxu0  ;;  %v9337_v22 = vpop.f32.mrf.mxu1 }
 0x242   : > { %v3169_v44 = vadd.f32 %v9192_v60, %v3168_v25  ;;  %v9333_v31 = vpop.f32.mrf.mxu2  ;;  %v9335_v54 = vpop.f32.mrf.mxu3  ;;  %12742 = vst [vmem:[#allocation78_spill] sm:$0xff] %v9337_v22  ;;  %v858_v25 = vrot.slane %v8557_v23, 7 }
 0x243   : > { %12740 = vst [vmem:[#allocation76_spill] sm:$0xff] %v9333_v31 }
 0x244   : > { %12741 = vst [vmem:[#allocation77_spill] sm:$0xff] %v9335_v54  ;;  %v4400_v49 = vmax.f32 %v3169_v44, 0.0  ;;  %7308 = vmatmul.msk.bf16.gmra.mxu0 %vm2310_vm2, %v2042_v20  ;;  %7368 = vmatmul.msk.bf16.gmra.mxu1 %vm2310_vm2, %v2102_v1  ;;  %v9348_v44 = vperm.slane %v842_v58, 0  ;;  %v1165_v58 = vadd.f32 %v9309_v39, %v8505_v51 }
 0x246   : > { %v4943_v48 = vsel %vm2310_vm2, %v4400_v49, 0.0  ;;  %v2237_v49 = vpack.c.bf16 %v1945_v57, %v1944_v0  ;;  %v1290_v1 = vadd.f32 %v9348_v44, %v8481_v35  ;;  %v9372_v57 = vperm.slane %v858_v25, 0 }
 0x247   : > { %v4944_v55 = vadd.f32 %v4943_v48, %v4942_v26  ;;  %7431 = vmatmul.msk.bf16.gmra.mxu2 %vm2310_vm2, %v2165_v17  ;;  %v1045_v26 = vadd.f32 %v9307_v24, %v8505_v51  ;;  %v1291_v17 = vadd.f32 %v9348_v44, %v8483_v36 }
 0x248   : > { %v1802_v54 = vmax.f32 %v1290_v1, 0.0  ;;  %v1435_v1 = vadd.f32 %v9372_v57, %v8483_v36 }
 0x249   : > { %v3170_v20 = vpop.f32.mrf.mxu0  ;;  %v9358_v28 = vpop.f32.mrf.mxu1  ;;  %v1557_v48 = vmax.f32 %v1045_v26, 0.0 }
 0x24a   : > { %v3171_v13 = vadd.f32 %v9192_v60, %v3170_v20  ;;  %v9351_v53 = vpop.f32.mrf.mxu2  ;;  %v9353_v40 = vpop.f32.mrf.mxu3  ;;  %12745 = vst [vmem:[#allocation81_spill] sm:$0xff] %v9358_v28  ;;  %v1164_v20 = vadd.f32 %v9309_v39, %v8501_v47 }
 0x24b   : > { %12743 = vst [vmem:[#allocation79_spill] sm:$0xff] %v9351_v53  ;;  %v1803_v53 = vmax.f32 %v1291_v17, 0.0 }
 0x24c   : > { %12744 = vst [vmem:[#allocation80_spill] sm:$0xff] %v9353_v40  ;;  %v4401_v42 = vmax.f32 %v3171_v13, 0.0  ;;  %v1556_v13 = vmax.f32 %v1044_v15, 0.0  ;;  %v1677_v40 = vmax.f32 %v1165_v58, 0.0  ;;  %v1434_v58 = vadd.f32 %v9372_v57, %v8481_v35 }
 0x24d   : > { %v2166_v25 = vpack.c.bf16 %v1803_v53, %v1802_v54  ;;  %v1047_v53 = vadd.f32 %v9307_v24, %v8538_v10 }
 0x24e   : > { %v4945_v9 = vsel %vm2310_vm2, %v4401_v42, 0.0  ;;  %v2043_v26 = vpack.c.bf16 %v1557_v48, %v1556_v13  ;;  %v1946_v48 = vmax.f32 %v1434_v58, 0.0 }
 0x24f   : > { %v4946_v32 = vadd.f32 %v4945_v9, %v4944_v55  ;;  %7503 = vmatmul.msk.bf16.gmra.mxu3 %vm2310_vm2, %v2237_v49  ;;  %v1676_v55 = vmax.f32 %v1164_v20, 0.0  ;;  %v1947_v20 = vmax.f32 %v1435_v1, 0.0  ;;  %v1559_v1 = vmax.f32 %v1047_v53, 0.0 }
 0x251   : > { %v3173_v0 = vpop.f32.mrf.mxu0  ;;  %v9379_v49 = vpop.f32.mrf.mxu1  ;;  %v2103_v15 = vpack.c.bf16 %v1677_v40, %v1676_v55  ;;  %v2238_v55 = vpack.c.bf16 %v1947_v20, %v1946_v48 }
 0x252   : > { %v3174_v31 = vadd.f32 %v9192_v60, %v3173_v0  ;;  %v9375_v28 = vpop.f32.mrf.mxu2  ;;  %v9377_v22 = vpop.f32.mrf.mxu3  ;;  %12748 = vst [vmem:[#allocation84_spill] sm:$0xff] %v9379_v49 }
 0x253   : > { %12746 = vst [vmem:[#allocation82_spill] sm:$0xff] %v9375_v28 }
 0x254   : > { %12747 = vst [vmem:[#allocation83_spill] sm:$0xff] %v9377_v22  ;;  %v4402_v42 = vmax.f32 %v3174_v31, 0.0  ;;  %7309 = vmatmul.msk.bf16.gmra.mxu0 %vm2310_vm2, %v2043_v26  ;;  %7369 = vmatmul.msk.bf16.gmra.mxu1 %vm2310_vm2, %v2103_v15  ;;  %v1292_v15 = vadd.f32 %v9348_v44, %v8501_v47 }
 0x256   : > { %v4947_v17 = vsel %vm2310_vm2, %v4402_v42, 0.0  ;;  %v1167_v42 = vadd.f32 %v9309_v39, %v8538_v10 }
 0x257   : > { %v4948_v9 = vadd.f32 %v4947_v17, %v4946_v32  ;;  %7432 = vmatmul.msk.bf16.gmra.mxu2 %vm2310_vm2, %v2166_v25  ;;  %v1046_v32 = vadd.f32 %v9307_v24, %v8532_v6  ;;  %v1293_v25 = vadd.f32 %v9348_v44, %v8505_v51 }
 0x258   : > { %v1679_v20 = vmax.f32 %v1167_v42, 0.0  ;;  %v1437_v42 = vadd.f32 %v9372_v57, %v8505_v51 }
 0x259   : > { %v3175_v31 = vpop.f32.mrf.mxu0  ;;  %v9396_v26 = vpop.f32.mrf.mxu1  ;;  %v1805_v22 = vmax.f32 %v1293_v25, 0.0 }
 0x25a   : > { %v3176_v13 = vadd.f32 %v9192_v60, %v3175_v31  ;;  %v9390_v40 = vpop.f32.mrf.mxu2  ;;  %v9392_v54 = vpop.f32.mrf.mxu3  ;;  %12751 = vst [vmem:[#allocation87_spill] sm:$0xff] %v9396_v26  ;;  %v1166_v31 = vadd.f32 %v9309_v39, %v8532_v6 }
 0x25b   : > { %12749 = vst [vmem:[#allocation85_spill] sm:$0xff] %v9390_v40 }
 0x25c   : > { %12750 = vst [vmem:[#allocation86_spill] sm:$0xff] %v9392_v54  ;;  %v4403_v0 = vmax.f32 %v3176_v13, 0.0  ;;  %v1558_v13 = vmax.f32 %v1046_v32, 0.0  ;;  %v1804_v54 = vmax.f32 %v1292_v15, 0.0  ;;  %v1436_v32 = vadd.f32 %v9372_v57, %v8501_v47 }
 0x25e   : > { %v4949_v58 = vsel %vm2310_vm2, %v4403_v0, 0.0  ;;  %v2044_v49 = vpack.c.bf16 %v1559_v1, %v1558_v13  ;;  %v1678_v0 = vmax.f32 %v1166_v31, 0.0  ;;  %v1948_v1 = vmax.f32 %v1436_v32, 0.0 }
 0x25f   : > { %v4950_v17 = vadd.f32 %v4949_v58, %v4948_v9  ;;  %7504 = vmatmul.msk.bf16.gmra.mxu3 %vm2310_vm2, %v2238_v55  ;;  %v2167_v58 = vpack.c.bf16 %v1805_v22, %v1804_v54  ;;  %v1949_v31 = vmax.f32 %v1437_v42, 0.0  ;;  %v1049_v54 = vadd.f32 %v9307_v24, %v8577_v46 }
 0x260   : > { %v2104_v55 = vpack.c.bf16 %v1679_v20, %v1678_v0 }
 0x261   : > { %v3178_v48 = vpop.f32.mrf.mxu0  ;;  %v9415_v9 = vpop.f32.mrf.mxu1  ;;  %v2239_v0 = vpack.c.bf16 %v1949_v31, %v1948_v1  ;;  %v1561_v32 = vmax.f32 %v1049_v54, 0.0 }
 0x262   : > { %v3179_v40 = vadd.f32 %v9192_v60, %v3178_v48  ;;  %v9411_v28 = vpop.f32.mrf.mxu2  ;;  %v9413_v26 = vpop.f32.mrf.mxu3  ;;  %12754 = vst [vmem:[#allocation90_spill] sm:$0xff] %v9415_v9 }
 0x263   : > { %12752 = vst [vmem:[#allocation88_spill] sm:$0xff] %v9411_v28 }
 0x264   : > { %12753 = vst [vmem:[#allocation89_spill] sm:$0xff] %v9413_v26  ;;  %v4404_v53 = vmax.f32 %v3179_v40, 0.0  ;;  %7310 = vmatmul.msk.bf16.gmra.mxu0 %vm2310_vm2, %v2044_v49  ;;  %7370 = vmatmul.msk.bf16.gmra.mxu1 %vm2310_vm2, %v2104_v55  ;;  %v1295_v55 = vadd.f32 %v9348_v44, %v8538_v10 }
 0x266   : > { %v4951_v15 = vsel %vm2310_vm2, %v4404_v53, 0.0  ;;  %v1169_v53 = vadd.f32 %v9309_v39, %v8577_v46 }
 0x267   : > { %v4952_v25 = vadd.f32 %v4951_v15, %v4950_v17  ;;  %7433 = vmatmul.msk.bf16.gmra.mxu2 %vm2310_vm2, %v2167_v58  ;;  %v1048_v17 = vadd.f32 %v9307_v24, %v8575_v43  ;;  %v1168_v15 = vadd.f32 %v9309_v39, %v8575_v43  ;;  %v829_v39 = vrot.slane %v8598_v5, 6 }
 0x268   : > { %v1681_v31 = vmax.f32 %v1169_v53, 0.0 }
 0x269   : > { %v3180_v40 = vpop.f32.mrf.mxu0  ;;  %v9432_v20 = vpop.f32.mrf.mxu1  ;;  %v1560_v24 = vmax.f32 %v1048_v17, 0.0 }
 0x26a   : > { %v3181_v49 = vadd.f32 %v9192_v60, %v3180_v40  ;;  %v9426_v13 = vpop.f32.mrf.mxu2  ;;  %v9428_v22 = vpop.f32.mrf.mxu3  ;;  %12757 = vst [vmem:[#allocation93_spill] sm:$0xff] %v9432_v20  ;;  %v1294_v40 = vadd.f32 %v9348_v44, %v8532_v6 }
 0x26b   : > { %12755 = vst [vmem:[#allocation91_spill] sm:$0xff] %v9426_v13  ;;  %v2045_v54 = vpack.c.bf16 %v1561_v32, %v1560_v24 }
 0x26c   : > { %12756 = vst [vmem:[#allocation92_spill] sm:$0xff] %v9428_v22  ;;  %v4405_v48 = vmax.f32 %v3181_v49, 0.0  ;;  %v1807_v49 = vmax.f32 %v1295_v55, 0.0  ;;  %v1438_v55 = vadd.f32 %v9372_v57, %v8532_v6 }
 0x26e   : > { %v4953_v58 = vsel %vm2310_vm2, %v4405_v48, 0.0  ;;  %v1806_v48 = vmax.f32 %v1294_v40, 0.0  ;;  %v1950_v24 = vmax.f32 %v1438_v55, 0.0  ;;  %v1297_v55 = vadd.f32 %v9348_v44, %v8577_v46 }
 0x26f   : > { %v4954_v42 = vadd.f32 %v4953_v58, %v4952_v25  ;;  %7505 = vmatmul.msk.bf16.gmra.mxu3 %vm2310_vm2, %v2239_v0  ;;  %v1680_v25 = vmax.f32 %v1168_v15, 0.0  ;;  %v816_v0 = vrot.slane %v8470_v29, 7 }
 0x270   : > { %v2168_v53 = vpack.c.bf16 %v1807_v49, %v1806_v48 }
 0x271   : > { %v3183_v1 = vpop.f32.mrf.mxu0  ;;  %v9453_v28 = vpop.f32.mrf.mxu1  ;;  %v2105_v17 = vpack.c.bf16 %v1681_v31, %v1680_v25  ;;  %v9463_v29 = vperm.slane %v816_v0, 0 }
 0x272   : > { %v3184_v22 = vadd.f32 %v9192_v60, %v3183_v1  ;;  %v9447_v26 = vpop.f32.mrf.mxu2  ;;  %v9449_v13 = vpop.f32.mrf.mxu3  ;;  %12760 = vst [vmem:[#allocation96_spill] sm:$0xff] %v9453_v28  ;;  %v1439_v1 = vadd.f32 %v9372_v57, %v8538_v10 }
 0x273   : > { %12758 = vst [vmem:[#allocation94_spill] sm:$0xff] %v9447_v26  ;;  %v1050_v0 = vadd.f32 %v9463_v29, %v8481_v35 }
 0x274   : > { %12759 = vst [vmem:[#allocation95_spill] sm:$0xff] %v9449_v13  ;;  %v4406_v58 = vmax.f32 %v3184_v22, 0.0  ;;  %7311 = vmatmul.msk.bf16.gmra.mxu0 %vm2310_vm2, %v2045_v54  ;;  %7371 = vmatmul.msk.bf16.gmra.mxu1 %vm2310_vm2, %v2105_v17  ;;  %v9465_v22 = vperm.slane %v829_v39, 0  ;;  %v1951_v31 = vmax.f32 %v1439_v1, 0.0 }
 0x276   : > { %v4955_v32 = vsel %vm2310_vm2, %v4406_v58, 0.0  ;;  %v2240_v39 = vpack.c.bf16 %v1951_v31, %v1950_v24  ;;  %v1170_v17 = vadd.f32 %v9465_v22, %v8481_v35 }
 0x277   : > { %v4956_v15 = vadd.f32 %v4955_v32, %v4954_v42  ;;  %7434 = vmatmul.msk.bf16.gmra.mxu2 %vm2310_vm2, %v2168_v53  ;;  %v1051_v42 = vadd.f32 %v9463_v29, %v8483_v36  ;;  %v1171_v53 = vadd.f32 %v9465_v22, %v8483_v36 }
 0x278   : > { %v1682_v31 = vmax.f32 %v1170_v17, 0.0  ;;  %v1441_v17 = vadd.f32 %v9372_v57, %v8577_v46 }
 0x279   : > { %v3185_v40 = vpop.f32.mrf.mxu0  ;;  %v9474_v58 = vpop.f32.mrf.mxu1  ;;  %v1563_v32 = vmax.f32 %v1051_v42, 0.0  ;;  %v1683_v13 = vmax.f32 %v1171_v53, 0.0 }
 0x27a   : > { %v3186_v49 = vadd.f32 %v9192_v60, %v3185_v40  ;;  %v9468_v54 = vpop.f32.mrf.mxu2  ;;  %v9470_v25 = vpop.f32.mrf.mxu3  ;;  %12763 = vst [vmem:[#allocation99_spill] sm:$0xff] %v9474_v58 }
 0x27b   : > { %12761 = vst [vmem:[#allocation97_spill] sm:$0xff] %v9468_v54  ;;  %v1809_v54 = vmax.f32 %v1297_v55, 0.0 }
 0x27c   : > { %12762 = vst [vmem:[#allocation98_spill] sm:$0xff] %v9470_v25  ;;  %v4407_v48 = vmax.f32 %v3186_v49, 0.0  ;;  %v1296_v49 = vadd.f32 %v9348_v44, %v8575_v43  ;;  %v1562_v25 = vmax.f32 %v1050_v0, 0.0  ;;  %v843_v44 = vrot.slane %v8629_v37, 6 }
 0x27d   : > { %v2106_v0 = vpack.c.bf16 %v1683_v13, %v1682_v31  ;;  %v694_v13 = vld [vmem:[%s12672_s29 + $0x38] sm:$0xff] }
 0x27e   : > { %v4957_v1 = vsel %vm2310_vm2, %v4407_v48, 0.0  ;;  %v2046_v20 = vpack.c.bf16 %v1563_v32, %v1562_v25  ;;  %v1808_v48 = vmax.f32 %v1296_v49, 0.0  ;;  %v9504_v25 = vperm.slane %v843_v44, 0 }
 0x27f   : > { %v4958_v40 = vadd.f32 %v4957_v1, %v4956_v15  ;;  %7506 = vmatmul.msk.bf16.gmra.mxu3 %vm2310_vm2, %v2240_v39  ;;  %v1053_v49 = vadd.f32 %v9463_v29, %v8505_v51 }
 0x280   : > { %v2169_v39 = vpack.c.bf16 %v1809_v54, %v1808_v48  ;;  %v1953_v54 = vmax.f32 %v1441_v17, 0.0  ;;  %v1299_v17 = vadd.f32 %v9504_v25, %v8483_v36 }
 0x281   : > { %v3188_v24 = vpop.f32.mrf.mxu0  ;;  %v9493_v15 = vpop.f32.mrf.mxu1 }
 0x282   : > { %v3189_v26 = vadd.f32 %v9192_v60, %v3188_v24  ;;  %v9489_v58 = vpop.f32.mrf.mxu2  ;;  %v9491_v28 = vpop.f32.mrf.mxu3  ;;  %12766 = vst [vmem:[#allocation102_spill] sm:$0xff] %v9493_v15 }
 0x283   : > { %12764 = vst [vmem:[#allocation100_spill] sm:$0xff] %v9489_v58 }
 0x284   : > { %12765 = vst [vmem:[#allocation101_spill] sm:$0xff] %v9491_v28  ;;  %v4408_v42 = vmax.f32 %v3189_v26, 0.0  ;;  %7312 = vmatmul.msk.bf16.gmra.mxu0 %vm2310_vm2, %v2046_v20  ;;  %7372 = vmatmul.msk.bf16.gmra.mxu1 %vm2310_vm2, %v2106_v0  ;;  %v1440_v26 = vadd.f32 %v9372_v57, %v8575_v43  ;;  %v9517_v57 = vadd.f32 %v8707_v8, %v694_v13  ;;  %v1565_v8 = vmax.f32 %v1053_v49, 0.0 }
 0x285   : > { %v1173_v0 = vadd.f32 %v9465_v22, %v8505_v51  ;;  %v1172_v13 = vadd.f32 %v9465_v22, %v8501_v47  ;;  %v1811_v28 = vmax.f32 %v1299_v17, 0.0 }
 0x286   : > { %v4959_v53 = vsel %vm2310_vm2, %v4408_v42, 0.0  ;;  %v1952_v24 = vmax.f32 %v1440_v26, 0.0  ;;  %v1052_v42 = vadd.f32 %v9463_v29, %v8501_v47 }
 0x287   : > { %v4960_v55 = vadd.f32 %v4959_v53, %v4958_v40  ;;  %7435 = vmatmul.msk.bf16.gmra.mxu2 %vm2310_vm2, %v2169_v39  ;;  %v1298_v39 = vadd.f32 %v9504_v25, %v8481_v35  ;;  %v1684_v49 = vmax.f32 %v1172_v13, 0.0 }
 0x288   : > { %v2241_v44 = vpack.c.bf16 %v1953_v54, %v1952_v24  ;;  %v9534_v54 = vperm.slane %v9517_v57, 0  ;;  %v1685_v24 = vmax.f32 %v1173_v0, 0.0 }
 0x289   : > { %v3190_v20 = vpop.f32.mrf.mxu0  ;;  %v9519_v48 = vpop.f32.mrf.mxu1 }
 0x28a   : > { %v3191_v1 = vadd.f32 %v9192_v60, %v3190_v20  ;;  %v9510_v32 = vpop.f32.mrf.mxu2  ;;  %v9512_v40 = vpop.f32.mrf.mxu3  ;;  %12769 = vst [vmem:[#allocation105_spill] sm:$0xff] %v9519_v48  ;;  %v1564_v20 = vmax.f32 %v1052_v42, 0.0  ;;  %v2107_v42 = vpack.c.bf16 %v1685_v24, %v1684_v49  ;;  %v1442_v0 = vadd.f32 %v9534_v54, %v8481_v35 }
 0x28b   : > { %12767 = vst [vmem:[#allocation103_spill] sm:$0xff] %v9510_v32 }
 0x28c   : > { %12768 = vst [vmem:[#allocation104_spill] sm:$0xff] %v9512_v40  ;;  %v4409_v31 = vmax.f32 %v3191_v1, 0.0  ;;  %v1810_v40 = vmax.f32 %v1298_v39, 0.0  ;;  %v1443_v39 = vadd.f32 %v9534_v54, %v8483_v36 }
 0x28e   : > { %v4961_v53 = vsel %vm2310_vm2, %v4409_v31, 0.0  ;;  %v2170_v48 = vpack.c.bf16 %v1811_v28, %v1810_v40  ;;  %v1955_v13 = vmax.f32 %v1443_v39, 0.0  ;;  %v1055_v40 = vadd.f32 %v9463_v29, %v8538_v10 }
 0x28f   : > { %v4962_v26 = vadd.f32 %v4961_v53, %v4960_v55  ;;  %7507 = vmatmul.msk.bf16.gmra.mxu3 %vm2310_vm2, %v2241_v44  ;;  %v2047_v55 = vpack.c.bf16 %v1565_v8, %v1564_v20  ;;  %v1954_v8 = vmax.f32 %v1442_v0, 0.0  ;;  %v1301_v0 = vadd.f32 %v9504_v25, %v8505_v51 }
 0x291   : > { %v3193_v1 = vpop.f32.mrf.mxu0  ;;  %v9541_v53 = vpop.f32.mrf.mxu1 }
 0x292   : > { %v3194_v32 = vadd.f32 %v9192_v60, %v3193_v1  ;;  %v9537_v58 = vpop.f32.mrf.mxu2  ;;  %v9539_v31 = vpop.f32.mrf.mxu3  ;;  %12772 = vst [vmem:[#allocation108_spill] sm:$0xff] %v9541_v53 }
 0x293   : > { %12770 = vst [vmem:[#allocation106_spill] sm:$0xff] %v9537_v58 }
 0x294   : > { %12771 = vst [vmem:[#allocation107_spill] sm:$0xff] %v9539_v31  ;;  %v4410_v44 = vmax.f32 %v3194_v32, 0.0  ;;  %7313 = vmatmul.msk.bf16.gmra.mxu0 %vm2310_vm2, %v2047_v55  ;;  %7373 = vmatmul.msk.bf16.gmra.mxu1 %vm2310_vm2, %v2107_v42  ;;  %v1300_v42 = vadd.f32 %v9504_v25, %v8501_v47 }
 0x296   : > { %v4963_v17 = vsel %vm2310_vm2, %v4410_v44, 0.0  ;;  %v2242_v44 = vpack.c.bf16 %v1955_v13, %v1954_v8  ;;  %v1812_v31 = vmax.f32 %v1300_v42, 0.0 }
 0x297   : > { %v4964_v1 = vadd.f32 %v4963_v17, %v4962_v26  ;;  %7436 = vmatmul.msk.bf16.gmra.mxu2 %vm2310_vm2, %v2170_v48  ;;  %v1054_v26 = vadd.f32 %v9463_v29, %v8532_v6  ;;  %v1175_v48 = vadd.f32 %v9465_v22, %v8538_v10  ;;  %v1567_v17 = vmax.f32 %v1055_v40, 0.0 }
 0x299   : > { %v3195_v32 = vpop.f32.mrf.mxu0  ;;  %v9558_v49 = vpop.f32.mrf.mxu1  ;;  %v1687_v13 = vmax.f32 %v1175_v48, 0.0  ;;  %v1445_v48 = vadd.f32 %v9534_v54, %v8505_v51 }
 0x29a   : > { %v3196_v20 = vadd.f32 %v9192_v60, %v3195_v32  ;;  %v9552_v24 = vpop.f32.mrf.mxu2  ;;  %v9554_v28 = vpop.f32.mrf.mxu3  ;;  %12775 = vst [vmem:[#allocation111_spill] sm:$0xff] %v9558_v49 }
 0x29b   : > { %12773 = vst [vmem:[#allocation109_spill] sm:$0xff] %v9552_v24  ;;  %v1813_v24 = vmax.f32 %v1301_v0, 0.0 }
 0x29c   : > { %12774 = vst [vmem:[#allocation110_spill] sm:$0xff] %v9554_v28  ;;  %v4411_v55 = vmax.f32 %v3196_v20, 0.0  ;;  %v1174_v20 = vadd.f32 %v9465_v22, %v8532_v6  ;;  %v1566_v28 = vmax.f32 %v1054_v26, 0.0  ;;  %v1444_v26 = vadd.f32 %v9534_v54, %v8501_v47 }
 0x29e   : > { %v4965_v39 = vsel %vm2310_vm2, %v4411_v55, 0.0  ;;  %v2048_v15 = vpack.c.bf16 %v1567_v17, %v1566_v28  ;;  %v1686_v55 = vmax.f32 %v1174_v20, 0.0  ;;  %v1956_v28 = vmax.f32 %v1444_v26, 0.0 }
 0x29f   : > { %v4966_v32 = vadd.f32 %v4965_v39, %v4964_v1  ;;  %7508 = vmatmul.msk.bf16.gmra.mxu3 %vm2310_vm2, %v2242_v44  ;;  %v2171_v39 = vpack.c.bf16 %v1813_v24, %v1812_v31  ;;  %v1957_v17 = vmax.f32 %v1445_v48, 0.0  ;;  %v1057_v24 = vadd.f32 %v9463_v29, %v8577_v46 }
 0x2a0   : > { %v2108_v44 = vpack.c.bf16 %v1687_v13, %v1686_v55 }
 0x2a1   : > { %v3198_v8 = vpop.f32.mrf.mxu0  ;;  %v9577_v1 = vpop.f32.mrf.mxu1  ;;  %v2243_v55 = vpack.c.bf16 %v1957_v17, %v1956_v28  ;;  %v1569_v26 = vmax.f32 %v1057_v24, 0.0 }
 0x2a2   : > { %v3199_v58 = vadd.f32 %v9192_v60, %v3198_v8  ;;  %v9573_v49 = vpop.f32.mrf.mxu2  ;;  %v9575_v53 = vpop.f32.mrf.mxu3  ;;  %12778 = vst [vmem:[#allocation114_spill] sm:$0xff] %v9577_v1 }
 0x2a3   : > { %12776 = vst [vmem:[#allocation112_spill] sm:$0xff] %v9573_v49 }
 0x2a4   : > { %12777 = vst [vmem:[#allocation113_spill] sm:$0xff] %v9575_v53  ;;  %v4412_v40 = vmax.f32 %v3199_v58, 0.0  ;;  %7314 = vmatmul.msk.bf16.gmra.mxu0 %vm2310_vm2, %v2048_v15  ;;  %7374 = vmatmul.msk.bf16.gmra.mxu1 %vm2310_vm2, %v2108_v44  ;;  %v1303_v44 = vadd.f32 %v9504_v25, %v8538_v10 }
 0x2a6   : > { %v4967_v42 = vsel %vm2310_vm2, %v4412_v40, 0.0  ;;  %v1177_v40 = vadd.f32 %v9465_v22, %v8577_v46 }
 0x2a7   : > { %v4968_v0 = vadd.f32 %v4967_v42, %v4966_v32  ;;  %7437 = vmatmul.msk.bf16.gmra.mxu2 %vm2310_vm2, %v2171_v39  ;;  %v1056_v32 = vadd.f32 %v9463_v29, %v8575_v43  ;;  %v1176_v42 = vadd.f32 %v9465_v22, %v8575_v43 }
 0x2a8   : > { %v1689_v17 = vmax.f32 %v1177_v40, 0.0  ;;  %v1446_v40 = vadd.f32 %v9534_v54, %v8532_v6 }
 0x2a9   : > { %v3200_v58 = vpop.f32.mrf.mxu0  ;;  %v9594_v13 = vpop.f32.mrf.mxu1  ;;  %v1568_v29 = vmax.f32 %v1056_v32, 0.0 }
 0x2aa   : > { %v3201_v15 = vadd.f32 %v9192_v60, %v3200_v58  ;;  %v9588_v20 = vpop.f32.mrf.mxu2  ;;  %v9590_v31 = vpop.f32.mrf.mxu3  ;;  %12781 = vst [vmem:[#allocation117_spill] sm:$0xff] %v9594_v13  ;;  %v1302_v58 = vadd.f32 %v9504_v25, %v8532_v6 }
 0x2ab   : > { %12779 = vst [vmem:[#allocation115_spill] sm:$0xff] %v9588_v20  ;;  %v2049_v24 = vpack.c.bf16 %v1569_v26, %v1568_v29 }
 0x2ac   : > { %12780 = vst [vmem:[#allocation116_spill] sm:$0xff] %v9590_v31  ;;  %v4413_v8 = vmax.f32 %v3201_v15, 0.0  ;;  %v1815_v15 = vmax.f32 %v1303_v44, 0.0  ;;  %v1447_v44 = vadd.f32 %v9534_v54, %v8538_v10 }
 0x2ae   : > { %v4969_v39 = vsel %vm2310_vm2, %v4413_v8, 0.0  ;;  %v1814_v8 = vmax.f32 %v1302_v58, 0.0  ;;  %v1958_v58 = vmax.f32 %v1446_v40, 0.0  ;;  %v1959_v29 = vmax.f32 %v1447_v44, 0.0 }
 0x2af   : > { %v4970_v48 = vadd.f32 %v4969_v39, %v4968_v0  ;;  %7509 = vmatmul.msk.bf16.gmra.mxu3 %vm2310_vm2, %v2243_v55  ;;  %v1688_v0 = vmax.f32 %v1176_v42, 0.0  ;;  %v830_v55 = vrot.slane %v8598_v5, 7  ;;  %v1305_v40 = vadd.f32 %v9504_v25, %v8577_v46 }
 0x2b0   : > { %v2172_v49 = vpack.c.bf16 %v1815_v15, %v1814_v8 }
 0x2b1   : > { %v3203_v28 = vpop.f32.mrf.mxu0  ;;  %v9614_v22 = vpop.f32.mrf.mxu1  ;;  %v2109_v32 = vpack.c.bf16 %v1689_v17, %v1688_v0  ;;  %v9627_v5 = vperm.slane %v830_v55, 0 }
 0x2b2   : > { %v3204_v31 = vadd.f32 %v9192_v60, %v3203_v28  ;;  %v9609_v53 = vpop.f32.mrf.mxu2  ;;  %v9611_v20 = vpop.f32.mrf.mxu3  ;;  %12784 = vst [vmem:[#allocation120_spill] sm:$0xff] %v9614_v22  ;;  %v9622_v28 = vperm.slane %v8524_v2, 0 }
 0x2b3   : > { %12782 = vst [vmem:[#allocation118_spill] sm:$0xff] %v9609_v53  ;;  %v1178_v55 = vadd.f32 %v9627_v5, %v8481_v35 }
 0x2b4   : > { %12783 = vst [vmem:[#allocation119_spill] sm:$0xff] %v9611_v20  ;;  %v4414_v39 = vmax.f32 %v3204_v31, 0.0  ;;  %7315 = vmatmul.msk.bf16.gmra.mxu0 %vm2310_vm2, %v2049_v24  ;;  %7375 = vmatmul.msk.bf16.gmra.mxu1 %vm2310_vm2, %v2109_v32  ;;  %v1058_v0 = vadd.f32 %v9622_v28, %v8481_v35  ;;  %v1179_v32 = vadd.f32 %v9627_v5, %v8483_v36 }
 0x2b6   : > { %v4971_v26 = vsel %vm2310_vm2, %v4414_v39, 0.0  ;;  %v1691_v20 = vmax.f32 %v1179_v32, 0.0  ;;  %v1449_v32 = vadd.f32 %v9534_v54, %v8577_v46 }
 0x2b7   : > { %v4972_v42 = vadd.f32 %v4971_v26, %v4970_v48  ;;  %7438 = vmatmul.msk.bf16.gmra.mxu2 %vm2310_vm2, %v2172_v49  ;;  %v1059_v48 = vadd.f32 %v9622_v28, %v8483_v36  ;;  %v2244_v49 = vpack.c.bf16 %v1959_v29, %v1958_v58  ;;  %v1570_v26 = vmax.f32 %v1058_v0, 0.0 }
 0x2b8   : > { %v1690_v29 = vmax.f32 %v1178_v55, 0.0  ;;  %v844_v0 = vrot.slane %v8629_v37, 7  ;;  %v1448_v55 = vadd.f32 %v9534_v54, %v8575_v43  ;;  %v1061_v54 = vadd.f32 %v9622_v28, %v8505_v51 }
 0x2b9   : > { %v3205_v31 = vpop.f32.mrf.mxu0  ;;  %v9638_v39 = vpop.f32.mrf.mxu1 }
 0x2ba   : > { %v3206_v17 = vadd.f32 %v9192_v60, %v3205_v31  ;;  %v9630_v15 = vpop.f32.mrf.mxu2  ;;  %v9632_v24 = vpop.f32.mrf.mxu3  ;;  %12787 = vst [vmem:[#allocation123_spill] sm:$0xff] %v9638_v39  ;;  %v1571_v31 = vmax.f32 %v1059_v48, 0.0  ;;  %v9666_v37 = vperm.slane %v844_v0, 0  ;;  %v1181_v0 = vadd.f32 %v9627_v5, %v8505_v51 }
 0x2bb   : > { %12785 = vst [vmem:[#allocation121_spill] sm:$0xff] %v9630_v15  ;;  %v1817_v15 = vmax.f32 %v1305_v40, 0.0 }
 0x2bc   : > { %12786 = vst [vmem:[#allocation122_spill] sm:$0xff] %v9632_v24  ;;  %v4415_v8 = vmax.f32 %v3206_v17, 0.0  ;;  %v1304_v17 = vadd.f32 %v9504_v25, %v8575_v43  ;;  %v2050_v13 = vpack.c.bf16 %v1571_v31, %v1570_v26  ;;  %v2110_v25 = vpack.c.bf16 %v1691_v20, %v1690_v29 }
 0x2bd   : > { %v1960_v26 = vmax.f32 %v1448_v55, 0.0  ;;  %v1060_v29 = vadd.f32 %v9622_v28, %v8501_v47 }
 0x2be   : > { %v4973_v44 = vsel %vm2310_vm2, %v4415_v8, 0.0  ;;  %v1816_v8 = vmax.f32 %v1304_v17, 0.0 }
 0x2bf   : > { %v4974_v24 = vadd.f32 %v4973_v44, %v4972_v42  ;;  %7510 = vmatmul.msk.bf16.gmra.mxu3 %vm2310_vm2, %v2244_v49 }
 0x2c0   : > { %v2173_v49 = vpack.c.bf16 %v1817_v15, %v1816_v8 }
 0x2c1   : > { %v3208_v58 = vpop.f32.mrf.mxu0  ;;  %v9656_v48 = vpop.f32.mrf.mxu1 }
 0x2c2   : > { %v3209_v53 = vadd.f32 %v9192_v60, %v3208_v58  ;;  %v9651_v39 = vpop.f32.mrf.mxu2  ;;  %v9653_v22 = vpop.f32.mrf.mxu3  ;;  %12790 = vst [vmem:[#allocation126_spill] sm:$0xff] %v9656_v48 }
 0x2c3   : > { %12788 = vst [vmem:[#allocation124_spill] sm:$0xff] %v9651_v39 }
 0x2c4   : > { %12789 = vst [vmem:[#allocation125_spill] sm:$0xff] %v9653_v22  ;;  %v4416_v42 = vmax.f32 %v3209_v53, 0.0  ;;  %7316 = vmatmul.msk.bf16.gmra.mxu0 %vm2310_vm2, %v2050_v13  ;;  %7376 = vmatmul.msk.bf16.gmra.mxu1 %vm2310_vm2, %v2110_v25  ;;  %v1961_v13 = vmax.f32 %v1449_v32, 0.0  ;;  %v1180_v32 = vadd.f32 %v9627_v5, %v8501_v47  ;;  %v9695_v22 = vld [vmem:[%s12677_s7] ss:$0 sm:$0xff] }
 0x2c6   : > { %v4975_v40 = vsel %vm2310_vm2, %v4416_v42, 0.0  ;;  %v2245_v8 = vpack.c.bf16 %v1961_v13, %v1960_v26  ;;  %v1307_v42 = vadd.f32 %v9666_v37, %v8483_v36  ;;  %v1693_v13 = vmax.f32 %v1181_v0, 0.0 }
 0x2c7   : > { %v4976_v44 = vadd.f32 %v4975_v40, %v4974_v24  ;;  %7439 = vmatmul.msk.bf16.gmra.mxu2 %vm2310_vm2, %v2173_v49  ;;  %v859_v24 = vrot.slane %v9517_v57, 1  ;;  %v1573_v49 = vmax.f32 %v1061_v54, 0.0  ;;  %v1572_v40 = vmax.f32 %v1060_v29, 0.0 }
 0x2c9   : > { %v3210_v53 = vpop.f32.mrf.mxu0  ;;  %v9676_v58 = vpop.f32.mrf.mxu1 }
 0x2ca   : > { %v3211_v20 = vadd.f32 %v9192_v60, %v3210_v53  ;;  %v9669_v15 = vpop.f32.mrf.mxu2  ;;  %v9671_v31 = vpop.f32.mrf.mxu3  ;;  %12793 = vst [vmem:[#allocation129_spill] sm:$0xff] %v9676_v58  ;;  %v1306_v60 = vadd.f32 %v9666_v37, %v8481_v35  ;;  %v9690_v53 = vperm.slane %v859_v24, 0 }
 0x2cb   : > { %12791 = vst [vmem:[#allocation127_spill] sm:$0xff] %v9669_v15 }
 0x2cc   : > { %12792 = vst [vmem:[#allocation128_spill] sm:$0xff] %v9671_v31  ;;  %v4417_v17 = vmax.f32 %v3211_v20, 0.0  ;;  %v1818_v20 = vmax.f32 %v1306_v60, 0.0  ;;  %v1819_v31 = vmax.f32 %v1307_v42, 0.0  ;;  %v1450_v42 = vadd.f32 %v9690_v53, %v8481_v35 }
 0x2cd   : > { %v1451_v15 = vadd.f32 %v9690_v53, %v8483_v36 }
 0x2ce   : > { %v4977_v25 = vsel %vm2310_vm2, %v4417_v17, 0.0  ;;  %v2174_v60 = vpack.c.bf16 %v1819_v31, %v1818_v20  ;;  %v1063_v20 = vadd.f32 %v9622_v28, %v8538_v10 }
 0x2cf   : > { %v4978_v55 = vadd.f32 %v4977_v25, %v4976_v44  ;;  %7511 = vmatmul.msk.bf16.gmra.mxu3 %vm2310_vm2, %v2245_v8  ;;  %v2051_v8 = vpack.c.bf16 %v1573_v49, %v1572_v40  ;;  %v1692_v25 = vmax.f32 %v1180_v32, 0.0  ;;  %v1962_v32 = vmax.f32 %v1450_v42, 0.0 }
 0x2d0   : > { %v1963_v40 = vmax.f32 %v1451_v15, 0.0  ;;  %v1308_v15 = vadd.f32 %v9666_v37, %v8501_v47 }
 0x2d1   : > { %v3213_v26 = vpop.f32.mrf.mxu0  ;;  %v9702_v24 = vpop.f32.mrf.mxu1  ;;  %v2111_v0 = vpack.c.bf16 %v1693_v13, %v1692_v25 }
 0x2d2   : > { %v3214_v54 = vadd.f32 %v9695_v22, %v3213_v26  ;;  %v9698_v44 = vpop.f32.mrf.mxu2  ;;  %v9700_v17 = vpop.f32.mrf.mxu3  ;;  %12796 = vst [vmem:[#allocation132_spill] sm:$0xff] %v9702_v24 }
 0x2d3   : > { %12794 = vst [vmem:[#allocation130_spill] sm:$0xff] %v9698_v44 }
 0x2d4   : > { %12795 = vst [vmem:[#allocation131_spill] sm:$0xff] %v9700_v17  ;;  %v4418_v29 = vmax.f32 %v3214_v54, 0.0  ;;  %7317 = vmatmul.msk.bf16.gmra.mxu0 %vm2310_vm2, %v2051_v8  ;;  %7377 = vmatmul.msk.bf16.gmra.mxu1 %vm2310_vm2, %v2111_v0  ;;  %v1183_v0 = vadd.f32 %v9627_v5, %v8538_v10  ;;  %v1820_v17 = vmax.f32 %v1308_v15, 0.0 }
 0x2d6   : > { %v4979_v26 = vsel %vm2310_vm2, %v4418_v29, 0.0  ;;  %v2246_v29 = vpack.c.bf16 %v1963_v40, %v1962_v32  ;;  %v1695_v40 = vmax.f32 %v1183_v0, 0.0  ;;  %v1453_v0 = vadd.f32 %v9690_v53, %v8505_v51 }
 0x2d7   : > { %v4980_v44 = vadd.f32 %v4979_v26, %v4978_v55  ;;  %7440 = vmatmul.msk.bf16.gmra.mxu2 %vm2310_vm2, %v2174_v60  ;;  %v1062_v55 = vadd.f32 %v9622_v28, %v8532_v6  ;;  %v1309_v60 = vadd.f32 %v9666_v37, %v8505_v51  ;;  %v1575_v26 = vmax.f32 %v1063_v20, 0.0 }
 0x2d9   : > { %v3215_v49 = vpop.f32.mrf.mxu0  ;;  %v9719_v25 = vpop.f32.mrf.mxu1 }
 0x2da   : > { %v3216_v54 = vadd.f32 %v9695_v22, %v3215_v49  ;;  %v9713_v13 = vpop.f32.mrf.mxu2  ;;  %v9715_v31 = vpop.f32.mrf.mxu3  ;;  %12799 = vst [vmem:[#allocation135_spill] sm:$0xff] %v9719_v25 }
 0x2db   : > { %12797 = vst [vmem:[#allocation133_spill] sm:$0xff] %v9713_v13  ;;  %v1821_v13 = vmax.f32 %v1309_v60, 0.0 }
 0x2dc   : > { %12798 = vst [vmem:[#allocation134_spill] sm:$0xff] %v9715_v31  ;;  %v4419_v8 = vmax.f32 %v3216_v54, 0.0  ;;  %v1182_v54 = vadd.f32 %v9627_v5, %v8532_v6  ;;  %v1574_v31 = vmax.f32 %v1062_v55, 0.0  ;;  %v1452_v55 = vadd.f32 %v9690_v53, %v8501_v47 }
 0x2de   : > { %v4981_v42 = vsel %vm2310_vm2, %v4419_v8, 0.0  ;;  %v2052_v58 = vpack.c.bf16 %v1575_v26, %v1574_v31  ;;  %v1694_v8 = vmax.f32 %v1182_v54, 0.0  ;;  %v1964_v31 = vmax.f32 %v1452_v55, 0.0 }
 0x2df   : > { %v4982_v49 = vadd.f32 %v4981_v42, %v4980_v44  ;;  %7512 = vmatmul.msk.bf16.gmra.mxu3 %vm2310_vm2, %v2246_v29  ;;  %v2175_v42 = vpack.c.bf16 %v1821_v13, %v1820_v17  ;;  %v1965_v26 = vmax.f32 %v1453_v0, 0.0  ;;  %v1065_v13 = vadd.f32 %v9622_v28, %v8577_v46 }
 0x2e0   : > { %v2112_v29 = vpack.c.bf16 %v1695_v40, %v1694_v8 }
 0x2e1   : > { %v3218_v32 = vpop.f32.mrf.mxu0  ;;  %v9738_v44 = vpop.f32.mrf.mxu1  ;;  %v2247_v8 = vpack.c.bf16 %v1965_v26, %v1964_v31  ;;  %v1577_v55 = vmax.f32 %v1065_v13, 0.0 }
 0x2e2   : > { %v3219_v39 = vadd.f32 %v9695_v22, %v3218_v32  ;;  %v9734_v25 = vpop.f32.mrf.mxu2  ;;  %v9736_v24 = vpop.f32.mrf.mxu3  ;;  %12802 = vst [vmem:[#allocation138_spill] sm:$0xff] %v9738_v44 }
 0x2e3   : > { %12800 = vst [vmem:[#allocation136_spill] sm:$0xff] %v9734_v25 }
 0x2e4   : > { %12801 = vst [vmem:[#allocation137_spill] sm:$0xff] %v9736_v24  ;;  %v4420_v20 = vmax.f32 %v3219_v39, 0.0  ;;  %7318 = vmatmul.msk.bf16.gmra.mxu0 %vm2310_vm2, %v2052_v58  ;;  %7378 = vmatmul.msk.bf16.gmra.mxu1 %vm2310_vm2, %v2112_v29  ;;  %v1311_v29 = vadd.f32 %v9666_v37, %v8538_v10 }
 0x2e6   : > { %v4983_v15 = vsel %vm2310_vm2, %v4420_v20, 0.0  ;;  %v1185_v20 = vadd.f32 %v9627_v5, %v8577_v46 }
 0x2e7   : > { %v4984_v60 = vadd.f32 %v4983_v15, %v4982_v49  ;;  %7441 = vmatmul.msk.bf16.gmra.mxu2 %vm2310_vm2, %v2175_v42  ;;  %v1064_v49 = vadd.f32 %v9622_v28, %v8575_v43  ;;  %v1184_v15 = vadd.f32 %v9627_v5, %v8575_v43 }
 0x2e8   : > { %v1697_v26 = vmax.f32 %v1185_v20, 0.0  ;;  %v1454_v20 = vadd.f32 %v9690_v53, %v8532_v6 }
 0x2e9   : > { %v3220_v39 = vpop.f32.mrf.mxu0  ;;  %v9755_v40 = vpop.f32.mrf.mxu1  ;;  %v1576_v28 = vmax.f32 %v1064_v49, 0.0 }
 0x2ea   : > { %v3221_v58 = vadd.f32 %v9695_v22, %v3220_v39  ;;  %v9749_v54 = vpop.f32.mrf.mxu2  ;;  %v9751_v17 = vpop.f32.mrf.mxu3  ;;  %12805 = vst [vmem:[#allocation141_spill] sm:$0xff] %v9755_v40  ;;  %v1310_v39 = vadd.f32 %v9666_v37, %v8532_v6 }
 0x2eb   : > { %12803 = vst [vmem:[#allocation139_spill] sm:$0xff] %v9749_v54 }
 0x2ec   : > { %12804 = vst [vmem:[#allocation140_spill] sm:$0xff] %v9751_v17  ;;  %v4421_v32 = vmax.f32 %v3221_v58, 0.0  ;;  %v1823_v58 = vmax.f32 %v1311_v29, 0.0  ;;  %v817_v17 = vrot.slane %v8524_v2, 1  ;;  %v1455_v29 = vadd.f32 %v9690_v53, %v8538_v10 }
 0x2ee   : > { %v4985_v42 = vsel %vm2310_vm2, %v4421_v32, 0.0  ;;  %v1696_v32 = vmax.f32 %v1184_v15, 0.0 }
 0x2ef   : > { %v4986_v0 = vadd.f32 %v4985_v42, %v4984_v60  ;;  %7513 = vmatmul.msk.bf16.gmra.mxu3 %vm2310_vm2, %v2247_v8  ;;  %v2053_v60 = vpack.c.bf16 %v1577_v55, %v1576_v28  ;;  %v1822_v8 = vmax.f32 %v1310_v39, 0.0  ;;  %v1966_v39 = vmax.f32 %v1454_v20, 0.0 }
 0x2f0   : > { %v2113_v49 = vpack.c.bf16 %v1697_v26, %v1696_v32  ;;  %v1967_v28 = vmax.f32 %v1455_v29, 0.0 }
 0x2f1   : > { %v3223_v31 = vpop.f32.mrf.mxu0  ;;  %v9775_v5 = vpop.f32.mrf.mxu1  ;;  %v2176_v25 = vpack.c.bf16 %v1823_v58, %v1822_v8 }
 0x2f2   : > { %v3224_v24 = vadd.f32 %v9695_v22, %v3223_v31  ;;  %v9771_v54 = vpop.f32.mrf.mxu2  ;;  %v9773_v13 = vpop.f32.mrf.mxu3  ;;  %12808 = vst [vmem:[#allocation144_spill] sm:$0xff] %v9775_v5  ;;  %v9782_v31 = vperm.slane %v817_v17, 0  ;;  %v2248_v32 = vpack.c.bf16 %v1967_v28, %v1966_v39  ;;  %v692_v39 = vld [vmem:[%s12672_s29 + $0x28] sm:$0xff] }
 0x2f3   : > { %12806 = vst [vmem:[#allocation142_spill] sm:$0xff] %v9771_v54 }
 0x2f4   : > { %12807 = vst [vmem:[#allocation143_spill] sm:$0xff] %v9773_v13  ;;  %v4422_v42 = vmax.f32 %v3224_v24, 0.0  ;;  %7319 = vmatmul.msk.bf16.gmra.mxu0 %vm2310_vm2, %v2053_v60  ;;  %7379 = vmatmul.msk.bf16.gmra.mxu1 %vm2310_vm2, %v2113_v49  ;;  %v9788_v24 = vperm.slane %v8503_v50, 0  ;;  %v1066_v17 = vadd.f32 %v9782_v31, %v8481_v35  ;;  %v1313_v49 = vadd.f32 %v9666_v37, %v8577_v46 }
 0x2f6   : > { %v4987_v13 = vsel %vm2310_vm2, %v4422_v42, 0.0  ;;  %v1186_v8 = vadd.f32 %v9788_v24, %v8481_v35  ;;  %v1187_v42 = vadd.f32 %v9788_v24, %v8483_v36  ;;  %v1578_v29 = vmax.f32 %v1066_v17, 0.0 }
 0x2f7   : > { %v4988_v55 = vadd.f32 %v4987_v13, %v4986_v0  ;;  %7442 = vmatmul.msk.bf16.gmra.mxu2 %vm2310_vm2, %v2176_v25  ;;  %v1067_v0 = vadd.f32 %v9782_v31, %v8483_v36 }
 0x2f8   : > { %v1699_v54 = vmax.f32 %v1187_v42, 0.0  ;;  %v1456_v42 = vadd.f32 %v9690_v53, %v8575_v43 }
 0x2f9   : > { %v3225_v15 = vpop.f32.mrf.mxu0  ;;  %v9799_v25 = vpop.f32.mrf.mxu1 }
 0x2fa   : > { %v3226_v26 = vadd.f32 %v9695_v22, %v3225_v15  ;;  %v9791_v58 = vpop.f32.mrf.mxu2  ;;  %v9793_v60 = vpop.f32.mrf.mxu3  ;;  %12811 = vst [vmem:[#allocation147_spill] sm:$0xff] %v9799_v25  ;;  %v1579_v15 = vmax.f32 %v1067_v0, 0.0  ;;  %v1825_v25 = vmax.f32 %v1313_v49, 0.0  ;;  %v1457_v49 = vadd.f32 %v9690_v53, %v8577_v46 }
 0x2fb   : > { %12809 = vst [vmem:[#allocation145_spill] sm:$0xff] %v9791_v58  ;;  %v1698_v58 = vmax.f32 %v1186_v8, 0.0  ;;  %v1069_v53 = vadd.f32 %v9782_v31, %v8505_v51 }
 0x2fc   : > { %12810 = vst [vmem:[#allocation146_spill] sm:$0xff] %v9793_v60  ;;  %v4423_v13 = vmax.f32 %v3226_v26, 0.0  ;;  %v1312_v26 = vadd.f32 %v9666_v37, %v8575_v43 }
 0x2fe   : > { %v4989_v20 = vsel %vm2310_vm2, %v4423_v13, 0.0  ;;  %v1824_v0 = vmax.f32 %v1312_v26, 0.0  ;;  %v9820_v13 = vadd.f32 %v8535_v7, %v692_v39 }
 0x2ff   : > { %v4990_v60 = vadd.f32 %v4989_v20, %v4988_v55  ;;  %7514 = vmatmul.msk.bf16.gmra.mxu3 %vm2310_vm2, %v2248_v32  ;;  %v2054_v55 = vpack.c.bf16 %v1579_v15, %v1578_v29  ;;  %v2114_v20 = vpack.c.bf16 %v1699_v54, %v1698_v58  ;;  %v1968_v15 = vmax.f32 %v1456_v42, 0.0 }
 0x300   : > { %v2177_v8 = vpack.c.bf16 %v1825_v25, %v1824_v0  ;;  %v9833_v7 = vperm.slane %v9820_v13, 0  ;;  %v1969_v54 = vmax.f32 %v1457_v49, 0.0  ;;  %v1068_v0 = vadd.f32 %v9782_v31, %v8501_v47 }
 0x301   : > { %v3228_v28 = vpop.f32.mrf.mxu0  ;;  %v9822_v32 = vpop.f32.mrf.mxu1 }
 0x302   : > { %v3229_v5 = vadd.f32 %v9695_v22, %v3228_v28  ;;  %v9815_v40 = vpop.f32.mrf.mxu2  ;;  %v9817_v17 = vpop.f32.mrf.mxu3  ;;  %12814 = vst [vmem:[#allocation150_spill] sm:$0xff] %v9822_v32  ;;  %v1314_v42 = vadd.f32 %v9833_v7, %v8481_v35  ;;  %v1315_v49 = vadd.f32 %v9833_v7, %v8483_v36 }
 0x303   : > { %12812 = vst [vmem:[#allocation148_spill] sm:$0xff] %v9815_v40 }
 0x304   : > { %12813 = vst [vmem:[#allocation149_spill] sm:$0xff] %v9817_v17  ;;  %v4424_v37 = vmax.f32 %v3229_v5, 0.0  ;;  %7320 = vmatmul.msk.bf16.gmra.mxu0 %vm2310_vm2, %v2054_v55  ;;  %7380 = vmatmul.msk.bf16.gmra.mxu1 %vm2310_vm2, %v2114_v20  ;;  %v2249_v20 = vpack.c.bf16 %v1969_v54, %v1968_v15  ;;  %v1580_v17 = vmax.f32 %v1068_v0, 0.0  ;;  %v1826_v40 = vmax.f32 %v1314_v42, 0.0 }
 0x306   : > { %v4991_v28 = vsel %vm2310_vm2, %v4424_v37, 0.0  ;;  %v1188_v37 = vadd.f32 %v9788_v24, %v8501_v47 }
 0x307   : > { %v4992_v29 = vadd.f32 %v4991_v28, %v4990_v60  ;;  %7443 = vmatmul.msk.bf16.gmra.mxu2 %vm2310_vm2, %v2177_v8  ;;  %v860_v60 = vrot.slane %v9517_v57, 2  ;;  %v1189_v8 = vadd.f32 %v9788_v24, %v8505_v51 }
 0x308   : > { %v1700_v15 = vmax.f32 %v1188_v37, 0.0 }
 0x309   : > { %v3230_v5 = vpop.f32.mrf.mxu0  ;;  %v9843_v55 = vpop.f32.mrf.mxu1  ;;  %v1701_v54 = vmax.f32 %v1189_v8, 0.0 }
 0x30a   : > { %v3231_v58 = vadd.f32 %v9695_v22, %v3230_v5  ;;  %v9836_v25 = vpop.f32.mrf.mxu2  ;;  %v9838_v26 = vpop.f32.mrf.mxu3  ;;  %12817 = vst [vmem:[#allocation153_spill] sm:$0xff] %v9843_v55  ;;  %v1581_v5 = vmax.f32 %v1069_v53, 0.0  ;;  %v1827_v55 = vmax.f32 %v1315_v49, 0.0 }
 0x30b   : > { %12815 = vst [vmem:[#allocation151_spill] sm:$0xff] %v9836_v25 }
 0x30c   : > { %12816 = vst [vmem:[#allocation152_spill] sm:$0xff] %v9838_v26  ;;  %v4425_v39 = vmax.f32 %v3231_v58, 0.0  ;;  %v9857_v26 = vperm.slane %v860_v60, 0  ;;  %v2055_v1 = vpack.c.bf16 %v1581_v5, %v1580_v17  ;;  %v2178_v60 = vpack.c.bf16 %v1827_v55, %v1826_v40 }
 0x30d   : > { %v1071_v55 = vadd.f32 %v9782_v31, %v8538_v10  ;;  %v1070_v5 = vadd.f32 %v9782_v31, %v8532_v6 }
 0x30e   : > { %v4993_v28 = vsel %vm2310_vm2, %v4425_v39, 0.0  ;;  %v1458_v0 = vadd.f32 %v9857_v26, %v8481_v35  ;;  %v1459_v37 = vadd.f32 %v9857_v26, %v8483_v36 }
 0x30f   : > { %v4994_v58 = vadd.f32 %v4993_v28, %v4992_v29  ;;  %7515 = vmatmul.msk.bf16.gmra.mxu3 %vm2310_vm2, %v2249_v20  ;;  %v2115_v29 = vpack.c.bf16 %v1701_v54, %v1700_v15  ;;  %v1191_v15 = vadd.f32 %v9788_v24, %v8538_v10  ;;  %v1316_v54 = vadd.f32 %v9833_v7, %v8501_v47 }
 0x310   : > { %v1971_v8 = vmax.f32 %v1459_v37, 0.0  ;;  %v1190_v37 = vadd.f32 %v9788_v24, %v8532_v6 }
 0x311   : > { %v3233_v25 = vpop.f32.mrf.mxu0  ;;  %v9864_v53 = vpop.f32.mrf.mxu1 }
 0x312   : > { %v3234_v32 = vadd.f32 %v9695_v22, %v3233_v25  ;;  %v9860_v44 = vpop.f32.mrf.mxu2  ;;  %v9862_v48 = vpop.f32.mrf.mxu3  ;;  %12820 = vst [vmem:[#allocation156_spill] sm:$0xff] %v9864_v53 }
 0x313   : > { %12818 = vst [vmem:[#allocation154_spill] sm:$0xff] %v9860_v44 }
 0x314   : > { %12819 = vst [vmem:[#allocation155_spill] sm:$0xff] %v9862_v48  ;;  %v4426_v39 = vmax.f32 %v3234_v32, 0.0  ;;  %7321 = vmatmul.msk.bf16.gmra.mxu0 %vm2310_vm2, %v2055_v1  ;;  %7381 = vmatmul.msk.bf16.gmra.mxu1 %vm2310_vm2, %v2115_v29  ;;  %v1970_v32 = vmax.f32 %v1458_v0, 0.0 }
 0x316   : > { %v4995_v25 = vsel %vm2310_vm2, %v4426_v39, 0.0  ;;  %v1317_v39 = vadd.f32 %v9833_v7, %v8505_v51 }
 0x317   : > { %v4996_v20 = vadd.f32 %v4995_v25, %v4994_v58  ;;  %7444 = vmatmul.msk.bf16.gmra.mxu2 %vm2310_vm2, %v2178_v60  ;;  %v2250_v58 = vpack.c.bf16 %v1971_v8, %v1970_v32  ;;  %v1583_v60 = vmax.f32 %v1071_v55, 0.0  ;;  %v1582_v25 = vmax.f32 %v1070_v5, 0.0 }
 0x318   : > { %v1703_v32 = vmax.f32 %v1191_v15, 0.0  ;;  %v1828_v8 = vmax.f32 %v1316_v54, 0.0  ;;  %v1460_v5 = vadd.f32 %v9857_v26, %v8501_v47  ;;  %v1461_v15 = vadd.f32 %v9857_v26, %v8505_v51 }
 0x319   : > { %v3235_v17 = vpop.f32.mrf.mxu0  ;;  %v9881_v28 = vpop.f32.mrf.mxu1  ;;  %v2056_v44 = vpack.c.bf16 %v1583_v60, %v1582_v25 }
 0x31a   : > { %v3236_v1 = vadd.f32 %v9695_v22, %v3235_v17  ;;  %v9875_v42 = vpop.f32.mrf.mxu2  ;;  %v9877_v40 = vpop.f32.mrf.mxu3  ;;  %12823 = vst [vmem:[#allocation159_spill] sm:$0xff] %v9881_v28  ;;  %v1972_v60 = vmax.f32 %v1460_v5, 0.0 }
 0x31b   : > { %12821 = vst [vmem:[#allocation157_spill] sm:$0xff] %v9875_v42 }
 0x31c   : > { %12822 = vst [vmem:[#allocation158_spill] sm:$0xff] %v9877_v40  ;;  %v4427_v49 = vmax.f32 %v3236_v1, 0.0  ;;  %v1829_v1 = vmax.f32 %v1317_v39, 0.0 }
 0x31e   : > { %v4997_v29 = vsel %vm2310_vm2, %v4427_v49, 0.0  ;;  %v1702_v49 = vmax.f32 %v1190_v37, 0.0  ;;  %v1973_v37 = vmax.f32 %v1461_v15, 0.0 }
 0x31f   : > { %v4998_v0 = vadd.f32 %v4997_v29, %v4996_v20  ;;  %7516 = vmatmul.msk.bf16.gmra.mxu3 %vm2310_vm2, %v2250_v58  ;;  %v2179_v29 = vpack.c.bf16 %v1829_v1, %v1828_v8 }
 0x320   : > { %v2116_v58 = vpack.c.bf16 %v1703_v32, %v1702_v49  ;;  %v1073_v32 = vadd.f32 %v9782_v31, %v8577_v46  ;;  %v2251_v49 = vpack.c.bf16 %v1973_v37, %v1972_v60 }
 0x321   : > { %v3238_v17 = vpop.f32.mrf.mxu0  ;;  %v9900_v20 = vpop.f32.mrf.mxu1 }
 0x322   : > { %v3239_v40 = vadd.f32 %v9695_v22, %v3238_v17  ;;  %v9896_v48 = vpop.f32.mrf.mxu2  ;;  %v9898_v42 = vpop.f32.mrf.mxu3  ;;  %12826 = vst [vmem:[#allocation162_spill] sm:$0xff] %v9900_v20  ;;  %v1585_v15 = vmax.f32 %v1073_v32, 0.0 }
 0x323   : > { %12824 = vst [vmem:[#allocation160_spill] sm:$0xff] %v9896_v48 }
 0x324   : > { %12825 = vst [vmem:[#allocation161_spill] sm:$0xff] %v9898_v42  ;;  %v4428_v55 = vmax.f32 %v3239_v40, 0.0  ;;  %7322 = vmatmul.msk.bf16.gmra.mxu0 %vm2310_vm2, %v2056_v44  ;;  %7382 = vmatmul.msk.bf16.gmra.mxu1 %vm2310_vm2, %v2116_v58  ;;  %v1318_v58 = vadd.f32 %v9833_v7, %v8532_v6  ;;  %v818_v42 = vrot.slane %v8524_v2, 2 }
 0x326   : > { %v4999_v54 = vsel %vm2310_vm2, %v4428_v55, 0.0  ;;  %v1193_v55 = vadd.f32 %v9788_v24, %v8577_v46 }
 0x327   : > { %v5000_v39 = vadd.f32 %v4999_v54, %v4998_v0  ;;  %7445 = vmatmul.msk.bf16.gmra.mxu2 %vm2310_vm2, %v2179_v29  ;;  %v1072_v0 = vadd.f32 %v9782_v31, %v8575_v43  ;;  %v1319_v29 = vadd.f32 %v9833_v7, %v8538_v10 }
 0x328   : > { %v1705_v37 = vmax.f32 %v1193_v55, 0.0  ;;  %v1462_v55 = vadd.f32 %v9857_v26, %v8532_v6 }
 0x329   : > { %v3240_v40 = vpop.f32.mrf.mxu0  ;;  %v9917_v1 = vpop.f32.mrf.mxu1  ;;  %v1584_v31 = vmax.f32 %v1072_v0, 0.0 }
 0x32a   : > { %v3241_v44 = vadd.f32 %v9695_v22, %v3240_v40  ;;  %v9911_v25 = vpop.f32.mrf.mxu2  ;;  %v9913_v17 = vpop.f32.mrf.mxu3  ;;  %12829 = vst [vmem:[#allocation165_spill] sm:$0xff] %v9917_v1  ;;  %v1192_v40 = vadd.f32 %v9788_v24, %v8575_v43 }
 0x32b   : > { %12827 = vst [vmem:[#allocation163_spill] sm:$0xff] %v9911_v25  ;;  %v2057_v32 = vpack.c.bf16 %v1585_v15, %v1584_v31 }
 0x32c   : > { %12828 = vst [vmem:[#allocation164_spill] sm:$0xff] %v9913_v17  ;;  %v4429_v8 = vmax.f32 %v3241_v44, 0.0  ;;  %v1830_v44 = vmax.f32 %v1318_v58, 0.0  ;;  %v1831_v17 = vmax.f32 %v1319_v29, 0.0  ;;  %v1463_v58 = vadd.f32 %v9857_v26, %v8538_v10 }
 0x32d   : > { %v9945_v29 = vperm.slane %v818_v42, 0 }
 0x32e   : > { %v5001_v5 = vsel %vm2310_vm2, %v4429_v8, 0.0  ;;  %v831_v8 = vrot.slane %v8503_v50, 1  ;;  %v2180_v0 = vpack.c.bf16 %v1831_v17, %v1830_v44  ;;  %v1975_v17 = vmax.f32 %v1463_v58, 0.0 }
 0x32f   : > { %v5002_v54 = vadd.f32 %v5001_v5, %v5000_v39  ;;  %7517 = vmatmul.msk.bf16.gmra.mxu3 %vm2310_vm2, %v2251_v49  ;;  %v1704_v39 = vmax.f32 %v1192_v40, 0.0  ;;  %v1074_v42 = vadd.f32 %v9945_v29, %v8481_v35 }
 0x331   : > { %v3243_v60 = vpop.f32.mrf.mxu0  ;;  %v9938_v5 = vpop.f32.mrf.mxu1  ;;  %v2117_v24 = vpack.c.bf16 %v1705_v37, %v1704_v39 }
 0x332   : > { %v3244_v25 = vadd.f32 %v9695_v22, %v3243_v60  ;;  %v9933_v48 = vpop.f32.mrf.mxu2  ;;  %v9935_v1 = vpop.f32.mrf.mxu3  ;;  %12832 = vst [vmem:[#allocation168_spill] sm:$0xff] %v9938_v5  ;;  %v1974_v60 = vmax.f32 %v1462_v55, 0.0  ;;  %v1321_v55 = vadd.f32 %v9833_v7, %v8577_v46 }
 0x333   : > { %12830 = vst [vmem:[#allocation166_spill] sm:$0xff] %v9933_v48 }
 0x334   : > { %12831 = vst [vmem:[#allocation167_spill] sm:$0xff] %v9935_v1  ;;  %v4430_v49 = vmax.f32 %v3244_v25, 0.0  ;;  %7323 = vmatmul.msk.bf16.gmra.mxu0 %vm2310_vm2, %v2057_v32  ;;  %7383 = vmatmul.msk.bf16.gmra.mxu1 %vm2310_vm2, %v2117_v24  ;;  %v9950_v25 = vperm.slane %v831_v8, 0  ;;  %v2252_v8 = vpack.c.bf16 %v1975_v17, %v1974_v60 }
 0x336   : > { %v5003_v15 = vsel %vm2310_vm2, %v4430_v49, 0.0  ;;  %v1194_v24 = vadd.f32 %v9950_v25, %v8481_v35 }
 0x337   : > { %v5004_v40 = vadd.f32 %v5003_v15, %v5002_v54  ;;  %7446 = vmatmul.msk.bf16.gmra.mxu2 %vm2310_vm2, %v2180_v0  ;;  %v1075_v54 = vadd.f32 %v9945_v29, %v8483_v36  ;;  %v1195_v0 = vadd.f32 %v9950_v25, %v8483_v36  ;;  %v1586_v15 = vmax.f32 %v1074_v42, 0.0 }
 0x338   : > { %v1706_v17 = vmax.f32 %v1194_v24, 0.0  ;;  %v845_v42 = vrot.slane %v9820_v13, 1  ;;  %v1464_v24 = vadd.f32 %v9857_v26, %v8575_v43 }
 0x339   : > { %v3245_v31 = vpop.f32.mrf.mxu0  ;;  %v9961_v49 = vpop.f32.mrf.mxu1  ;;  %v1707_v1 = vmax.f32 %v1195_v0, 0.0  ;;  %v1465_v0 = vadd.f32 %v9857_v26, %v8577_v46  ;;  %v1077_v26 = vadd.f32 %v9945_v29, %v8505_v51 }
 0x33a   : > { %v3246_v37 = vadd.f32 %v9695_v22, %v3245_v31  ;;  %v9953_v44 = vpop.f32.mrf.mxu2  ;;  %v9955_v32 = vpop.f32.mrf.mxu3  ;;  %12835 = vst [vmem:[#allocation171_spill] sm:$0xff] %v9961_v49  ;;  %v1587_v31 = vmax.f32 %v1075_v54, 0.0 }
 0x33b   : > { %12833 = vst [vmem:[#allocation169_spill] sm:$0xff] %v9953_v44  ;;  %v1833_v44 = vmax.f32 %v1321_v55, 0.0 }
 0x33c   : > { %12834 = vst [vmem:[#allocation170_spill] sm:$0xff] %v9955_v32  ;;  %v4431_v39 = vmax.f32 %v3246_v37, 0.0  ;;  %v1320_v37 = vadd.f32 %v9833_v7, %v8575_v43  ;;  %v2058_v20 = vpack.c.bf16 %v1587_v31, %v1586_v15  ;;  %v2118_v7 = vpack.c.bf16 %v1707_v1, %v1706_v17 }
 0x33d   : > { %v1976_v31 = vmax.f32 %v1464_v24, 0.0 }
 0x33e   : > { %v5005_v58 = vsel %vm2310_vm2, %v4431_v39, 0.0  ;;  %v1832_v39 = vmax.f32 %v1320_v37, 0.0 }
 0x33f   : > { %v5006_v32 = vadd.f32 %v5005_v58, %v5004_v40  ;;  %7518 = vmatmul.msk.bf16.gmra.mxu3 %vm2310_vm2, %v2252_v8 }
 0x340   : > { %v2181_v8 = vpack.c.bf16 %v1833_v44, %v1832_v39  ;;  %v1076_v39 = vadd.f32 %v9945_v29, %v8501_v47 }
 0x341   : > { %v3248_v60 = vpop.f32.mrf.mxu0  ;;  %v9979_v54 = vpop.f32.mrf.mxu1 }
 0x342   : > { %v3249_v48 = vadd.f32 %v9695_v22, %v3248_v60  ;;  %v9974_v49 = vpop.f32.mrf.mxu2  ;;  %v9976_v5 = vpop.f32.mrf.mxu3  ;;  %12838 = vst [vmem:[#allocation174_spill] sm:$0xff] %v9979_v54 }
 0x343   : > { %12836 = vst [vmem:[#allocation172_spill] sm:$0xff] %v9974_v49 }
 0x344   : > { %12837 = vst [vmem:[#allocation173_spill] sm:$0xff] %v9976_v5  ;;  %v4432_v40 = vmax.f32 %v3249_v48, 0.0  ;;  %7324 = vmatmul.msk.bf16.gmra.mxu0 %vm2310_vm2, %v2058_v20  ;;  %7384 = vmatmul.msk.bf16.gmra.mxu1 %vm2310_vm2, %v2118_v7  ;;  %v9989_v48 = vperm.slane %v845_v42, 0  ;;  %v1977_v20 = vmax.f32 %v1465_v0, 0.0  ;;  %v1196_v42 = vadd.f32 %v9950_v25, %v8501_v47 }
 0x345   : > { %v1197_v7 = vadd.f32 %v9950_v25, %v8505_v51 }
 0x346   : > { %v5007_v55 = vsel %vm2310_vm2, %v4432_v40, 0.0  ;;  %v2253_v40 = vpack.c.bf16 %v1977_v20, %v1976_v31  ;;  %v1323_v24 = vadd.f32 %v9989_v48, %v8483_v36  ;;  %v1708_v31 = vmax.f32 %v1196_v42, 0.0 }
 0x347   : > { %v5008_v58 = vadd.f32 %v5007_v55, %v5006_v32  ;;  %7447 = vmatmul.msk.bf16.gmra.mxu2 %vm2310_vm2, %v2181_v8  ;;  %v861_v32 = vrot.slane %v9517_v57, 3  ;;  %v1322_v8 = vadd.f32 %v9989_v48, %v8481_v35  ;;  %v1589_v55 = vmax.f32 %v1077_v26, 0.0 }
 0x348   : > { %v1709_v20 = vmax.f32 %v1197_v7, 0.0  ;;  %v1835_v49 = vmax.f32 %v1323_v24, 0.0 }
 0x349   : > { %v3250_v15 = vpop.f32.mrf.mxu0  ;;  %v9999_v17 = vpop.f32.mrf.mxu1 }
 0x34a   : > { %v3251_v1 = vadd.f32 %v9695_v22, %v3250_v15  ;;  %v9992_v44 = vpop.f32.mrf.mxu2  ;;  %v9994_v37 = vpop.f32.mrf.mxu3  ;;  %12841 = vst [vmem:[#allocation177_spill] sm:$0xff] %v9999_v17 }
 0x34b   : > { %12839 = vst [vmem:[#allocation175_spill] sm:$0xff] %v9992_v44  ;;  %v1834_v44 = vmax.f32 %v1322_v8, 0.0 }
 0x34c   : > { %12840 = vst [vmem:[#allocation176_spill] sm:$0xff] %v9994_v37  ;;  %v4433_v60 = vmax.f32 %v3251_v1, 0.0  ;;  %v10013_v1 = vperm.slane %v861_v32, 0  ;;  %v1588_v37 = vmax.f32 %v1076_v39, 0.0 }
 0x34d   : > { %v2182_v32 = vpack.c.bf16 %v1835_v49, %v1834_v44  ;;  %v1079_v44 = vadd.f32 %v9945_v29, %v8538_v10 }
 0x34e   : > { %v5009_v0 = vsel %vm2310_vm2, %v4433_v60, 0.0  ;;  %v2059_v53 = vpack.c.bf16 %v1589_v55, %v1588_v37  ;;  %v1466_v39 = vadd.f32 %v10013_v1, %v8481_v35  ;;  %v1467_v42 = vadd.f32 %v10013_v1, %v8483_v36 }
 0x34f   : > { %v5010_v15 = vadd.f32 %v5009_v0, %v5008_v58  ;;  %7519 = vmatmul.msk.bf16.gmra.mxu3 %vm2310_vm2, %v2253_v40  ;;  %v2119_v58 = vpack.c.bf16 %v1709_v20, %v1708_v31  ;;  %v1078_v55 = vadd.f32 %v9945_v29, %v8532_v6  ;;  %v1199_v31 = vadd.f32 %v9950_v25, %v8538_v10 }
 0x350   : > { %v1979_v7 = vmax.f32 %v1467_v42, 0.0  ;;  %v1324_v20 = vadd.f32 %v9989_v48, %v8501_v47  ;;  %v1198_v42 = vadd.f32 %v9950_v25, %v8532_v6 }
 0x351   : > { %v3253_v5 = vpop.f32.mrf.mxu0  ;;  %v10020_v26 = vpop.f32.mrf.mxu1 }
 0x352   : > { %v3254_v17 = vadd.f32 %v9695_v22, %v3253_v5  ;;  %v10016_v54 = vpop.f32.mrf.mxu2  ;;  %v10018_v28 = vpop.f32.mrf.mxu3  ;;  %12844 = vst [vmem:[#allocation180_spill] sm:$0xff] %v10020_v26 }
 0x353   : > { %12842 = vst [vmem:[#allocation178_spill] sm:$0xff] %v10016_v54 }
 0x354   : > { %12843 = vst [vmem:[#allocation179_spill] sm:$0xff] %v10018_v28  ;;  %v4434_v60 = vmax.f32 %v3254_v17, 0.0  ;;  %7325 = vmatmul.msk.bf16.gmra.mxu0 %vm2310_vm2, %v2059_v53  ;;  %7385 = vmatmul.msk.bf16.gmra.mxu1 %vm2310_vm2, %v2119_v58  ;;  %v1978_v17 = vmax.f32 %v1466_v39, 0.0 }
 0x356   : > { %v5011_v5 = vsel %vm2310_vm2, %v4434_v60, 0.0  ;;  %v1325_v60 = vadd.f32 %v9989_v48, %v8505_v51 }
 0x357   : > { %v5012_v40 = vadd.f32 %v5011_v5, %v5010_v15  ;;  %7448 = vmatmul.msk.bf16.gmra.mxu2 %vm2310_vm2, %v2182_v32  ;;  %v2254_v15 = vpack.c.bf16 %v1979_v7, %v1978_v17  ;;  %v1591_v32 = vmax.f32 %v1079_v44, 0.0  ;;  %v1590_v5 = vmax.f32 %v1078_v55, 0.0 }
 0x358   : > { %v1711_v17 = vmax.f32 %v1199_v31, 0.0  ;;  %v1836_v7 = vmax.f32 %v1324_v20, 0.0  ;;  %v1468_v55 = vadd.f32 %v10013_v1, %v8501_v47  ;;  %v1469_v31 = vadd.f32 %v10013_v1, %v8505_v51 }
 0x359   : > { %v3255_v37 = vpop.f32.mrf.mxu0  ;;  %v10037_v0 = vpop.f32.mrf.mxu1  ;;  %v2060_v54 = vpack.c.bf16 %v1591_v32, %v1590_v5 }
 0x35a   : > { %v3256_v53 = vadd.f32 %v9695_v22, %v3255_v37  ;;  %v10031_v8 = vpop.f32.mrf.mxu2  ;;  %v10033_v49 = vpop.f32.mrf.mxu3  ;;  %12847 = vst [vmem:[#allocation183_spill] sm:$0xff] %v10037_v0  ;;  %v1980_v32 = vmax.f32 %v1468_v55, 0.0 }
 0x35b   : > { %12845 = vst [vmem:[#allocation181_spill] sm:$0xff] %v10031_v8 }
 0x35c   : > { %12846 = vst [vmem:[#allocation182_spill] sm:$0xff] %v10033_v49  ;;  %v4435_v24 = vmax.f32 %v3256_v53, 0.0  ;;  %v1837_v53 = vmax.f32 %v1325_v60, 0.0 }
 0x35e   : > { %v5013_v58 = vsel %vm2310_vm2, %v4435_v24, 0.0  ;;  %v1710_v24 = vmax.f32 %v1198_v42, 0.0  ;;  %v1981_v42 = vmax.f32 %v1469_v31, 0.0 }
 0x35f   : > { %v5014_v39 = vadd.f32 %v5013_v58, %v5012_v40  ;;  %7520 = vmatmul.msk.bf16.gmra.mxu3 %vm2310_vm2, %v2254_v15  ;;  %v2183_v58 = vpack.c.bf16 %v1837_v53, %v1836_v7 }
 0x360   : > { %v2120_v15 = vpack.c.bf16 %v1711_v17, %v1710_v24  ;;  %v1081_v17 = vadd.f32 %v9945_v29, %v8577_v46  ;;  %v2255_v24 = vpack.c.bf16 %v1981_v42, %v1980_v32 }
 0x361   : > { %v3258_v37 = vpop.f32.mrf.mxu0  ;;  %v10056_v40 = vpop.f32.mrf.mxu1 }
 0x362   : > { %v3259_v49 = vadd.f32 %v9695_v22, %v3258_v37  ;;  %v10052_v28 = vpop.f32.mrf.mxu2  ;;  %v10054_v8 = vpop.f32.mrf.mxu3  ;;  %12850 = vst [vmem:[#allocation186_spill] sm:$0xff] %v10056_v40  ;;  %v1593_v31 = vmax.f32 %v1081_v17, 0.0 }
 0x363   : > { %12848 = vst [vmem:[#allocation184_spill] sm:$0xff] %v10052_v28 }
 0x364   : > { %12849 = vst [vmem:[#allocation185_spill] sm:$0xff] %v10054_v8  ;;  %v4436_v44 = vmax.f32 %v3259_v49, 0.0  ;;  %7326 = vmatmul.msk.bf16.gmra.mxu0 %vm2310_vm2, %v2060_v54  ;;  %7386 = vmatmul.msk.bf16.gmra.mxu1 %vm2310_vm2, %v2120_v15  ;;  %v1326_v15 = vadd.f32 %v9989_v48, %v8532_v6  ;;  %v819_v8 = vrot.slane %v8524_v2, 3 }
 0x366   : > { %v5015_v20 = vsel %vm2310_vm2, %v4436_v44, 0.0  ;;  %v1201_v44 = vadd.f32 %v9950_v25, %v8577_v46 }
 0x367   : > { %v5016_v60 = vadd.f32 %v5015_v20, %v5014_v39  ;;  %7449 = vmatmul.msk.bf16.gmra.mxu2 %vm2310_vm2, %v2183_v58  ;;  %v1080_v39 = vadd.f32 %v9945_v29, %v8575_v43  ;;  %v1327_v58 = vadd.f32 %v9989_v48, %v8538_v10 }
 0x368   : > { %v1713_v42 = vmax.f32 %v1201_v44, 0.0  ;;  %v1470_v44 = vadd.f32 %v10013_v1, %v8532_v6 }
 0x369   : > { %v3260_v49 = vpop.f32.mrf.mxu0  ;;  %v10073_v53 = vpop.f32.mrf.mxu1  ;;  %v1592_v29 = vmax.f32 %v1080_v39, 0.0 }
 0x36a   : > { %v3261_v54 = vadd.f32 %v9695_v22, %v3260_v49  ;;  %v10067_v5 = vpop.f32.mrf.mxu2  ;;  %v10069_v37 = vpop.f32.mrf.mxu3  ;;  %12853 = vst [vmem:[#allocation189_spill] sm:$0xff] %v10073_v53  ;;  %v1200_v49 = vadd.f32 %v9950_v25, %v8575_v43 }
 0x36b   : > { %12851 = vst [vmem:[#allocation187_spill] sm:$0xff] %v10067_v5  ;;  %v2061_v17 = vpack.c.bf16 %v1593_v31, %v1592_v29 }
 0x36c   : > { %12852 = vst [vmem:[#allocation188_spill] sm:$0xff] %v10069_v37  ;;  %v4437_v7 = vmax.f32 %v3261_v54, 0.0  ;;  %v1838_v54 = vmax.f32 %v1326_v15, 0.0  ;;  %v1839_v37 = vmax.f32 %v1327_v58, 0.0  ;;  %v1471_v15 = vadd.f32 %v10013_v1, %v8538_v10 }
 0x36d   : > { %v10101_v58 = vperm.slane %v819_v8, 0 }
 0x36e   : > { %v5017_v55 = vsel %vm2310_vm2, %v4437_v7, 0.0  ;;  %v832_v7 = vrot.slane %v8503_v50, 2  ;;  %v2184_v39 = vpack.c.bf16 %v1839_v37, %v1838_v54  ;;  %v1983_v37 = vmax.f32 %v1471_v15, 0.0 }
 0x36f   : > { %v5018_v20 = vadd.f32 %v5017_v55, %v5016_v60  ;;  %7521 = vmatmul.msk.bf16.gmra.mxu3 %vm2310_vm2, %v2255_v24  ;;  %v1712_v60 = vmax.f32 %v1200_v49, 0.0  ;;  %v1082_v8 = vadd.f32 %v10101_v58, %v8481_v35 }
 0x371   : > { %v3263_v32 = vpop.f32.mrf.mxu0  ;;  %v10094_v55 = vpop.f32.mrf.mxu1  ;;  %v2121_v25 = vpack.c.bf16 %v1713_v42, %v1712_v60 }
 0x372   : > { %v3264_v5 = vadd.f32 %v9695_v22, %v3263_v32  ;;  %v10089_v28 = vpop.f32.mrf.mxu2  ;;  %v10091_v53 = vpop.f32.mrf.mxu3  ;;  %12856 = vst [vmem:[#allocation192_spill] sm:$0xff] %v10094_v55  ;;  %v1982_v32 = vmax.f32 %v1470_v44, 0.0  ;;  %v1329_v44 = vadd.f32 %v9989_v48, %v8577_v46 }
 0x373   : > { %12854 = vst [vmem:[#allocation190_spill] sm:$0xff] %v10089_v28 }
 0x374   : > { %12855 = vst [vmem:[#allocation191_spill] sm:$0xff] %v10091_v53  ;;  %v4438_v24 = vmax.f32 %v3264_v5, 0.0  ;;  %7327 = vmatmul.msk.bf16.gmra.mxu0 %vm2310_vm2, %v2061_v17  ;;  %7387 = vmatmul.msk.bf16.gmra.mxu1 %vm2310_vm2, %v2121_v25  ;;  %v10106_v5 = vperm.slane %v832_v7, 0  ;;  %v2256_v7 = vpack.c.bf16 %v1983_v37, %v1982_v32 }
 0x376   : > { %v5019_v31 = vsel %vm2310_vm2, %v4438_v24, 0.0  ;;  %v1202_v25 = vadd.f32 %v10106_v5, %v8481_v35 }
 0x377   : > { %v5020_v49 = vadd.f32 %v5019_v31, %v5018_v20  ;;  %7450 = vmatmul.msk.bf16.gmra.mxu2 %vm2310_vm2, %v2184_v39  ;;  %v1083_v20 = vadd.f32 %v10101_v58, %v8483_v36  ;;  %v1203_v39 = vadd.f32 %v10106_v5, %v8483_v36  ;;  %v1594_v31 = vmax.f32 %v1082_v8, 0.0 }
 0x378   : > { %v1714_v37 = vmax.f32 %v1202_v25, 0.0  ;;  %v846_v8 = vrot.slane %v9820_v13, 2  ;;  %v1472_v25 = vadd.f32 %v10013_v1, %v8575_v43 }
 0x379   : > { %v3265_v29 = vpop.f32.mrf.mxu0  ;;  %v10117_v24 = vpop.f32.mrf.mxu1  ;;  %v1715_v53 = vmax.f32 %v1203_v39, 0.0  ;;  %v1473_v39 = vadd.f32 %v10013_v1, %v8577_v46  ;;  %v1085_v1 = vadd.f32 %v10101_v58, %v8505_v51 }
 0x37a   : > { %v3266_v42 = vadd.f32 %v9695_v22, %v3265_v29  ;;  %v10109_v54 = vpop.f32.mrf.mxu2  ;;  %v10111_v17 = vpop.f32.mrf.mxu3  ;;  %12859 = vst [vmem:[#allocation195_spill] sm:$0xff] %v10117_v24  ;;  %v1595_v29 = vmax.f32 %v1083_v20, 0.0 }
 0x37b   : > { %12857 = vst [vmem:[#allocation193_spill] sm:$0xff] %v10109_v54  ;;  %v1841_v54 = vmax.f32 %v1329_v44, 0.0 }
 0x37c   : > { %12858 = vst [vmem:[#allocation194_spill] sm:$0xff] %v10111_v17  ;;  %v4439_v60 = vmax.f32 %v3266_v42, 0.0  ;;  %v1328_v42 = vadd.f32 %v9989_v48, %v8575_v43  ;;  %v2062_v40 = vpack.c.bf16 %v1595_v29, %v1594_v31  ;;  %v2122_v48 = vpack.c.bf16 %v1715_v53, %v1714_v37 }
 0x37d   : > { %v1984_v29 = vmax.f32 %v1472_v25, 0.0 }
 0x37e   : > { %v5021_v15 = vsel %vm2310_vm2, %v4439_v60, 0.0  ;;  %v1840_v60 = vmax.f32 %v1328_v42, 0.0 }
 0x37f   : > { %v5022_v17 = vadd.f32 %v5021_v15, %v5020_v49  ;;  %7522 = vmatmul.msk.bf16.gmra.mxu3 %vm2310_vm2, %v2256_v7 }
 0x380   : > { %v2185_v7 = vpack.c.bf16 %v1841_v54, %v1840_v60  ;;  %v1084_v60 = vadd.f32 %v10101_v58, %v8501_v47 }
 0x381   : > { %v3268_v32 = vpop.f32.mrf.mxu0  ;;  %v10135_v20 = vpop.f32.mrf.mxu1 }
 0x382   : > { %v3269_v28 = vadd.f32 %v9695_v22, %v3268_v32  ;;  %v10130_v24 = vpop.f32.mrf.mxu2  ;;  %v10132_v55 = vpop.f32.mrf.mxu3  ;;  %12862 = vst [vmem:[#allocation198_spill] sm:$0xff] %v10135_v20 }
 0x383   : > { %12860 = vst [vmem:[#allocation196_spill] sm:$0xff] %v10130_v24 }
 0x384   : > { %12861 = vst [vmem:[#allocation197_spill] sm:$0xff] %v10132_v55  ;;  %v4440_v49 = vmax.f32 %v3269_v28, 0.0  ;;  %7328 = vmatmul.msk.bf16.gmra.mxu0 %vm2310_vm2, %v2062_v40  ;;  %7388 = vmatmul.msk.bf16.gmra.mxu1 %vm2310_vm2, %v2122_v48  ;;  %v10145_v28 = vperm.slane %v846_v8, 0  ;;  %v1985_v40 = vmax.f32 %v1473_v39, 0.0  ;;  %v1204_v8 = vadd.f32 %v10106_v5, %v8501_v47 }
 0x385   : > { %v1205_v48 = vadd.f32 %v10106_v5, %v8505_v51 }
 0x386   : > { %v5023_v44 = vsel %vm2310_vm2, %v4440_v49, 0.0  ;;  %v2257_v49 = vpack.c.bf16 %v1985_v40, %v1984_v29  ;;  %v1331_v25 = vadd.f32 %v10145_v28, %v8483_v36  ;;  %v1716_v29 = vmax.f32 %v1204_v8, 0.0 }
 0x387   : > { %v5024_v15 = vadd.f32 %v5023_v44, %v5022_v17  ;;  %7451 = vmatmul.msk.bf16.gmra.mxu2 %vm2310_vm2, %v2185_v7  ;;  %v862_v17 = vrot.slane %v9517_v57, 4  ;;  %v1330_v7 = vadd.f32 %v10145_v28, %v8481_v35  ;;  %v1597_v44 = vmax.f32 %v1085_v1, 0.0 }
 0x388   : > { %v1717_v40 = vmax.f32 %v1205_v48, 0.0  ;;  %v1843_v24 = vmax.f32 %v1331_v25, 0.0  ;;  %v1086_v48 = vadd.f32 %v10101_v58, %v8532_v6  ;;  %v1207_v25 = vadd.f32 %v10106_v5, %v8538_v10 }
 0x389   : > { %v3270_v31 = vpop.f32.mrf.mxu0  ;;  %v10155_v37 = vpop.f32.mrf.mxu1 }
 0x38a   : > { %v3271_v53 = vadd.f32 %v9695_v22, %v3270_v31  ;;  %v10148_v54 = vpop.f32.mrf.mxu2  ;;  %v10150_v42 = vpop.f32.mrf.mxu3  ;;  %12865 = vst [vmem:[#allocation201_spill] sm:$0xff] %v10155_v37  ;;  %v2123_v1 = vpack.c.bf16 %v1717_v40, %v1716_v29 }
 0x38b   : > { %12863 = vst [vmem:[#allocation199_spill] sm:$0xff] %v10148_v54  ;;  %v1842_v54 = vmax.f32 %v1330_v7, 0.0 }
 0x38c   : > { %12864 = vst [vmem:[#allocation200_spill] sm:$0xff] %v10150_v42  ;;  %v4441_v32 = vmax.f32 %v3271_v53, 0.0  ;;  %v10169_v53 = vperm.slane %v862_v17, 0  ;;  %v1596_v42 = vmax.f32 %v1084_v60, 0.0 }
 0x38d   : > { %v2186_v17 = vpack.c.bf16 %v1843_v24, %v1842_v54  ;;  %v10189_v24 = vld [vmem:[%s12677_s7] ss:$0 sm:$0xff] }
 0x38e   : > { %v5025_v39 = vsel %vm2310_vm2, %v4441_v32, 0.0  ;;  %v2063_v0 = vpack.c.bf16 %v1597_v44, %v1596_v42  ;;  %v1474_v32 = vadd.f32 %v10169_v53, %v8481_v35  ;;  %v1475_v60 = vadd.f32 %v10169_v53, %v8483_v36 }
 0x38f   : > { %v5026_v31 = vadd.f32 %v5025_v39, %v5024_v15  ;;  %7523 = vmatmul.msk.bf16.gmra.mxu3 %vm2310_vm2, %v2257_v49  ;;  %v1332_v39 = vadd.f32 %v10145_v28, %v8501_v47  ;;  %v1333_v44 = vadd.f32 %v10145_v28, %v8505_v51 }
 0x391   : > { %v3273_v55 = vpop.f32.mrf.mxu0  ;;  %v10177_v15 = vpop.f32.mrf.mxu1 }
 0x392   : > { %v3274_v37 = vadd.f32 %v9695_v22, %v3273_v55  ;;  %v10172_v20 = vpop.f32.mrf.mxu2  ;;  %v10174_v9 = vpop.f32.mrf.mxu3 }
 0x393   : > { %12866 = vst [vmem:[#allocation202_spill] sm:$0xff] %v10172_v20 }
 0x394   : > { %v4442_v26 = vmax.f32 %v3274_v37, 0.0  ;;  %12867 = vst [vmem:[#allocation203_spill] sm:$0xff] %v10174_v9  ;;  %7329 = vmatmul.msk.bf16.gmra.mxu0 %vm2310_vm2, %v2063_v0  ;;  %7389 = vmatmul.msk.bf16.gmra.mxu1 %vm2310_vm2, %v2123_v1  ;;  %v1986_v37 = vmax.f32 %v1474_v32, 0.0  ;;  %v1987_v0 = vmax.f32 %v1475_v60, 0.0  ;;  %v1206_v32 = vadd.f32 %v10106_v5, %v8532_v6 }
 0x395   : > { %v1598_v60 = vmax.f32 %v1086_v48, 0.0  ;;  %v1477_v48 = vadd.f32 %v10169_v53, %v8505_v51 }
 0x396   : > { %v5027_v22 = vsel %vm2310_vm2, %v4442_v26, 0.0  ;;  %v1087_v26 = vadd.f32 %v10101_v58, %v8538_v10  ;;  %v2258_v7 = vpack.c.bf16 %v1987_v0, %v1986_v37  ;;  %v1844_v37 = vmax.f32 %v1332_v39, 0.0 }
 0x397   : > { %v5028_v55 = vadd.f32 %v5027_v22, %v5026_v31  ;;  %7452 = vmatmul.msk.bf16.gmra.mxu2 %vm2310_vm2, %v2186_v17  ;;  %v1845_v0 = vmax.f32 %v1333_v44, 0.0 }
 0x398   : > { %v1599_v40 = vmax.f32 %v1087_v26, 0.0 }
 0x399   : > { %v3275_v42 = vpop.f32.mrf.mxu0  ;;  %v10207_v17 = vpop.f32.mrf.mxu1 }
 0x39a   : > { %v3276_v54 = vadd.f32 %v10189_v24, %v3275_v42  ;;  %v10192_v8 = vpop.f32.mrf.mxu2  ;;  %v10205_v29 = vpop.f32.mrf.mxu3  ;;  %12870 = vst [vmem:[#allocation206_spill] sm:$0xff] %v10207_v17  ;;  %v1719_v42 = vmax.f32 %v1207_v25, 0.0 }
 0x39b   : > { %12868 = vst [vmem:[#allocation204_spill] sm:$0xff] %v10192_v8 }
 0x39c   : > { %v4443_v49 = vmax.f32 %v3276_v54, 0.0  ;;  %12869 = vst [vmem:[#allocation205_spill] sm:$0xff] %v10205_v29  ;;  %v1718_v29 = vmax.f32 %v1206_v32, 0.0 }
 0x39e   : > { %v5029_v31 = vsel %vm2310_vm2, %v4443_v49, 0.0  ;;  %v2064_v49 = vpack.c.bf16 %v1599_v40, %v1598_v60  ;;  %v1989_v60 = vmax.f32 %v1477_v48, 0.0 }
 0x39f   : > { %v5030_v1 = vadd.f32 %v5029_v31, %v5028_v55  ;;  %7524 = vmatmul.msk.bf16.gmra.mxu3 %vm2310_vm2, %v2258_v7  ;;  %v2124_v55 = vpack.c.bf16 %v1719_v42, %v1718_v29  ;;  %v2187_v31 = vpack.c.bf16 %v1845_v0, %v1844_v37  ;;  %v1476_v7 = vadd.f32 %v10169_v53, %v8501_v47 }
 0x3a0   : > { %v1089_v37 = vadd.f32 %v10101_v58, %v8577_v46 }
 0x3a1   : > { %v3278_v22 = vpop.f32.mrf.mxu0  ;;  %v10225_v40 = vpop.f32.mrf.mxu1  ;;  %v1988_v29 = vmax.f32 %v1476_v7, 0.0 }
 0x3a2   : > { %v3279_v54 = vadd.f32 %v10189_v24, %v3278_v22  ;;  %v10213_v9 = vpop.f32.mrf.mxu2  ;;  %v10223_v44 = vpop.f32.mrf.mxu3  ;;  %12873 = vst [vmem:[#allocation209_spill] sm:$0xff] %v10225_v40  ;;  %v1601_v7 = vmax.f32 %v1089_v37, 0.0 }
 0x3a3   : > { %12871 = vst [vmem:[#allocation207_spill] sm:$0xff] %v10213_v9 }
 0x3a4   : > { %v4444_v26 = vmax.f32 %v3279_v54, 0.0  ;;  %7330 = vmatmul.msk.bf16.gmra.mxu0 %vm2310_vm2, %v2064_v49  ;;  %7390 = vmatmul.msk.bf16.gmra.mxu1 %vm2310_vm2, %v2124_v55  ;;  %12872 = vst [vmem:[#allocation208_spill] sm:$0xff] %v10223_v44  ;;  %v2259_v54 = vpack.c.bf16 %v1989_v60, %v1988_v29  ;;  %v1209_v49 = vadd.f32 %v10106_v5, %v8577_v46  ;;  %v820_v44 = vrot.slane %v8524_v2, 4 }
 0x3a5   : > { %v1335_v55 = vadd.f32 %v10145_v28, %v8538_v10 }
 0x3a6   : > { %v5031_v25 = vsel %vm2310_vm2, %v4444_v26, 0.0  ;;  %v1334_v26 = vadd.f32 %v10145_v28, %v8532_v6  ;;  %v1721_v29 = vmax.f32 %v1209_v49, 0.0 }
 0x3a7   : > { %v5032_v39 = vadd.f32 %v5031_v25, %v5030_v1  ;;  %7453 = vmatmul.msk.bf16.gmra.mxu2 %vm2310_vm2, %v2187_v31  ;;  %v1088_v1 = vadd.f32 %v10101_v58, %v8575_v43  ;;  %v1208_v25 = vadd.f32 %v10106_v5, %v8575_v43 }
 0x3a8   : > { %v1846_v60 = vmax.f32 %v1334_v26, 0.0  ;;  %v1478_v26 = vadd.f32 %v10169_v53, %v8532_v6 }
 0x3a9   : > { %v3280_v32 = vpop.f32.mrf.mxu0  ;;  %v1600_v58 = vmax.f32 %v1088_v1, 0.0 }
 0x3aa   : > { %v3281_v22 = vadd.f32 %v10189_v24, %v3280_v32  ;;  %v10228_v42 = vpop.f32.mrf.mxu2 }
 0x3ab   : > { %12874 = vst [vmem:[#allocation210_spill] sm:$0xff] %v10228_v42  ;;  %v10245_v42 = vpop.f32.mrf.mxu3  ;;  %v2065_v37 = vpack.c.bf16 %v1601_v7, %v1600_v58 }
 0x3ac   : > { %v4445_v0 = vmax.f32 %v3281_v22, 0.0  ;;  %v1847_v22 = vmax.f32 %v1335_v55, 0.0  ;;  %12875 = vst [vmem:[#allocation211_spill] sm:$0xff] %v10245_v42  ;;  %v1479_v55 = vadd.f32 %v10169_v53, %v8538_v10 }
 0x3ae   : > { %v5033_v31 = vsel %vm2310_vm2, %v4445_v0, 0.0  ;;  %v1720_v0 = vmax.f32 %v1208_v25, 0.0  ;;  %v2188_v49 = vpack.c.bf16 %v1847_v22, %v1846_v60 }
 0x3af   : > { %v5034_v48 = vadd.f32 %v5033_v31, %v5032_v39  ;;  %7525 = vmatmul.msk.bf16.gmra.mxu3 %vm2310_vm2, %v2259_v54  ;;  %v10250_v39 = vpop.f32.mrf.mxu1  ;;  %v833_v54 = vrot.slane %v8503_v50, 3  ;;  %v10258_v31 = vperm.slane %v820_v44, 0 }
 0x3b0   : > { %12877 = vst [vmem:[#allocation213_spill] sm:$0xff] %v10250_v39  ;;  %v2125_v1 = vpack.c.bf16 %v1721_v29, %v1720_v0  ;;  %v1991_v29 = vmax.f32 %v1479_v55, 0.0 }
 0x3b1   : > { %v3283_v32 = vpop.f32.mrf.mxu0  ;;  %v1090_v44 = vadd.f32 %v10258_v31, %v8481_v35 }
 0x3b2   : > { %v3284_v9 = vadd.f32 %v10189_v24, %v3283_v32  ;;  %v10248_v8 = vpop.f32.mrf.mxu2  ;;  %v1990_v32 = vmax.f32 %v1478_v26, 0.0  ;;  %v1337_v26 = vadd.f32 %v10145_v28, %v8577_v46 }
 0x3b3   : > { %12876 = vst [vmem:[#allocation212_spill] sm:$0xff] %v10248_v8 }
 0x3b4   : > { %v4446_v5 = vmax.f32 %v3284_v9, 0.0  ;;  %7331 = vmatmul.msk.bf16.gmra.mxu0 %vm2310_vm2, %v2065_v37  ;;  %7391 = vmatmul.msk.bf16.gmra.mxu1 %vm2310_vm2, %v2125_v1  ;;  %v10263_v9 = vperm.slane %v833_v54, 0  ;;  %v1091_v37 = vadd.f32 %v10258_v31, %v8483_v36  ;;  %v2260_v54 = vpack.c.bf16 %v1991_v29, %v1990_v32 }
 0x3b6   : > { %v5035_v7 = vsel %vm2310_vm2, %v4446_v5, 0.0  ;;  %v1210_v1 = vadd.f32 %v10263_v9, %v8481_v35 }
 0x3b7   : > { %v5036_v58 = vadd.f32 %v5035_v7, %v5034_v48  ;;  %7454 = vmatmul.msk.bf16.gmra.mxu2 %vm2310_vm2, %v2188_v49  ;;  %v10272_v48 = vpop.f32.mrf.mxu3  ;;  %v10274_v5 = vpop.f32.mrf.mxu1  ;;  %v1211_v49 = vadd.f32 %v10263_v9, %v8483_v36  ;;  %v1602_v7 = vmax.f32 %v1090_v44, 0.0 }
 0x3b8   : > { %12879 = vst [vmem:[#allocation215_spill] sm:$0xff] %v10272_v48  ;;  %v1722_v29 = vmax.f32 %v1210_v1, 0.0 }
 0x3b9   : > { %v3285_v25 = vpop.f32.mrf.mxu0  ;;  %12880 = vst [vmem:[#allocation216_spill] sm:$0xff] %v10274_v5  ;;  %v1723_v48 = vmax.f32 %v1211_v49, 0.0 }
 0x3ba   : > { %v3286_v60 = vadd.f32 %v10189_v24, %v3285_v25  ;;  %v10266_v22 = vpop.f32.mrf.mxu2  ;;  %v1603_v25 = vmax.f32 %v1091_v37, 0.0 }
 0x3bb   : > { %12878 = vst [vmem:[#allocation214_spill] sm:$0xff] %v10266_v22  ;;  %v1849_v22 = vmax.f32 %v1337_v26, 0.0 }
 0x3bc   : > { %v4447_v0 = vmax.f32 %v3286_v60, 0.0  ;;  %v1336_v60 = vadd.f32 %v10145_v28, %v8575_v43  ;;  %v2066_v5 = vpack.c.bf16 %v1603_v25, %v1602_v7  ;;  %v1480_v28 = vadd.f32 %v10169_v53, %v8575_v43 }
 0x3bd   : > { %v863_v25 = vrot.slane %v9517_v57, 5 }
 0x3be   : > { %v5037_v55 = vsel %vm2310_vm2, %v4447_v0, 0.0  ;;  %v1848_v39 = vmax.f32 %v1336_v60, 0.0  ;;  %v847_v0 = vrot.slane %v9820_v13, 3 }
 0x3bf   : > { %v5038_v42 = vadd.f32 %v5037_v55, %v5036_v58  ;;  %7526 = vmatmul.msk.bf16.gmra.mxu3 %vm2310_vm2, %v2260_v54  ;;  %v2126_v58 = vpack.c.bf16 %v1723_v48, %v1722_v29  ;;  %v1481_v54 = vadd.f32 %v10169_v53, %v8577_v46  ;;  %v10295_v1 = vpop.f32.mrf.mxu3  ;;  %v10298_v26 = vpop.f32.mrf.mxu1  ;;  %v1093_v53 = vadd.f32 %v10258_v31, %v8505_v51 }
 0x3c0   : > { %v2189_v37 = vpack.c.bf16 %v1849_v22, %v1848_v39  ;;  %12882 = vst [vmem:[#allocation218_spill] sm:$0xff] %v10295_v1  ;;  %v1992_v22 = vmax.f32 %v1480_v28, 0.0 }
 0x3c1   : > { %v3288_v32 = vpop.f32.mrf.mxu0  ;;  %12883 = vst [vmem:[#allocation219_spill] sm:$0xff] %v10298_v26  ;;  %v1993_v48 = vmax.f32 %v1481_v54, 0.0  ;;  %v1605_v28 = vmax.f32 %v1093_v53, 0.0 }
 0x3c2   : > { %v3289_v8 = vadd.f32 %v10189_v24, %v3288_v32  ;;  %v10287_v20 = vpop.f32.mrf.mxu2  ;;  %v1212_v32 = vadd.f32 %v10263_v9, %v8501_v47 }
 0x3c3   : > { %12881 = vst [vmem:[#allocation217_spill] sm:$0xff] %v10287_v20  ;;  %v2261_v29 = vpack.c.bf16 %v1993_v48, %v1992_v22 }
 0x3c4   : > { %v4448_v44 = vmax.f32 %v3289_v8, 0.0  ;;  %7332 = vmatmul.msk.bf16.gmra.mxu0 %vm2310_vm2, %v2066_v5  ;;  %7392 = vmatmul.msk.bf16.gmra.mxu1 %vm2310_vm2, %v2126_v58  ;;  %v10302_v8 = vperm.slane %v847_v0, 0  ;;  %v1213_v0 = vadd.f32 %v10263_v9, %v8505_v51  ;;  %v1724_v1 = vmax.f32 %v1212_v32, 0.0 }
 0x3c6   : > { %v5039_v49 = vsel %vm2310_vm2, %v4448_v44, 0.0  ;;  %v1338_v44 = vadd.f32 %v10302_v8, %v8481_v35  ;;  %v1339_v58 = vadd.f32 %v10302_v8, %v8483_v36 }
 0x3c7   : > { %v5040_v55 = vadd.f32 %v5039_v49, %v5038_v42  ;;  %7455 = vmatmul.msk.bf16.gmra.mxu2 %vm2310_vm2, %v2189_v37  ;;  %v1092_v42 = vadd.f32 %v10258_v31, %v8501_v47  ;;  %v10322_v49 = vperm.slane %v863_v25, 0  ;;  %v10326_v48 = vpop.f32.mrf.mxu1 }
 0x3c8   : > { %12886 = vst [vmem:[#allocation222_spill] sm:$0xff] %v10326_v48  ;;  %v1850_v20 = vmax.f32 %v1338_v44, 0.0  ;;  %v1851_v26 = vmax.f32 %v1339_v58, 0.0 }
 0x3c9   : > { %v3290_v39 = vpop.f32.mrf.mxu0  ;;  %v1604_v22 = vmax.f32 %v1092_v42, 0.0  ;;  %v1482_v42 = vadd.f32 %v10322_v49, %v8481_v35 }
 0x3ca   : > { %v3291_v5 = vadd.f32 %v10189_v24, %v3290_v39  ;;  %v10305_v7 = vpop.f32.mrf.mxu2  ;;  %v10324_v39 = vpop.f32.mrf.mxu3 }
 0x3cb   : > { %12884 = vst [vmem:[#allocation220_spill] sm:$0xff] %v10305_v7  ;;  %v1725_v7 = vmax.f32 %v1213_v0, 0.0  ;;  %v2067_v53 = vpack.c.bf16 %v1605_v28, %v1604_v22  ;;  %v1994_v58 = vmax.f32 %v1482_v42, 0.0 }
 0x3cc   : > { %v4449_v60 = vmax.f32 %v3291_v5, 0.0  ;;  %12885 = vst [vmem:[#allocation221_spill] sm:$0xff] %v10324_v39 }
 0x3cd   : > { %v2127_v25 = vpack.c.bf16 %v1725_v7, %v1724_v1 }
 0x3ce   : > { %v5041_v37 = vsel %vm2310_vm2, %v4449_v60, 0.0  ;;  %v2190_v60 = vpack.c.bf16 %v1851_v26, %v1850_v20  ;;  %v1095_v26 = vadd.f32 %v10258_v31, %v8538_v10 }
 0x3cf   : > { %v5042_v54 = vadd.f32 %v5041_v37, %v5040_v55  ;;  %7527 = vmatmul.msk.bf16.gmra.mxu3 %vm2310_vm2, %v2261_v29  ;;  %v1483_v29 = vadd.f32 %v10322_v49, %v8483_v36  ;;  %v10346_v7 = vpop.f32.mrf.mxu1 }
 0x3d0   : > { %12890 = vst [vmem:[#allocation226_spill] sm:$0xff] %v10346_v7 }
 0x3d1   : > { %v3293_v5 = vpop.f32.mrf.mxu0 }
 0x3d2   : > { %v3294_v40 = vadd.f32 %v10189_v24, %v3293_v5  ;;  %v10329_v17 = vpop.f32.mrf.mxu2  ;;  %v10339_v37 = vpop.f32.mrf.mxu3  ;;  %v1215_v5 = vadd.f32 %v10263_v9, %v8538_v10 }
 0x3d3   : > { %12887 = vst [vmem:[#allocation223_spill] sm:$0xff] %v10329_v17 }
 0x3d4   : > { %v4450_v55 = vmax.f32 %v3294_v40, 0.0  ;;  %7333 = vmatmul.msk.bf16.gmra.mxu0 %vm2310_vm2, %v2067_v53  ;;  %7393 = vmatmul.msk.bf16.gmra.mxu1 %vm2310_vm2, %v2127_v25  ;;  %v1995_v40 = vmax.f32 %v1483_v29, 0.0  ;;  %12888 = vst [vmem:[#allocation224_spill] sm:$0xff] %v10339_v37  ;;  %v1340_v53 = vadd.f32 %v10302_v8, %v8501_v47  ;;  %v1214_v29 = vadd.f32 %v10263_v9, %v8532_v6 }
 0x3d6   : > { %v5043_v32 = vsel %vm2310_vm2, %v4450_v55, 0.0  ;;  %v2262_v22 = vpack.c.bf16 %v1995_v40, %v1994_v58  ;;  %v1341_v55 = vadd.f32 %v10302_v8, %v8505_v51  ;;  %v1727_v58 = vmax.f32 %v1215_v5, 0.0 }
 0x3d7   : > { %v5044_v0 = vadd.f32 %v5043_v32, %v5042_v54  ;;  %7456 = vmatmul.msk.bf16.gmra.mxu2 %vm2310_vm2, %v2190_v60  ;;  %v1094_v54 = vadd.f32 %v10258_v31, %v8532_v6  ;;  %v1607_v60 = vmax.f32 %v1095_v26, 0.0  ;;  %v1852_v40 = vmax.f32 %v1340_v53, 0.0 }
 0x3d8   : > { %v1726_v17 = vmax.f32 %v1214_v29, 0.0  ;;  %v1485_v5 = vadd.f32 %v10322_v49, %v8505_v51  ;;  %v1097_v29 = vadd.f32 %v10258_v31, %v8577_v46 }
 0x3d9   : > { %v3295_v44 = vpop.f32.mrf.mxu0  ;;  %v1606_v32 = vmax.f32 %v1094_v54, 0.0  ;;  %v1484_v54 = vadd.f32 %v10322_v49, %v8501_v47 }
 0x3da   : > { %v3296_v20 = vadd.f32 %v10189_v24, %v3295_v44  ;;  %v10342_v1 = vpop.f32.mrf.mxu2  ;;  %v10363_v7 = vpop.f32.mrf.mxu3 }
 0x3db   : > { %12889 = vst [vmem:[#allocation225_spill] sm:$0xff] %v10342_v1  ;;  %v2068_v1 = vpack.c.bf16 %v1607_v60, %v1606_v32 }
 0x3dc   : > { %v4451_v28 = vmax.f32 %v3296_v20, 0.0  ;;  %v1853_v20 = vmax.f32 %v1341_v55, 0.0  ;;  %12892 = vst [vmem:[#allocation228_spill] sm:$0xff] %v10363_v7  ;;  %v821_v7 = vrot.slane %v8524_v2, 5 }
 0x3de   : > { %v5045_v25 = vsel %vm2310_vm2, %v4451_v28, 0.0  ;;  %v2128_v28 = vpack.c.bf16 %v1727_v58, %v1726_v17 }
 0x3df   : > { %v5046_v42 = vadd.f32 %v5045_v25, %v5044_v0  ;;  %7528 = vmatmul.msk.bf16.gmra.mxu3 %vm2310_vm2, %v2262_v22  ;;  %v10366_v0 = vpop.f32.mrf.mxu1  ;;  %v2191_v22 = vpack.c.bf16 %v1853_v20, %v1852_v40  ;;  %v1996_v25 = vmax.f32 %v1484_v54, 0.0  ;;  %v1342_v40 = vadd.f32 %v10302_v8, %v8532_v6 }
 0x3e0   : > { %12893 = vst [vmem:[#allocation229_spill] sm:$0xff] %v10366_v0  ;;  %v1343_v20 = vadd.f32 %v10302_v8, %v8538_v10 }
 0x3e1   : > { %v3298_v44 = vpop.f32.mrf.mxu0 }
 0x3e2   : > { %v3299_v37 = vadd.f32 %v10189_v24, %v3298_v44  ;;  %v10361_v39 = vpop.f32.mrf.mxu2  ;;  %v1096_v44 = vadd.f32 %v10258_v31, %v8575_v43  ;;  %v1216_v31 = vadd.f32 %v10263_v9, %v8575_v43 }
 0x3e3   : > { %12891 = vst [vmem:[#allocation227_spill] sm:$0xff] %v10361_v39 }
 0x3e4   : > { %v4452_v26 = vmax.f32 %v3299_v37, 0.0  ;;  %7334 = vmatmul.msk.bf16.gmra.mxu0 %vm2310_vm2, %v2068_v1  ;;  %7394 = vmatmul.msk.bf16.gmra.mxu1 %vm2310_vm2, %v2128_v28  ;;  %v1997_v1 = vmax.f32 %v1485_v5, 0.0 }
 0x3e6   : > { %v5047_v53 = vsel %vm2310_vm2, %v4452_v26, 0.0  ;;  %v2263_v58 = vpack.c.bf16 %v1997_v1, %v1996_v25  ;;  %v10388_v26 = vpop.f32.mrf.mxu3  ;;  %v1854_v1 = vmax.f32 %v1342_v40, 0.0  ;;  %v10406_v40 = vperm.slane %v821_v7, 0 }
 0x3e7   : > { %v5048_v55 = vadd.f32 %v5047_v53, %v5046_v42  ;;  %7457 = vmatmul.msk.bf16.gmra.mxu2 %vm2310_vm2, %v2191_v22  ;;  %v1217_v42 = vadd.f32 %v10263_v9, %v8577_v46  ;;  %12895 = vst [vmem:[#allocation231_spill] sm:$0xff] %v10388_v26  ;;  %v1609_v22 = vmax.f32 %v1097_v29, 0.0  ;;  %v10391_v54 = vpop.f32.mrf.mxu1  ;;  %v1608_v53 = vmax.f32 %v1096_v44, 0.0 }
 0x3e8   : > { %12896 = vst [vmem:[#allocation232_spill] sm:$0xff] %v10391_v54  ;;  %v1486_v44 = vadd.f32 %v10322_v49, %v8532_v6 }
 0x3e9   : > { %v3300_v37 = vpop.f32.mrf.mxu0  ;;  %v1729_v25 = vmax.f32 %v1217_v42, 0.0  ;;  %v2069_v29 = vpack.c.bf16 %v1609_v22, %v1608_v53  ;;  %v1487_v42 = vadd.f32 %v10322_v49, %v8538_v10 }
 0x3ea   : > { %v3301_v60 = vadd.f32 %v10189_v24, %v3300_v37  ;;  %v10376_v17 = vpop.f32.mrf.mxu2 }
 0x3eb   : > { %12894 = vst [vmem:[#allocation230_spill] sm:$0xff] %v10376_v17 }
 0x3ec   : > { %v4453_v32 = vmax.f32 %v3301_v60, 0.0  ;;  %v1855_v60 = vmax.f32 %v1343_v20, 0.0 }
 0x3ee   : > { %v5049_v28 = vsel %vm2310_vm2, %v4453_v32, 0.0  ;;  %v1728_v32 = vmax.f32 %v1216_v31, 0.0  ;;  %v2192_v9 = vpack.c.bf16 %v1855_v60, %v1854_v1  ;;  %v1999_v1 = vmax.f32 %v1487_v42, 0.0 }
 0x3ef   : > { %v5050_v5 = vadd.f32 %v5049_v28, %v5048_v55  ;;  %7529 = vmatmul.msk.bf16.gmra.mxu3 %vm2310_vm2, %v2263_v58  ;;  %v834_v55 = vrot.slane %v8503_v50, 4  ;;  %v10415_v31 = vpop.f32.mrf.mxu1 }
 0x3f0   : > { %v2129_v58 = vpack.c.bf16 %v1729_v25, %v1728_v32  ;;  %12899 = vst [vmem:[#allocation235_spill] sm:$0xff] %v10415_v31  ;;  %v1998_v25 = vmax.f32 %v1486_v44, 0.0 }
 0x3f1   : > { %v3303_v37 = vpop.f32.mrf.mxu0  ;;  %v10413_v22 = vperm.slane %v834_v55, 0 }
 0x3f2   : > { %v3304_v26 = vadd.f32 %v10189_v24, %v3303_v37  ;;  %v10398_v17 = vpop.f32.mrf.mxu2 }
 0x3f3   : > { %12897 = vst [vmem:[#allocation233_spill] sm:$0xff] %v10398_v17  ;;  %v1218_v55 = vadd.f32 %v10413_v22, %v8481_v35 }
 0x3f4   : > { %v4454_v28 = vmax.f32 %v3304_v26, 0.0  ;;  %7335 = vmatmul.msk.bf16.gmra.mxu0 %vm2310_vm2, %v2069_v29  ;;  %7395 = vmatmul.msk.bf16.gmra.mxu1 %vm2310_vm2, %v2129_v58  ;;  %v10411_v26 = vpop.f32.mrf.mxu3  ;;  %v1099_v29 = vadd.f32 %v10406_v40, %v8483_v36  ;;  %v1219_v58 = vadd.f32 %v10413_v22, %v8483_v36 }
 0x3f5   : > { %12898 = vst [vmem:[#allocation234_spill] sm:$0xff] %v10411_v26 }
 0x3f6   : > { %v5051_v20 = vsel %vm2310_vm2, %v4454_v28, 0.0  ;;  %v2264_v28 = vpack.c.bf16 %v1999_v1, %v1998_v25  ;;  %v1730_v1 = vmax.f32 %v1218_v55, 0.0  ;;  %v1731_v26 = vmax.f32 %v1219_v58, 0.0 }
 0x3f7   : > { %v5052_v37 = vadd.f32 %v5051_v20, %v5050_v5  ;;  %7458 = vmatmul.msk.bf16.gmra.mxu2 %vm2310_vm2, %v2192_v9  ;;  %v1098_v5 = vadd.f32 %v10406_v40, %v8481_v35  ;;  %v1345_v9 = vadd.f32 %v10302_v8, %v8577_v46  ;;  %v1611_v20 = vmax.f32 %v1099_v29, 0.0 }
 0x3f8   : > { %v1488_v55 = vadd.f32 %v10322_v49, %v8575_v43  ;;  %v1489_v58 = vadd.f32 %v10322_v49, %v8577_v46  ;;  %v864_v49 = vrot.slane %v9517_v57, 6 }
 0x3f9   : > { %v3305_v53 = vpop.f32.mrf.mxu0  ;;  %v1610_v42 = vmax.f32 %v1098_v5, 0.0 }
 0x3fa   : > { %v3306_v60 = vadd.f32 %v10189_v24, %v3305_v53  ;;  %v10418_v7 = vpop.f32.mrf.mxu2 }
 0x3fb   : > { %12900 = vst [vmem:[#allocation236_spill] sm:$0xff] %v10418_v7  ;;  %v1857_v7 = vmax.f32 %v1345_v9, 0.0  ;;  %v2070_v54 = vpack.c.bf16 %v1611_v20, %v1610_v42  ;;  %v2000_v20 = vmax.f32 %v1488_v55, 0.0 }
 0x3fc   : > { %v4455_v32 = vmax.f32 %v3306_v60, 0.0  ;;  %v1344_v60 = vadd.f32 %v10302_v8, %v8575_v43  ;;  %v10434_v17 = vpop.f32.mrf.mxu3  ;;  %v2130_v8 = vpack.c.bf16 %v1731_v26, %v1730_v1  ;;  %v1100_v1 = vadd.f32 %v10406_v40, %v8501_v47 }
 0x3fd   : > { %12901 = vst [vmem:[#allocation237_spill] sm:$0xff] %v10434_v17 }
 0x3fe   : > { %v5053_v44 = vsel %vm2310_vm2, %v4455_v32, 0.0  ;;  %v10439_v32 = vpop.f32.mrf.mxu1  ;;  %v1856_v5 = vmax.f32 %v1344_v60, 0.0  ;;  %v1101_v60 = vadd.f32 %v10406_v40, %v8505_v51 }
 0x3ff   : > { %v5054_v53 = vadd.f32 %v5053_v44, %v5052_v37  ;;  %7530 = vmatmul.msk.bf16.gmra.mxu3 %vm2310_vm2, %v2264_v28  ;;  %12903 = vst [vmem:[#allocation239_spill] sm:$0xff] %v10439_v32  ;;  %v848_v37 = vrot.slane %v9820_v13, 4 }
 0x400   : > { %v2193_v28 = vpack.c.bf16 %v1857_v7, %v1856_v5  ;;  %v1220_v5 = vadd.f32 %v10413_v22, %v8501_v47 }
 0x401   : > { %v3308_v25 = vpop.f32.mrf.mxu0  ;;  %v10450_v42 = vperm.slane %v848_v37, 0 }
 0x402   : > { %v3309_v39 = vadd.f32 %v10189_v24, %v3308_v25  ;;  %v10437_v31 = vpop.f32.mrf.mxu2 }
 0x403   : > { %12902 = vst [vmem:[#allocation238_spill] sm:$0xff] %v10437_v31  ;;  %v1347_v55 = vadd.f32 %v10450_v42, %v8483_v36 }
 0x404   : > { %v4456_v29 = vmax.f32 %v3309_v39, 0.0  ;;  %7336 = vmatmul.msk.bf16.gmra.mxu0 %vm2310_vm2, %v2070_v54  ;;  %7396 = vmatmul.msk.bf16.gmra.mxu1 %vm2310_vm2, %v2130_v8  ;;  %v2001_v54 = vmax.f32 %v1489_v58, 0.0  ;;  %v10458_v25 = vpop.f32.mrf.mxu3  ;;  %v1221_v8 = vadd.f32 %v10413_v22, %v8505_v51 }
 0x405   : > { %12905 = vst [vmem:[#allocation241_spill] sm:$0xff] %v10458_v25  ;;  %v1612_v25 = vmax.f32 %v1100_v1, 0.0  ;;  %v1859_v31 = vmax.f32 %v1347_v55, 0.0 }
 0x406   : > { %v5055_v9 = vsel %vm2310_vm2, %v4456_v29, 0.0  ;;  %v10464_v37 = vpop.f32.mrf.mxu1  ;;  %v2265_v29 = vpack.c.bf16 %v2001_v54, %v2000_v20  ;;  %v1732_v20 = vmax.f32 %v1220_v5, 0.0  ;;  %v1733_v54 = vmax.f32 %v1221_v8, 0.0 }
 0x407   : > { %v5056_v44 = vadd.f32 %v5055_v9, %v5054_v53  ;;  %7459 = vmatmul.msk.bf16.gmra.mxu2 %vm2310_vm2, %v2193_v28  ;;  %12906 = vst [vmem:[#allocation242_spill] sm:$0xff] %v10464_v37  ;;  %v1346_v28 = vadd.f32 %v10450_v42, %v8481_v35  ;;  %v1613_v9 = vmax.f32 %v1101_v60, 0.0  ;;  %v1103_v8 = vadd.f32 %v10406_v40, %v8538_v10 }
 0x408   : > { %v2131_v60 = vpack.c.bf16 %v1733_v54, %v1732_v20 }
 0x409   : > { %v3310_v39 = vpop.f32.mrf.mxu0  ;;  %v2071_v0 = vpack.c.bf16 %v1613_v9, %v1612_v25  ;;  %v1348_v9 = vadd.f32 %v10450_v42, %v8501_v47  ;;  %v1615_v54 = vmax.f32 %v1103_v8, 0.0 }
 0x40a   : > { %v3311_v26 = vadd.f32 %v10189_v24, %v3310_v39  ;;  %v10453_v7 = vpop.f32.mrf.mxu2 }
 0x40b   : > { %12904 = vst [vmem:[#allocation240_spill] sm:$0xff] %v10453_v7  ;;  %v1858_v7 = vmax.f32 %v1346_v28, 0.0 }
 0x40c   : > { %v4457_v53 = vmax.f32 %v3311_v26, 0.0  ;;  %v10474_v26 = vperm.slane %v864_v49, 0  ;;  %v10484_v1 = vpop.f32.mrf.mxu3 }
 0x40d   : > { %12908 = vst [vmem:[#allocation244_spill] sm:$0xff] %v10484_v1 }
 0x40e   : > { %v5057_v58 = vsel %vm2310_vm2, %v4457_v53, 0.0  ;;  %v1490_v49 = vadd.f32 %v10474_v26, %v8481_v35  ;;  %v1491_v53 = vadd.f32 %v10474_v26, %v8483_v36 }
 0x40f   : > { %v5058_v39 = vadd.f32 %v5057_v58, %v5056_v44  ;;  %7531 = vmatmul.msk.bf16.gmra.mxu3 %vm2310_vm2, %v2265_v29  ;;  %v2194_v44 = vpack.c.bf16 %v1859_v31, %v1858_v7  ;;  %v10487_v29 = vpop.f32.mrf.mxu1  ;;  %v1223_v58 = vadd.f32 %v10413_v22, %v8538_v10 }
 0x410   : > { %v2002_v25 = vmax.f32 %v1490_v49, 0.0  ;;  %v2003_v31 = vmax.f32 %v1491_v53, 0.0 }
 0x411   : > { %v3313_v17 = vpop.f32.mrf.mxu0 }
 0x412   : > { %v3314_v37 = vadd.f32 %v10189_v24, %v3313_v17  ;;  %v10477_v32 = vpop.f32.mrf.mxu2  ;;  %v2266_v55 = vpack.c.bf16 %v2003_v31, %v2002_v25  ;;  %v1735_v25 = vmax.f32 %v1223_v58, 0.0  ;;  %v1860_v31 = vmax.f32 %v1348_v9, 0.0 }
 0x413   : > { %12907 = vst [vmem:[#allocation243_spill] sm:$0xff] %v10477_v32 }
 0x414   : > { %v4458_v48 = vmax.f32 %v3314_v37, 0.0  ;;  %7337 = vmatmul.msk.bf16.gmra.mxu0 %vm2310_vm2, %v2071_v0  ;;  %7397 = vmatmul.msk.bf16.gmra.mxu1 %vm2310_vm2, %v2131_v60  ;;  %v10508_v49 = vpop.f32.mrf.mxu3 }
 0x415   : > { %12910 = vst [vmem:[#allocation246_spill] sm:$0xff] %v10508_v49  ;;  %v1493_v49 = vadd.f32 %v10474_v26, %v8505_v51 }
 0x416   : > { %v5059_v5 = vsel %vm2310_vm2, %v4458_v48, 0.0  ;;  %v1102_v48 = vadd.f32 %v10406_v40, %v8532_v6 }
 0x417   : > { %v5060_v17 = vadd.f32 %v5059_v5, %v5058_v39  ;;  %7460 = vmatmul.msk.bf16.gmra.mxu2 %vm2310_vm2, %v2194_v44  ;;  %v1349_v39 = vadd.f32 %v10450_v42, %v8505_v51  ;;  %v1222_v44 = vadd.f32 %v10413_v22, %v8532_v6  ;;  %v10510_v5 = vpop.f32.mrf.mxu1 }
 0x418   : > { %v1614_v53 = vmax.f32 %v1102_v48, 0.0  ;;  %v1492_v48 = vadd.f32 %v10474_v26, %v8501_v47 }
 0x419   : > { %v3315_v0 = vpop.f32.mrf.mxu0 }
 0x41a   : > { %v3316_v7 = vadd.f32 %v10189_v24, %v3315_v0  ;;  %v10492_v37 = vpop.f32.mrf.mxu2  ;;  %v2072_v8 = vpack.c.bf16 %v1615_v54, %v1614_v53  ;;  %v2004_v54 = vmax.f32 %v1492_v48, 0.0 }
 0x41b   : > { %12909 = vst [vmem:[#allocation245_spill] sm:$0xff] %v10492_v37 }
 0x41c   : > { %v4459_v28 = vmax.f32 %v3316_v7, 0.0  ;;  %v1861_v7 = vmax.f32 %v1349_v39, 0.0 }
 0x41e   : > { %v5061_v20 = vsel %vm2310_vm2, %v4459_v28, 0.0 }
 0x41f   : > { %v5062_v60 = vadd.f32 %v5061_v20, %v5060_v17  ;;  %7532 = vmatmul.msk.bf16.gmra.mxu3 %vm2310_vm2, %v2266_v55  ;;  %v1734_v17 = vmax.f32 %v1222_v44, 0.0  ;;  %v2195_v20 = vpack.c.bf16 %v1861_v7, %v1860_v31  ;;  %v10523_v44 = vpop.f32.mrf.mxu3  ;;  %v10530_v31 = vpop.f32.mrf.mxu1 }
 0x420   : > { %12912 = vst [vmem:[#allocation248_spill] sm:$0xff] %v10523_v44  ;;  %v822_v44 = vrot.slane %v8524_v2, 6  ;;  %v1494_v2 = vadd.f32 %v10474_v26, %v8532_v6 }
 0x421   : > { %v3318_v0 = vpop.f32.mrf.mxu0  ;;  %v2132_v55 = vpack.c.bf16 %v1735_v25, %v1734_v17  ;;  %v1105_v25 = vadd.f32 %v10406_v40, %v8577_v46  ;;  %12914 = vst [vmem:[#allocation250_spill] sm:$0xff] %v10530_v31  ;;  %v1225_v17 = vadd.f32 %v10413_v22, %v8577_v46 }
 0x422   : > { %v3319_v1 = vadd.f32 %v10189_v24, %v3318_v0  ;;  %v10513_v37 = vpop.f32.mrf.mxu2 }
 0x423   : > { %12911 = vst [vmem:[#allocation247_spill] sm:$0xff] %v10513_v37 }
 0x424   : > { %v4460_v28 = vmax.f32 %v3319_v1, 0.0  ;;  %7338 = vmatmul.msk.bf16.gmra.mxu0 %vm2310_vm2, %v2072_v8  ;;  %7398 = vmatmul.msk.bf16.gmra.mxu1 %vm2310_vm2, %v2132_v55  ;;  %v2005_v1 = vmax.f32 %v1493_v49, 0.0  ;;  %v1350_v49 = vadd.f32 %v10450_v42, %v8532_v6 }
 0x426   : > { %v5063_v58 = vsel %vm2310_vm2, %v4460_v28, 0.0  ;;  %v2267_v8 = vpack.c.bf16 %v2005_v1, %v2004_v54  ;;  %v1351_v28 = vadd.f32 %v10450_v42, %v8538_v10  ;;  %v1737_v54 = vmax.f32 %v1225_v17, 0.0 }
 0x427   : > { %v5064_v9 = vadd.f32 %v5063_v58, %v5062_v60  ;;  %7461 = vmatmul.msk.bf16.gmra.mxu2 %vm2310_vm2, %v2195_v20  ;;  %v1104_v60 = vadd.f32 %v10406_v40, %v8575_v43  ;;  %v1617_v20 = vmax.f32 %v1105_v25, 0.0  ;;  %v1224_v58 = vadd.f32 %v10413_v22, %v8575_v43  ;;  %v10549_v25 = vpop.f32.mrf.mxu3  ;;  %v10552_v22 = vpop.f32.mrf.mxu1 }
 0x428   : > { %v1862_v1 = vmax.f32 %v1350_v49, 0.0  ;;  %12916 = vst [vmem:[#allocation252_spill] sm:$0xff] %v10549_v25  ;;  %v1495_v49 = vadd.f32 %v10474_v26, %v8538_v10 }
 0x429   : > { %v3320_v39 = vpop.f32.mrf.mxu0  ;;  %v1616_v40 = vmax.f32 %v1104_v60, 0.0  ;;  %12917 = vst [vmem:[#allocation253_spill] sm:$0xff] %v10552_v22 }
 0x42a   : > { %v3321_v53 = vadd.f32 %v10189_v24, %v3320_v39  ;;  %v10526_v0 = vpop.f32.mrf.mxu2 }
 0x42b   : > { %12913 = vst [vmem:[#allocation249_spill] sm:$0xff] %v10526_v0  ;;  %v2073_v32 = vpack.c.bf16 %v1617_v20, %v1616_v40  ;;  %v2007_v40 = vmax.f32 %v1495_v49, 0.0 }
 0x42c   : > { %v4461_v7 = vmax.f32 %v3321_v53, 0.0  ;;  %v1863_v53 = vmax.f32 %v1351_v28, 0.0  ;;  %v10558_v28 = vperm.slane %v822_v44, 0 }
 0x42e   : > { %v5065_v55 = vsel %vm2310_vm2, %v4461_v7, 0.0  ;;  %v1736_v7 = vmax.f32 %v1224_v58, 0.0  ;;  %v2196_v17 = vpack.c.bf16 %v1863_v53, %v1862_v1  ;;  %v2006_v58 = vmax.f32 %v1494_v2, 0.0 }
 0x42f   : > { %v5066_v48 = vadd.f32 %v5065_v55, %v5064_v9  ;;  %7533 = vmatmul.msk.bf16.gmra.mxu3 %vm2310_vm2, %v2267_v8  ;;  %v835_v9 = vrot.slane %v8503_v50, 5  ;;  %v1106_v44 = vadd.f32 %v10558_v28, %v8481_v35  ;;  %v1107_v1 = vadd.f32 %v10558_v28, %v8483_v36 }
 0x430   : > { %v2133_v60 = vpack.c.bf16 %v1737_v54, %v1736_v7  ;;  %v2268_v53 = vpack.c.bf16 %v2007_v40, %v2006_v58  ;;  %v1352_v58 = vadd.f32 %v10450_v42, %v8575_v43 }
 0x431   : > { %v3323_v39 = vpop.f32.mrf.mxu0  ;;  %v1618_v2 = vmax.f32 %v1106_v44, 0.0  ;;  %v1619_v49 = vmax.f32 %v1107_v1, 0.0  ;;  %v849_v44 = vrot.slane %v9820_v13, 5 }
 0x432   : > { %v3324_v0 = vadd.f32 %v10189_v24, %v3323_v39  ;;  %v10546_v37 = vpop.f32.mrf.mxu2 }
 0x433   : > { %12915 = vst [vmem:[#allocation251_spill] sm:$0xff] %v10546_v37  ;;  %v2074_v22 = vpack.c.bf16 %v1619_v49, %v1618_v2 }
 0x434   : > { %v4462_v8 = vmax.f32 %v3324_v0, 0.0  ;;  %7339 = vmatmul.msk.bf16.gmra.mxu0 %vm2310_vm2, %v2073_v32  ;;  %7399 = vmatmul.msk.bf16.gmra.mxu1 %vm2310_vm2, %v2133_v60  ;;  %v10563_v32 = vperm.slane %v835_v9, 0  ;;  %v10578_v60 = vpop.f32.mrf.mxu3 }
 0x435   : > { %12919 = vst [vmem:[#allocation255_spill] sm:$0xff] %v10578_v60 }
 0x436   : > { %v5067_v55 = vsel %vm2310_vm2, %v4462_v8, 0.0  ;;  %v1226_v7 = vadd.f32 %v10563_v32, %v8481_v35  ;;  %v1227_v9 = vadd.f32 %v10563_v32, %v8483_v36  ;;  %v1353_v8 = vadd.f32 %v10450_v42, %v8577_v46 }
 0x437   : > { %v5068_v20 = vadd.f32 %v5067_v55, %v5066_v48  ;;  %7462 = vmatmul.msk.bf16.gmra.mxu2 %vm2310_vm2, %v2196_v17  ;;  %v10581_v55 = vpop.f32.mrf.mxu1  ;;  %v1496_v42 = vadd.f32 %v10474_v26, %v8575_v43 }
 0x438   : > { %12920 = vst [vmem:[#allocation256_spill] sm:$0xff] %v10581_v55  ;;  %v1739_v25 = vmax.f32 %v1227_v9, 0.0 }
 0x439   : > { %v3325_v0 = vpop.f32.mrf.mxu0 }
 0x43a   : > { %v3326_v39 = vadd.f32 %v10189_v24, %v3325_v0  ;;  %v10566_v54 = vpop.f32.mrf.mxu2 }
 0x43b   : > { %12918 = vst [vmem:[#allocation254_spill] sm:$0xff] %v10566_v54  ;;  %v1865_v54 = vmax.f32 %v1353_v8, 0.0 }
 0x43c   : > { %v4463_v48 = vmax.f32 %v3326_v39, 0.0  ;;  %v1738_v39 = vmax.f32 %v1226_v7, 0.0  ;;  %v1497_v7 = vadd.f32 %v10474_v26, %v8577_v46  ;;  %v1109_v26 = vadd.f32 %v10558_v28, %v8505_v51 }
 0x43e   : > { %v5069_v17 = vsel %vm2310_vm2, %v4463_v48, 0.0  ;;  %v1864_v48 = vmax.f32 %v1352_v58, 0.0  ;;  %v2009_v2 = vmax.f32 %v1497_v7, 0.0 }
 0x43f   : > { %v5070_v0 = vadd.f32 %v5069_v17, %v5068_v20  ;;  %7534 = vmatmul.msk.bf16.gmra.mxu3 %vm2310_vm2, %v2268_v53  ;;  %v2134_v20 = vpack.c.bf16 %v1739_v25, %v1738_v39  ;;  %v10598_v17 = vpop.f32.mrf.mxu3  ;;  %v1228_v39 = vadd.f32 %v10563_v32, %v8501_v47 }
 0x440   : > { %v2197_v53 = vpack.c.bf16 %v1865_v54, %v1864_v48  ;;  %12922 = vst [vmem:[#allocation258_spill] sm:$0xff] %v10598_v17  ;;  %v2008_v54 = vmax.f32 %v1496_v42, 0.0  ;;  %v1621_v42 = vmax.f32 %v1109_v26, 0.0 }
 0x441   : > { %v3328_v40 = vpop.f32.mrf.mxu0 }
 0x442   : > { %v3329_v37 = vadd.f32 %v10189_v24, %v3328_v40  ;;  %v10587_v60 = vpop.f32.mrf.mxu2  ;;  %v1108_v40 = vadd.f32 %v10558_v28, %v8501_v47 }
 0x443   : > { %12921 = vst [vmem:[#allocation257_spill] sm:$0xff] %v10587_v60 }
 0x444   : > { %v4464_v1 = vmax.f32 %v3329_v37, 0.0  ;;  %7340 = vmatmul.msk.bf16.gmra.mxu0 %vm2310_vm2, %v2074_v22  ;;  %7400 = vmatmul.msk.bf16.gmra.mxu1 %vm2310_vm2, %v2134_v20  ;;  %v10600_v37 = vperm.slane %v849_v44, 0  ;;  %v10602_v22 = vpop.f32.mrf.mxu1  ;;  %v2269_v44 = vpack.c.bf16 %v2009_v2, %v2008_v54  ;;  %v1740_v54 = vmax.f32 %v1228_v39, 0.0 }
 0x445   : > { %12923 = vst [vmem:[#allocation259_spill] sm:$0xff] %v10602_v22 }
 0x446   : > { %v5071_v9 = vsel %vm2310_vm2, %v4464_v1, 0.0  ;;  %v1229_v1 = vadd.f32 %v10563_v32, %v8505_v51  ;;  %v1354_v20 = vadd.f32 %v10600_v37, %v8481_v35 }
 0x447   : > { %v5072_v8 = vadd.f32 %v5071_v9, %v5070_v0  ;;  %7463 = vmatmul.msk.bf16.gmra.mxu2 %vm2310_vm2, %v2197_v53  ;;  %v865_v0 = vrot.slane %v9517_v57, 7  ;;  %v1355_v53 = vadd.f32 %v10600_v37, %v8483_v36  ;;  %v10624_v60 = vpop.f32.mrf.mxu3 }
 0x448   : > { %v1741_v2 = vmax.f32 %v1229_v1, 0.0  ;;  %v1866_v17 = vmax.f32 %v1354_v20, 0.0  ;;  %12925 = vst [vmem:[#allocation261_spill] sm:$0xff] %v10624_v60 }
 0x449   : > { %v3330_v25 = vpop.f32.mrf.mxu0  ;;  %v10622_v9 = vperm.slane %v865_v0, 0 }
 0x44a   : > { %v3331_v49 = vadd.f32 %v10189_v24, %v3330_v25  ;;  %v10612_v48 = vpop.f32.mrf.mxu2  ;;  %v1620_v25 = vmax.f32 %v1108_v40, 0.0 }
 0x44b   : > { %12924 = vst [vmem:[#allocation260_spill] sm:$0xff] %v10612_v48  ;;  %v1867_v48 = vmax.f32 %v1355_v53, 0.0  ;;  %v1498_v0 = vadd.f32 %v10622_v9, %v8481_v35  ;;  %v1499_v40 = vadd.f32 %v10622_v9, %v8483_v36 }
 0x44c   : > { %v4465_v58 = vmax.f32 %v3331_v49, 0.0  ;;  %v2075_v55 = vpack.c.bf16 %v1621_v42, %v1620_v25  ;;  %v10627_v31 = vpop.f32.mrf.mxu1  ;;  %v1110_v42 = vadd.f32 %v10558_v28, %v8532_v6 }
 0x44d   : > { %v2198_v26 = vpack.c.bf16 %v1867_v48, %v1866_v17  ;;  %v2010_v20 = vmax.f32 %v1498_v0, 0.0  ;;  %v1111_v48 = vadd.f32 %v10558_v28, %v8538_v10 }
 0x44e   : > { %v5073_v57 = vsel %vm2310_vm2, %v4465_v58, 0.0  ;;  %v1622_v0 = vmax.f32 %v1110_v42, 0.0 }
 0x44f   : > { %v5074_v7 = vadd.f32 %v5073_v57, %v5072_v8  ;;  %7535 = vmatmul.msk.bf16.gmra.mxu3 %vm2310_vm2, %v2269_v44  ;;  %v2135_v8 = vpack.c.bf16 %v1741_v2, %v1740_v54  ;;  %v10642_v53 = vpop.f32.mrf.mxu3  ;;  %v1356_v54 = vadd.f32 %v10600_v37, %v8501_v47 }
 0x450   : > { %12927 = vst [vmem:[#allocation263_spill] sm:$0xff] %v10642_v53  ;;  %v1500_v53 = vadd.f32 %v10622_v9, %v8501_v47 }
 0x451   : > { %v3333_v49 = vpop.f32.mrf.mxu0 }
 0x452   : > { %v3334_v22 = vadd.f32 %v10189_v24, %v3333_v49  ;;  %v10635_v1 = vpop.f32.mrf.mxu2  ;;  %v1231_v49 = vadd.f32 %v10563_v32, %v8538_v10 }
 0x453   : > { %12926 = vst [vmem:[#allocation262_spill] sm:$0xff] %v10635_v1 }
 0x454   : > { %v4466_v58 = vmax.f32 %v3334_v22, 0.0  ;;  %7341 = vmatmul.msk.bf16.gmra.mxu0 %vm2310_vm2, %v2075_v55  ;;  %7401 = vmatmul.msk.bf16.gmra.mxu1 %vm2310_vm2, %v2135_v8  ;;  %v2011_v55 = vmax.f32 %v1499_v40, 0.0 }
 0x456   : > { %v5075_v39 = vsel %vm2310_vm2, %v4466_v58, 0.0  ;;  %v2270_v25 = vpack.c.bf16 %v2011_v55, %v2010_v20  ;;  %v1623_v58 = vmax.f32 %v1111_v48, 0.0  ;;  %v1868_v20 = vmax.f32 %v1356_v54, 0.0 }
 0x457   : > { %v5076_v44 = vadd.f32 %v5075_v39, %v5074_v7  ;;  %7464 = vmatmul.msk.bf16.gmra.mxu2 %vm2310_vm2, %v2198_v26  ;;  %v10646_v7 = vpop.f32.mrf.mxu1  ;;  %v1230_v26 = vadd.f32 %v10563_v32, %v8532_v6  ;;  %v10671_v54 = vpop.f32.mrf.mxu3 }
 0x458   : > { %12929 = vst [vmem:[#allocation265_spill] sm:$0xff] %v10671_v54 }
 0x459   : > { %v3335_v22 = vpop.f32.mrf.mxu0 }
 0x45a   : > { %v3336_v17 = vadd.f32 %v10189_v24, %v3335_v22  ;;  %v1357_v24 = vadd.f32 %v10600_v37, %v8505_v51  ;;  %v10658_v40 = vpop.f32.mrf.mxu2  ;;  %v1743_v22 = vmax.f32 %v1231_v49, 0.0  ;;  %v1501_v49 = vadd.f32 %v10622_v9, %v8505_v51 }
 0x45b   : > { %12928 = vst [vmem:[#allocation264_spill] sm:$0xff] %v10658_v40 }
 0x45c   : > { %v4467_v57 = vmax.f32 %v3336_v17, 0.0  ;;  %v1869_v55 = vmax.f32 %v1357_v24, 0.0  ;;  %v10663_v17 = vld [vmem:[%s12677_s7] ss:$0 sm:$0xff] }
 0x45e   : > { %v5077_v2 = vsel %vm2310_vm2, %v4467_v57, 0.0  ;;  %v1742_v57 = vmax.f32 %v1230_v26, 0.0  ;;  %v2199_v42 = vpack.c.bf16 %v1869_v55, %v1868_v20  ;;  %v2012_v26 = vmax.f32 %v1500_v53, 0.0 }
 0x45f   : > { %v5078_v8 = vadd.f32 %v5077_v2, %v5076_v44  ;;  %7536 = vmatmul.msk.bf16.gmra.mxu3 %vm2310_vm2, %v2270_v25  ;;  %v2076_v44 = vpack.c.bf16 %v1623_v58, %v1622_v0  ;;  %v10674_v60 = vpop.f32.mrf.mxu1  ;;  %v2013_v0 = vmax.f32 %v1501_v49, 0.0  ;;  %v1113_v20 = vadd.f32 %v10558_v28, %v8577_v46  ;;  %v10694_v49 = vpop.f32.mrf.mxu3 }
 0x460   : > { %v2136_v2 = vpack.c.bf16 %v1743_v22, %v1742_v57  ;;  %v1358_v57 = vadd.f32 %v10600_v37, %v8532_v6  ;;  %v1359_v53 = vadd.f32 %v10600_v37, %v8538_v10  ;;  %12931 = vst [vmem:[#allocation267_spill] sm:$0xff] %v10694_v49 }
 0x461   : > { %v3338_v39 = vpop.f32.mrf.mxu0 }
 0x462   : > { %v3339_v48 = vadd.f32 %v10663_v17, %v3338_v39  ;;  %v10681_v55 = vpop.f32.mrf.mxu2  ;;  %v1871_v54 = vmax.f32 %v1359_v53, 0.0  ;;  %v1503_v53 = vadd.f32 %v10622_v9, %v8538_v10 }
 0x463   : > { %12930 = vst [vmem:[#allocation266_spill] sm:$0xff] %v10681_v55 }
 0x464   : > { %v4468_v25 = vmax.f32 %v3339_v48, 0.0  ;;  %7342 = vmatmul.msk.bf16.gmra.mxu0 %vm2310_vm2, %v2076_v44  ;;  %7402 = vmatmul.msk.bf16.gmra.mxu1 %vm2310_vm2, %v2136_v2  ;;  %v1112_v48 = vadd.f32 %v10558_v28, %v8575_v43  ;;  %v2271_v44 = vpack.c.bf16 %v2013_v0, %v2012_v26  ;;  %v1625_v2 = vmax.f32 %v1113_v20, 0.0 }
 0x465   : > { %v1870_v0 = vmax.f32 %v1358_v57, 0.0 }
 0x466   : > { %v5079_v24 = vsel %vm2310_vm2, %v4468_v25, 0.0  ;;  %v1624_v28 = vmax.f32 %v1112_v48, 0.0 }
 0x467   : > { %v5080_v39 = vadd.f32 %v5079_v24, %v5078_v8  ;;  %7465 = vmatmul.msk.bf16.gmra.mxu2 %vm2310_vm2, %v2199_v42  ;;  %v1233_v8 = vadd.f32 %v10563_v32, %v8577_v46  ;;  %v1232_v42 = vadd.f32 %v10563_v32, %v8575_v43  ;;  %v10696_v24 = vpop.f32.mrf.mxu1  ;;  %v1502_v32 = vadd.f32 %v10622_v9, %v8532_v6 }
 0x468   : > { %v2200_v57 = vpack.c.bf16 %v1871_v54, %v1870_v0  ;;  %v1114_v54 = vadd.f32 %v8542_v12, %v8481_v35 }
 0x469   : > { %v3340_v58 = vpop.f32.mrf.mxu0  ;;  %v1745_v26 = vmax.f32 %v1233_v8, 0.0  ;;  %v1744_v20 = vmax.f32 %v1232_v42, 0.0  ;;  %v2014_v42 = vmax.f32 %v1502_v32, 0.0 }
 0x46a   : > { %v3341_v22 = vadd.f32 %v10663_v17, %v3340_v58  ;;  %v10704_v49 = vpop.f32.mrf.mxu2  ;;  %v1626_v32 = vmax.f32 %v1114_v54, 0.0 }
 0x46b   : > { %12932 = vst [vmem:[#allocation268_spill] sm:$0xff] %v10704_v49  ;;  %v2137_v8 = vpack.c.bf16 %v1745_v26, %v1744_v20  ;;  %v1361_v20 = vadd.f32 %v10600_v37, %v8577_v46 }
 0x46c   : > { %v4469_v25 = vmax.f32 %v3341_v22, 0.0  ;;  %v2077_v22 = vpack.c.bf16 %v1625_v2, %v1624_v28  ;;  %v2015_v28 = vmax.f32 %v1503_v53, 0.0 }
 0x46e   : > { %v5081_v55 = vsel %vm2310_vm2, %v4469_v25, 0.0 }
 0x46f   : > { %7537 = vmatmul.msk.bf16.gmra.mxu3 %vm2310_vm2, %v2271_v44  ;;  %v836_v44 = vrot.slane %v8503_v50, 6  ;;  %v5082_v48 = vadd.f32 %v5081_v55, %v5080_v39  ;;  %v1115_v55 = vadd.f32 %v8542_v12, %v8483_v36 }
 0x471   : > { %v3343_v58 = vpop.f32.mrf.mxu0  ;;  %v10711_v50 = vperm.slane %v836_v44, 0 }
 0x472   : > { %v3344_v40 = vadd.f32 %v10663_v17, %v3343_v58  ;;  %v10718_v58 = vpop.f32.mrf.mxu1 }
 0x473   : > { %12933 = vst [vmem:[#allocation269_spill] sm:$0xff] %v10718_v58  ;;  %v1234_v26 = vadd.f32 %v10711_v50, %v8481_v35  ;;  %v1235_v0 = vadd.f32 %v10711_v50, %v8483_v36 }
 0x474   : > { %v4470_v1 = vmax.f32 %v3344_v40, 0.0  ;;  %7343 = vmatmul.msk.bf16.gmra.mxu0 %vm2310_vm2, %v2077_v22  ;;  %7403 = vmatmul.msk.bf16.gmra.mxu1 %vm2310_vm2, %v2137_v8  ;;  %v2272_v22 = vpack.c.bf16 %v2015_v28, %v2014_v42  ;;  %v10728_v8 = vpop.f32.mrf.mxu2  ;;  %v8030_v42 = vld [vmem:[%s12936_s8 + $0x18] sm:$0xff] }
 0x475   : > { %12935 = vst [vmem:[#allocation271_spill] sm:$0xff] %v10728_v8  ;;  %v1746_v53 = vmax.f32 %v1234_v26, 0.0  ;;  %5950 = vmatpush.bf16.msrb.mxu3 %v8030_v42 }
 0x476   : > { %v5083_v25 = vsel %vm2310_vm2, %v4470_v1, 0.0  ;;  %v10720_v1 = vpop.f32.mrf.mxu3 }
 0x477   : > { %v5084_v2 = vadd.f32 %v5083_v25, %v5082_v48  ;;  %7466 = vmatmul.msk.bf16.gmra.mxu2 %vm2310_vm2, %v2200_v57  ;;  %12934 = vst [vmem:[#allocation270_spill] sm:$0xff] %v10720_v1  ;;  %v1627_v48 = vmax.f32 %v1115_v55, 0.0  ;;  %v1360_v57 = vadd.f32 %v10600_v37, %v8575_v43  ;;  %v1747_v25 = vmax.f32 %v1235_v0, 0.0 }
 0x478   : > { %v1873_v1 = vmax.f32 %v1361_v20, 0.0 }
 0x479   : > { %v3345_v40 = vpop.f32.mrf.mxu0  ;;  %v2078_v54 = vpack.c.bf16 %v1627_v48, %v1626_v32  ;;  %v1872_v55 = vmax.f32 %v1360_v57, 0.0  ;;  %v2138_v37 = vpack.c.bf16 %v1747_v25, %v1746_v53  ;;  %v1505_v32 = vadd.f32 %v10622_v9, %v8577_v46 }
 0x47a   : > { %v3346_v39 = vadd.f32 %v10663_v17, %v3345_v40  ;;  %v10740_v26 = vpop.f32.mrf.mxu1 }
 0x47b   : > { %12937 = vst [vmem:[#allocation272_spill] sm:$0xff] %v10740_v26  ;;  %v2201_v49 = vpack.c.bf16 %v1873_v1, %v1872_v55  ;;  %v2017_v1 = vmax.f32 %v1505_v32, 0.0 }
 0x47c   : > { %v4471_v44 = vmax.f32 %v3346_v39, 0.0  ;;  %v10753_v25 = vpop.f32.mrf.mxu2 }
 0x47d   : > { %12939 = vst [vmem:[#allocation274_spill] sm:$0xff] %v10753_v25 }
 0x47e   : > { %v5085_v28 = vsel %vm2310_vm2, %v4471_v44, 0.0  ;;  %v10742_v0 = vpop.f32.mrf.mxu3  ;;  %v1504_v44 = vadd.f32 %v10622_v9, %v8575_v43  ;;  %v1116_v9 = vadd.f32 %v8542_v12, %v8501_v47 }
 0x47f   : > { %7538 = vmatmul.msk.bf16.gmra.mxu3 %vm2310_vm2, %v2272_v22  ;;  %v850_v22 = vrot.slane %v9820_v13, 6  ;;  %12938 = vst [vmem:[#allocation273_spill] sm:$0xff] %v10742_v0  ;;  %v5086_v20 = vadd.f32 %v5085_v28, %v5084_v2  ;;  %v1117_v28 = vadd.f32 %v8542_v12, %v8505_v51 }
 0x480   : > { %v2016_v2 = vmax.f32 %v1504_v44, 0.0  ;;  %v1628_v12 = vmax.f32 %v1116_v9, 0.0 }
 0x481   : > { %v3348_v40 = vpop.f32.mrf.mxu0  ;;  %v10751_v53 = vperm.slane %v850_v22, 0 }
 0x482   : > { %v3349_v39 = vadd.f32 %v10663_v17, %v3348_v40 }
 0x483   : > { %v1363_v55 = vadd.f32 %v10751_v53, %v8483_v36 }
 0x484   : > { %v4472_v8 = vmax.f32 %v3349_v39, 0.0  ;;  %7344 = vmatmul.msk.bf16.gmra.mxu0 %vm2310_vm2, %v2078_v54  ;;  %7404 = vmatmul.msk.bf16.gmra.mxu1 %vm2310_vm2, %v2138_v37  ;;  %v2273_v39 = vpack.c.bf16 %v2017_v1, %v2016_v2  ;;  %v1362_v54 = vadd.f32 %v10751_v53, %v8481_v35  ;;  %v1629_v37 = vmax.f32 %v1117_v28, 0.0  ;;  %v10775_v58 = vpop.f32.mrf.mxu2 }
 0x485   : > { %v1875_v1 = vmax.f32 %v1363_v55, 0.0  ;;  %12942 = vst [vmem:[#allocation277_spill] sm:$0xff] %v10775_v58 }
 0x486   : > { %v5087_v48 = vsel %vm2310_vm2, %v4472_v8, 0.0  ;;  %v1236_v8 = vadd.f32 %v10711_v50, %v8501_v47  ;;  %v10770_v44 = vpop.f32.mrf.mxu3  ;;  %v1874_v2 = vmax.f32 %v1362_v54, 0.0  ;;  %v2079_v26 = vpack.c.bf16 %v1629_v37, %v1628_v12 }
 0x487   : > { %v5088_v57 = vadd.f32 %v5087_v48, %v5086_v20  ;;  %7467 = vmatmul.msk.bf16.gmra.mxu2 %vm2310_vm2, %v2201_v49  ;;  %v1237_v49 = vadd.f32 %v10711_v50, %v8505_v51  ;;  %v10768_v20 = vpop.f32.mrf.mxu1  ;;  %12941 = vst [vmem:[#allocation276_spill] sm:$0xff] %v10770_v44 }
 0x488   : > { %12940 = vst [vmem:[#allocation275_spill] sm:$0xff] %v10768_v20  ;;  %v1748_v48 = vmax.f32 %v1236_v8, 0.0  ;;  %v2202_v20 = vpack.c.bf16 %v1875_v1, %v1874_v2 }
 0x489   : > { %v3350_v40 = vpop.f32.mrf.mxu0 }
 0x48a   : > { %v3351_v42 = vadd.f32 %v10663_v17, %v3350_v40  ;;  %v1749_v40 = vmax.f32 %v1237_v49, 0.0 }
 0x48c   : > { %v4473_v22 = vmax.f32 %v3351_v42, 0.0  ;;  %v2139_v44 = vpack.c.bf16 %v1749_v40, %v1748_v48  ;;  %v10784_v55 = vpop.f32.mrf.mxu2 }
 0x48d   : > { %12943 = vst [vmem:[#allocation278_spill] sm:$0xff] %v10784_v55 }
 0x48e   : > { %v5089_v0 = vsel %vm2310_vm2, %v4473_v22, 0.0  ;;  %v1238_v22 = vadd.f32 %v10711_v50, %v8532_v6 }
 0x48f   : > { %7539 = vmatmul.msk.bf16.gmra.mxu3 %vm2310_vm2, %v2273_v39  ;;  %v5090_v28 = vadd.f32 %v5089_v0, %v5088_v57  ;;  %v10781_v8 = vpop.f32.mrf.mxu1  ;;  %v1364_v0 = vadd.f32 %v10751_v53, %v8501_v47  ;;  %v1365_v57 = vadd.f32 %v10751_v53, %v8505_v51 }
 0x490   : > { %v1750_v2 = vmax.f32 %v1238_v22, 0.0  ;;  %v1366_v22 = vadd.f32 %v10751_v53, %v8532_v6 }
 0x491   : > { %v3353_v32 = vpop.f32.mrf.mxu0  ;;  %v1877_v12 = vmax.f32 %v1365_v57, 0.0 }
 0x492   : > { %v3354_v25 = vadd.f32 %v10663_v17, %v3353_v32 }
 0x494   : > { %v4474_v42 = vmax.f32 %v3354_v25, 0.0  ;;  %7345 = vmatmul.msk.bf16.gmra.mxu0 %vm2310_vm2, %v2079_v26  ;;  %7405 = vmatmul.msk.bf16.gmra.mxu1 %vm2310_vm2, %v2139_v44  ;;  %v1239_v26 = vadd.f32 %v10711_v50, %v8538_v10  ;;  %v1876_v44 = vmax.f32 %v1364_v0, 0.0 }
 0x496   : > { %v5091_v9 = vsel %vm2310_vm2, %v4474_v42, 0.0 }
 0x497   : > { %v5092_v39 = vadd.f32 %v5091_v9, %v5090_v28  ;;  %7468 = vmatmul.msk.bf16.gmra.mxu2 %vm2310_vm2, %v2202_v20  ;;  %v1751_v20 = vmax.f32 %v1239_v26, 0.0  ;;  %v10796_v40 = vpop.f32.mrf.mxu1  ;;  %v2203_v9 = vpack.c.bf16 %v1877_v12, %v1876_v44  ;;  %v1240_v12 = vadd.f32 %v10711_v50, %v8575_v43 }
 0x499   : > { %v3355_v49 = vpop.f32.mrf.mxu0  ;;  %v2140_v28 = vpack.c.bf16 %v1751_v20, %v1750_v2 }
 0x49a   : > { %v3356_v54 = vadd.f32 %v10663_v17, %v3355_v49 }
 0x49c   : > { %v4475_v25 = vmax.f32 %v3356_v54, 0.0  ;;  %v10799_v54 = vpop.f32.mrf.mxu2 }
 0x49d   : > { %12944 = vst [vmem:[#allocation279_spill] sm:$0xff] %v10799_v54 }
 0x49e   : > { %v5093_v32 = vsel %vm2310_vm2, %v4475_v25, 0.0 }
 0x49f   : > { %v5094_v42 = vadd.f32 %v5093_v32, %v5092_v39  ;;  %v10804_v25 = vpop.f32.mrf.mxu1  ;;  %v1241_v39 = vadd.f32 %v10711_v50, %v8577_v46 }
 0x4a1   : > { %v3358_v37 = vpop.f32.mrf.mxu0  ;;  %v1753_v2 = vmax.f32 %v1241_v39, 0.0 }
 0x4a2   : > { %v3359_v48 = vadd.f32 %v10663_v17, %v3358_v37  ;;  %v1367_v37 = vadd.f32 %v10751_v53, %v8538_v10 }
 0x4a4   : > { %v4476_v1 = vmax.f32 %v3359_v48, 0.0  ;;  %7406 = vmatmul.msk.bf16.gmra.mxu1 %vm2310_vm2, %v2140_v28  ;;  %v10815_v32 = vpop.f32.mrf.mxu2 }
 0x4a5   : > { %12945 = vst [vmem:[#allocation280_spill] sm:$0xff] %v10815_v32 }
 0x4a6   : > { %v5095_v49 = vsel %vm2310_vm2, %v4476_v1, 0.0  ;;  %v1878_v1 = vmax.f32 %v1366_v22, 0.0 }
 0x4a7   : > { %v5096_v55 = vadd.f32 %v5095_v49, %v5094_v42  ;;  %7469 = vmatmul.msk.bf16.gmra.mxu2 %vm2310_vm2, %v2203_v9  ;;  %v1879_v42 = vmax.f32 %v1367_v37, 0.0  ;;  %v1752_v9 = vmax.f32 %v1240_v12, 0.0  ;;  %v10819_v58 = vpop.f32.mrf.mxu1  ;;  %v1369_v37 = vadd.f32 %v10751_v53, %v8577_v46 }
 0x4a8   : > { %12946 = vst [vmem:[#allocation281_spill] sm:$0xff] %v10819_v58 }
 0x4a9   : > { %v3360_v26 = vpop.f32.mrf.mxu0 }
 0x4aa   : > { %v3361_v0 = vadd.f32 %v10663_v17, %v3360_v26  ;;  %v2141_v26 = vpack.c.bf16 %v1753_v2, %v1752_v9 }
 0x4ac   : > { %v4477_v57 = vmax.f32 %v3361_v0, 0.0  ;;  %v2204_v0 = vpack.c.bf16 %v1879_v42, %v1878_v1  ;;  %v10824_v39 = vpop.f32.mrf.mxu2 }
 0x4ad   : > { %12947 = vst [vmem:[#allocation282_spill] sm:$0xff] %v10824_v39 }
 0x4ae   : > { %v5097_v20 = vsel %vm2310_vm2, %v4477_v57, 0.0 }
 0x4af   : > { %v5098_v44 = vadd.f32 %v5097_v20, %v5096_v55 }
 0x4b1   : > { %v3363_v48 = vpop.f32.mrf.mxu0 }
 0x4b2   : > { %v3364_v28 = vadd.f32 %v10663_v17, %v3363_v48  ;;  %v1368_v48 = vadd.f32 %v10751_v53, %v8575_v43 }
 0x4b4   : > { %v4478_v49 = vmax.f32 %v3364_v28, 0.0  ;;  %7407 = vmatmul.msk.bf16.gmra.mxu1 %vm2310_vm2, %v2141_v26  ;;  %v1880_v1 = vmax.f32 %v1368_v48, 0.0  ;;  %v851_v28 = vrot.slane %v9820_v13, 7  ;;  %v10833_v9 = vpop.f32.mrf.mxu2 }
 0x4b5   : > { %12948 = vst [vmem:[#allocation283_spill] sm:$0xff] %v10833_v9 }
 0x4b6   : > { %v5099_v54 = vsel %vm2310_vm2, %v4478_v49, 0.0 }
 0x4b7   : > { %v5100_v55 = vadd.f32 %v5099_v54, %v5098_v44  ;;  %7470 = vmatmul.msk.bf16.gmra.mxu2 %vm2310_vm2, %v2204_v0  ;;  %v1881_v44 = vmax.f32 %v1369_v37, 0.0 }
 0x4b9   : > { %v3365_v50 = vpop.f32.mrf.mxu0  ;;  %v2205_v49 = vpack.c.bf16 %v1881_v44, %v1880_v1 }
 0x4ba   : > { %v3366_v57 = vadd.f32 %v10663_v17, %v3365_v50 }
 0x4bc   : > { %v4479_v22 = vmax.f32 %v3366_v57, 0.0 }
 0x4be   : > { %v5101_v20 = vsel %vm2310_vm2, %v4479_v22, 0.0  ;;  %v10839_v22 = vpop.f32.mrf.mxu2 }
 0x4bf   : > { %v5102_v12 = vadd.f32 %v5101_v20, %v5100_v55  ;;  %v913_v55 = vperm.slane %v851_v28, 0  ;;  %12949 = vst [vmem:[#allocation284_spill] sm:$0xff] %v10839_v22 }
 0x4c1   : > { %v3368_v54 = vpop.f32.mrf.mxu0  ;;  %v1370_v53 = vadd.f32 %v913_v55, %v8481_v35  ;;  %v1371_v57 = vadd.f32 %v913_v55, %v8483_v36 }
 0x4c2   : > { %v3369_v2 = vadd.f32 %v10663_v17, %v3368_v54 }
 0x4c3   : > { %v1882_v20 = vmax.f32 %v1370_v53, 0.0  ;;  %v1883_v48 = vmax.f32 %v1371_v57, 0.0 }
 0x4c4   : > { %v4480_v42 = vmax.f32 %v3369_v2, 0.0  ;;  %v1373_v2 = vadd.f32 %v913_v55, %v8505_v51 }
 0x4c5   : > { %v2206_v13 = vpack.c.bf16 %v1883_v48, %v1882_v20  ;;  %v1374_v20 = vadd.f32 %v913_v55, %v8532_v6  ;;  %v1375_v48 = vadd.f32 %v913_v55, %v8538_v10 }
 0x4c6   : > { %v5103_v26 = vsel %vm2310_vm2, %v4480_v42, 0.0  ;;  %v10842_v54 = vpop.f32.mrf.mxu2  ;;  %v1885_v28 = vmax.f32 %v1373_v2, 0.0  ;;  %v8050_v2 = vld [vmem:[%s12625_s12 + $0x78] sm:$0xff] }
 0x4c7   : > { %v5104_v0 = vadd.f32 %v5103_v26, %v5102_v12  ;;  %7471 = vmatmul.msk.bf16.gmra.mxu2 %vm2310_vm2, %v2205_v49  ;;  %12950 = vst [vmem:[#allocation285_spill] sm:$0xff] %v10842_v54  ;;  %v1372_v12 = vadd.f32 %v913_v55, %v8501_v47  ;;  %v1886_v54 = vmax.f32 %v1374_v20, 0.0  ;;  %v1887_v22 = vmax.f32 %v1375_v48, 0.0  ;;  %6833 = vmatpush.bf16.msra.mxu0 %v8050_v2 }
 0x4c9   : > { %v3370_v50 = vpop.f32.mrf.mxu0  ;;  %v1884_v42 = vmax.f32 %v1372_v12, 0.0  ;;  %v2208_v9 = vpack.c.bf16 %v1887_v22, %v1886_v54 }
 0x4ca   : > { %v3371_v22 = vadd.f32 %v10663_v17, %v3370_v50 }
 0x4cb   : > { %v2207_v26 = vpack.c.bf16 %v1885_v28, %v1884_v42  ;;  %v8058_v42 = vld [vmem:[%s12625_s12 + $0xb8] sm:$0xff]  ;;  %v1377_v28 = vadd.f32 %v913_v55, %v8577_v46 }
 0x4cc   : > { %6846 = vmatpush.bf16.msra.mxu1 %v8058_v42 }
 0x4cd   : > { %v1889_v20 = vmax.f32 %v1377_v28, 0.0 }
 0x4ce   : > { %v10846_v49 = vpop.f32.mrf.mxu2 }
 0x4cf   : > { %12951 = vst [vmem:[#allocation286_spill] sm:$0xff] %v10846_v49 }
 0x4d1   : > { %v3373_v37 = vpop.f32.mrf.mxu0 }
 0x4d2   : > { %v3374_v48 = vadd.f32 %v10663_v17, %v3373_v37 }
 0x4d4   : > { %v4482_v58 = vmax.f32 %v3374_v48, 0.0 }
 0x4d6   : > { %v10849_v57 = vpop.f32.mrf.mxu2  ;;  %v5107_v37 = vsel %vm2310_vm2, %v4482_v58, 0.0 }
 0x4d7   : > { %7472 = vmatmul.msk.bf16.gmra.mxu2 %vm2310_vm2, %v2206_v13  ;;  %12952 = vst [vmem:[#allocation287_spill] sm:$0xff] %v10849_v57  ;;  %v4481_v57 = vmax.f32 %v3371_v22, 0.0 }
 0x4d9   : > { %v3375_v44 = vpop.f32.mrf.mxu0 }
 0x4da   : > { %v3376_v49 = vadd.f32 %v10663_v17, %v3375_v44 }
 0x4dc   : > { %v4483_v42 = vmax.f32 %v3376_v49, 0.0 }
 0x4de   : > { %v10853_v39 = vpop.f32.mrf.mxu2 }
 0x4df   : > { %12953 = vst [vmem:[#allocation288_spill] sm:$0xff] %v10853_v39 }
 0x4e1   : > { %v3378_v1 = vpop.f32.mrf.mxu0 }
 0x4e2   : > { %v3379_v2 = vadd.f32 %v10663_v17, %v3378_v1  ;;  %v5109_v1 = vsel %vm2310_vm2, %v4483_v42, 0.0 }
 0x4e6   : > { %v10865_v54 = vpop.f32.mrf.mxu2 }
 0x4e7   : > { %7473 = vmatmul.msk.bf16.gmra.mxu2 %vm2310_vm2, %v2207_v26  ;;  %v1376_v26 = vadd.f32 %v913_v55, %v8575_v43  ;;  %12954 = vst [vmem:[#allocation289_spill] sm:$0xff] %v10865_v54  ;;  %v5105_v55 = vsel %vm2310_vm2, %v4481_v57, 0.0  ;;  %v10874_v54 = vperm.slane %v8557_v23, 0 }
 0x4e9   : > { %v3380_v53 = vpop.f32.mrf.mxu0  ;;  %v1888_v39 = vmax.f32 %v1376_v26, 0.0  ;;  %v4484_v26 = vmax.f32 %v3379_v2, 0.0  ;;  %v1379_v23 = vadd.f32 %v10874_v54, %v8483_v36 }
 0x4ea   : > { %v3381_v50 = vadd.f32 %v10663_v17, %v3380_v53  ;;  %v1378_v53 = vadd.f32 %v10874_v54, %v8481_v35 }
 0x4eb   : > { %v2209_v32 = vpack.c.bf16 %v1889_v20, %v1888_v39  ;;  %v5106_v39 = vadd.f32 %v5105_v55, %v5104_v0  ;;  %v5111_v58 = vsel %vm2310_vm2, %v4484_v26, 0.0 }
 0x4ed   : > { %v5108_v49 = vadd.f32 %v5107_v37, %v5106_v39  ;;  %v1891_v37 = vmax.f32 %v1379_v23, 0.0 }
 0x4ee   : > { %v10878_v22 = vpop.f32.mrf.mxu2 }
 0x4ef   : > { %12955 = vst [vmem:[#allocation290_spill] sm:$0xff] %v10878_v22  ;;  %v5110_v0 = vadd.f32 %v5109_v1, %v5108_v49 }
 0x4f1   : > { %v3383_v13 = vpop.f32.mrf.mxu0  ;;  %v5112_v42 = vadd.f32 %v5111_v58, %v5110_v0 }
 0x4f2   : > { %v3384_v44 = vadd.f32 %v10663_v17, %v3383_v13 }
 0x4f4   : > { %v4486_v20 = vmax.f32 %v3384_v44, 0.0 }
 0x4f6   : > { %v5115_v39 = vsel %vm2310_vm2, %v4486_v20, 0.0 }
 0x4f7   : > { %7474 = vmatmul.msk.bf16.gmra.mxu2 %vm2310_vm2, %v2208_v9 }
 0x4f9   : > { %v3385_v12 = vpop.f32.mrf.mxu0 }
 0x4fa   : > { %v3386_v57 = vadd.f32 %v10663_v17, %v3385_v12 }
 0x4fc   : > { %v4487_v2 = vmax.f32 %v3386_v57, 0.0 }
 0x4fe   : > { %v5117_v26 = vsel %vm2310_vm2, %v4487_v2, 0.0 }
 0x501   : > { %v3388_v9 = vpop.f32.mrf.mxu0 }
 0x502   : > { %v3389_v13 = vadd.f32 %v10663_v17, %v3388_v9  ;;  %v10893_v9 = vpop.f32.mrf.mxu2 }
 0x504   : > { %v4488_v22 = vmax.f32 %v3389_v13, 0.0  ;;  %v3401_v13 = vadd.f32 %v10663_v17, %v8803_v30  ;;  %v3406_v30 = vadd.f32 %v10663_v17, %v8845_v34  ;;  %v3411_v34 = vadd.f32 %v10663_v17, %v8885_v4 }
 0x506   : > { %v5119_v57 = vsel %vm2310_vm2, %v4488_v22, 0.0 }
 0x507   : > { %7475 = vmatmul.msk.bf16.gmra.mxu2 %vm2310_vm2, %v2209_v32  ;;  %v4485_v32 = vmax.f32 %v3381_v50, 0.0  ;;  %v1890_v50 = vmax.f32 %v1378_v53, 0.0  ;;  %v3399_v53 = vadd.f32 %v10663_v17, %v8788_v11  ;;  %v1380_v11 = vadd.f32 %v10874_v54, %v8501_v47 }
 0x509   : > { %v3390_v28 = vpop.f32.mrf.mxu0  ;;  %v5113_v48 = vsel %vm2310_vm2, %v4485_v32, 0.0  ;;  %v2210_v32 = vpack.c.bf16 %v1891_v37, %v1890_v50  ;;  %v4492_v22 = vmax.f32 %v3399_v53, 0.0  ;;  %v1892_v47 = vmax.f32 %v1380_v11, 0.0 }
 0x50a   : > { %v3391_v55 = vadd.f32 %v10663_v17, %v3390_v28  ;;  %v5114_v35 = vadd.f32 %v5113_v48, %v5112_v42  ;;  %v1381_v42 = vadd.f32 %v10874_v54, %v8505_v51  ;;  %v10913_v37 = vpop.f32.mrf.mxu2 }
 0x50c   : > { %v4489_v44 = vmax.f32 %v3391_v55, 0.0  ;;  %v5116_v1 = vadd.f32 %v5115_v39, %v5114_v35 }
 0x50e   : > { %v5118_v49 = vadd.f32 %v5117_v26, %v5116_v1  ;;  %v5121_v23 = vsel %vm2310_vm2, %v4489_v44, 0.0  ;;  %v5127_v26 = vsel %vm2310_vm2, %v4492_v22, 0.0  ;;  %v3409_v44 = vadd.f32 %v10663_v17, %v8864_v14 }
 0x50f   : > { %v3419_v22 = vadd.f32 %v10663_v17, %v8942_v52  ;;  %v1382_v52 = vadd.f32 %v10874_v54, %v8532_v6 }
 0x510   : > { %v5120_v58 = vadd.f32 %v5119_v57, %v5118_v49  ;;  %v4495_v57 = vmax.f32 %v3406_v30, 0.0  ;;  %v4496_v53 = vmax.f32 %v3409_v44, 0.0 }
 0x511   : > { %v3393_v12 = vpop.f32.mrf.mxu0  ;;  %v4500_v30 = vmax.f32 %v3419_v22, 0.0  ;;  %v3439_v22 = vadd.f32 %v10663_v17, %v9098_v56  ;;  %v1385_v56 = vadd.f32 %v10874_v54, %v8577_v46 }
 0x512   : > { %v3394_v36 = vadd.f32 %v10663_v17, %v3393_v12  ;;  %v5122_v48 = vadd.f32 %v5121_v23, %v5120_v58  ;;  %v4493_v12 = vmax.f32 %v3401_v13, 0.0  ;;  %v3414_v23 = vadd.f32 %v10663_v17, %v8906_v41  ;;  %v10933_v41 = vpop.f32.mrf.mxu2 }
 0x513   : > { %v5133_v14 = vsel %vm2310_vm2, %v4495_v57, 0.0  ;;  %v4497_v13 = vmax.f32 %v3411_v34, 0.0  ;;  %v5135_v4 = vsel %vm2310_vm2, %v4496_v53, 0.0  ;;  %v1894_v57 = vmax.f32 %v1382_v52, 0.0 }
 0x514   : > { %v4490_v28 = vmax.f32 %v3394_v36, 0.0  ;;  %v3404_v36 = vadd.f32 %v10663_v17, %v8824_v63  ;;  %v5129_v51 = vsel %vm2310_vm2, %v4493_v12, 0.0 }
 0x516   : > { %v5123_v0 = vsel %vm2310_vm2, %v4490_v28, 0.0  ;;  %v4494_v63 = vmax.f32 %v3404_v36, 0.0  ;;  %v10931_v36 = vpop.f32.mrf.mxu1 }
 0x517   : > { %7476 = vmatmul.msk.bf16.gmra.mxu2 %vm2310_vm2, %v2210_v32  ;;  %v5124_v55 = vadd.f32 %v5123_v0, %v5122_v48  ;;  %v1893_v32 = vmax.f32 %v1381_v42, 0.0  ;;  %v3416_v0 = vadd.f32 %v10663_v17, %v8923_v16  ;;  %v4498_v48 = vmax.f32 %v3414_v23, 0.0 }
 0x518   : > { %v5131_v49 = vsel %vm2310_vm2, %v4494_v63, 0.0  ;;  %v3421_v16 = vadd.f32 %v10663_v17, %v8959_v61  ;;  %v3426_v61 = vadd.f32 %v10663_v17, %v9001_v45 }
 0x519   : > { %v3395_v20 = vpop.f32.mrf.mxu0  ;;  %v4499_v11 = vmax.f32 %v3416_v0, 0.0  ;;  %v5139_v12 = vsel %vm2310_vm2, %v4498_v48, 0.0 }
 0x51a   : > { %v3396_v35 = vadd.f32 %v10663_v17, %v3395_v20  ;;  %v2211_v20 = vpack.c.bf16 %v1893_v32, %v1892_v47  ;;  %v4501_v44 = vmax.f32 %v3421_v16, 0.0  ;;  %v5143_v47 = vsel %vm2310_vm2, %v4500_v30, 0.0  ;;  %v10956_v53 = vpop.f32.mrf.mxu2 }
 0x51b   : > { %v5141_v63 = vsel %vm2310_vm2, %v4499_v11, 0.0  ;;  %v3441_v11 = vadd.f32 %v10663_v17, %v9115_v62  ;;  %v3446_v62 = vadd.f32 %v10663_v17, %v9157_v18 }
 0x51c   : > { %v4491_v2 = vmax.f32 %v3396_v35, 0.0  ;;  %v5145_v6 = vsel %vm2310_vm2, %v4501_v44, 0.0  ;;  %v1384_v44 = vadd.f32 %v10874_v54, %v8575_v43  ;;  %v12957_v43 = vld [vmem:[#allocation60_spill] sm:$0xff] }
 0x51e   : > { %v5125_v50 = vsel %vm2310_vm2, %v4491_v2, 0.0  ;;  %v1896_v18 = vmax.f32 %v1384_v44, 0.0 }
 0x51f   : > { %v5126_v39 = vadd.f32 %v5125_v50, %v5124_v55  ;;  %v5137_v55 = vsel %vm2310_vm2, %v4497_v13, 0.0  ;;  %v3424_v50 = vadd.f32 %v10663_v17, %v8980_v27  ;;  %v3429_v27 = vadd.f32 %v10663_v17, %v9020_v33 }
 0x520   : > { %v3434_v33 = vadd.f32 %v10663_v17, %v9062_v19 }
 0x521   : > { %v5128_v1 = vadd.f32 %v5127_v26, %v5126_v39  ;;  %v1383_v26 = vadd.f32 %v10874_v54, %v8538_v10  ;;  %v4502_v32 = vmax.f32 %v3424_v50, 0.0  ;;  %v3431_v10 = vadd.f32 %v10663_v17, %v9041_v38 }
 0x522   : > { %v4506_v48 = vmax.f32 %v3434_v33, 0.0  ;;  %v10976_v50 = vpop.f32.mrf.mxu2  ;;  %v3454_v54 = vadd.f32 %v10663_v17, %v12957_v43 }
 0x523   : > { %v5130_v28 = vadd.f32 %v5129_v51, %v5128_v1  ;;  %v1895_v34 = vmax.f32 %v1383_v26, 0.0  ;;  %v5147_v23 = vsel %vm2310_vm2, %v4502_v32, 0.0  ;;  %v4505_v0 = vmax.f32 %v3431_v10, 0.0 }
 0x524   : > { %v4509_v26 = vmax.f32 %v3441_v11, 0.0  ;;  %v1897_v32 = vmax.f32 %v1385_v56, 0.0 }
 0x525   : > { %v5132_v58 = vadd.f32 %v5131_v49, %v5130_v28  ;;  %v4503_v28 = vmax.f32 %v3426_v61, 0.0  ;;  %v10954_v49 = vpop.f32.mrf.mxu1  ;;  %v5153_v19 = vsel %vm2310_vm2, %v4505_v0, 0.0 }
 0x526   : > { %v5161_v46 = vsel %vm2310_vm2, %v4509_v26, 0.0  ;;  %v12962_v26 = vld [vmem:[#allocation75_spill] sm:$0xff] }
 0x527   : > { %v5134_v35 = vadd.f32 %v5133_v14, %v5132_v58  ;;  %7477 = vmatmul.msk.bf16.gmra.mxu2 %vm2310_vm2, %v2211_v20  ;;  %v4504_v58 = vmax.f32 %v3429_v27, 0.0  ;;  %v2212_v14 = vpack.c.bf16 %v1895_v34, %v1894_v57  ;;  %v5149_v13 = vsel %vm2310_vm2, %v4503_v28, 0.0 }
 0x528   : > { %v4511_v27 = vmax.f32 %v3446_v62, 0.0  ;;  %v3466_v62 = vadd.f32 %v10663_v17, %v12962_v26 }
 0x529   : > { %v5136_v2 = vadd.f32 %v5135_v4, %v5134_v35  ;;  %v3436_v35 = vadd.f32 %v10663_v17, %v9079_v59  ;;  %v5151_v4 = vsel %vm2310_vm2, %v4504_v58, 0.0  ;;  %v4508_v59 = vmax.f32 %v3439_v22, 0.0  ;;  %v12958_v58 = vld [vmem:[#allocation63_spill] sm:$0xff] }
 0x52a   : > { %v3456_v33 = vadd.f32 %v10663_v17, %v12958_v58 }
 0x52b   : > { %v5138_v42 = vadd.f32 %v5137_v55, %v5136_v2  ;;  %v4507_v55 = vmax.f32 %v3436_v35, 0.0  ;;  %v4514_v35 = vmax.f32 %v3454_v54, 0.0 }
 0x52d   : > { %v5140_v39 = vadd.f32 %v5139_v12, %v5138_v42  ;;  %v5155_v42 = vsel %vm2310_vm2, %v4506_v48, 0.0  ;;  %v3444_v12 = vadd.f32 %v10663_v17, %v9136_v21  ;;  %v10974_v30 = vpop.f32.mrf.mxu1  ;;  %v5157_v52 = vsel %vm2310_vm2, %v4507_v55, 0.0 }
 0x52e   : > { %v5159_v21 = vsel %vm2310_vm2, %v4508_v59, 0.0  ;;  %v12961_v59 = vld [vmem:[#allocation72_spill] sm:$0xff] }
 0x52f   : > { %v5142_v1 = vadd.f32 %v5141_v63, %v5140_v39  ;;  %v4510_v61 = vmax.f32 %v3444_v12, 0.0  ;;  %v3464_v12 = vadd.f32 %v10663_v17, %v12961_v59 }
 0x531   : > { %v5144_v51 = vadd.f32 %v5143_v47, %v5142_v1  ;;  %v3449_v1 = vadd.f32 %v10663_v17, %v9176_v3  ;;  %v5165_v3 = vsel %vm2310_vm2, %v4511_v27, 0.0  ;;  %v4519_v27 = vmax.f32 %v3466_v62, 0.0 }
 0x533   : > { %v5146_v45 = vadd.f32 %v5145_v6, %v5144_v51  ;;  %v12956_v51 = vld [vmem:[#allocation57_spill] sm:$0xff]  ;;  %v5163_v6 = vsel %vm2310_vm2, %v4510_v61, 0.0  ;;  %v4512_v28 = vmax.f32 %v3449_v1, 0.0  ;;  %v12963_v61 = vld [vmem:[#allocation78_spill] sm:$0xff] }
 0x534   : > { %v3451_v57 = vadd.f32 %v10663_v17, %v12956_v51  ;;  %v3469_v1 = vadd.f32 %v10663_v17, %v12963_v61  ;;  %v12964_v51 = vld [vmem:[#allocation81_spill] sm:$0xff] }
 0x535   : > { %v5148_v20 = vadd.f32 %v5147_v23, %v5146_v45  ;;  %v2213_v45 = vpack.c.bf16 %v1897_v32, %v1896_v18  ;;  %v5167_v0 = vsel %vm2310_vm2, %v4512_v28, 0.0  ;;  %v12965_v28 = vld [vmem:[#allocation84_spill] sm:$0xff] }
 0x536   : > { %v4513_v23 = vmax.f32 %v3451_v57, 0.0  ;;  %v3471_v57 = vadd.f32 %v10663_v17, %v12964_v51  ;;  %v3474_v43 = vadd.f32 %v10663_v17, %v12965_v28 }
 0x537   : > { %v5150_v38 = vadd.f32 %v5149_v13, %v5148_v20  ;;  %7478 = vmatmul.msk.bf16.gmra.mxu2 %vm2310_vm2, %v2212_v14  ;;  %v10997_v20 = vpop.f32.mrf.mxu1  ;;  %v10999_v14 = vpop.f32.mrf.mxu2 }
 0x538   : > { %v5169_v22 = vsel %vm2310_vm2, %v4513_v23, 0.0 }
 0x539   : > { %v5152_v2 = vadd.f32 %v5151_v4, %v5150_v38  ;;  %v12959_v38 = vld [vmem:[#allocation66_spill] sm:$0xff] }
 0x53a   : > { %v3459_v4 = vadd.f32 %v10663_v17, %v12959_v38 }
 0x53b   : > { %v5154_v16 = vadd.f32 %v5153_v19, %v5152_v2  ;;  %v4515_v2 = vmax.f32 %v3456_v33, 0.0  ;;  %v12960_v19 = vld [vmem:[#allocation69_spill] sm:$0xff] }
 0x53c   : > { %v3461_v55 = vadd.f32 %v10663_v17, %v12960_v19 }
 0x53d   : > { %v5156_v39 = vadd.f32 %v5155_v42, %v5154_v16  ;;  %v5171_v16 = vsel %vm2310_vm2, %v4514_v35, 0.0  ;;  %v4516_v42 = vmax.f32 %v3459_v4, 0.0  ;;  %v5173_v56 = vsel %vm2310_vm2, %v4515_v2, 0.0 }
 0x53f   : > { %v5158_v63 = vadd.f32 %v5157_v52, %v5156_v39  ;;  %v4517_v52 = vmax.f32 %v3461_v55, 0.0  ;;  %v5175_v44 = vsel %vm2310_vm2, %v4516_v42, 0.0  ;;  %v12969_v42 = vld [vmem:[#allocation96_spill] sm:$0xff] }
 0x540   : > { %v3484_v59 = vadd.f32 %v10663_v17, %v12969_v42  ;;  %v12977_v42 = vld [vmem:[#allocation120_spill] sm:$0xff] }
 0x541   : > { %v5160_v47 = vadd.f32 %v5159_v21, %v5158_v63  ;;  %v4518_v21 = vmax.f32 %v3464_v12, 0.0 }
 0x543   : > { %v5162_v34 = vadd.f32 %v5161_v46, %v5160_v47  ;;  %v11017_v47 = vpop.f32.mrf.mxu1  ;;  %v5177_v46 = vsel %vm2310_vm2, %v4517_v52, 0.0  ;;  %v5179_v18 = vsel %vm2310_vm2, %v4518_v21, 0.0  ;;  %v12970_v52 = vld [vmem:[#allocation99_spill] sm:$0xff]  ;;  %v12971_v21 = vld [vmem:[#allocation102_spill] sm:$0xff] }
 0x544   : > { %v3486_v26 = vadd.f32 %v10663_v17, %v12970_v52  ;;  %v3489_v61 = vadd.f32 %v10663_v17, %v12971_v21  ;;  %v12978_v52 = vld [vmem:[#allocation123_spill] sm:$0xff] }
 0x545   : > { %v5164_v10 = vadd.f32 %v5163_v6, %v5162_v34  ;;  %v4520_v6 = vmax.f32 %v3469_v1, 0.0 }
 0x547   : > { %v5166_v13 = vadd.f32 %v5165_v3, %v5164_v10  ;;  %7479 = vmatmul.msk.bf16.gmra.mxu2 %vm2310_vm2, %v2213_v45  ;;  %v5181_v10 = vsel %vm2310_vm2, %v4519_v27, 0.0  ;;  %v4521_v45 = vmax.f32 %v3471_v57, 0.0  ;;  %v12966_v3 = vld [vmem:[#allocation87_spill] sm:$0xff]  ;;  %v5183_v33 = vsel %vm2310_vm2, %v4520_v6, 0.0  ;;  %v12972_v27 = vld [vmem:[#allocation105_spill] sm:$0xff]  ;;  %v12973_v6 = vld [vmem:[#allocation108_spill] sm:$0xff] }
 0x548   : > { %v3476_v23 = vadd.f32 %v10663_v17, %v12966_v3  ;;  %v3491_v51 = vadd.f32 %v10663_v17, %v12972_v27  ;;  %v3494_v28 = vadd.f32 %v10663_v17, %v12973_v6  ;;  %v12974_v3 = vld [vmem:[#allocation111_spill] sm:$0xff] }
 0x549   : > { %v5168_v48 = vadd.f32 %v5167_v0, %v5166_v13  ;;  %v4522_v13 = vmax.f32 %v3474_v43, 0.0  ;;  %v12967_v0 = vld [vmem:[#allocation90_spill] sm:$0xff]  ;;  %v5185_v4 = vsel %vm2310_vm2, %v4521_v45, 0.0 }
 0x54a   : > { %v3479_v35 = vadd.f32 %v10663_v17, %v12967_v0  ;;  %v4529_v45 = vmax.f32 %v3491_v51, 0.0  ;;  %v12975_v0 = vld [vmem:[#allocation114_spill] sm:$0xff]  ;;  %v12980_v51 = vld [vmem:[#allocation129_spill] sm:$0xff] }
 0x54b   : > { %v5170_v11 = vadd.f32 %v5169_v22, %v5168_v48  ;;  %v4523_v48 = vmax.f32 %v3476_v23, 0.0  ;;  %v12968_v22 = vld [vmem:[#allocation93_spill] sm:$0xff]  ;;  %v11034_v19 = vpop.f32.mrf.mxu1  ;;  %v3496_v23 = vadd.f32 %v10663_v17, %v12974_v3 }
 0x54c   : > { %v3481_v2 = vadd.f32 %v10663_v17, %v12968_v22  ;;  %v12976_v22 = vld [vmem:[#allocation117_spill] sm:$0xff] }
 0x54d   : > { %v5172_v39 = vadd.f32 %v5171_v16, %v5170_v11  ;;  %v5187_v11 = vsel %vm2310_vm2, %v4522_v13, 0.0  ;;  %v4524_v16 = vmax.f32 %v3479_v35, 0.0  ;;  %v4530_v13 = vmax.f32 %v3494_v28, 0.0  ;;  %v12981_v28 = vld [vmem:[#allocation132_spill] sm:$0xff] }
 0x54e   : > { %v3499_v35 = vadd.f32 %v10663_v17, %v12975_v0 }
 0x54f   : > { %v5174_v63 = vadd.f32 %v5173_v56, %v5172_v39  ;;  %v5189_v39 = vsel %vm2310_vm2, %v4523_v48, 0.0  ;;  %v4525_v56 = vmax.f32 %v3481_v2, 0.0  ;;  %v4531_v48 = vmax.f32 %v3496_v23, 0.0  ;;  %v11083_v23 = vld [vmem:[%s12677_s7] ss:$0 sm:$0xff] }
 0x550   : > { %v3501_v2 = vadd.f32 %v10663_v17, %v12976_v22 }
 0x551   : > { %v5176_v32 = vadd.f32 %v5175_v44, %v5174_v63  ;;  %v5191_v63 = vsel %vm2310_vm2, %v4524_v16, 0.0  ;;  %v4526_v44 = vmax.f32 %v3484_v59, 0.0  ;;  %v4532_v16 = vmax.f32 %v3499_v35, 0.0 }
 0x552   : > { %v3504_v59 = vadd.f32 %v10663_v17, %v12977_v42 }
 0x553   : > { %v5178_v34 = vadd.f32 %v5177_v46, %v5176_v32  ;;  %v5193_v32 = vsel %vm2310_vm2, %v4525_v56, 0.0  ;;  %v4527_v46 = vmax.f32 %v3486_v26, 0.0  ;;  %v11051_v43 = vpop.f32.mrf.mxu1  ;;  %v4533_v56 = vmax.f32 %v3501_v2, 0.0 }
 0x554   : > { %v3506_v26 = vadd.f32 %v10663_v17, %v12978_v52  ;;  %v4534_v21 = vmax.f32 %v3504_v59, 0.0 }
 0x555   : > { %v5180_v54 = vadd.f32 %v5179_v18, %v5178_v34  ;;  %v5195_v34 = vsel %vm2310_vm2, %v4526_v44, 0.0  ;;  %v4528_v18 = vmax.f32 %v3489_v61, 0.0  ;;  %v5207_v44 = vsel %vm2310_vm2, %v4532_v16, 0.0  ;;  %v12979_v61 = vld [vmem:[#allocation126_spill] sm:$0xff] }
 0x556   : > { %v4535_v27 = vmax.f32 %v3506_v26, 0.0 }
 0x557   : > { %v5182_v58 = vadd.f32 %v5181_v10, %v5180_v54  ;;  %v5197_v10 = vsel %vm2310_vm2, %v4527_v46, 0.0  ;;  %v5209_v46 = vsel %vm2310_vm2, %v4533_v56, 0.0 }
 0x559   : > { %v5184_v38 = vadd.f32 %v5183_v33, %v5182_v58  ;;  %v5199_v33 = vsel %vm2310_vm2, %v4528_v18, 0.0  ;;  %v5211_v18 = vsel %vm2310_vm2, %v4534_v21, 0.0 }
 0x55b   : > { %v5186_v55 = vadd.f32 %v5185_v4, %v5184_v38  ;;  %v5201_v4 = vsel %vm2310_vm2, %v4529_v45, 0.0  ;;  %v5213_v45 = vsel %vm2310_vm2, %v4535_v27, 0.0 }
 0x55d   : > { %v5188_v12 = vadd.f32 %v5187_v11, %v5186_v55  ;;  %v5203_v11 = vsel %vm2310_vm2, %v4530_v13, 0.0 }
 0x55f   : > { %v5190_v62 = vadd.f32 %v5189_v39, %v5188_v12  ;;  %v5205_v39 = vsel %vm2310_vm2, %v4531_v48, 0.0 }
 0x561   : > { %v5192_v1 = vadd.f32 %v5191_v63, %v5190_v62  ;;  %v11068_v62 = vpop.f32.mrf.mxu1 }
 0x563   : > { %v5194_v57 = vadd.f32 %v5193_v32, %v5192_v1  ;;  %v3509_v1 = vadd.f32 %v10663_v17, %v12979_v61 }
 0x565   : > { %v5196_v54 = vadd.f32 %v5195_v34, %v5194_v57  ;;  %v3511_v57 = vadd.f32 %v10663_v17, %v12980_v51  ;;  %v4536_v6 = vmax.f32 %v3509_v1, 0.0 }
 0x567   : > { %v5198_v58 = vadd.f32 %v5197_v10, %v5196_v54  ;;  %v3514_v54 = vadd.f32 %v10663_v17, %v12981_v28  ;;  %v4537_v3 = vmax.f32 %v3511_v57, 0.0  ;;  %v5215_v0 = vsel %vm2310_vm2, %v4536_v6, 0.0 }
 0x569   : > { %v5200_v38 = vadd.f32 %v5199_v33, %v5198_v58  ;;  %v12982_v58 = vld [vmem:[#allocation135_spill] sm:$0xff]  ;;  %v4538_v35 = vmax.f32 %v3514_v54, 0.0  ;;  %v11090_v17 = vpop.f32.mrf.mxu1  ;;  %v5217_v22 = vsel %vm2310_vm2, %v4537_v3, 0.0 }
 0x56a   : > { %v3516_v33 = vadd.f32 %v11083_v23, %v12982_v58 }
 0x56b   : > { %v5202_v55 = vadd.f32 %v5201_v4, %v5200_v38  ;;  %v12983_v38 = vld [vmem:[#allocation138_spill] sm:$0xff]  ;;  %v5219_v42 = vsel %vm2310_vm2, %v4538_v35, 0.0 }
 0x56c   : > { %v3519_v4 = vadd.f32 %v11083_v23, %v12983_v38  ;;  %v4539_v2 = vmax.f32 %v3516_v33, 0.0 }
 0x56d   : > { %v5204_v12 = vadd.f32 %v5203_v11, %v5202_v55  ;;  %v12984_v55 = vld [vmem:[#allocation141_spill] sm:$0xff] }
 0x56e   : > { %v3521_v11 = vadd.f32 %v11083_v23, %v12984_v55  ;;  %v4540_v59 = vmax.f32 %v3519_v4, 0.0  ;;  %v5221_v52 = vsel %vm2310_vm2, %v4539_v2, 0.0 }
 0x56f   : > { %v5206_v63 = vadd.f32 %v5205_v39, %v5204_v12  ;;  %v12985_v12 = vld [vmem:[#allocation144_spill] sm:$0xff] }
 0x570   : > { %v3524_v39 = vadd.f32 %v11083_v23, %v12985_v12  ;;  %v4541_v26 = vmax.f32 %v3521_v11, 0.0  ;;  %v5223_v61 = vsel %vm2310_vm2, %v4540_v59, 0.0 }
 0x571   : > { %v5208_v32 = vadd.f32 %v5207_v44, %v5206_v63  ;;  %v12986_v63 = vld [vmem:[#allocation147_spill] sm:$0xff]  ;;  %v11107_v6 = vpop.f32.mrf.mxu1 }
 0x572   : > { %v3526_v44 = vadd.f32 %v11083_v23, %v12986_v63  ;;  %v4542_v1 = vmax.f32 %v3524_v39, 0.0  ;;  %v5225_v51 = vsel %vm2310_vm2, %v4541_v26, 0.0 }
 0x573   : > { %v5210_v34 = vadd.f32 %v5209_v46, %v5208_v32  ;;  %v12987_v32 = vld [vmem:[#allocation150_spill] sm:$0xff] }
 0x574   : > { %v3529_v46 = vadd.f32 %v11083_v23, %v12987_v32  ;;  %v4543_v57 = vmax.f32 %v3526_v44, 0.0  ;;  %v5227_v54 = vsel %vm2310_vm2, %v4542_v1, 0.0  ;;  %v12994_v1 = vld [vmem:[#allocation171_spill] sm:$0xff] }
 0x575   : > { %v5212_v10 = vadd.f32 %v5211_v18, %v5210_v34  ;;  %v12988_v34 = vld [vmem:[#allocation153_spill] sm:$0xff]  ;;  %v3546_v32 = vadd.f32 %v11083_v23, %v12994_v1  ;;  %v13001_v1 = vld [vmem:[#allocation192_spill] sm:$0xff] }
 0x576   : > { %v3531_v18 = vadd.f32 %v11083_v23, %v12988_v34  ;;  %v5229_v33 = vsel %vm2310_vm2, %v4543_v57, 0.0  ;;  %v12995_v57 = vld [vmem:[#allocation174_spill] sm:$0xff] }
 0x577   : > { %v5214_v13 = vadd.f32 %v5213_v45, %v5212_v10  ;;  %v4544_v10 = vmax.f32 %v3529_v46, 0.0  ;;  %v12989_v45 = vld [vmem:[#allocation156_spill] sm:$0xff]  ;;  %v3549_v34 = vadd.f32 %v11083_v23, %v12995_v57  ;;  %v13002_v57 = vld [vmem:[#allocation195_spill] sm:$0xff] }
 0x578   : > { %v3534_v3 = vadd.f32 %v11083_v23, %v12989_v45 }
 0x579   : > { %v5216_v48 = vadd.f32 %v5215_v0, %v5214_v13  ;;  %v4545_v13 = vmax.f32 %v3531_v18, 0.0  ;;  %v12990_v0 = vld [vmem:[#allocation159_spill] sm:$0xff]  ;;  %v5231_v4 = vsel %vm2310_vm2, %v4544_v10, 0.0  ;;  %v11124_v63 = vpop.f32.mrf.mxu1  ;;  %v12996_v10 = vld [vmem:[#allocation177_spill] sm:$0xff] }
 0x57a   : > { %v3536_v35 = vadd.f32 %v11083_v23, %v12990_v0  ;;  %v3551_v45 = vadd.f32 %v11083_v23, %v12996_v10  ;;  %v13003_v10 = vld [vmem:[#allocation198_spill] sm:$0xff] }
 0x57b   : > { %v5218_v16 = vadd.f32 %v5217_v22, %v5216_v48  ;;  %v4546_v48 = vmax.f32 %v3534_v3, 0.0  ;;  %v12991_v22 = vld [vmem:[#allocation162_spill] sm:$0xff]  ;;  %v5233_v11 = vsel %vm2310_vm2, %v4545_v13, 0.0  ;;  %v12997_v13 = vld [vmem:[#allocation180_spill] sm:$0xff] }
 0x57c   : > { %v3539_v2 = vadd.f32 %v11083_v23, %v12991_v22  ;;  %v3554_v0 = vadd.f32 %v11083_v23, %v12997_v13 }
 0x57d   : > { %v5220_v56 = vadd.f32 %v5219_v42, %v5218_v16  ;;  %v4547_v16 = vmax.f32 %v3536_v35, 0.0  ;;  %v12992_v42 = vld [vmem:[#allocation165_spill] sm:$0xff]  ;;  %v5235_v39 = vsel %vm2310_vm2, %v4546_v48, 0.0  ;;  %v12998_v48 = vld [vmem:[#allocation183_spill] sm:$0xff] }
 0x57e   : > { %v3541_v59 = vadd.f32 %v11083_v23, %v12992_v42  ;;  %v3556_v22 = vadd.f32 %v11083_v23, %v12998_v48  ;;  %v12999_v42 = vld [vmem:[#allocation186_spill] sm:$0xff] }
 0x57f   : > { %v5222_v21 = vadd.f32 %v5221_v52, %v5220_v56  ;;  %v4548_v56 = vmax.f32 %v3539_v2, 0.0  ;;  %v12993_v52 = vld [vmem:[#allocation168_spill] sm:$0xff] }
 0x580   : > { %v3544_v26 = vadd.f32 %v11083_v23, %v12993_v52  ;;  %v13000_v52 = vld [vmem:[#allocation189_spill] sm:$0xff] }
 0x581   : > { %v5224_v27 = vadd.f32 %v5223_v61, %v5222_v21  ;;  %v5237_v21 = vsel %vm2310_vm2, %v4547_v16, 0.0  ;;  %v4549_v61 = vmax.f32 %v3541_v59, 0.0  ;;  %v11141_v2 = vpop.f32.mrf.mxu1  ;;  %v4554_v16 = vmax.f32 %v3554_v0, 0.0  ;;  %v13004_v0 = vld [vmem:[#allocation201_spill] sm:$0xff] }
 0x582   : > { %v3559_v59 = vadd.f32 %v11083_v23, %v12999_v42  ;;  %v13005_v42 = vld [vmem:[#allocation206_spill] sm:$0xff] }
 0x583   : > { %v5226_v28 = vadd.f32 %v5225_v51, %v5224_v27  ;;  %v5239_v27 = vsel %vm2310_vm2, %v4548_v56, 0.0  ;;  %v4550_v51 = vmax.f32 %v3544_v26, 0.0  ;;  %v4555_v56 = vmax.f32 %v3556_v22, 0.0 }
 0x584   : > { %v3561_v26 = vadd.f32 %v11083_v23, %v13000_v52  ;;  %v3574_v22 = vadd.f32 %v11083_v23, %v10177_v15  ;;  %v13006_v52 = vld [vmem:[#allocation209_spill] sm:$0xff] }
 0x585   : > { %v5228_v58 = vadd.f32 %v5227_v54, %v5226_v28  ;;  %v5241_v28 = vsel %vm2310_vm2, %v4549_v61, 0.0  ;;  %v4551_v54 = vmax.f32 %v3546_v32, 0.0  ;;  %v4556_v61 = vmax.f32 %v3559_v59, 0.0 }
 0x586   : > { %v3564_v32 = vadd.f32 %v11083_v23, %v13001_v1  ;;  %v3576_v59 = vadd.f32 %v11083_v23, %v13005_v42  ;;  %v13007_v1 = vld [vmem:[#allocation213_spill] sm:$0xff] }
 0x587   : > { %v5230_v38 = vadd.f32 %v5229_v33, %v5228_v58  ;;  %v5243_v58 = vsel %vm2310_vm2, %v4550_v51, 0.0  ;;  %v4552_v33 = vmax.f32 %v3549_v34, 0.0  ;;  %v4557_v51 = vmax.f32 %v3561_v26, 0.0 }
 0x588   : > { %v3566_v34 = vadd.f32 %v11083_v23, %v13002_v57  ;;  %v3579_v26 = vadd.f32 %v11083_v23, %v13006_v52  ;;  %v3581_v15 = vadd.f32 %v11083_v23, %v13007_v1  ;;  %v13008_v57 = vld [vmem:[#allocation216_spill] sm:$0xff] }
 0x589   : > { %v5232_v55 = vadd.f32 %v5231_v4, %v5230_v38  ;;  %v5245_v38 = vsel %vm2310_vm2, %v4551_v54, 0.0  ;;  %v4553_v4 = vmax.f32 %v3551_v45, 0.0  ;;  %v4558_v54 = vmax.f32 %v3564_v32, 0.0 }
 0x58a   : > { %v3569_v45 = vadd.f32 %v11083_v23, %v13003_v10  ;;  %v4559_v13 = vmax.f32 %v3566_v34, 0.0  ;;  %v3584_v34 = vadd.f32 %v11083_v23, %v13008_v57  ;;  %v13009_v10 = vld [vmem:[#allocation219_spill] sm:$0xff] }
 0x58b   : > { %v5234_v12 = vadd.f32 %v5233_v11, %v5232_v55  ;;  %v5247_v11 = vsel %vm2310_vm2, %v4552_v33, 0.0  ;;  %v5257_v33 = vsel %vm2310_vm2, %v4557_v51, 0.0  ;;  %v4564_v51 = vmax.f32 %v3579_v26, 0.0 }
 0x58c   : > { %v4560_v48 = vmax.f32 %v3569_v45, 0.0  ;;  %v3586_v45 = vadd.f32 %v11083_v23, %v13009_v10 }
 0x58d   : > { %v5236_v44 = vadd.f32 %v5235_v39, %v5234_v12  ;;  %v5249_v39 = vsel %vm2310_vm2, %v4553_v4, 0.0  ;;  %v5259_v4 = vsel %vm2310_vm2, %v4558_v54, 0.0  ;;  %v4565_v54 = vmax.f32 %v3581_v15, 0.0 }
 0x58f   : > { %v5238_v46 = vadd.f32 %v5237_v21, %v5236_v44  ;;  %v5251_v21 = vsel %vm2310_vm2, %v4554_v16, 0.0 }
 0x591   : > { %v5240_v18 = vadd.f32 %v5239_v27, %v5238_v46  ;;  %v5253_v27 = vsel %vm2310_vm2, %v4555_v56, 0.0  ;;  %v4562_v56 = vmax.f32 %v3574_v22, 0.0  ;;  %v13011_v22 = vld [vmem:[#allocation226_spill] sm:$0xff] }
 0x593   : > { %v5242_v3 = vadd.f32 %v5241_v28, %v5240_v18  ;;  %v5255_v28 = vsel %vm2310_vm2, %v4556_v61, 0.0  ;;  %v4563_v61 = vmax.f32 %v3576_v59, 0.0  ;;  %v13012_v59 = vld [vmem:[#allocation229_spill] sm:$0xff] }
 0x595   : > { %v5244_v35 = vadd.f32 %v5243_v58, %v5242_v3  ;;  %v11158_v3 = vpop.f32.mrf.mxu1 }
 0x597   : > { %v5246_v55 = vadd.f32 %v5245_v38, %v5244_v35  ;;  %v3571_v35 = vadd.f32 %v11083_v23, %v13004_v0  ;;  %v13010_v0 = vld [vmem:[#allocation222_spill] sm:$0xff] }
 0x599   : > { %v5248_v12 = vadd.f32 %v5247_v11, %v5246_v55  ;;  %v5261_v11 = vsel %vm2310_vm2, %v4559_v13, 0.0  ;;  %v4561_v16 = vmax.f32 %v3571_v35, 0.0  ;;  %v4566_v13 = vmax.f32 %v3584_v34, 0.0 }
 0x59a   : > { %v3589_v35 = vadd.f32 %v11083_v23, %v13010_v0 }
 0x59b   : > { %v5250_v44 = vadd.f32 %v5249_v39, %v5248_v12  ;;  %v5263_v39 = vsel %vm2310_vm2, %v4560_v48, 0.0  ;;  %v4567_v48 = vmax.f32 %v3586_v45, 0.0 }
 0x59c   : > { %v4568_v42 = vmax.f32 %v3589_v35, 0.0 }
 0x59d   : > { %v5252_v46 = vadd.f32 %v5251_v21, %v5250_v44  ;;  %v5265_v21 = vsel %vm2310_vm2, %v4561_v16, 0.0  ;;  %v11175_v32 = vpop.f32.mrf.mxu1  ;;  %v5275_v16 = vsel %vm2310_vm2, %v4566_v13, 0.0  ;;  %v5277_v52 = vsel %vm2310_vm2, %v4567_v48, 0.0 }
 0x59e   : > { %v5279_v1 = vsel %vm2310_vm2, %v4568_v42, 0.0 }
 0x59f   : > { %v5254_v18 = vadd.f32 %v5253_v27, %v5252_v46  ;;  %v5267_v27 = vsel %vm2310_vm2, %v4562_v56, 0.0 }
 0x5a1   : > { %v5256_v58 = vadd.f32 %v5255_v28, %v5254_v18  ;;  %v5269_v28 = vsel %vm2310_vm2, %v4563_v61, 0.0 }
 0x5a3   : > { %v5258_v38 = vadd.f32 %v5257_v33, %v5256_v58  ;;  %v5271_v33 = vsel %vm2310_vm2, %v4564_v51, 0.0 }
 0x5a5   : > { %v5260_v55 = vadd.f32 %v5259_v4, %v5258_v38  ;;  %v5273_v4 = vsel %vm2310_vm2, %v4565_v54, 0.0 }
 0x5a7   : > { %v5262_v12 = vadd.f32 %v5261_v11, %v5260_v55  ;;  %v3591_v55 = vadd.f32 %v11083_v23, %v13011_v22 }
 0x5a9   : > { %v5264_v44 = vadd.f32 %v5263_v39, %v5262_v12  ;;  %v3594_v12 = vadd.f32 %v11083_v23, %v13012_v59  ;;  %v11192_v39 = vpop.f32.mrf.mxu1  ;;  %v4569_v26 = vmax.f32 %v3591_v55, 0.0 }
 0x5ab   : > { %v5266_v46 = vadd.f32 %v5265_v21, %v5264_v44  ;;  %v13013_v44 = vld [vmem:[#allocation232_spill] sm:$0xff]  ;;  %v4570_v15 = vmax.f32 %v3594_v12, 0.0  ;;  %v5281_v57 = vsel %vm2310_vm2, %v4569_v26, 0.0  ;;  %v13017_v12 = vld [vmem:[#allocation250_spill] sm:$0xff] }
 0x5ac   : > { %v3596_v21 = vadd.f32 %v11083_v23, %v13013_v44  ;;  %v13018_v44 = vld [vmem:[#allocation253_spill] sm:$0xff] }
 0x5ad   : > { %v5268_v18 = vadd.f32 %v5267_v27, %v5266_v46  ;;  %v13014_v46 = vld [vmem:[#allocation235_spill] sm:$0xff]  ;;  %v5283_v10 = vsel %vm2310_vm2, %v4570_v15, 0.0 }
 0x5ae   : > { %v3599_v27 = vadd.f32 %v11083_v23, %v13014_v46  ;;  %v4571_v34 = vmax.f32 %v3596_v21, 0.0  ;;  %v3614_v21 = vadd.f32 %v11083_v23, %v13018_v44  ;;  %v13019_v46 = vld [vmem:[#allocation256_spill] sm:$0xff] }
 0x5af   : > { %v5270_v58 = vadd.f32 %v5269_v28, %v5268_v18  ;;  %v13015_v18 = vld [vmem:[#allocation239_spill] sm:$0xff] }
 0x5b0   : > { %v3601_v28 = vadd.f32 %v11083_v23, %v13015_v18  ;;  %v4572_v45 = vmax.f32 %v3599_v27, 0.0  ;;  %v5285_v0 = vsel %vm2310_vm2, %v4571_v34, 0.0  ;;  %v13020_v34 = vld [vmem:[#allocation259_spill] sm:$0xff] }
 0x5b1   : > { %v5272_v38 = vadd.f32 %v5271_v33, %v5270_v58  ;;  %v13016_v58 = vld [vmem:[#allocation242_spill] sm:$0xff]  ;;  %v3619_v18 = vadd.f32 %v11083_v23, %v13020_v34  ;;  %v3639_v34 = vadd.f32 %v11083_v23, %v10781_v8 }
 0x5b2   : > { %v3604_v33 = vadd.f32 %v11083_v23, %v13016_v58  ;;  %v4573_v35 = vmax.f32 %v3601_v28, 0.0  ;;  %v5287_v22 = vsel %vm2310_vm2, %v4572_v45, 0.0  ;;  %v3621_v58 = vadd.f32 %v11083_v23, %v10627_v31 }
 0x5b3   : > { %v5274_v11 = vadd.f32 %v5273_v4, %v5272_v38  ;;  %v3606_v38 = vadd.f32 %v11083_v23, %v10487_v29  ;;  %v11209_v4 = vpop.f32.mrf.mxu1  ;;  %v3629_v31 = vadd.f32 %v11083_v23, %v10696_v24 }
 0x5b4   : > { %v4574_v55 = vmax.f32 %v3604_v33, 0.0  ;;  %v5289_v42 = vsel %vm2310_vm2, %v4573_v35, 0.0  ;;  %v3624_v35 = vadd.f32 %v11083_v23, %v10646_v7 }
 0x5b5   : > { %v5276_v56 = vadd.f32 %v5275_v16, %v5274_v11  ;;  %v3609_v11 = vadd.f32 %v11083_v23, %v10510_v5  ;;  %v4575_v59 = vmax.f32 %v3606_v38, 0.0  ;;  %v3616_v5 = vadd.f32 %v11083_v23, %v13019_v46  ;;  %v13023_v46 = vld [vmem:[#allocation275_spill] sm:$0xff] }
 0x5b6   : > { %v5291_v26 = vsel %vm2310_vm2, %v4574_v55, 0.0  ;;  %v3626_v55 = vadd.f32 %v11083_v23, %v10674_v60  ;;  %v4584_v60 = vmax.f32 %v3629_v31, 0.0 }
 0x5b7   : > { %v5278_v61 = vadd.f32 %v5277_v52, %v5276_v56  ;;  %v3611_v56 = vadd.f32 %v11083_v23, %v13017_v12  ;;  %v4576_v29 = vmax.f32 %v3609_v11, 0.0  ;;  %v4579_v45 = vmax.f32 %v3616_v5, 0.0 }
 0x5b8   : > { %v3636_v5 = vadd.f32 %v11083_v23, %v13023_v46 }
 0x5b9   : > { %v5280_v51 = vadd.f32 %v5279_v1, %v5278_v61  ;;  %v5293_v1 = vsel %vm2310_vm2, %v4575_v59, 0.0  ;;  %v4577_v15 = vmax.f32 %v3611_v56, 0.0  ;;  %v4583_v56 = vmax.f32 %v3626_v55, 0.0 }
 0x5bb   : > { %v5282_v54 = vadd.f32 %v5281_v57, %v5280_v51  ;;  %v5295_v51 = vsel %vm2310_vm2, %v4576_v29, 0.0  ;;  %v4578_v57 = vmax.f32 %v3614_v21, 0.0  ;;  %v11226_v28 = vpop.f32.mrf.mxu1  ;;  %v13022_v21 = vld [vmem:[#allocation272_spill] sm:$0xff] }
 0x5bd   : > { %v5284_v13 = vadd.f32 %v5283_v10, %v5282_v54  ;;  %v5297_v10 = vsel %vm2310_vm2, %v4577_v15, 0.0  ;;  %v5309_v15 = vsel %vm2310_vm2, %v4583_v56, 0.0 }
 0x5bf   : > { %v5286_v48 = vadd.f32 %v5285_v0, %v5284_v13  ;;  %v5299_v13 = vsel %vm2310_vm2, %v4578_v57, 0.0  ;;  %v4580_v0 = vmax.f32 %v3619_v18, 0.0 }
 0x5c1   : > { %v5288_v16 = vadd.f32 %v5287_v22, %v5286_v48  ;;  %v5301_v48 = vsel %vm2310_vm2, %v4579_v45, 0.0  ;;  %v4581_v22 = vmax.f32 %v3621_v58, 0.0  ;;  %v3641_v45 = vadd.f32 %v11083_v23, %v10796_v40 }
 0x5c3   : > { %v5290_v52 = vadd.f32 %v5289_v42, %v5288_v16  ;;  %v5303_v16 = vsel %vm2310_vm2, %v4580_v0, 0.0  ;;  %v4582_v42 = vmax.f32 %v3624_v35, 0.0  ;;  %v5305_v12 = vsel %vm2310_vm2, %v4581_v22, 0.0  ;;  %v13024_v22 = vld [vmem:[#allocation281_spill] sm:$0xff] }
 0x5c4   : > { %v3644_v0 = vadd.f32 %v11083_v23, %v10804_v25  ;;  %v4589_v8 = vmax.f32 %v3641_v45, 0.0  ;;  %v3646_v55 = vadd.f32 %v11083_v23, %v13024_v22 }
 0x5c5   : > { %v5292_v61 = vadd.f32 %v5291_v26, %v5290_v52  ;;  %v13021_v52 = vld [vmem:[#allocation269_spill] sm:$0xff]  ;;  %v11243_v26 = vpop.f32.mrf.mxu1  ;;  %v5307_v44 = vsel %vm2310_vm2, %v4582_v42, 0.0  ;;  %v3649_v42 = vadd.f32 %v11083_v23, %v10931_v36  ;;  %v3656_v36 = vadd.f32 %v11083_v23, %v10997_v20 }
 0x5c6   : > { %v3631_v7 = vadd.f32 %v11083_v23, %v13021_v52  ;;  %v4590_v40 = vmax.f32 %v3644_v0, 0.0  ;;  %v4591_v25 = vmax.f32 %v3646_v55, 0.0 }
 0x5c7   : > { %v5294_v27 = vadd.f32 %v5293_v1, %v5292_v61  ;;  %v3634_v61 = vadd.f32 %v11083_v23, %v13022_v21 }
 0x5c8   : > { %v4585_v24 = vmax.f32 %v3631_v7, 0.0  ;;  %v5323_v52 = vsel %vm2310_vm2, %v4590_v40, 0.0  ;;  %v4592_v7 = vmax.f32 %v3649_v42, 0.0 }
 0x5c9   : > { %v5296_v54 = vadd.f32 %v5295_v51, %v5294_v27  ;;  %v5311_v51 = vsel %vm2310_vm2, %v4584_v60, 0.0  ;;  %v4586_v57 = vmax.f32 %v3634_v61, 0.0  ;;  %v5325_v60 = vsel %vm2310_vm2, %v4591_v25, 0.0 }
 0x5cb   : > { %v5298_v33 = vadd.f32 %v5297_v10, %v5296_v54  ;;  %v5313_v54 = vsel %vm2310_vm2, %v4585_v24, 0.0  ;;  %v4587_v10 = vmax.f32 %v3636_v5, 0.0  ;;  %v3659_v24 = vadd.f32 %v11083_v23, %v11017_v47 }
 0x5cd   : > { %v5300_v38 = vadd.f32 %v5299_v13, %v5298_v33  ;;  %v5315_v33 = vsel %vm2310_vm2, %v4586_v57, 0.0  ;;  %v4588_v13 = vmax.f32 %v3639_v34, 0.0  ;;  %v11260_v35 = vpop.f32.mrf.mxu1  ;;  %v4596_v20 = vmax.f32 %v3659_v24, 0.0 }
 0x5ce   : > { %v3664_v34 = vadd.f32 %v11083_v23, %v11051_v43  ;;  %v3669_v43 = vadd.f32 %v11083_v23, %v11090_v17  ;;  %v3681_v24 = vadd.f32 %v11083_v23, %v11175_v32  ;;  %v3689_v32 = vadd.f32 %v11083_v23, %v11226_v28 }
 0x5cf   : > { %v5302_v11 = vadd.f32 %v5301_v48, %v5300_v38  ;;  %v5317_v48 = vsel %vm2310_vm2, %v4587_v10, 0.0  ;;  %v13026_v10 = vld [vmem:[#allocation13_spill] sm:$0xff] }
 0x5d0   : > { %v4600_v25 = vmax.f32 %v3669_v43, 0.0 }
 0x5d1   : > { %v5304_v59 = vadd.f32 %v5303_v16, %v5302_v11  ;;  %v5319_v16 = vsel %vm2310_vm2, %v4588_v13, 0.0 }
 0x5d3   : > { %v5306_v29 = vadd.f32 %v5305_v12, %v5304_v59  ;;  %v5321_v59 = vsel %vm2310_vm2, %v4589_v8, 0.0  ;;  %v3651_v12 = vadd.f32 %v11083_v23, %v10954_v49  ;;  %v4598_v8 = vmax.f32 %v3664_v34, 0.0 }
 0x5d5   : > { %v5308_v1 = vadd.f32 %v5307_v44, %v5306_v29  ;;  %v3654_v29 = vadd.f32 %v11083_v23, %v10974_v30  ;;  %v4593_v21 = vmax.f32 %v3651_v12, 0.0  ;;  %v11277_v61 = vpop.f32.mrf.mxu1  ;;  %v4595_v30 = vmax.f32 %v3656_v36, 0.0 }
 0x5d6   : > { %v3674_v12 = vadd.f32 %v11083_v23, %v11124_v63  ;;  %v3679_v36 = vadd.f32 %v11083_v23, %v11158_v3  ;;  %v3686_v3 = vadd.f32 %v11083_v23, %v11209_v4  ;;  %v3694_v4 = vadd.f32 %v11083_v23, %v11260_v35 }
 0x5d7   : > { %v5310_v27 = vadd.f32 %v5309_v15, %v5308_v1  ;;  %v5327_v15 = vsel %vm2310_vm2, %v4592_v7, 0.0  ;;  %v4594_v49 = vmax.f32 %v3654_v29, 0.0  ;;  %v5329_v5 = vsel %vm2310_vm2, %v4593_v21, 0.0 }
 0x5d8   : > { %v3676_v29 = vadd.f32 %v11083_v23, %v11141_v2  ;;  %v4602_v21 = vmax.f32 %v3674_v12, 0.0  ;;  %v3696_v28 = vadd.f32 %v11083_v23, %v11277_v61 }
 0x5d9   : > { %v5312_v18 = vadd.f32 %v5311_v51, %v5310_v27  ;;  %v3661_v27 = vadd.f32 %v11083_v23, %v11034_v19  ;;  %v5331_v57 = vsel %vm2310_vm2, %v4594_v49, 0.0  ;;  %v3666_v19 = vadd.f32 %v11083_v23, %v11068_v62 }
 0x5da   : > { %v4603_v49 = vmax.f32 %v3676_v29, 0.0 }
 0x5db   : > { %v5314_v58 = vadd.f32 %v5313_v54, %v5312_v18  ;;  %v13025_v54 = vld [vmem:[#allocation11_spill] sm:$0xff]  ;;  %v4597_v13 = vmax.f32 %v3661_v27, 0.0  ;;  %v4599_v42 = vmax.f32 %v3666_v19, 0.0 }
 0x5dc   : > { %v1386_v45 = vadd.f32 %v13026_v10, %v13025_v54 }
 0x5dd   : > { %v5316_v38 = vadd.f32 %v5315_v33, %v5314_v58  ;;  %v13027_v58 = vld [vmem:[#allocation12_spill] sm:$0xff]  ;;  %v5333_v33 = vsel %vm2310_vm2, %v4595_v30, 0.0  ;;  %v3698_v22 = vpop.f32.mrf.mxu1  ;;  %v5337_v40 = vsel %vm2310_vm2, %v4597_v13, 0.0  ;;  %v5341_v17 = vsel %vm2310_vm2, %v4599_v42, 0.0 }
 0x5de   : > { %v1387_v47 = vadd.f32 %v13026_v10, %v13027_v58  ;;  %v3684_v30 = vadd.f32 %v11083_v23, %v11192_v39  ;;  %v4607_v58 = vmax.f32 %v3686_v3, 0.0  ;;  %v3691_v39 = vadd.f32 %v11083_v23, %v11243_v26 }
 0x5df   : > { %v5318_v11 = vadd.f32 %v5317_v48, %v5316_v38  ;;  %v11295_v38 = vpop.f32.mrf.mxu2  ;;  %v5335_v48 = vsel %vm2310_vm2, %v4596_v20, 0.0  ;;  %v4608_v13 = vmax.f32 %v3689_v32, 0.0  ;;  %v3699_v26 = vadd.f32 %v11083_v23, %v3698_v22 }
 0x5e1   : > { %v5320_v31 = vadd.f32 %v5319_v16, %v5318_v11  ;;  %v1898_v11 = vmax.f32 %v1386_v45, 0.0  ;;  %v1899_v16 = vmax.f32 %v1387_v47, 0.0  ;;  %v5359_v43 = vsel %vm2310_vm2, %v4608_v13, 0.0 }
 0x5e3   : > { %v5322_v56 = vadd.f32 %v5321_v59, %v5320_v31  ;;  %v3671_v31 = vadd.f32 %v11083_v23, %v11107_v6  ;;  %v5339_v59 = vsel %vm2310_vm2, %v4598_v8, 0.0  ;;  %v5343_v6 = vsel %vm2310_vm2, %v4600_v25, 0.0 }
 0x5e5   : > { %v5324_v44 = vadd.f32 %v5323_v52, %v5322_v56  ;;  %v2214_v52 = vpack.c.bf16 %v1899_v16, %v1898_v11  ;;  %v4601_v7 = vmax.f32 %v3671_v31, 0.0  ;;  %v3700_v63 = vpop.f32.mrf.mxu1 }
 0x5e6   : > { %v3701_v42 = vadd.f32 %v11083_v23, %v3700_v63 }
 0x5e7   : > { %v5326_v1 = vadd.f32 %v5325_v60, %v5324_v44  ;;  %v11309_v60 = vpop.f32.mrf.mxu2  ;;  %7480 = vmatmul.msk.bf16.gmra.mxu2 %vm2310_vm2, %v2214_v52 }
 0x5e9   : > { %v5328_v46 = vadd.f32 %v5327_v15, %v5326_v1  ;;  %v5345_v15 = vsel %vm2310_vm2, %v4601_v7, 0.0 }
 0x5eb   : > { %v5330_v51 = vadd.f32 %v5329_v5, %v5328_v46  ;;  %v5347_v46 = vsel %vm2310_vm2, %v4602_v21, 0.0  ;;  %v4604_v5 = vmax.f32 %v3679_v36, 0.0  ;;  %v13029_v21 = vld [vmem:[#allocation15_spill] sm:$0xff] }
 0x5ec   : > { %v3711_v36 = vadd.f32 %v11083_v23, %v13029_v21 }
 0x5ed   : > { %v5332_v18 = vadd.f32 %v5331_v57, %v5330_v51  ;;  %v5349_v51 = vsel %vm2310_vm2, %v4603_v49, 0.0  ;;  %v4605_v57 = vmax.f32 %v3681_v24, 0.0  ;;  %v5351_v34 = vsel %vm2310_vm2, %v4604_v5, 0.0  ;;  %v3703_v10 = vpop.f32.mrf.mxu1  ;;  %v13030_v24 = vld [vmem:[#allocation16_spill] sm:$0xff] }
 0x5ee   : > { %v3704_v25 = vadd.f32 %v11083_v23, %v3703_v10 }
 0x5ef   : > { %v5334_v0 = vadd.f32 %v5333_v33, %v5332_v18  ;;  %v4606_v18 = vmax.f32 %v3684_v30, 0.0  ;;  %v5353_v45 = vsel %vm2310_vm2, %v4605_v57, 0.0  ;;  %v4617_v30 = vmax.f32 %v3711_v36, 0.0 }
 0x5f1   : > { %v5336_v55 = vadd.f32 %v5335_v48, %v5334_v0  ;;  %v5355_v33 = vsel %vm2310_vm2, %v4606_v18, 0.0  ;;  %v5357_v0 = vsel %vm2310_vm2, %v4607_v58, 0.0  ;;  %v4609_v48 = vmax.f32 %v3691_v39, 0.0  ;;  %v13032_v18 = vld [vmem:[#allocation19_spill] sm:$0xff]  ;;  %v13033_v58 = vld [vmem:[#allocation21_spill] sm:$0xff] }
 0x5f2   : > { %v3719_v32 = vadd.f32 %v11083_v23, %v13032_v18  ;;  %v5377_v10 = vsel %vm2310_vm2, %v4617_v30, 0.0  ;;  %v3721_v39 = vadd.f32 %v11083_v23, %v13033_v58  ;;  %v13043_v18 = vld [vmem:[#allocation41_spill] sm:$0xff]  ;;  %v13044_v58 = vld [vmem:[#allocation43_spill] sm:$0xff] }
 0x5f3   : > { %v5338_v62 = vadd.f32 %v5337_v40, %v5336_v55  ;;  %v4610_v55 = vmax.f32 %v3694_v4, 0.0  ;;  %v5361_v16 = vsel %vm2310_vm2, %v4609_v48, 0.0  ;;  %v4611_v40 = vmax.f32 %v3696_v28, 0.0  ;;  %v13034_v4 = vld [vmem:[#allocation23_spill] sm:$0xff] }
 0x5f4   : > { %v4620_v13 = vmax.f32 %v3719_v32, 0.0  ;;  %v4621_v28 = vmax.f32 %v3721_v39, 0.0  ;;  %v3746_v32 = vadd.f32 %v11083_v23, %v13043_v18  ;;  %v3749_v39 = vadd.f32 %v11083_v23, %v13044_v58  ;;  %v13054_v18 = vld [vmem:[#allocation67_spill] sm:$0xff]  ;;  %v13055_v58 = vld [vmem:[#allocation70_spill] sm:$0xff] }
 0x5f5   : > { %v5340_v56 = vadd.f32 %v5339_v59, %v5338_v62  ;;  %v3705_v31 = vpop.f32.mrf.mxu1  ;;  %v5363_v62 = vsel %vm2310_vm2, %v4610_v55, 0.0  ;;  %v4612_v59 = vmax.f32 %v3699_v26, 0.0  ;;  %v5365_v12 = vsel %vm2310_vm2, %v4611_v40, 0.0 }
 0x5f6   : > { %v3706_v52 = vadd.f32 %v11083_v23, %v3705_v31  ;;  %v5383_v26 = vsel %vm2310_vm2, %v4620_v13, 0.0  ;;  %v4631_v13 = vmax.f32 %v3746_v32, 0.0  ;;  %v3774_v32 = vadd.f32 %v11083_v23, %v13054_v18  ;;  %v13065_v18 = vld [vmem:[#allocation100_spill] sm:$0xff] }
 0x5f7   : > { %v5342_v44 = vadd.f32 %v5341_v17, %v5340_v56  ;;  %v4613_v56 = vmax.f32 %v3701_v42, 0.0  ;;  %v13028_v17 = vld [vmem:[#allocation14_spill] sm:$0xff]  ;;  %v5367_v29 = vsel %vm2310_vm2, %v4612_v59, 0.0 }
 0x5f8   : > { %v3709_v7 = vadd.f32 %v11083_v23, %v13028_v17 }
 0x5f9   : > { %v5344_v1 = vadd.f32 %v5343_v6, %v5342_v44  ;;  %v4614_v44 = vmax.f32 %v3704_v25, 0.0  ;;  %v5369_v63 = vsel %vm2310_vm2, %v4613_v56, 0.0  ;;  %v13038_v56 = vld [vmem:[#allocation31_spill] sm:$0xff] }
 0x5fa   : > { %v4616_v49 = vmax.f32 %v3709_v7, 0.0 }
 0x5fb   : > { %v5346_v2 = vadd.f32 %v5345_v15, %v5344_v1  ;;  %v4615_v1 = vmax.f32 %v3706_v52, 0.0  ;;  %v3734_v52 = vadd.f32 %v11083_v23, %v13038_v56  ;;  %v13049_v56 = vld [vmem:[#allocation53_spill] sm:$0xff] }
 0x5fd   : > { %v5348_v27 = vadd.f32 %v5347_v46, %v5346_v2  ;;  %v3714_v2 = vadd.f32 %v11083_v23, %v13030_v24  ;;  %v5371_v46 = vsel %vm2310_vm2, %v4614_v44, 0.0  ;;  %v5373_v57 = vsel %vm2310_vm2, %v4615_v1, 0.0 }
 0x5fe   : > { %v4626_v36 = vmax.f32 %v3734_v52, 0.0  ;;  %v3761_v52 = vadd.f32 %v11083_v23, %v13049_v56  ;;  %v13060_v56 = vld [vmem:[#allocation85_spill] sm:$0xff] }
 0x5ff   : > { %v5350_v20 = vadd.f32 %v5349_v51, %v5348_v27  ;;  %v13031_v27 = vld [vmem:[#allocation17_spill] sm:$0xff] }
 0x600   : > { %v3716_v51 = vadd.f32 %v11083_v23, %v13031_v27  ;;  %v5395_v30 = vsel %vm2310_vm2, %v4626_v36, 0.0  ;;  %v4637_v36 = vmax.f32 %v3761_v52, 0.0  ;;  %v3789_v52 = vadd.f32 %v11083_v23, %v13060_v56  ;;  %v13071_v56 = vld [vmem:[#allocation118_spill] sm:$0xff] }
 0x601   : > { %v5352_v54 = vadd.f32 %v5351_v34, %v5350_v20  ;;  %v5375_v20 = vsel %vm2310_vm2, %v4616_v49, 0.0  ;;  %v4618_v34 = vmax.f32 %v3714_v2, 0.0  ;;  %v13041_v2 = vld [vmem:[#allocation37_spill] sm:$0xff] }
 0x603   : > { %v5354_v47 = vadd.f32 %v5353_v45, %v5352_v54  ;;  %v4619_v45 = vmax.f32 %v3716_v51, 0.0  ;;  %v13042_v51 = vld [vmem:[#allocation39_spill] sm:$0xff] }
 0x605   : > { %v5356_v19 = vadd.f32 %v5355_v33, %v5354_v47  ;;  %v5379_v33 = vsel %vm2310_vm2, %v4618_v34, 0.0  ;;  %v5381_v48 = vsel %vm2310_vm2, %v4619_v45, 0.0 }
 0x607   : > { %v5358_v8 = vadd.f32 %v5357_v0, %v5356_v19  ;;  %v3724_v19 = vadd.f32 %v11083_v23, %v13034_v4  ;;  %v13045_v4 = vld [vmem:[#allocation45_spill] sm:$0xff] }
 0x609   : > { %v5360_v11 = vadd.f32 %v5359_v43, %v5358_v8  ;;  %v13035_v8 = vld [vmem:[#allocation25_spill] sm:$0xff] }
 0x60a   : > { %v3726_v43 = vadd.f32 %v11083_v23, %v13035_v8  ;;  %v13046_v8 = vld [vmem:[#allocation47_spill] sm:$0xff] }
 0x60b   : > { %v5362_v35 = vadd.f32 %v5361_v16, %v5360_v11  ;;  %v4622_v11 = vmax.f32 %v3724_v19, 0.0  ;;  %v13036_v16 = vld [vmem:[#allocation27_spill] sm:$0xff]  ;;  %v3751_v19 = vadd.f32 %v11083_v23, %v13045_v4  ;;  %v13056_v4 = vld [vmem:[#allocation73_spill] sm:$0xff] }
 0x60c   : > { %v3729_v40 = vadd.f32 %v11083_v23, %v13036_v16  ;;  %v4623_v31 = vmax.f32 %v3726_v43, 0.0  ;;  %v3754_v43 = vadd.f32 %v11083_v23, %v13046_v8  ;;  %v13047_v16 = vld [vmem:[#allocation49_spill] sm:$0xff]  ;;  %v13057_v8 = vld [vmem:[#allocation76_spill] sm:$0xff] }
 0x60d   : > { %v5364_v61 = vadd.f32 %v5363_v62, %v5362_v35  ;;  %v5385_v35 = vsel %vm2310_vm2, %v4621_v28, 0.0  ;;  %v13037_v62 = vld [vmem:[#allocation29_spill] sm:$0xff]  ;;  %v4632_v28 = vmax.f32 %v3749_v39, 0.0  ;;  %v3776_v39 = vadd.f32 %v11083_v23, %v13055_v58  ;;  %v13066_v58 = vld [vmem:[#allocation103_spill] sm:$0xff] }
 0x60e   : > { %v3731_v59 = vadd.f32 %v11083_v23, %v13037_v62  ;;  %v5389_v17 = vsel %vm2310_vm2, %v4623_v31, 0.0  ;;  %v4634_v31 = vmax.f32 %v3754_v43, 0.0  ;;  %v13048_v62 = vld [vmem:[#allocation51_spill] sm:$0xff]  ;;  %v3781_v43 = vadd.f32 %v11083_v23, %v13057_v8  ;;  %v13068_v8 = vld [vmem:[#allocation109_spill] sm:$0xff] }
 0x60f   : > { %v5366_v22 = vadd.f32 %v5365_v12, %v5364_v61  ;;  %v5387_v61 = vsel %vm2310_vm2, %v4622_v11, 0.0  ;;  %v4624_v12 = vmax.f32 %v3729_v40, 0.0  ;;  %v4633_v11 = vmax.f32 %v3751_v19, 0.0 }
 0x610   : > { %v4625_v7 = vmax.f32 %v3731_v59, 0.0  ;;  %v3756_v40 = vadd.f32 %v11083_v23, %v13047_v16  ;;  %v3759_v59 = vadd.f32 %v11083_v23, %v13048_v62  ;;  %v3779_v19 = vadd.f32 %v11083_v23, %v13056_v4  ;;  %v13058_v16 = vld [vmem:[#allocation79_spill] sm:$0xff]  ;;  %v13059_v62 = vld [vmem:[#allocation82_spill] sm:$0xff] }
 0x611   : > { %v5368_v6 = vadd.f32 %v5367_v29, %v5366_v22  ;;  %v13039_v29 = vld [vmem:[#allocation33_spill] sm:$0xff]  ;;  %v5391_v21 = vsel %vm2310_vm2, %v4624_v12, 0.0  ;;  %v13067_v4 = vld [vmem:[#allocation106_spill] sm:$0xff] }
 0x612   : > { %v3736_v44 = vadd.f32 %v11083_v23, %v13039_v29  ;;  %v5393_v49 = vsel %vm2310_vm2, %v4625_v7, 0.0  ;;  %v4635_v12 = vmax.f32 %v3756_v40, 0.0  ;;  %v4636_v7 = vmax.f32 %v3759_v59, 0.0  ;;  %v13050_v29 = vld [vmem:[#allocation55_spill] sm:$0xff] }
 0x613   : > { %v5370_v15 = vadd.f32 %v5369_v63, %v5368_v6  ;;  %v13040_v63 = vld [vmem:[#allocation35_spill] sm:$0xff]  ;;  %v3784_v40 = vadd.f32 %v11083_v23, %v13058_v16  ;;  %v3786_v59 = vadd.f32 %v11083_v23, %v13059_v62  ;;  %v13069_v16 = vld [vmem:[#allocation112_spill] sm:$0xff] }
 0x614   : > { %v3739_v1 = vadd.f32 %v11083_v23, %v13040_v63  ;;  %v4627_v24 = vmax.f32 %v3736_v44, 0.0  ;;  %v3764_v44 = vadd.f32 %v11083_v23, %v13050_v29  ;;  %v13051_v63 = vld [vmem:[#allocation58_spill] sm:$0xff]  ;;  %v13061_v29 = vld [vmem:[#allocation88_spill] sm:$0xff]  ;;  %v13070_v62 = vld [vmem:[#allocation115_spill] sm:$0xff] }
 0x615   : > { %v5372_v5 = vadd.f32 %v5371_v46, %v5370_v15  ;;  %v3741_v46 = vadd.f32 %v11083_v23, %v13041_v2  ;;  %v13052_v2 = vld [vmem:[#allocation61_spill] sm:$0xff] }
 0x616   : > { %v4628_v27 = vmax.f32 %v3739_v1, 0.0  ;;  %v3766_v1 = vadd.f32 %v11083_v23, %v13051_v63  ;;  %v13062_v63 = vld [vmem:[#allocation91_spill] sm:$0xff] }
 0x617   : > { %v5374_v3 = vadd.f32 %v5373_v57, %v5372_v5  ;;  %v3744_v57 = vadd.f32 %v11083_v23, %v13042_v51  ;;  %v4629_v34 = vmax.f32 %v3741_v46, 0.0  ;;  %v3769_v46 = vadd.f32 %v11083_v23, %v13052_v2  ;;  %v13053_v51 = vld [vmem:[#allocation64_spill] sm:$0xff]  ;;  %v13063_v2 = vld [vmem:[#allocation94_spill] sm:$0xff] }
 0x619   : > { %v5376_v54 = vadd.f32 %v5375_v20, %v5374_v3  ;;  %v5397_v20 = vsel %vm2310_vm2, %v4627_v24, 0.0  ;;  %v4630_v45 = vmax.f32 %v3744_v57, 0.0  ;;  %v4638_v24 = vmax.f32 %v3764_v44, 0.0 }
 0x61a   : > { %v3771_v57 = vadd.f32 %v11083_v23, %v13053_v51  ;;  %v3791_v44 = vadd.f32 %v11083_v23, %v13061_v29  ;;  %v13064_v51 = vld [vmem:[#allocation97_spill] sm:$0xff] }
 0x61b   : > { %v5378_v47 = vadd.f32 %v5377_v10, %v5376_v54  ;;  %v5399_v10 = vsel %vm2310_vm2, %v4628_v27, 0.0  ;;  %v4639_v27 = vmax.f32 %v3766_v1, 0.0  ;;  %v3794_v1 = vadd.f32 %v11083_v23, %v13062_v63  ;;  %v13072_v29 = vld [vmem:[#allocation121_spill] sm:$0xff]  ;;  %v11483_v63 = vld [vmem:[%s12677_s7] ss:$0 sm:$0xff] }
 0x61d   : > { %v5380_v0 = vadd.f32 %v5379_v33, %v5378_v47  ;;  %v5401_v33 = vsel %vm2310_vm2, %v4629_v34, 0.0  ;;  %v4640_v34 = vmax.f32 %v3769_v46, 0.0  ;;  %v3796_v46 = vadd.f32 %v11083_v23, %v13063_v2 }
 0x61f   : > { %v5382_v55 = vadd.f32 %v5381_v48, %v5380_v0  ;;  %v5403_v48 = vsel %vm2310_vm2, %v4630_v45, 0.0  ;;  %v4641_v45 = vmax.f32 %v3771_v57, 0.0  ;;  %v3799_v57 = vadd.f32 %v11083_v23, %v13064_v51  ;;  %v13075_v51 = vld [vmem:[#allocation130_spill] sm:$0xff] }
 0x621   : > { %v5384_v42 = vadd.f32 %v5383_v26, %v5382_v55  ;;  %v5405_v26 = vsel %vm2310_vm2, %v4631_v13, 0.0  ;;  %v4642_v13 = vmax.f32 %v3774_v32, 0.0  ;;  %v3801_v32 = vadd.f32 %v11083_v23, %v13065_v18  ;;  %v13076_v18 = vld [vmem:[#allocation133_spill] sm:$0xff] }
 0x623   : > { %v5386_v25 = vadd.f32 %v5385_v35, %v5384_v42  ;;  %v5407_v35 = vsel %vm2310_vm2, %v4632_v28, 0.0  ;;  %v4643_v28 = vmax.f32 %v3776_v39, 0.0  ;;  %v3804_v39 = vadd.f32 %v11083_v23, %v13066_v58  ;;  %v13077_v58 = vld [vmem:[#allocation136_spill] sm:$0xff] }
 0x625   : > { %v5388_v22 = vadd.f32 %v5387_v61, %v5386_v25  ;;  %v5409_v61 = vsel %vm2310_vm2, %v4633_v11, 0.0  ;;  %v4644_v11 = vmax.f32 %v3779_v19, 0.0  ;;  %v3806_v19 = vadd.f32 %v11083_v23, %v13067_v4  ;;  %v13078_v4 = vld [vmem:[#allocation139_spill] sm:$0xff] }
 0x627   : > { %v5390_v6 = vadd.f32 %v5389_v17, %v5388_v22  ;;  %v5411_v17 = vsel %vm2310_vm2, %v4634_v31, 0.0  ;;  %v4645_v31 = vmax.f32 %v3781_v43, 0.0  ;;  %v3809_v43 = vadd.f32 %v11083_v23, %v13068_v8  ;;  %v13079_v8 = vld [vmem:[#allocation142_spill] sm:$0xff] }
 0x629   : > { %v5392_v15 = vadd.f32 %v5391_v21, %v5390_v6  ;;  %v5413_v21 = vsel %vm2310_vm2, %v4635_v12, 0.0  ;;  %v4646_v12 = vmax.f32 %v3784_v40, 0.0  ;;  %v3811_v40 = vadd.f32 %v11083_v23, %v13069_v16  ;;  %v13080_v16 = vld [vmem:[#allocation145_spill] sm:$0xff] }
 0x62b   : > { %v5394_v5 = vadd.f32 %v5393_v49, %v5392_v15  ;;  %v5415_v49 = vsel %vm2310_vm2, %v4636_v7, 0.0  ;;  %v4647_v7 = vmax.f32 %v3786_v59, 0.0  ;;  %v3814_v59 = vadd.f32 %v11083_v23, %v13070_v62  ;;  %v13081_v62 = vld [vmem:[#allocation148_spill] sm:$0xff] }
 0x62d   : > { %v5396_v3 = vadd.f32 %v5395_v30, %v5394_v5  ;;  %v5417_v30 = vsel %vm2310_vm2, %v4637_v36, 0.0  ;;  %v4648_v36 = vmax.f32 %v3789_v52, 0.0  ;;  %v3816_v52 = vadd.f32 %v11083_v23, %v13071_v56  ;;  %v13082_v56 = vld [vmem:[#allocation151_spill] sm:$0xff] }
 0x62f   : > { %v5398_v54 = vadd.f32 %v5397_v20, %v5396_v3  ;;  %v5419_v20 = vsel %vm2310_vm2, %v4638_v24, 0.0  ;;  %v4649_v24 = vmax.f32 %v3791_v44, 0.0  ;;  %v3819_v44 = vadd.f32 %v11083_v23, %v13072_v29  ;;  %v13083_v29 = vld [vmem:[#allocation154_spill] sm:$0xff] }
 0x631   : > { %v5400_v47 = vadd.f32 %v5399_v10, %v5398_v54  ;;  %v5421_v10 = vsel %vm2310_vm2, %v4639_v27, 0.0  ;;  %v4650_v27 = vmax.f32 %v3794_v1, 0.0  ;;  %v13073_v1 = vld [vmem:[#allocation124_spill] sm:$0xff]  ;;  %v4660_v2 = vmax.f32 %v3819_v44, 0.0 }
 0x632   : > { %v3846_v44 = vadd.f32 %v11483_v63, %v13083_v29  ;;  %v13094_v29 = vld [vmem:[#allocation187_spill] sm:$0xff] }
 0x633   : > { %v5402_v0 = vadd.f32 %v5401_v33, %v5400_v47  ;;  %v5423_v33 = vsel %vm2310_vm2, %v4640_v34, 0.0  ;;  %v4651_v34 = vmax.f32 %v3796_v46, 0.0  ;;  %v13074_v46 = vld [vmem:[#allocation127_spill] sm:$0xff] }
 0x635   : > { %v5404_v55 = vadd.f32 %v5403_v48, %v5402_v0  ;;  %v5425_v48 = vsel %vm2310_vm2, %v4641_v45, 0.0  ;;  %v4652_v45 = vmax.f32 %v3799_v57, 0.0  ;;  %v3826_v57 = vadd.f32 %v11483_v63, %v13075_v51  ;;  %v13086_v51 = vld [vmem:[#allocation163_spill] sm:$0xff] }
 0x637   : > { %v5406_v42 = vadd.f32 %v5405_v26, %v5404_v55  ;;  %v5427_v26 = vsel %vm2310_vm2, %v4642_v13, 0.0  ;;  %v4653_v13 = vmax.f32 %v3801_v32, 0.0  ;;  %v3829_v32 = vadd.f32 %v11483_v63, %v13076_v18  ;;  %v13087_v18 = vld [vmem:[#allocation166_spill] sm:$0xff] }
 0x639   : > { %v5408_v25 = vadd.f32 %v5407_v35, %v5406_v42  ;;  %v5429_v35 = vsel %vm2310_vm2, %v4643_v28, 0.0  ;;  %v4654_v28 = vmax.f32 %v3804_v39, 0.0  ;;  %v3831_v39 = vadd.f32 %v11483_v63, %v13077_v58  ;;  %v13088_v58 = vld [vmem:[#allocation169_spill] sm:$0xff] }
 0x63b   : > { %v5410_v22 = vadd.f32 %v5409_v61, %v5408_v25  ;;  %v5431_v61 = vsel %vm2310_vm2, %v4644_v11, 0.0  ;;  %v4655_v11 = vmax.f32 %v3806_v19, 0.0  ;;  %v3834_v19 = vadd.f32 %v11483_v63, %v13078_v4  ;;  %v13089_v4 = vld [vmem:[#allocation172_spill] sm:$0xff] }
 0x63d   : > { %v5412_v6 = vadd.f32 %v5411_v17, %v5410_v22  ;;  %v5433_v17 = vsel %vm2310_vm2, %v4645_v31, 0.0  ;;  %v4656_v31 = vmax.f32 %v3809_v43, 0.0  ;;  %v3836_v43 = vadd.f32 %v11483_v63, %v13079_v8  ;;  %v13090_v8 = vld [vmem:[#allocation175_spill] sm:$0xff] }
 0x63f   : > { %v5414_v15 = vadd.f32 %v5413_v21, %v5412_v6  ;;  %v5435_v21 = vsel %vm2310_vm2, %v4646_v12, 0.0  ;;  %v4657_v12 = vmax.f32 %v3811_v40, 0.0  ;;  %v3839_v40 = vadd.f32 %v11483_v63, %v13080_v16  ;;  %v13091_v16 = vld [vmem:[#allocation178_spill] sm:$0xff] }
 0x641   : > { %v5416_v5 = vadd.f32 %v5415_v49, %v5414_v15  ;;  %v5437_v49 = vsel %vm2310_vm2, %v4647_v7, 0.0  ;;  %v4658_v7 = vmax.f32 %v3814_v59, 0.0  ;;  %v3841_v59 = vadd.f32 %v11483_v63, %v13081_v62  ;;  %v13092_v62 = vld [vmem:[#allocation181_spill] sm:$0xff] }
 0x643   : > { %v5418_v3 = vadd.f32 %v5417_v30, %v5416_v5  ;;  %v5439_v30 = vsel %vm2310_vm2, %v4648_v36, 0.0  ;;  %v4659_v36 = vmax.f32 %v3816_v52, 0.0  ;;  %v3844_v52 = vadd.f32 %v11483_v63, %v13082_v56  ;;  %v13093_v56 = vld [vmem:[#allocation184_spill] sm:$0xff] }
 0x645   : > { %v5420_v54 = vadd.f32 %v5419_v20, %v5418_v3  ;;  %v5441_v20 = vsel %vm2310_vm2, %v4649_v24, 0.0  ;;  %v5459_v24 = vsel %vm2310_vm2, %v4658_v7, 0.0  ;;  %v4669_v7 = vmax.f32 %v3841_v59, 0.0 }
 0x646   : > { %v3869_v59 = vadd.f32 %v11483_v63, %v13092_v62  ;;  %v13103_v62 = vld [vmem:[#allocation212_spill] sm:$0xff] }
 0x647   : > { %v5422_v47 = vadd.f32 %v5421_v10, %v5420_v54  ;;  %v5443_v10 = vsel %vm2310_vm2, %v4650_v27, 0.0 }
 0x649   : > { %v5424_v0 = vadd.f32 %v5423_v33, %v5422_v47  ;;  %v5445_v33 = vsel %vm2310_vm2, %v4651_v34, 0.0 }
 0x64b   : > { %v5426_v55 = vadd.f32 %v5425_v48, %v5424_v0  ;;  %v5447_v48 = vsel %vm2310_vm2, %v4652_v45, 0.0  ;;  %v4663_v45 = vmax.f32 %v3826_v57, 0.0  ;;  %v3854_v57 = vadd.f32 %v11483_v63, %v13086_v51  ;;  %v13097_v51 = vld [vmem:[#allocation196_spill] sm:$0xff] }
 0x64d   : > { %v5428_v42 = vadd.f32 %v5427_v26, %v5426_v55  ;;  %v5449_v26 = vsel %vm2310_vm2, %v4653_v13, 0.0  ;;  %v4664_v13 = vmax.f32 %v3829_v32, 0.0  ;;  %v3856_v32 = vadd.f32 %v11483_v63, %v13087_v18  ;;  %v13098_v18 = vld [vmem:[#allocation199_spill] sm:$0xff] }
 0x64f   : > { %v5430_v25 = vadd.f32 %v5429_v35, %v5428_v42  ;;  %v5451_v35 = vsel %vm2310_vm2, %v4654_v28, 0.0  ;;  %v4665_v28 = vmax.f32 %v3831_v39, 0.0  ;;  %v3859_v39 = vadd.f32 %v11483_v63, %v13088_v58  ;;  %v13099_v58 = vld [vmem:[#allocation202_spill] sm:$0xff] }
 0x651   : > { %v5432_v22 = vadd.f32 %v5431_v61, %v5430_v25  ;;  %v5453_v61 = vsel %vm2310_vm2, %v4655_v11, 0.0  ;;  %v4666_v11 = vmax.f32 %v3834_v19, 0.0  ;;  %v3861_v19 = vadd.f32 %v11483_v63, %v13089_v4  ;;  %v13100_v4 = vld [vmem:[#allocation204_spill] sm:$0xff] }
 0x653   : > { %v5434_v6 = vadd.f32 %v5433_v17, %v5432_v22  ;;  %v5455_v17 = vsel %vm2310_vm2, %v4656_v31, 0.0  ;;  %v4667_v31 = vmax.f32 %v3836_v43, 0.0  ;;  %v3864_v43 = vadd.f32 %v11483_v63, %v13090_v8  ;;  %v13101_v8 = vld [vmem:[#allocation207_spill] sm:$0xff] }
 0x655   : > { %v5436_v15 = vadd.f32 %v5435_v21, %v5434_v6  ;;  %v5457_v21 = vsel %vm2310_vm2, %v4657_v12, 0.0  ;;  %v4668_v12 = vmax.f32 %v3839_v40, 0.0  ;;  %v3866_v40 = vadd.f32 %v11483_v63, %v13091_v16  ;;  %v13102_v16 = vld [vmem:[#allocation210_spill] sm:$0xff] }
 0x657   : > { %v5438_v5 = vadd.f32 %v5437_v49, %v5436_v15  ;;  %v3821_v15 = vadd.f32 %v11483_v63, %v13073_v1  ;;  %v13084_v1 = vld [vmem:[#allocation157_spill] sm:$0xff] }
 0x659   : > { %v5440_v3 = vadd.f32 %v5439_v30, %v5438_v5  ;;  %v3824_v5 = vadd.f32 %v11483_v63, %v13074_v46  ;;  %v5461_v30 = vsel %vm2310_vm2, %v4659_v36, 0.0  ;;  %v4661_v27 = vmax.f32 %v3821_v15, 0.0  ;;  %v13085_v46 = vld [vmem:[#allocation160_spill] sm:$0xff] }
 0x65a   : > { %v4670_v36 = vmax.f32 %v3844_v52, 0.0  ;;  %v3849_v15 = vadd.f32 %v11483_v63, %v13084_v1  ;;  %v3871_v52 = vadd.f32 %v11483_v63, %v13093_v56  ;;  %v13095_v1 = vld [vmem:[#allocation190_spill] sm:$0xff] }
 0x65b   : > { %v5442_v54 = vadd.f32 %v5441_v20, %v5440_v3  ;;  %v5463_v20 = vsel %vm2310_vm2, %v4660_v2, 0.0  ;;  %v4662_v34 = vmax.f32 %v3824_v5, 0.0  ;;  %v4671_v2 = vmax.f32 %v3846_v44, 0.0  ;;  %v13104_v56 = vld [vmem:[#allocation214_spill] sm:$0xff] }
 0x65c   : > { %v3851_v5 = vadd.f32 %v11483_v63, %v13085_v46  ;;  %v3874_v44 = vadd.f32 %v11483_v63, %v13094_v29  ;;  %v13096_v46 = vld [vmem:[#allocation193_spill] sm:$0xff] }
 0x65d   : > { %v5444_v47 = vadd.f32 %v5443_v10, %v5442_v54  ;;  %v5465_v10 = vsel %vm2310_vm2, %v4661_v27, 0.0  ;;  %v4672_v27 = vmax.f32 %v3849_v15, 0.0  ;;  %v3876_v15 = vadd.f32 %v11483_v63, %v13095_v1  ;;  %v13105_v29 = vld [vmem:[#allocation217_spill] sm:$0xff]  ;;  %v13106_v1 = vld [vmem:[#allocation220_spill] sm:$0xff] }
 0x65f   : > { %v5446_v0 = vadd.f32 %v5445_v33, %v5444_v47  ;;  %v5467_v33 = vsel %vm2310_vm2, %v4662_v34, 0.0  ;;  %v4673_v34 = vmax.f32 %v3851_v5, 0.0  ;;  %v3879_v5 = vadd.f32 %v11483_v63, %v13096_v46  ;;  %v13107_v46 = vld [vmem:[#allocation223_spill] sm:$0xff] }
 0x661   : > { %v5448_v55 = vadd.f32 %v5447_v48, %v5446_v0  ;;  %v5469_v48 = vsel %vm2310_vm2, %v4663_v45, 0.0  ;;  %v4674_v45 = vmax.f32 %v3854_v57, 0.0  ;;  %v3881_v57 = vadd.f32 %v11483_v63, %v13097_v51  ;;  %v13108_v51 = vld [vmem:[#allocation225_spill] sm:$0xff] }
 0x663   : > { %v5450_v42 = vadd.f32 %v5449_v26, %v5448_v55  ;;  %v5471_v26 = vsel %vm2310_vm2, %v4664_v13, 0.0  ;;  %v4675_v13 = vmax.f32 %v3856_v32, 0.0  ;;  %v3884_v32 = vadd.f32 %v11483_v63, %v13098_v18 }
 0x665   : > { %v5452_v25 = vadd.f32 %v5451_v35, %v5450_v42  ;;  %v5473_v35 = vsel %vm2310_vm2, %v4665_v28, 0.0  ;;  %v4676_v28 = vmax.f32 %v3859_v39, 0.0  ;;  %v3886_v39 = vadd.f32 %v11483_v63, %v13099_v58 }
 0x667   : > { %v5454_v22 = vadd.f32 %v5453_v61, %v5452_v25  ;;  %v5475_v61 = vsel %vm2310_vm2, %v4666_v11, 0.0  ;;  %v4677_v11 = vmax.f32 %v3861_v19, 0.0  ;;  %v3889_v19 = vadd.f32 %v11483_v63, %v13100_v4 }
 0x669   : > { %v5456_v6 = vadd.f32 %v5455_v17, %v5454_v22  ;;  %v5477_v17 = vsel %vm2310_vm2, %v4667_v31, 0.0  ;;  %v4678_v31 = vmax.f32 %v3864_v43, 0.0  ;;  %v3891_v43 = vadd.f32 %v11483_v63, %v13101_v8 }
 0x66b   : > { %v5458_v49 = vadd.f32 %v5457_v21, %v5456_v6  ;;  %v5479_v21 = vsel %vm2310_vm2, %v4668_v12, 0.0  ;;  %v4679_v12 = vmax.f32 %v3866_v40, 0.0  ;;  %v3894_v40 = vadd.f32 %v11483_v63, %v13102_v16 }
 0x66d   : > { %v5460_v23 = vadd.f32 %v5459_v24, %v5458_v49  ;;  %v5481_v24 = vsel %vm2310_vm2, %v4669_v7, 0.0  ;;  %v4680_v7 = vmax.f32 %v3869_v59, 0.0  ;;  %v3896_v59 = vadd.f32 %v11483_v63, %v13103_v62 }
 0x66f   : > { %v5462_v3 = vadd.f32 %v5461_v30, %v5460_v23  ;;  %v5483_v30 = vsel %vm2310_vm2, %v4670_v36, 0.0  ;;  %v4681_v36 = vmax.f32 %v3871_v52, 0.0  ;;  %v3899_v52 = vadd.f32 %v11483_v63, %v13104_v56 }
 0x671   : > { %v5464_v54 = vadd.f32 %v5463_v20, %v5462_v3  ;;  %v5485_v20 = vsel %vm2310_vm2, %v4671_v2, 0.0  ;;  %v4682_v2 = vmax.f32 %v3874_v44, 0.0  ;;  %v3901_v44 = vadd.f32 %v11483_v63, %v13105_v29 }
 0x673   : > { %v5466_v47 = vadd.f32 %v5465_v10, %v5464_v54  ;;  %v5487_v10 = vsel %vm2310_vm2, %v4672_v27, 0.0  ;;  %v4683_v27 = vmax.f32 %v3876_v15, 0.0  ;;  %v3904_v15 = vadd.f32 %v11483_v63, %v13106_v1 }
 0x675   : > { %v5468_v0 = vadd.f32 %v5467_v33, %v5466_v47  ;;  %v5489_v33 = vsel %vm2310_vm2, %v4673_v34, 0.0  ;;  %v4684_v34 = vmax.f32 %v3879_v5, 0.0  ;;  %v3906_v5 = vadd.f32 %v11483_v63, %v13107_v46 }
 0x677   : > { %v5470_v55 = vadd.f32 %v5469_v48, %v5468_v0  ;;  %v5491_v48 = vsel %vm2310_vm2, %v4674_v45, 0.0  ;;  %v4685_v45 = vmax.f32 %v3881_v57, 0.0  ;;  %v3909_v57 = vadd.f32 %v11483_v63, %v13108_v51 }
 0x678   : > { %v4695_v18 = vmax.f32 %v3906_v5, 0.0 }
 0x679   : > { %v5472_v42 = vadd.f32 %v5471_v26, %v5470_v55  ;;  %v5493_v26 = vsel %vm2310_vm2, %v4675_v13, 0.0  ;;  %v4686_v13 = vmax.f32 %v3884_v32, 0.0  ;;  %v13109_v32 = vld [vmem:[#allocation227_spill] sm:$0xff]  ;;  %v4696_v58 = vmax.f32 %v3909_v57, 0.0 }
 0x67b   : > { %v5474_v25 = vadd.f32 %v5473_v35, %v5472_v42  ;;  %v5495_v35 = vsel %vm2310_vm2, %v4676_v28, 0.0  ;;  %v4687_v28 = vmax.f32 %v3886_v39, 0.0  ;;  %v13110_v39 = vld [vmem:[#allocation230_spill] sm:$0xff] }
 0x67d   : > { %v5476_v22 = vadd.f32 %v5475_v61, %v5474_v25  ;;  %v5497_v61 = vsel %vm2310_vm2, %v4677_v11, 0.0  ;;  %v4688_v11 = vmax.f32 %v3889_v19, 0.0  ;;  %v13111_v19 = vld [vmem:[#allocation233_spill] sm:$0xff] }
 0x67f   : > { %v5478_v6 = vadd.f32 %v5477_v17, %v5476_v22  ;;  %v5499_v17 = vsel %vm2310_vm2, %v4678_v31, 0.0  ;;  %v4689_v31 = vmax.f32 %v3891_v43, 0.0  ;;  %v13112_v43 = vld [vmem:[#allocation236_spill] sm:$0xff] }
 0x681   : > { %v5480_v49 = vadd.f32 %v5479_v21, %v5478_v6  ;;  %v5501_v21 = vsel %vm2310_vm2, %v4679_v12, 0.0  ;;  %v4690_v12 = vmax.f32 %v3894_v40, 0.0  ;;  %v13113_v40 = vld [vmem:[#allocation238_spill] sm:$0xff] }
 0x683   : > { %v5482_v23 = vadd.f32 %v5481_v24, %v5480_v49  ;;  %v5503_v24 = vsel %vm2310_vm2, %v4680_v7, 0.0  ;;  %v4691_v7 = vmax.f32 %v3896_v59, 0.0 }
 0x685   : > { %v5484_v3 = vadd.f32 %v5483_v30, %v5482_v23  ;;  %v5505_v30 = vsel %vm2310_vm2, %v4681_v36, 0.0  ;;  %v4692_v36 = vmax.f32 %v3899_v52, 0.0 }
 0x687   : > { %v5486_v54 = vadd.f32 %v5485_v20, %v5484_v3  ;;  %v5507_v20 = vsel %vm2310_vm2, %v4682_v2, 0.0  ;;  %v4693_v2 = vmax.f32 %v3901_v44, 0.0 }
 0x689   : > { %v5488_v47 = vadd.f32 %v5487_v10, %v5486_v54  ;;  %v5509_v10 = vsel %vm2310_vm2, %v4683_v27, 0.0  ;;  %v4694_v27 = vmax.f32 %v3904_v15, 0.0 }
 0x68b   : > { %v5490_v0 = vadd.f32 %v5489_v33, %v5488_v47  ;;  %v5511_v33 = vsel %vm2310_vm2, %v4684_v34, 0.0  ;;  %v5529_v34 = vsel %vm2310_vm2, %v4693_v2, 0.0 }
 0x68d   : > { %v5492_v55 = vadd.f32 %v5491_v48, %v5490_v0  ;;  %v5513_v48 = vsel %vm2310_vm2, %v4685_v45, 0.0  ;;  %v5531_v45 = vsel %vm2310_vm2, %v4694_v27, 0.0 }
 0x68f   : > { %v5494_v42 = vadd.f32 %v5493_v26, %v5492_v55  ;;  %v5515_v26 = vsel %vm2310_vm2, %v4686_v13, 0.0  ;;  %v5533_v13 = vsel %vm2310_vm2, %v4695_v18, 0.0 }
 0x691   : > { %v5496_v25 = vadd.f32 %v5495_v35, %v5494_v42  ;;  %v5517_v35 = vsel %vm2310_vm2, %v4687_v28, 0.0  ;;  %v5535_v28 = vsel %vm2310_vm2, %v4696_v58, 0.0 }
 0x693   : > { %v5498_v22 = vadd.f32 %v5497_v61, %v5496_v25  ;;  %v5519_v61 = vsel %vm2310_vm2, %v4688_v11, 0.0 }
 0x695   : > { %v5500_v6 = vadd.f32 %v5499_v17, %v5498_v22  ;;  %v5521_v17 = vsel %vm2310_vm2, %v4689_v31, 0.0 }
 0x697   : > { %v5502_v49 = vadd.f32 %v5501_v21, %v5500_v6  ;;  %v5523_v21 = vsel %vm2310_vm2, %v4690_v12, 0.0 }
 0x699   : > { %v5504_v23 = vadd.f32 %v5503_v24, %v5502_v49  ;;  %v5525_v24 = vsel %vm2310_vm2, %v4691_v7, 0.0 }
 0x69b   : > { %v5506_v3 = vadd.f32 %v5505_v30, %v5504_v23  ;;  %v5527_v30 = vsel %vm2310_vm2, %v4692_v36, 0.0 }
 0x69d   : > { %v5508_v54 = vadd.f32 %v5507_v20, %v5506_v3  ;;  %v11592_v3 = vpop.f32.mrf.mxu2 }
 0x69f   : > { %v5510_v47 = vadd.f32 %v5509_v10, %v5508_v54  ;;  %v3911_v54 = vadd.f32 %v11483_v63, %v13109_v32 }
 0x6a1   : > { %v5512_v0 = vadd.f32 %v5511_v33, %v5510_v47  ;;  %v3914_v47 = vadd.f32 %v11483_v63, %v13110_v39  ;;  %v4697_v4 = vmax.f32 %v3911_v54, 0.0 }
 0x6a3   : > { %v5514_v55 = vadd.f32 %v5513_v48, %v5512_v0  ;;  %v3916_v0 = vadd.f32 %v11483_v63, %v13111_v19  ;;  %v4698_v8 = vmax.f32 %v3914_v47, 0.0  ;;  %v5537_v11 = vsel %vm2310_vm2, %v4697_v4, 0.0 }
 0x6a5   : > { %v5516_v42 = vadd.f32 %v5515_v26, %v5514_v55  ;;  %v3919_v55 = vadd.f32 %v11483_v63, %v13112_v43  ;;  %v4699_v16 = vmax.f32 %v3916_v0, 0.0  ;;  %v5539_v62 = vsel %vm2310_vm2, %v4698_v8, 0.0 }
 0x6a7   : > { %v5518_v25 = vadd.f32 %v5517_v35, %v5516_v42  ;;  %v3921_v42 = vadd.f32 %v11483_v63, %v13113_v40  ;;  %v11609_v35 = vpop.f32.mrf.mxu2  ;;  %v4700_v59 = vmax.f32 %v3919_v55, 0.0  ;;  %v5541_v56 = vsel %vm2310_vm2, %v4699_v16, 0.0 }
 0x6a9   : > { %v5520_v22 = vadd.f32 %v5519_v61, %v5518_v25  ;;  %v13114_v25 = vld [vmem:[#allocation240_spill] sm:$0xff]  ;;  %v4701_v52 = vmax.f32 %v3921_v42, 0.0  ;;  %v5543_v29 = vsel %vm2310_vm2, %v4700_v59, 0.0 }
 0x6aa   : > { %v3924_v61 = vadd.f32 %v11483_v63, %v13114_v25  ;;  %v13124_v59 = vld [vmem:[#allocation264_spill] sm:$0xff] }
 0x6ab   : > { %v5522_v6 = vadd.f32 %v5521_v17, %v5520_v22  ;;  %v13115_v22 = vld [vmem:[#allocation243_spill] sm:$0xff]  ;;  %v5545_v1 = vsel %vm2310_vm2, %v4701_v52, 0.0  ;;  %v3949_v25 = vadd.f32 %v11483_v63, %v13124_v59  ;;  %v13125_v52 = vld [vmem:[#allocation266_spill] sm:$0xff] }
 0x6ac   : > { %v3926_v17 = vadd.f32 %v11483_v63, %v13115_v22  ;;  %v4702_v44 = vmax.f32 %v3924_v61, 0.0  ;;  %v3951_v22 = vadd.f32 %v11483_v63, %v13125_v52 }
 0x6ad   : > { %v5524_v49 = vadd.f32 %v5523_v21, %v5522_v6  ;;  %v13116_v6 = vld [vmem:[#allocation245_spill] sm:$0xff] }
 0x6ae   : > { %v3929_v21 = vadd.f32 %v11483_v63, %v13116_v6  ;;  %v4703_v15 = vmax.f32 %v3926_v17, 0.0  ;;  %v5547_v46 = vsel %vm2310_vm2, %v4702_v44, 0.0  ;;  %v13126_v44 = vld [vmem:[#allocation268_spill] sm:$0xff] }
 0x6af   : > { %v5526_v23 = vadd.f32 %v5525_v24, %v5524_v49  ;;  %v13117_v49 = vld [vmem:[#allocation247_spill] sm:$0xff]  ;;  %v11626_v27 = vpop.f32.mrf.mxu2  ;;  %v3954_v6 = vadd.f32 %v11483_v63, %v13126_v44 }
 0x6b0   : > { %v3931_v24 = vadd.f32 %v11483_v63, %v13117_v49  ;;  %v4704_v5 = vmax.f32 %v3929_v21, 0.0  ;;  %v5549_v57 = vsel %vm2310_vm2, %v4703_v15, 0.0  ;;  %v13127_v15 = vld [vmem:[#allocation271_spill] sm:$0xff] }
 0x6b1   : > { %v5528_v20 = vadd.f32 %v5527_v30, %v5526_v23  ;;  %v13118_v23 = vld [vmem:[#allocation249_spill] sm:$0xff]  ;;  %v3956_v49 = vadd.f32 %v11483_v63, %v13127_v15 }
 0x6b2   : > { %v3934_v30 = vadd.f32 %v11483_v63, %v13118_v23  ;;  %v5551_v54 = vsel %vm2310_vm2, %v4704_v5, 0.0  ;;  %v4714_v5 = vmax.f32 %v3954_v6, 0.0  ;;  %v13128_v23 = vld [vmem:[#allocation274_spill] sm:$0xff]  ;;  %v13136_v6 = vld [vmem:[#allocation285_spill] sm:$0xff] }
 0x6b3   : > { %v5530_v10 = vadd.f32 %v5529_v34, %v5528_v20  ;;  %v4705_v20 = vmax.f32 %v3931_v24, 0.0  ;;  %v13119_v34 = vld [vmem:[#allocation251_spill] sm:$0xff] }
 0x6b4   : > { %v3936_v18 = vadd.f32 %v11483_v63, %v13119_v34  ;;  %v13129_v34 = vld [vmem:[#allocation277_spill] sm:$0xff] }
 0x6b5   : > { %v5532_v33 = vadd.f32 %v5531_v45, %v5530_v10  ;;  %v4706_v10 = vmax.f32 %v3934_v30, 0.0  ;;  %v13120_v45 = vld [vmem:[#allocation254_spill] sm:$0xff]  ;;  %v5553_v47 = vsel %vm2310_vm2, %v4705_v20, 0.0  ;;  %v3959_v30 = vadd.f32 %v11483_v63, %v13128_v23 }
 0x6b6   : > { %v3939_v58 = vadd.f32 %v11483_v63, %v13120_v45  ;;  %v4715_v20 = vmax.f32 %v3956_v49, 0.0  ;;  %v13130_v45 = vld [vmem:[#allocation278_spill] sm:$0xff] }
 0x6b7   : > { %v5534_v48 = vadd.f32 %v5533_v13, %v5532_v33  ;;  %v4707_v33 = vmax.f32 %v3936_v18, 0.0  ;;  %v13121_v13 = vld [vmem:[#allocation257_spill] sm:$0xff]  ;;  %v5555_v0 = vsel %vm2310_vm2, %v4706_v10, 0.0  ;;  %v11643_v40 = vpop.f32.mrf.mxu2  ;;  %v3961_v18 = vadd.f32 %v11483_v63, %v13129_v34 }
 0x6b8   : > { %v3941_v4 = vadd.f32 %v11483_v63, %v13121_v13  ;;  %v4716_v10 = vmax.f32 %v3959_v30, 0.0  ;;  %v13131_v13 = vld [vmem:[#allocation279_spill] sm:$0xff] }
 0x6b9   : > { %v5536_v26 = vadd.f32 %v5535_v28, %v5534_v48  ;;  %v4708_v48 = vmax.f32 %v3939_v58, 0.0  ;;  %v13122_v28 = vld [vmem:[#allocation260_spill] sm:$0xff]  ;;  %v5557_v55 = vsel %vm2310_vm2, %v4707_v33, 0.0  ;;  %v3964_v58 = vadd.f32 %v11483_v63, %v13130_v45 }
 0x6ba   : > { %v3944_v8 = vadd.f32 %v11483_v63, %v13122_v28  ;;  %v4717_v33 = vmax.f32 %v3961_v18, 0.0 }
 0x6bb   : > { %v5538_v31 = vadd.f32 %v5537_v11, %v5536_v26  ;;  %v4709_v26 = vmax.f32 %v3941_v4, 0.0  ;;  %v13123_v11 = vld [vmem:[#allocation262_spill] sm:$0xff]  ;;  %v3966_v4 = vadd.f32 %v11483_v63, %v13131_v13  ;;  %v4718_v28 = vmax.f32 %v3964_v58, 0.0 }
 0x6bc   : > { %v3946_v16 = vadd.f32 %v11483_v63, %v13123_v11 }
 0x6bd   : > { %v5540_v12 = vadd.f32 %v5539_v62, %v5538_v31  ;;  %v5559_v31 = vsel %vm2310_vm2, %v4708_v48, 0.0  ;;  %v4710_v62 = vmax.f32 %v3944_v8, 0.0  ;;  %v5575_v48 = vsel %vm2310_vm2, %v4716_v10, 0.0  ;;  %v13132_v8 = vld [vmem:[#allocation280_spill] sm:$0xff] }
 0x6be   : > { %v4719_v11 = vmax.f32 %v3966_v4, 0.0 }
 0x6bf   : > { %v5542_v7 = vadd.f32 %v5541_v56, %v5540_v12  ;;  %v5561_v12 = vsel %vm2310_vm2, %v4709_v26, 0.0  ;;  %v4711_v56 = vmax.f32 %v3946_v16, 0.0  ;;  %v5577_v26 = vsel %vm2310_vm2, %v4717_v33, 0.0  ;;  %v13133_v16 = vld [vmem:[#allocation282_spill] sm:$0xff] }
 0x6c1   : > { %v5544_v36 = vadd.f32 %v5543_v29, %v5542_v7  ;;  %v5563_v7 = vsel %vm2310_vm2, %v4710_v62, 0.0  ;;  %v4712_v29 = vmax.f32 %v3949_v25, 0.0  ;;  %v5579_v62 = vsel %vm2310_vm2, %v4718_v28, 0.0  ;;  %v13134_v25 = vld [vmem:[#allocation283_spill] sm:$0xff] }
 0x6c3   : > { %v5546_v2 = vadd.f32 %v5545_v1, %v5544_v36  ;;  %v5565_v36 = vsel %vm2310_vm2, %v4711_v56, 0.0  ;;  %v4713_v1 = vmax.f32 %v3951_v22, 0.0  ;;  %v5581_v56 = vsel %vm2310_vm2, %v4719_v11, 0.0  ;;  %v13135_v22 = vld [vmem:[#allocation284_spill] sm:$0xff] }
 0x6c5   : > { %v5548_v51 = vadd.f32 %v5547_v46, %v5546_v2  ;;  %v11657_v2 = vpop.f32.mrf.mxu2  ;;  %v5567_v46 = vsel %vm2310_vm2, %v4712_v29, 0.0 }
 0x6c7   : > { %v5550_v32 = vadd.f32 %v5549_v57, %v5548_v51  ;;  %v5569_v57 = vsel %vm2310_vm2, %v4713_v1, 0.0 }
 0x6c9   : > { %v5552_v39 = vadd.f32 %v5551_v54, %v5550_v32  ;;  %v5571_v54 = vsel %vm2310_vm2, %v4714_v5, 0.0 }
 0x6cb   : > { %v5554_v19 = vadd.f32 %v5553_v47, %v5552_v39  ;;  %v5573_v47 = vsel %vm2310_vm2, %v4715_v20, 0.0 }
 0x6cd   : > { %v5556_v43 = vadd.f32 %v5555_v0, %v5554_v19  ;;  %v11671_v0 = vpop.f32.mrf.mxu2 }
 0x6cf   : > { %v5558_v42 = vadd.f32 %v5557_v55, %v5556_v43  ;;  %v3969_v43 = vadd.f32 %v11483_v63, %v13132_v8 }
 0x6d1   : > { %v5560_v61 = vadd.f32 %v5559_v31, %v5558_v42  ;;  %v3971_v42 = vadd.f32 %v11483_v63, %v13133_v16  ;;  %v4720_v59 = vmax.f32 %v3969_v43, 0.0 }
 0x6d3   : > { %v5562_v17 = vadd.f32 %v5561_v12, %v5560_v61  ;;  %v3974_v61 = vadd.f32 %v11483_v63, %v13134_v25  ;;  %v4721_v52 = vmax.f32 %v3971_v42, 0.0  ;;  %v5583_v29 = vsel %vm2310_vm2, %v4720_v59, 0.0 }
 0x6d5   : > { %v5564_v21 = vadd.f32 %v5563_v7, %v5562_v17  ;;  %v3976_v17 = vadd.f32 %v11483_v63, %v13135_v22  ;;  %v4722_v44 = vmax.f32 %v3974_v61, 0.0  ;;  %v11688_v1 = vpop.f32.mrf.mxu2  ;;  %v5585_v15 = vsel %vm2310_vm2, %v4721_v52, 0.0 }
 0x6d6   : > { %v3999_v61 = vadd.f32 %v11483_v63, %v10933_v41  ;;  %v4001_v22 = vadd.f32 %v11483_v63, %v10956_v53  ;;  %v4009_v53 = vadd.f32 %v11483_v63, %v11295_v38  ;;  %v8029_v38 = vld [vmem:[%s12936_s8 + $0x10] sm:$0xff] }
 0x6d7   : > { %v5566_v24 = vadd.f32 %v5565_v36, %v5564_v21  ;;  %v3979_v21 = vadd.f32 %v11483_v63, %v13136_v6  ;;  %v4723_v49 = vmax.f32 %v3976_v17, 0.0  ;;  %v5587_v23 = vsel %vm2310_vm2, %v4722_v44, 0.0  ;;  %5951 = vmatpush.bf16.msrb.mxu3 %v8029_v38 }
 0x6d8   : > { %v4733_v41 = vmax.f32 %v4001_v22, 0.0 }
 0x6d9   : > { %v5568_v51 = vadd.f32 %v5567_v46, %v5566_v24  ;;  %v13137_v24 = vld [vmem:[#allocation286_spill] sm:$0xff]  ;;  %v4724_v30 = vmax.f32 %v3979_v21, 0.0  ;;  %v5589_v34 = vsel %vm2310_vm2, %v4723_v49, 0.0  ;;  %v4006_v21 = vadd.f32 %v11483_v63, %v10999_v14 }
 0x6da   : > { %v3981_v46 = vadd.f32 %v11483_v63, %v13137_v24  ;;  %v4014_v14 = vadd.f32 %v11483_v63, %v11592_v3 }
 0x6db   : > { %v5570_v32 = vadd.f32 %v5569_v57, %v5568_v51  ;;  %v13138_v51 = vld [vmem:[#allocation287_spill] sm:$0xff]  ;;  %v5591_v45 = vsel %vm2310_vm2, %v4724_v30, 0.0 }
 0x6dc   : > { %v3984_v57 = vadd.f32 %v11483_v63, %v13138_v51  ;;  %v4725_v18 = vmax.f32 %v3981_v46, 0.0 }
 0x6dd   : > { %v5572_v39 = vadd.f32 %v5571_v54, %v5570_v32  ;;  %v13139_v32 = vld [vmem:[#allocation288_spill] sm:$0xff]  ;;  %v11702_v13 = vpop.f32.mrf.mxu2 }
 0x6de   : > { %v3986_v54 = vadd.f32 %v11483_v63, %v13139_v32  ;;  %v4726_v58 = vmax.f32 %v3984_v57, 0.0  ;;  %v5593_v4 = vsel %vm2310_vm2, %v4725_v18, 0.0  ;;  %v4736_v57 = vmax.f32 %v4009_v53, 0.0 }
 0x6df   : > { %v5574_v19 = vadd.f32 %v5573_v47, %v5572_v39  ;;  %v13140_v39 = vld [vmem:[#allocation289_spill] sm:$0xff] }
 0x6e0   : > { %v3989_v47 = vadd.f32 %v11483_v63, %v13140_v39  ;;  %v5595_v43 = vsel %vm2310_vm2, %v4726_v58, 0.0  ;;  %v4019_v58 = vadd.f32 %v11483_v63, %v11626_v27 }
 0x6e1   : > { %v5576_v55 = vadd.f32 %v5575_v48, %v5574_v19  ;;  %v4727_v19 = vmax.f32 %v3986_v54, 0.0  ;;  %v13141_v48 = vld [vmem:[#allocation290_spill] sm:$0xff]  ;;  %v4016_v54 = vadd.f32 %v11483_v63, %v11609_v35 }
 0x6e2   : > { %v3991_v28 = vadd.f32 %v11483_v63, %v13141_v48 }
 0x6e3   : > { %v5578_v31 = vadd.f32 %v5577_v26, %v5576_v55  ;;  %v4728_v55 = vmax.f32 %v3989_v47, 0.0  ;;  %v3994_v26 = vadd.f32 %v11483_v63, %v10893_v9  ;;  %v5597_v16 = vsel %vm2310_vm2, %v4727_v19, 0.0 }
 0x6e4   : > { %v4729_v42 = vmax.f32 %v3991_v28, 0.0  ;;  %v4021_v19 = vadd.f32 %v11483_v63, %v11643_v40  ;;  %v4740_v28 = vmax.f32 %v4019_v58, 0.0  ;;  %v4029_v40 = vadd.f32 %v11483_v63, %v11688_v1 }
 0x6e5   : > { %v5580_v12 = vadd.f32 %v5579_v62, %v5578_v31  ;;  %v3996_v31 = vadd.f32 %v11483_v63, %v10913_v37  ;;  %v5599_v59 = vsel %vm2310_vm2, %v4728_v55, 0.0  ;;  %v4730_v25 = vmax.f32 %v3994_v26, 0.0 }
 0x6e6   : > { %v5601_v52 = vsel %vm2310_vm2, %v4729_v42, 0.0  ;;  %v4732_v37 = vmax.f32 %v3999_v61, 0.0  ;;  %v4741_v27 = vmax.f32 %v4021_v19, 0.0  ;;  %v4026_v26 = vadd.f32 %v11483_v63, %v11671_v0 }
 0x6e7   : > { %v5582_v7 = vadd.f32 %v5581_v56, %v5580_v12  ;;  %v11716_v56 = vpop.f32.mrf.mxu2  ;;  %v4731_v9 = vmax.f32 %v3996_v31, 0.0 }
 0x6e8   : > { %v4034_v0 = vadd.f32 %v11483_v63, %v11716_v56 }
 0x6e9   : > { %v5584_v36 = vadd.f32 %v5583_v29, %v5582_v7  ;;  %v5603_v7 = vsel %vm2310_vm2, %v4730_v25, 0.0  ;;  %v4004_v29 = vadd.f32 %v11483_v63, %v10976_v50  ;;  %v5605_v6 = vsel %vm2310_vm2, %v4731_v9, 0.0 }
 0x6ea   : > { %v4011_v50 = vadd.f32 %v11483_v63, %v11309_v60  ;;  %v8057_v60 = vld [vmem:[%s12625_s12 + $0xb0] sm:$0xff]  ;;  %v4743_v25 = vmax.f32 %v4026_v26, 0.0 }
 0x6eb   : > { %v5586_v5 = vadd.f32 %v5585_v15, %v5584_v36  ;;  %v5607_v15 = vsel %vm2310_vm2, %v4732_v37, 0.0  ;;  %v4734_v49 = vmax.f32 %v4004_v29, 0.0  ;;  %6847 = vmatpush.bf16.msra.mxu1 %v8057_v60  ;;  %v4746_v29 = vmax.f32 %v4034_v0, 0.0 }
 0x6ec   : > { %v4737_v32 = vmax.f32 %v4011_v50, 0.0  ;;  %v5629_v22 = vsel %vm2310_vm2, %v4743_v25, 0.0 }
 0x6ed   : > { %v5588_v20 = vadd.f32 %v5587_v23, %v5586_v5  ;;  %v5609_v5 = vsel %vm2310_vm2, %v4733_v41, 0.0  ;;  %v4735_v23 = vmax.f32 %v4006_v21, 0.0  ;;  %v5611_v51 = vsel %vm2310_vm2, %v4734_v49, 0.0 }
 0x6ef   : > { %v5590_v10 = vadd.f32 %v5589_v34, %v5588_v20  ;;  %v4035_v46 = vpop.f32.mrf.mxu2  ;;  %v8049_v34 = vld [vmem:[%s12625_s12 + $0x70] sm:$0xff]  ;;  %v5613_v18 = vsel %vm2310_vm2, %v4735_v23, 0.0 }
 0x6f0   : > { %6834 = vmatpush.bf16.msra.mxu0 %v8049_v34  ;;  %v4036_v1 = vadd.f32 %v11483_v63, %v4035_v46 }
 0x6f1   : > { %v5592_v33 = vadd.f32 %v5591_v45, %v5590_v10  ;;  %v5615_v10 = vsel %vm2310_vm2, %v4736_v57, 0.0  ;;  %v4738_v45 = vmax.f32 %v4014_v14, 0.0 }
 0x6f2   : > { %v4747_v21 = vmax.f32 %v4036_v1, 0.0 }
 0x6f3   : > { %v5594_v8 = vadd.f32 %v5593_v4, %v5592_v33  ;;  %v5617_v33 = vsel %vm2310_vm2, %v4737_v32, 0.0  ;;  %v4739_v4 = vmax.f32 %v4016_v54, 0.0  ;;  %v5619_v35 = vsel %vm2310_vm2, %v4738_v45, 0.0 }
 0x6f4   : > { %v5637_v46 = vsel %vm2310_vm2, %v4747_v21, 0.0 }
 0x6f5   : > { %v5596_v11 = vadd.f32 %v5595_v43, %v5594_v8  ;;  %v4024_v8 = vadd.f32 %v11483_v63, %v11657_v2  ;;  %v5621_v55 = vsel %vm2310_vm2, %v4739_v4, 0.0  ;;  %v4031_v2 = vadd.f32 %v11483_v63, %v11702_v13 }
 0x6f7   : > { %v5598_v62 = vadd.f32 %v5597_v16, %v5596_v11  ;;  %v4038_v47 = vpop.f32.mrf.mxu2  ;;  %v5623_v16 = vsel %vm2310_vm2, %v4740_v28, 0.0  ;;  %v4742_v42 = vmax.f32 %v4024_v8, 0.0 }
 0x6f9   : > { %v5600_v12 = vadd.f32 %v5599_v59, %v5598_v62  ;;  %v5625_v59 = vsel %vm2310_vm2, %v4741_v27, 0.0 }
 0x6fb   : > { %v5602_v17 = vadd.f32 %v5601_v52, %v5600_v12  ;;  %v5627_v12 = vsel %vm2310_vm2, %v4742_v42, 0.0  ;;  %v4744_v52 = vmax.f32 %v4029_v40, 0.0 }
 0x6fd   : > { %v5604_v44 = vadd.f32 %v5603_v7, %v5602_v17  ;;  %v4745_v17 = vmax.f32 %v4031_v2, 0.0  ;;  %v5631_v37 = vsel %vm2310_vm2, %v4744_v52, 0.0 }
 0x6ff   : > { %v5606_v36 = vadd.f32 %v5605_v6, %v5604_v44  ;;  %v4040_v62 = vpop.f32.mrf.mxu2  ;;  %v4039_v44 = vadd.f32 %v11483_v63, %v4038_v47  ;;  %v5633_v41 = vsel %vm2310_vm2, %v4745_v17, 0.0 }
 0x701   : > { %v5608_v24 = vadd.f32 %v5607_v15, %v5606_v36  ;;  %v4041_v36 = vadd.f32 %v11483_v63, %v4040_v62  ;;  %v5635_v15 = vsel %vm2310_vm2, %v4746_v29, 0.0  ;;  %v4748_v49 = vmax.f32 %v4039_v44, 0.0 }
 0x703   : > { %v5610_v30 = vadd.f32 %v5609_v5, %v5608_v24  ;;  %v4749_v5 = vmax.f32 %v4041_v36, 0.0  ;;  %v5639_v50 = vsel %vm2310_vm2, %v4748_v49, 0.0  ;;  %v11802_v49 = vpop.f32.mrf.mxu3 }
 0x705   : > { %v5612_v20 = vadd.f32 %v5611_v51, %v5610_v30  ;;  %v5641_v14 = vsel %vm2310_vm2, %v4749_v5, 0.0 }
 0x707   : > { %v5614_v3 = vadd.f32 %v5613_v18, %v5612_v20  ;;  %v4043_v6 = vpop.f32.mrf.mxu2 }
 0x708   : > { %v4044_v53 = vadd.f32 %v11483_v63, %v4043_v6 }
 0x709   : > { %v5616_v39 = vadd.f32 %v5615_v10, %v5614_v3 }
 0x70a   : > { %v4750_v30 = vmax.f32 %v4044_v53, 0.0 }
 0x70b   : > { %v5618_v48 = vadd.f32 %v5617_v33, %v5616_v39 }
 0x70c   : > { %v5643_v38 = vsel %vm2310_vm2, %v4750_v30, 0.0 }
 0x70d   : > { %v5620_v43 = vadd.f32 %v5619_v35, %v5618_v48 }
 0x70f   : > { %v5622_v11 = vadd.f32 %v5621_v55, %v5620_v43  ;;  %v4045_v57 = vpop.f32.mrf.mxu2 }
 0x710   : > { %v4046_v3 = vadd.f32 %v11483_v63, %v4045_v57 }
 0x711   : > { %v5624_v31 = vadd.f32 %v5623_v16, %v5622_v11 }
 0x712   : > { %v4751_v45 = vmax.f32 %v4046_v3, 0.0  ;;  %v13146_v3 = vld [vmem:[#allocation26_spill] sm:$0xff] }
 0x713   : > { %v5626_v61 = vadd.f32 %v5625_v59, %v5624_v31 }
 0x714   : > { %v5645_v39 = vsel %vm2310_vm2, %v4751_v45, 0.0 }
 0x715   : > { %v5628_v9 = vadd.f32 %v5627_v12, %v5626_v61 }
 0x717   : > { %v5630_v7 = vadd.f32 %v5629_v22, %v5628_v9  ;;  %v4048_v60 = vpop.f32.mrf.mxu2 }
 0x718   : > { %v4049_v58 = vadd.f32 %v11483_v63, %v4048_v60 }
 0x719   : > { %v5632_v13 = vadd.f32 %v5631_v37, %v5630_v7 }
 0x71a   : > { %v4752_v47 = vmax.f32 %v4049_v58, 0.0 }
 0x71b   : > { %v5634_v56 = vadd.f32 %v5633_v41, %v5632_v13 }
 0x71c   : > { %v5647_v48 = vsel %vm2310_vm2, %v4752_v47, 0.0  ;;  %v13147_v47 = vld [vmem:[#allocation28_spill] sm:$0xff] }
 0x71d   : > { %v5636_v24 = vadd.f32 %v5635_v15, %v5634_v56  ;;  %v13142_v56 = vld [vmem:[#allocation18_spill] sm:$0xff] }
 0x71e   : > { %v4074_v15 = vadd.f32 %v11483_v63, %v13142_v56 }
 0x71f   : > { %v5638_v23 = vadd.f32 %v5637_v46, %v5636_v24  ;;  %v4050_v18 = vpop.f32.mrf.mxu2  ;;  %v13143_v24 = vld [vmem:[#allocation20_spill] sm:$0xff] }
 0x720   : > { %v4051_v33 = vadd.f32 %v11483_v63, %v4050_v18  ;;  %v4076_v46 = vadd.f32 %v11483_v63, %v13143_v24  ;;  %v4762_v30 = vmax.f32 %v4074_v15, 0.0 }
 0x721   : > { %v5640_v51 = vadd.f32 %v5639_v50, %v5638_v23 }
 0x722   : > { %v4753_v35 = vmax.f32 %v4051_v33, 0.0  ;;  %v4086_v33 = vadd.f32 %v11483_v63, %v13147_v47 }
 0x723   : > { %v5642_v20 = vadd.f32 %v5641_v14, %v5640_v51  ;;  %v13144_v51 = vld [vmem:[#allocation22_spill] sm:$0xff] }
 0x724   : > { %v5649_v43 = vsel %vm2310_vm2, %v4753_v35, 0.0  ;;  %v4079_v57 = vadd.f32 %v11483_v63, %v13144_v51  ;;  %v13156_v51 = vld [vmem:[#allocation46_spill] sm:$0xff] }
 0x725   : > { %v5644_v34 = vadd.f32 %v5643_v38, %v5642_v20  ;;  %v4763_v20 = vmax.f32 %v4076_v46, 0.0  ;;  %v13145_v38 = vld [vmem:[#allocation24_spill] sm:$0xff] }
 0x726   : > { %v13155_v46 = vld [vmem:[#allocation44_spill] sm:$0xff] }
 0x727   : > { %v4053_v32 = vpop.f32.mrf.mxu2  ;;  %v5646_v4 = vadd.f32 %v5645_v39, %v5644_v34  ;;  %v4081_v34 = vadd.f32 %v11483_v63, %v13145_v38  ;;  %v5669_v58 = vsel %vm2310_vm2, %v4763_v20, 0.0 }
 0x728   : > { %v4054_v28 = vadd.f32 %v11483_v63, %v4053_v32  ;;  %v5667_v32 = vsel %vm2310_vm2, %v4762_v30, 0.0 }
 0x729   : > { %v5648_v8 = vadd.f32 %v5647_v48, %v5646_v4  ;;  %v4765_v39 = vmax.f32 %v4081_v34, 0.0  ;;  %v11819_v4 = vpop.f32.mrf.mxu3  ;;  %v13157_v34 = vld [vmem:[#allocation48_spill] sm:$0xff] }
 0x72a   : > { %v4754_v55 = vmax.f32 %v4054_v28, 0.0  ;;  %v13148_v28 = vld [vmem:[#allocation30_spill] sm:$0xff] }
 0x72b   : > { %v5650_v26 = vadd.f32 %v5649_v43, %v5648_v8  ;;  %v4089_v8 = vadd.f32 %v11483_v63, %v13148_v28 }
 0x72c   : > { %v5651_v16 = vsel %vm2310_vm2, %v4754_v55, 0.0  ;;  %v5673_v55 = vsel %vm2310_vm2, %v4765_v39, 0.0 }
 0x72d   : > { %v5652_v31 = vadd.f32 %v5651_v16, %v5650_v26  ;;  %v13149_v26 = vld [vmem:[#allocation32_spill] sm:$0xff] }
 0x72f   : > { %v4055_v54 = vpop.f32.mrf.mxu2 }
 0x730   : > { %v4056_v27 = vadd.f32 %v11483_v63, %v4055_v54  ;;  %v4764_v54 = vmax.f32 %v4079_v57, 0.0  ;;  %v4109_v57 = vadd.f32 %v11483_v63, %v13156_v51 }
 0x732   : > { %v4755_v42 = vmax.f32 %v4056_v27, 0.0  ;;  %v5671_v48 = vsel %vm2310_vm2, %v4764_v54, 0.0  ;;  %v4767_v27 = vmax.f32 %v4086_v33, 0.0  ;;  %v13159_v33 = vld [vmem:[#allocation52_spill] sm:$0xff] }
 0x734   : > { %v5653_v62 = vsel %vm2310_vm2, %v4755_v42, 0.0 }
 0x735   : > { %v5654_v2 = vadd.f32 %v5653_v62, %v5652_v31  ;;  %v13150_v31 = vld [vmem:[#allocation34_spill] sm:$0xff] }
 0x736   : > { %v4094_v62 = vadd.f32 %v11483_v63, %v13150_v31 }
 0x737   : > { %v4058_v10 = vpop.f32.mrf.mxu2 }
 0x738   : > { %v4059_v40 = vadd.f32 %v11483_v63, %v4058_v10  ;;  %v4084_v10 = vadd.f32 %v11483_v63, %v13146_v3  ;;  %v4776_v3 = vmax.f32 %v4109_v57, 0.0 }
 0x73a   : > { %v4756_v59 = vmax.f32 %v4059_v40, 0.0  ;;  %v4766_v35 = vmax.f32 %v4084_v10, 0.0  ;;  %v4768_v40 = vmax.f32 %v4089_v8, 0.0  ;;  %v13158_v10 = vld [vmem:[#allocation50_spill] sm:$0xff] }
 0x73b   : > { %v13160_v8 = vld [vmem:[#allocation54_spill] sm:$0xff] }
 0x73c   : > { %v5655_v12 = vsel %vm2310_vm2, %v4756_v59, 0.0  ;;  %v5675_v42 = vsel %vm2310_vm2, %v4766_v35, 0.0  ;;  %v5695_v35 = vsel %vm2310_vm2, %v4776_v3, 0.0 }
 0x73d   : > { %v5656_v9 = vadd.f32 %v5655_v12, %v5654_v2 }
 0x73f   : > { %v4060_v19 = vpop.f32.mrf.mxu2 }
 0x740   : > { %v4061_v25 = vadd.f32 %v11483_v63, %v4060_v19 }
 0x742   : > { %v4757_v52 = vmax.f32 %v4061_v25, 0.0  ;;  %v5677_v25 = vsel %vm2310_vm2, %v4767_v27, 0.0 }
 0x744   : > { %v5657_v22 = vsel %vm2310_vm2, %v4757_v52, 0.0 }
 0x745   : > { %v5658_v7 = vadd.f32 %v5657_v22, %v5656_v9  ;;  %v4770_v9 = vmax.f32 %v4094_v62, 0.0  ;;  %v13152_v22 = vld [vmem:[#allocation38_spill] sm:$0xff] }
 0x747   : > { %v4063_v11 = vpop.f32.mrf.mxu2 }
 0x748   : > { %v4064_v0 = vadd.f32 %v11483_v63, %v4063_v11  ;;  %v4091_v11 = vadd.f32 %v11483_v63, %v13149_v26 }
 0x74a   : > { %v4758_v17 = vmax.f32 %v4064_v0, 0.0  ;;  %v4769_v2 = vmax.f32 %v4091_v11, 0.0  ;;  %v5679_v0 = vsel %vm2310_vm2, %v4768_v40, 0.0  ;;  %v11868_v11 = vld [vmem:[%s12677_s7] ss:$0 sm:$0xff]  ;;  %s7175_s7 = scalar_lea.hbm %s12634_s21, %s8400_s3 }
 0x74b   : > { %s7179_s1 = sshll.u32 %s7175_s7, 4  ;;  %s7180_s1 = int_to_ptr.hbm [resolvable:$true] %s7179_s1 }
 0x74c   : > { %v5659_v29 = vsel %vm2310_vm2, %v4758_v17, 0.0  ;;  %v4099_v17 = vadd.f32 %v11483_v63, %v13152_v22  ;;  %s8219_s28 = sshra.s32 %s7180_s1, 4  ;;  %s8220_s28 = int_to_ptr.hbm [resolvable:$true] %s8219_s28 }
 0x74d   : > { %v5660_v6 = vadd.f32 %v5659_v29, %v5658_v7  ;;  %p8226_p0 = scmp.lt.s32.totalorder %s8220_s28, %s12634_s21 }
 0x74f   : > { %v4065_v61 = vpop.f32.mrf.mxu2 }
 0x750   : > { %v4066_v1 = vadd.f32 %v11483_v63, %v4065_v61  ;;  %v13151_v61 = vld [vmem:[#allocation36_spill] sm:$0xff] }
 0x751   : > { %v4096_v12 = vadd.f32 %v11483_v63, %v13151_v61 }
 0x752   : > { %v4759_v44 = vmax.f32 %v4066_v1, 0.0  ;;  %v11836_v1 = vpop.f32.mrf.mxu3 }
 0x753   : > { %v4771_v29 = vmax.f32 %v4096_v12, 0.0 }
 0x754   : > { %v5661_v41 = vsel %vm2310_vm2, %v4759_v44, 0.0  ;;  %v13153_v44 = vld [vmem:[#allocation40_spill] sm:$0xff] }
 0x755   : > { %v5662_v36 = vadd.f32 %v5661_v41, %v5660_v6  ;;  %v5683_v41 = vsel %vm2310_vm2, %v4770_v9, 0.0 }
 0x757   : > { %v4068_v37 = vpop.f32.mrf.mxu2 }
 0x758   : > { %v4069_v13 = vadd.f32 %v11483_v63, %v4068_v37  ;;  %v5681_v37 = vsel %vm2310_vm2, %v4769_v2, 0.0 }
 0x75a   : > { %v4760_v21 = vmax.f32 %v4069_v13, 0.0  ;;  %v4101_v13 = vadd.f32 %v11483_v63, %v13153_v44 }
 0x75c   : > { %v5663_v5 = vsel %vm2310_vm2, %v4760_v21, 0.0  ;;  %v4772_v21 = vmax.f32 %v4099_v17, 0.0  ;;  %v4773_v24 = vmax.f32 %v4101_v13, 0.0 }
 0x75d   : > { %v5664_v50 = vadd.f32 %v5663_v5, %v5662_v36  ;;  %v13154_v36 = vld [vmem:[#allocation42_spill] sm:$0xff]  ;;  %v4106_v5 = vadd.f32 %v11483_v63, %v13155_v46 }
 0x75e   : > { %v4104_v56 = vadd.f32 %v11483_v63, %v13154_v36  ;;  %v5689_v20 = vsel %vm2310_vm2, %v4773_v24, 0.0 }
 0x75f   : > { %v4070_v53 = vpop.f32.mrf.mxu2  ;;  %v4775_v38 = vmax.f32 %v4106_v5, 0.0 }
 0x760   : > { %v4071_v23 = vadd.f32 %v11483_v63, %v4070_v53  ;;  %v5685_v53 = vsel %vm2310_vm2, %v4771_v29, 0.0  ;;  %v4774_v30 = vmax.f32 %v4104_v56, 0.0 }
 0x761   : > { %v5693_v39 = vsel %vm2310_vm2, %v4775_v38, 0.0 }
 0x762   : > { %v4761_v14 = vmax.f32 %v4071_v23, 0.0  ;;  %v5691_v54 = vsel %vm2310_vm2, %v4774_v30, 0.0 }
 0x764   : > { %v5665_v60 = vsel %vm2310_vm2, %v4761_v14, 0.0 }
 0x765   : > { %v5666_v18 = vadd.f32 %v5665_v60, %v5664_v50  ;;  %v5687_v50 = vsel %vm2310_vm2, %v4772_v21, 0.0  ;;  %v4111_v60 = vadd.f32 %v11483_v63, %v13157_v34 }
 0x767   : > { %v5668_v45 = vadd.f32 %v5667_v32, %v5666_v18  ;;  %v11853_v18 = vpop.f32.mrf.mxu3  ;;  %v4777_v47 = vmax.f32 %v4111_v60, 0.0 }
 0x769   : > { %v5670_v19 = vadd.f32 %v5669_v58, %v5668_v45  ;;  %v4114_v45 = vadd.f32 %v11483_v63, %v13158_v10  ;;  %v5697_v27 = vsel %vm2310_vm2, %v4777_v47, 0.0 }
 0x76b   : > { %v5672_v43 = vadd.f32 %v5671_v48, %v5670_v19  ;;  %v4116_v19 = vadd.f32 %v11483_v63, %v13159_v33  ;;  %v4778_v28 = vmax.f32 %v4114_v45, 0.0 }
 0x76d   : > { %v5674_v16 = vadd.f32 %v5673_v55, %v5672_v43  ;;  %v4119_v43 = vadd.f32 %v11483_v63, %v13160_v8  ;;  %v4779_v26 = vmax.f32 %v4116_v19, 0.0  ;;  %v5699_v31 = vsel %vm2310_vm2, %v4778_v28, 0.0 }
 0x76f   : > { %v5676_v59 = vadd.f32 %v5675_v42, %v5674_v16  ;;  %v13161_v16 = vld [vmem:[#allocation56_spill] sm:$0xff]  ;;  %v4780_v62 = vmax.f32 %v4119_v43, 0.0  ;;  %v11875_v63 = vpop.f32.mrf.mxu3  ;;  %v5701_v61 = vsel %vm2310_vm2, %v4779_v26, 0.0 }
 0x770   : > { %v4121_v42 = vadd.f32 %v11868_v11, %v13161_v16 }
 0x771   : > { %v5678_v52 = vadd.f32 %v5677_v25, %v5676_v59  ;;  %v13162_v59 = vld [vmem:[#allocation59_spill] sm:$0xff]  ;;  %v5703_v22 = vsel %vm2310_vm2, %v4780_v62, 0.0  ;;  %v13173_v62 = vld [vmem:[#allocation92_spill] sm:$0xff] }
 0x772   : > { %v4124_v25 = vadd.f32 %v11868_v11, %v13162_v59  ;;  %v4781_v12 = vmax.f32 %v4121_v42, 0.0  ;;  %v4151_v59 = vadd.f32 %v11868_v11, %v13173_v62 }
 0x773   : > { %v5680_v7 = vadd.f32 %v5679_v0, %v5678_v52  ;;  %v13163_v52 = vld [vmem:[#allocation62_spill] sm:$0xff] }
 0x774   : > { %v4126_v0 = vadd.f32 %v11868_v11, %v13163_v52  ;;  %v4782_v17 = vmax.f32 %v4124_v25, 0.0  ;;  %v5705_v44 = vsel %vm2310_vm2, %v4781_v12, 0.0  ;;  %v13174_v12 = vld [vmem:[#allocation95_spill] sm:$0xff] }
 0x775   : > { %v5682_v6 = vadd.f32 %v5681_v37, %v5680_v7  ;;  %v13164_v7 = vld [vmem:[#allocation65_spill] sm:$0xff]  ;;  %v4154_v52 = vadd.f32 %v11868_v11, %v13174_v12 }
 0x776   : > { %v4129_v37 = vadd.f32 %v11868_v11, %v13164_v7  ;;  %v4783_v13 = vmax.f32 %v4126_v0, 0.0  ;;  %v5707_v36 = vsel %vm2310_vm2, %v4782_v17, 0.0  ;;  %v13175_v17 = vld [vmem:[#allocation98_spill] sm:$0xff] }
 0x777   : > { %v5684_v15 = vadd.f32 %v5683_v41, %v5682_v6  ;;  %v13165_v6 = vld [vmem:[#allocation68_spill] sm:$0xff]  ;;  %v11892_v30 = vpop.f32.mrf.mxu3  ;;  %v4156_v7 = vadd.f32 %v11868_v11, %v13175_v17 }
 0x778   : > { %v4131_v41 = vadd.f32 %v11868_v11, %v13165_v6  ;;  %v4784_v56 = vmax.f32 %v4129_v37, 0.0  ;;  %v5709_v46 = vsel %vm2310_vm2, %v4783_v13, 0.0  ;;  %v13176_v13 = vld [vmem:[#allocation101_spill] sm:$0xff] }
 0x779   : > { %v5686_v23 = vadd.f32 %v5685_v53, %v5684_v15  ;;  %v13166_v15 = vld [vmem:[#allocation71_spill] sm:$0xff]  ;;  %v4159_v6 = vadd.f32 %v11868_v11, %v13176_v13 }
 0x77a   : > { %v4134_v53 = vadd.f32 %v11868_v11, %v13166_v15  ;;  %v4785_v5 = vmax.f32 %v4131_v41, 0.0  ;;  %v5711_v57 = vsel %vm2310_vm2, %v4784_v56, 0.0  ;;  %v13177_v56 = vld [vmem:[#allocation104_spill] sm:$0xff] }
 0x77b   : > { %v5688_v14 = vadd.f32 %v5687_v50, %v5686_v23  ;;  %v13167_v23 = vld [vmem:[#allocation74_spill] sm:$0xff]  ;;  %v4161_v15 = vadd.f32 %v11868_v11, %v13177_v56 }
 0x77c   : > { %v4136_v50 = vadd.f32 %v11868_v11, %v13167_v23  ;;  %v5713_v60 = vsel %vm2310_vm2, %v4785_v5, 0.0  ;;  %v4796_v5 = vmax.f32 %v4159_v6, 0.0  ;;  %v13178_v23 = vld [vmem:[#allocation107_spill] sm:$0xff]  ;;  %v13187_v6 = vld [vmem:[#allocation134_spill] sm:$0xff] }
 0x77d   : > { %v5690_v32 = vadd.f32 %v5689_v20, %v5688_v14  ;;  %v4786_v14 = vmax.f32 %v4134_v53, 0.0  ;;  %v13168_v20 = vld [vmem:[#allocation77_spill] sm:$0xff] }
 0x77e   : > { %v4139_v38 = vadd.f32 %v11868_v11, %v13168_v20  ;;  %v13179_v20 = vld [vmem:[#allocation110_spill] sm:$0xff] }
 0x77f   : > { %v5692_v58 = vadd.f32 %v5691_v54, %v5690_v32  ;;  %v4787_v32 = vmax.f32 %v4136_v50, 0.0  ;;  %v13169_v54 = vld [vmem:[#allocation80_spill] sm:$0xff]  ;;  %v5715_v45 = vsel %vm2310_vm2, %v4786_v14, 0.0  ;;  %v11909_v16 = vpop.f32.mrf.mxu3  ;;  %v4164_v50 = vadd.f32 %v11868_v11, %v13178_v23 }
 0x780   : > { %v4141_v3 = vadd.f32 %v11868_v11, %v13169_v54  ;;  %v4797_v14 = vmax.f32 %v4161_v15, 0.0  ;;  %v13180_v54 = vld [vmem:[#allocation113_spill] sm:$0xff] }
 0x781   : > { %v5694_v48 = vadd.f32 %v5693_v39, %v5692_v58  ;;  %v4788_v58 = vmax.f32 %v4139_v38, 0.0  ;;  %v13170_v39 = vld [vmem:[#allocation83_spill] sm:$0xff]  ;;  %v5717_v19 = vsel %vm2310_vm2, %v4787_v32, 0.0  ;;  %v4166_v38 = vadd.f32 %v11868_v11, %v13179_v20 }
 0x782   : > { %v4144_v47 = vadd.f32 %v11868_v11, %v13170_v39  ;;  %v4798_v32 = vmax.f32 %v4164_v50, 0.0  ;;  %v13181_v39 = vld [vmem:[#allocation116_spill] sm:$0xff] }
 0x783   : > { %v5696_v55 = vadd.f32 %v5695_v35, %v5694_v48  ;;  %v4789_v48 = vmax.f32 %v4141_v3, 0.0  ;;  %v13171_v35 = vld [vmem:[#allocation86_spill] sm:$0xff]  ;;  %v5719_v43 = vsel %vm2310_vm2, %v4788_v58, 0.0  ;;  %v4169_v3 = vadd.f32 %v11868_v11, %v13180_v54 }
 0x784   : > { %v4146_v28 = vadd.f32 %v11868_v11, %v13171_v35  ;;  %v4799_v58 = vmax.f32 %v4166_v38, 0.0  ;;  %v13182_v35 = vld [vmem:[#allocation119_spill] sm:$0xff] }
 0x785   : > { %v5698_v40 = vadd.f32 %v5697_v27, %v5696_v55  ;;  %v4790_v55 = vmax.f32 %v4144_v47, 0.0  ;;  %v13172_v27 = vld [vmem:[#allocation89_spill] sm:$0xff]  ;;  %v4171_v47 = vadd.f32 %v11868_v11, %v13181_v39  ;;  %v8048_v39 = vld [vmem:[%s12625_s12 + $0x68] sm:$0xff] }
 0x786   : > { %v4149_v26 = vadd.f32 %v11868_v11, %v13172_v27  ;;  %6835 = vmatpush.bf16.msra.mxu0 %v8048_v39 }
 0x787   : > { %v5700_v2 = vadd.f32 %v5699_v31, %v5698_v40  ;;  %v5721_v40 = vsel %vm2310_vm2, %v4789_v48, 0.0  ;;  %v4791_v31 = vmax.f32 %v4146_v28, 0.0  ;;  %v11926_v53 = vpop.f32.mrf.mxu3  ;;  %v4800_v48 = vmax.f32 %v4169_v3, 0.0 }
 0x788   : > { %v4174_v28 = vadd.f32 %v11868_v11, %v13182_v35  ;;  %v4801_v27 = vmax.f32 %v4171_v47, 0.0  ;;  %v8056_v47 = vld [vmem:[%s12625_s12 + $0xa8] sm:$0xff]  ;;  %v13192_v35 = vld [vmem:[#allocation149_spill] sm:$0xff] }
 0x789   : > { %v5702_v9 = vadd.f32 %v5701_v61, %v5700_v2  ;;  %v5723_v2 = vsel %vm2310_vm2, %v4790_v55, 0.0  ;;  %v4792_v61 = vmax.f32 %v4149_v26, 0.0  ;;  %v5741_v55 = vsel %vm2310_vm2, %v4799_v58, 0.0  ;;  %v13183_v26 = vld [vmem:[#allocation122_spill] sm:$0xff]  ;;  %6848 = vmatpush.bf16.msra.mxu1 %v8056_v47 }
 0x78a   : > { %v4802_v62 = vmax.f32 %v4174_v28, 0.0  ;;  %v4199_v28 = vadd.f32 %v11868_v11, %v13192_v35 }
 0x78b   : > { %v5704_v29 = vadd.f32 %v5703_v22, %v5702_v9  ;;  %v5725_v9 = vsel %vm2310_vm2, %v4791_v31, 0.0  ;;  %v4793_v22 = vmax.f32 %v4151_v59, 0.0  ;;  %v5743_v31 = vsel %vm2310_vm2, %v4800_v48, 0.0  ;;  %v13184_v59 = vld [vmem:[#allocation125_spill] sm:$0xff] }
 0x78d   : > { %v5706_v21 = vadd.f32 %v5705_v44, %v5704_v29  ;;  %v5727_v29 = vsel %vm2310_vm2, %v4792_v61, 0.0  ;;  %v4794_v44 = vmax.f32 %v4154_v52, 0.0  ;;  %v5745_v61 = vsel %vm2310_vm2, %v4801_v27, 0.0  ;;  %v13185_v52 = vld [vmem:[#allocation128_spill] sm:$0xff]  ;;  %v8047_v27 = vld [vmem:[%s12625_s12 + $0x60] sm:$0xff] }
 0x78e   : > { %6836 = vmatpush.bf16.msra.mxu0 %v8047_v27  ;;  %v13201_v27 = vld [vmem:[#allocation176_spill] sm:$0xff] }
 0x78f   : > { %v5708_v24 = vadd.f32 %v5707_v36, %v5706_v21  ;;  %v5729_v21 = vsel %vm2310_vm2, %v4793_v22, 0.0  ;;  %v4795_v36 = vmax.f32 %v4156_v7, 0.0  ;;  %v5747_v22 = vsel %vm2310_vm2, %v4802_v62, 0.0  ;;  %v13186_v7 = vld [vmem:[#allocation131_spill] sm:$0xff] }
 0x791   : > { %v5710_v51 = vadd.f32 %v5709_v46, %v5708_v24  ;;  %v5731_v46 = vsel %vm2310_vm2, %v4794_v44, 0.0 }
 0x793   : > { %v5712_v34 = vadd.f32 %v5711_v57, %v5710_v51  ;;  %v5733_v57 = vsel %vm2310_vm2, %v4795_v36, 0.0 }
 0x795   : > { %v5714_v10 = vadd.f32 %v5713_v60, %v5712_v34  ;;  %v5735_v60 = vsel %vm2310_vm2, %v4796_v5, 0.0 }
 0x797   : > { %v5716_v33 = vadd.f32 %v5715_v45, %v5714_v10  ;;  %v5737_v45 = vsel %vm2310_vm2, %v4797_v14, 0.0 }
 0x799   : > { %v5718_v8 = vadd.f32 %v5717_v19, %v5716_v33  ;;  %v5739_v19 = vsel %vm2310_vm2, %v4798_v32, 0.0 }
 0x79b   : > { %v5720_v42 = vadd.f32 %v5719_v43, %v5718_v8  ;;  %v11943_v8 = vpop.f32.mrf.mxu3 }
 0x79d   : > { %v5722_v25 = vadd.f32 %v5721_v40, %v5720_v42  ;;  %v4176_v42 = vadd.f32 %v11868_v11, %v13183_v26  ;;  %v8055_v26 = vld [vmem:[%s12625_s12 + $0xa0] sm:$0xff] }
 0x79e   : > { %6849 = vmatpush.bf16.msra.mxu1 %v8055_v26  ;;  %v4221_v26 = vadd.f32 %v11868_v11, %v13201_v27 }
 0x79f   : > { %v5724_v0 = vadd.f32 %v5723_v2, %v5722_v25  ;;  %v4179_v25 = vadd.f32 %v11868_v11, %v13184_v59  ;;  %v4803_v12 = vmax.f32 %v4176_v42, 0.0  ;;  %v8027_v59 = vld [vmem:[%s12936_s8] sm:$0xff] }
 0x7a1   : > { %v5726_v37 = vadd.f32 %v5725_v9, %v5724_v0  ;;  %v4181_v0 = vadd.f32 %v11868_v11, %v13185_v52  ;;  %v4804_v17 = vmax.f32 %v4179_v25, 0.0  ;;  %v5749_v44 = vsel %vm2310_vm2, %v4803_v12, 0.0  ;;  %v13194_v12 = vld [vmem:[#allocation155_spill] sm:$0xff] }
 0x7a2   : > { %v4204_v52 = vadd.f32 %v11868_v11, %v13194_v12  ;;  %v4821_v12 = vmax.f32 %v4221_v26, 0.0  ;;  %v13211_v26 = vld [vmem:[#allocation205_spill] sm:$0xff] }
 0x7a3   : > { %v5728_v41 = vadd.f32 %v5727_v29, %v5726_v37  ;;  %v4184_v37 = vadd.f32 %v11868_v11, %v13186_v7  ;;  %v4805_v13 = vmax.f32 %v4181_v0, 0.0  ;;  %v5751_v56 = vsel %vm2310_vm2, %v4804_v17, 0.0 }
 0x7a5   : > { %v5730_v24 = vadd.f32 %v5729_v21, %v5728_v41  ;;  %v4186_v41 = vadd.f32 %v11868_v11, %v13187_v6  ;;  %v11960_v21 = vpop.f32.mrf.mxu3  ;;  %v4806_v15 = vmax.f32 %v4184_v37, 0.0  ;;  %v5753_v23 = vsel %vm2310_vm2, %v4805_v13, 0.0  ;;  %v13195_v37 = vld [vmem:[#allocation158_spill] sm:$0xff] }
 0x7a6   : > { %v4814_v6 = vmax.f32 %v4204_v52, 0.0  ;;  %v13203_v52 = vld [vmem:[#allocation182_spill] sm:$0xff] }
 0x7a7   : > { %v5732_v51 = vadd.f32 %v5731_v46, %v5730_v24  ;;  %v13188_v24 = vld [vmem:[#allocation137_spill] sm:$0xff]  ;;  %v4807_v50 = vmax.f32 %v4186_v41, 0.0  ;;  %v5755_v20 = vsel %vm2310_vm2, %v4806_v15, 0.0 }
 0x7a8   : > { %v4189_v46 = vadd.f32 %v11868_v11, %v13188_v24  ;;  %v13196_v41 = vld [vmem:[#allocation161_spill] sm:$0xff] }
 0x7a9   : > { %v5734_v34 = vadd.f32 %v5733_v57, %v5732_v51  ;;  %v13189_v51 = vld [vmem:[#allocation140_spill] sm:$0xff]  ;;  %v5757_v54 = vsel %vm2310_vm2, %v4807_v50, 0.0 }
 0x7aa   : > { %v4191_v57 = vadd.f32 %v11868_v11, %v13189_v51  ;;  %v4808_v38 = vmax.f32 %v4189_v46, 0.0  ;;  %v8045_v15 = vld [vmem:[%s12625_s12 + $0x50] sm:$0xff] }
 0x7ab   : > { %v5736_v10 = vadd.f32 %v5735_v60, %v5734_v34  ;;  %v13190_v34 = vld [vmem:[#allocation143_spill] sm:$0xff]  ;;  %v8053_v24 = vld [vmem:[%s12625_s12 + $0x90] sm:$0xff] }
 0x7ac   : > { %v4194_v60 = vadd.f32 %v11868_v11, %v13190_v34  ;;  %v4809_v3 = vmax.f32 %v4191_v57, 0.0 }
 0x7ad   : > { %v5738_v33 = vadd.f32 %v5737_v45, %v5736_v10  ;;  %v13191_v10 = vld [vmem:[#allocation146_spill] sm:$0xff] }
 0x7ae   : > { %v4196_v45 = vadd.f32 %v11868_v11, %v13191_v10  ;;  %v4810_v48 = vmax.f32 %v4194_v60, 0.0  ;;  %v5761_v42 = vsel %vm2310_vm2, %v4809_v3, 0.0 }
 0x7af   : > { %v5740_v43 = vadd.f32 %v5739_v19, %v5738_v33  ;;  %v8028_v33 = vld [vmem:[%s12936_s8 + $0x8] sm:$0xff]  ;;  %v5759_v19 = vsel %vm2310_vm2, %v4808_v38, 0.0  ;;  %s12311_s8 = scalar_lea.vmem %s13237_s27, %s8157_s23  ;;  %s8225_s27 = scalar_lea.hbm %s12634_s21, 2 }
 0x7b0   : > { %5952 = vmatpush.bf16.msrb.mxu3 %v8028_v33  ;;  %v13198_v38 = vld [vmem:[#allocation167_spill] sm:$0xff] }
 0x7b1   : > { %v5742_v40 = vadd.f32 %v5741_v55, %v5740_v43  ;;  %v11986_v43 = vpop.f32.mrf.mxu3  ;;  %v4214_v34 = vadd.f32 %v11868_v11, %v13198_v38 }
 0x7b3   : > { %v5744_v2 = vadd.f32 %v5743_v31, %v5742_v40  ;;  %v4811_v40 = vmax.f32 %v4196_v45, 0.0  ;;  %v13193_v31 = vld [vmem:[#allocation152_spill] sm:$0xff]  ;;  %v13199_v45 = vld [vmem:[#allocation170_spill] sm:$0xff]  ;;  %v4818_v33 = vmax.f32 %v4214_v34, 0.0 }
 0x7b4   : > { %v4201_v62 = vadd.f32 %v11868_v11, %v13193_v31  ;;  %5953 = vmatpush.bf16.msrb.mxu3 %v8027_v59 }
 0x7b5   : > { %v5746_v9 = vadd.f32 %v5745_v61, %v5744_v2  ;;  %v5763_v2 = vsel %vm2310_vm2, %v4810_v48, 0.0  ;;  %v4812_v61 = vmax.f32 %v4199_v28, 0.0  ;;  %v5765_v17 = vsel %vm2310_vm2, %v4811_v40, 0.0 }
 0x7b6   : > { %v4813_v7 = vmax.f32 %v4201_v62, 0.0  ;;  %v5779_v40 = vsel %vm2310_vm2, %v4818_v33, 0.0  ;;  %v13202_v62 = vld [vmem:[#allocation179_spill] sm:$0xff] }
 0x7b7   : > { %v5748_v29 = vadd.f32 %v5747_v22, %v5746_v9  ;;  %v8046_v9 = vld [vmem:[%s12625_s12 + $0x58] sm:$0xff]  ;;  %v5767_v13 = vsel %vm2310_vm2, %v4812_v61, 0.0  ;;  %v4224_v59 = vadd.f32 %v11868_v11, %v13202_v62 }
 0x7b8   : > { %v8054_v22 = vld [vmem:[%s12625_s12 + $0x98] sm:$0xff]  ;;  %6837 = vmatpush.bf16.msra.mxu0 %v8046_v9  ;;  %v5769_v46 = vsel %vm2310_vm2, %v4813_v7, 0.0 }
 0x7b9   : > { %v5750_v36 = vadd.f32 %v5749_v44, %v5748_v29  ;;  %v4206_v29 = vadd.f32 %v11868_v11, %v13195_v37  ;;  %6850 = vmatpush.bf16.msra.mxu1 %v8054_v22  ;;  %v12024_v51 = vpop.f32.mrf.mxu3  ;;  %v13204_v7 = vld [vmem:[#allocation185_spill] sm:$0xff] }
 0x7ba   : > { %v4229_v37 = vadd.f32 %v11868_v11, %v13204_v7 }
 0x7bb   : > { %v5752_v5 = vadd.f32 %v5751_v56, %v5750_v36  ;;  %v4209_v36 = vadd.f32 %v11868_v11, %v13196_v41 }
 0x7bc   : > { %6838 = vmatpush.bf16.msra.mxu0 %v8045_v15  ;;  %v4824_v15 = vmax.f32 %v4229_v37, 0.0 }
 0x7bd   : > { %v5754_v14 = vadd.f32 %v5753_v23, %v5752_v5  ;;  %v4815_v5 = vmax.f32 %v4206_v29, 0.0  ;;  %v13197_v23 = vld [vmem:[#allocation164_spill] sm:$0xff]  ;;  %6851 = vmatpush.bf16.msra.mxu1 %v8053_v24  ;;  %v13206_v24 = vld [vmem:[#allocation191_spill] sm:$0xff] }
 0x7be   : > { %v4211_v50 = vadd.f32 %v11868_v11, %v13197_v23  ;;  %v5791_v34 = vsel %vm2310_vm2, %v4824_v15, 0.0 }
 0x7bf   : > { %v5756_v32 = vadd.f32 %v5755_v20, %v5754_v14  ;;  %v5771_v14 = vsel %vm2310_vm2, %v4814_v6, 0.0  ;;  %v4816_v20 = vmax.f32 %v4209_v36, 0.0  ;;  %v5773_v3 = vsel %vm2310_vm2, %v4815_v5, 0.0  ;;  %v13205_v6 = vld [vmem:[#allocation188_spill] sm:$0xff] }
 0x7c0   : > { %v4817_v10 = vmax.f32 %v4211_v50, 0.0  ;;  %v4231_v41 = vadd.f32 %v11868_v11, %v13205_v6 }
 0x7c1   : > { %v5758_v58 = vadd.f32 %v5757_v54, %v5756_v32  ;;  %v8044_v32 = vld [vmem:[%s12625_s12 + $0x48] sm:$0xff]  ;;  %v5775_v47 = vsel %vm2310_vm2, %v4816_v20, 0.0 }
 0x7c2   : > { %v8052_v54 = vld [vmem:[%s12625_s12 + $0x88] sm:$0xff]  ;;  %6839 = vmatpush.bf16.msra.mxu0 %v8044_v32  ;;  %v5777_v28 = vsel %vm2310_vm2, %v4817_v10, 0.0  ;;  %v4825_v50 = vmax.f32 %v4231_v41, 0.0  ;;  %v13208_v32 = vld [vmem:[#allocation197_spill] sm:$0xff] }
 0x7c3   : > { %v5760_v55 = vadd.f32 %v5759_v19, %v5758_v58  ;;  %v4216_v58 = vadd.f32 %v11868_v11, %v13199_v45  ;;  %v13200_v19 = vld [vmem:[#allocation173_spill] sm:$0xff]  ;;  %6852 = vmatpush.bf16.msra.mxu1 %v8052_v54  ;;  %v4239_v54 = vadd.f32 %v11868_v11, %v13208_v32 }
 0x7c4   : > { %v4219_v48 = vadd.f32 %v11868_v11, %v13200_v19  ;;  %v5793_v10 = vsel %vm2310_vm2, %v4825_v50, 0.0 }
 0x7c5   : > { %v5762_v25 = vadd.f32 %v5761_v42, %v5760_v55  ;;  %v4819_v55 = vmax.f32 %v4216_v58, 0.0  ;;  %v13209_v58 = vld [vmem:[#allocation200_spill] sm:$0xff]  ;;  %v4828_v19 = vmax.f32 %v4239_v54, 0.0 }
 0x7c6   : > { %v4820_v31 = vmax.f32 %v4219_v48, 0.0  ;;  %v13210_v48 = vld [vmem:[#allocation203_spill] sm:$0xff] }
 0x7c7   : > { %v5764_v0 = vadd.f32 %v5763_v2, %v5762_v25  ;;  %v12047_v25 = vpop.f32.mrf.mxu3  ;;  %v5781_v61 = vsel %vm2310_vm2, %v4819_v55, 0.0 }
 0x7c8   : > { %v5783_v22 = vsel %vm2310_vm2, %v4820_v31, 0.0  ;;  %v5799_v31 = vsel %vm2310_vm2, %v4828_v19, 0.0 }
 0x7c9   : > { %v5766_v44 = vadd.f32 %v5765_v17, %v5764_v0  ;;  %v4226_v0 = vadd.f32 %v11868_v11, %v13203_v52  ;;  %v4822_v17 = vmax.f32 %v4224_v59, 0.0  ;;  %v13212_v59 = vld [vmem:[#allocation208_spill] sm:$0xff] }
 0x7cb   : > { %v5768_v56 = vadd.f32 %v5767_v13, %v5766_v44  ;;  %v5785_v44 = vsel %vm2310_vm2, %v4821_v12, 0.0  ;;  %v4823_v13 = vmax.f32 %v4226_v0, 0.0 }
 0x7cd   : > { %v5770_v57 = vadd.f32 %v5769_v46, %v5768_v56  ;;  %v5787_v56 = vsel %vm2310_vm2, %v4822_v17, 0.0  ;;  %v4234_v46 = vadd.f32 %v11868_v11, %v13206_v24  ;;  %v5789_v23 = vsel %vm2310_vm2, %v4823_v13, 0.0 }
 0x7cf   : > { %v5772_v60 = vadd.f32 %v5771_v14, %v5770_v57  ;;  %v13207_v57 = vld [vmem:[#allocation194_spill] sm:$0xff]  ;;  %v12064_v20 = vpop.f32.mrf.mxu3 }
 0x7d0   : > { %v4236_v14 = vadd.f32 %v11868_v11, %v13207_v57 }
 0x7d1   : > { %v5774_v39 = vadd.f32 %v5773_v3, %v5772_v60  ;;  %v4826_v60 = vmax.f32 %v4234_v46, 0.0 }
 0x7d2   : > { %v4827_v45 = vmax.f32 %v4236_v14, 0.0 }
 0x7d3   : > { %v5776_v35 = vadd.f32 %v5775_v47, %v5774_v39  ;;  %v4241_v39 = vadd.f32 %v11868_v11, %v13209_v58  ;;  %v5795_v33 = vsel %vm2310_vm2, %v4826_v60, 0.0 }
 0x7d4   : > { %v5797_v55 = vsel %vm2310_vm2, %v4827_v45, 0.0 }
 0x7d5   : > { %v5778_v42 = vadd.f32 %v5777_v28, %v5776_v35  ;;  %v4244_v35 = vadd.f32 %v11868_v11, %v13210_v48  ;;  %v4829_v27 = vmax.f32 %v4241_v39, 0.0 }
 0x7d7   : > { %v5780_v2 = vadd.f32 %v5779_v40, %v5778_v42  ;;  %v4246_v42 = vadd.f32 %v11868_v11, %v13211_v26  ;;  %v4830_v62 = vmax.f32 %v4244_v35, 0.0  ;;  %v5801_v52 = vsel %vm2310_vm2, %v4829_v27, 0.0 }
 0x7d9   : > { %v5782_v9 = vadd.f32 %v5781_v61, %v5780_v2  ;;  %v4249_v2 = vadd.f32 %v11868_v11, %v13212_v59  ;;  %v12081_v61 = vpop.f32.mrf.mxu3  ;;  %v4831_v0 = vmax.f32 %v4246_v42, 0.0  ;;  %v5803_v7 = vsel %vm2310_vm2, %v4830_v62, 0.0 }
 0x7db   : > { %v5784_v29 = vadd.f32 %v5783_v22, %v5782_v9  ;;  %v13213_v9 = vld [vmem:[#allocation211_spill] sm:$0xff]  ;;  %v4832_v37 = vmax.f32 %v4249_v2, 0.0  ;;  %v5805_v6 = vsel %vm2310_vm2, %v4831_v0, 0.0 }
 0x7dc   : > { %v4251_v22 = vadd.f32 %v11868_v11, %v13213_v9 }
 0x7dd   : > { %v5786_v36 = vadd.f32 %v5785_v44, %v5784_v29  ;;  %v13214_v29 = vld [vmem:[#allocation215_spill] sm:$0xff]  ;;  %v5807_v24 = vsel %vm2310_vm2, %v4832_v37, 0.0  ;;  %v13223_v37 = vld [vmem:[#allocation244_spill] sm:$0xff] }
 0x7de   : > { %v4254_v44 = vadd.f32 %v11868_v11, %v13214_v29  ;;  %v4833_v41 = vmax.f32 %v4251_v22, 0.0  ;;  %v4276_v29 = vadd.f32 %v11868_v11, %v13223_v37  ;;  %v13232_v37 = vld [vmem:[#allocation267_spill] sm:$0xff] }
 0x7df   : > { %v5788_v5 = vadd.f32 %v5787_v56, %v5786_v36  ;;  %v13215_v36 = vld [vmem:[#allocation218_spill] sm:$0xff] }
 0x7e0   : > { %v4256_v56 = vadd.f32 %v11868_v11, %v13215_v36  ;;  %v4834_v46 = vmax.f32 %v4254_v44, 0.0  ;;  %v5809_v57 = vsel %vm2310_vm2, %v4833_v41, 0.0  ;;  %v13224_v41 = vld [vmem:[#allocation246_spill] sm:$0xff] }
 0x7e1   : > { %v5790_v38 = vadd.f32 %v5789_v23, %v5788_v5  ;;  %v13216_v5 = vld [vmem:[#allocation221_spill] sm:$0xff]  ;;  %v12098_v60 = vpop.f32.mrf.mxu3  ;;  %v4279_v36 = vadd.f32 %v11868_v11, %v13224_v41 }
 0x7e2   : > { %v4259_v23 = vadd.f32 %v11868_v11, %v13216_v5  ;;  %v4835_v14 = vmax.f32 %v4256_v56, 0.0  ;;  %v5811_v54 = vsel %vm2310_vm2, %v4834_v46, 0.0  ;;  %v13225_v46 = vld [vmem:[#allocation248_spill] sm:$0xff] }
 0x7e3   : > { %v5792_v3 = vadd.f32 %v5791_v34, %v5790_v38  ;;  %v13217_v38 = vld [vmem:[#allocation224_spill] sm:$0xff]  ;;  %v4281_v5 = vadd.f32 %v11868_v11, %v13225_v46 }
 0x7e4   : > { %v4261_v34 = vadd.f32 %v11868_v11, %v13217_v38  ;;  %v5813_v39 = vsel %vm2310_vm2, %v4835_v14, 0.0  ;;  %v13226_v14 = vld [vmem:[#allocation252_spill] sm:$0xff] }
 0x7e5   : > { %v5794_v47 = vadd.f32 %v5793_v10, %v5792_v3  ;;  %v4836_v3 = vmax.f32 %v4259_v23, 0.0  ;;  %v13218_v10 = vld [vmem:[#allocation228_spill] sm:$0xff]  ;;  %v4284_v38 = vadd.f32 %v11868_v11, %v13226_v14 }
 0x7e6   : > { %v4264_v45 = vadd.f32 %v11868_v11, %v13218_v10 }
 0x7e7   : > { %v5796_v28 = vadd.f32 %v5795_v33, %v5794_v47  ;;  %v4837_v47 = vmax.f32 %v4261_v34, 0.0  ;;  %v13219_v33 = vld [vmem:[#allocation231_spill] sm:$0xff]  ;;  %v5815_v35 = vsel %vm2310_vm2, %v4836_v3, 0.0 }
 0x7e8   : > { %v4266_v19 = vadd.f32 %v11868_v11, %v13219_v33  ;;  %v13227_v3 = vld [vmem:[#allocation255_spill] sm:$0xff]  ;;  %v13228_v33 = vld [vmem:[#allocation258_spill] sm:$0xff] }
 0x7e9   : > { %v5798_v40 = vadd.f32 %v5797_v55, %v5796_v28  ;;  %v4838_v28 = vmax.f32 %v4264_v45, 0.0  ;;  %v13220_v55 = vld [vmem:[#allocation234_spill] sm:$0xff]  ;;  %v5817_v42 = vsel %vm2310_vm2, %v4837_v47, 0.0  ;;  %v12115_v9 = vpop.f32.mrf.mxu3  ;;  %v4286_v10 = vadd.f32 %v11868_v11, %v13227_v3 }
 0x7ea   : > { %v4269_v27 = vadd.f32 %v11868_v11, %v13220_v55  ;;  %v4846_v47 = vmax.f32 %v4284_v38, 0.0  ;;  %v13229_v55 = vld [vmem:[#allocation261_spill] sm:$0xff]  ;;  %v13235_v38 = vld [vmem:[#allocation276_spill] sm:$0xff] }
 0x7eb   : > { %v5800_v12 = vadd.f32 %v5799_v31, %v5798_v40  ;;  %v4839_v40 = vmax.f32 %v4266_v19, 0.0  ;;  %v13221_v31 = vld [vmem:[#allocation237_spill] sm:$0xff]  ;;  %v5819_v2 = vsel %vm2310_vm2, %v4838_v28, 0.0  ;;  %v4289_v19 = vadd.f32 %v11868_v11, %v13228_v33 }
 0x7ec   : > { %v4271_v62 = vadd.f32 %v11868_v11, %v13221_v31  ;;  %v4847_v28 = vmax.f32 %v4286_v10, 0.0  ;;  %v13230_v31 = vld [vmem:[#allocation263_spill] sm:$0xff]  ;;  %v4309_v10 = vadd.f32 %v11868_v11, %v11802_v49  ;;  %v4311_v33 = vadd.f32 %v11868_v11, %v11819_v4 }
 0x7ed   : > { %v5802_v17 = vadd.f32 %v5801_v52, %v5800_v12  ;;  %v4840_v12 = vmax.f32 %v4269_v27, 0.0  ;;  %v13222_v52 = vld [vmem:[#allocation241_spill] sm:$0xff]  ;;  %v4291_v27 = vadd.f32 %v11868_v11, %v13229_v55  ;;  %v4314_v55 = vadd.f32 %v11868_v11, %v11836_v1 }
 0x7ee   : > { %v4274_v0 = vadd.f32 %v11868_v11, %v13222_v52  ;;  %v13231_v52 = vld [vmem:[#allocation265_spill] sm:$0xff]  ;;  %v4857_v49 = vmax.f32 %v4311_v33, 0.0  ;;  %v4321_v1 = vadd.f32 %v11868_v11, %v11892_v30  ;;  %v4329_v30 = vadd.f32 %v11868_v11, %v11943_v8 }
 0x7ef   : > { %v5804_v13 = vadd.f32 %v5803_v7, %v5802_v17  ;;  %v5821_v17 = vsel %vm2310_vm2, %v4839_v40, 0.0  ;;  %v4841_v7 = vmax.f32 %v4271_v62, 0.0  ;;  %v4848_v40 = vmax.f32 %v4289_v19, 0.0 }
 0x7f0   : > { %v4294_v62 = vadd.f32 %v11868_v11, %v13230_v31  ;;  %v4858_v4 = vmax.f32 %v4314_v55, 0.0  ;;  %v4336_v8 = vadd.f32 %v11868_v11, %v12024_v51  ;;  %v4344_v51 = vadd.f32 %v11868_v11, %v12081_v61 }
 0x7f1   : > { %v5806_v15 = vadd.f32 %v5805_v6, %v5804_v13  ;;  %v5823_v13 = vsel %vm2310_vm2, %v4840_v12, 0.0  ;;  %v4842_v6 = vmax.f32 %v4274_v0, 0.0  ;;  %v12132_v45 = vpop.f32.mrf.mxu3  ;;  %v4849_v12 = vmax.f32 %v4291_v27, 0.0 }
 0x7f2   : > { %v4296_v0 = vadd.f32 %v11868_v11, %v13231_v52  ;;  %v4351_v61 = vadd.f32 %v11868_v11, %v12132_v45  ;;  %v8051_v45 = vld [vmem:[%s12625_s12 + $0x80] sm:$0xff] }
 0x7f3   : > { %v5808_v50 = vadd.f32 %v5807_v24, %v5806_v15  ;;  %v5825_v15 = vsel %vm2310_vm2, %v4841_v7, 0.0  ;;  %v4843_v24 = vmax.f32 %v4276_v29, 0.0  ;;  %v4850_v7 = vmax.f32 %v4294_v62, 0.0  ;;  %6853 = vmatpush.bf16.msra.mxu1 %v8051_v45 }
 0x7f4   : > { %v4299_v29 = vadd.f32 %v11868_v11, %v13232_v37  ;;  %v4851_v41 = vmax.f32 %v4296_v0, 0.0  ;;  %v4319_v62 = vadd.f32 %v11868_v11, %v11875_v63  ;;  %v5859_v0 = vsel %vm2310_vm2, %v4858_v4, 0.0 }
 0x7f5   : > { %v5810_v32 = vadd.f32 %v5809_v57, %v5808_v50  ;;  %v5827_v50 = vsel %vm2310_vm2, %v4842_v6, 0.0  ;;  %v4844_v57 = vmax.f32 %v4279_v36, 0.0  ;;  %v5841_v6 = vsel %vm2310_vm2, %v4849_v12, 0.0  ;;  %v13233_v36 = vld [vmem:[#allocation270_spill] sm:$0xff] }
 0x7f6   : > { %v4852_v46 = vmax.f32 %v4299_v29, 0.0  ;;  %v4861_v29 = vmax.f32 %v4321_v1, 0.0  ;;  %v4326_v63 = vadd.f32 %v11868_v11, %v11926_v53  ;;  %v4334_v53 = vadd.f32 %v11868_v11, %v11986_v43 }
 0x7f7   : > { %v5812_v58 = vadd.f32 %v5811_v54, %v5810_v32  ;;  %v5829_v32 = vsel %vm2310_vm2, %v4843_v24, 0.0  ;;  %v4845_v54 = vmax.f32 %v4281_v5, 0.0  ;;  %v5843_v24 = vsel %vm2310_vm2, %v4850_v7, 0.0  ;;  %v13234_v5 = vld [vmem:[#allocation273_spill] sm:$0xff] }
 0x7f8   : > { %v4341_v43 = vadd.f32 %v11868_v11, %v12064_v20  ;;  %v4349_v20 = vadd.f32 %v11868_v11, %v12115_v9 }
 0x7f9   : > { %v5814_v48 = vadd.f32 %v5813_v39, %v5812_v58  ;;  %v5831_v39 = vsel %vm2310_vm2, %v4844_v57, 0.0  ;;  %v5845_v57 = vsel %vm2310_vm2, %v4851_v41, 0.0 }
 0x7fb   : > { %v5816_v26 = vadd.f32 %v5815_v35, %v5814_v48  ;;  %v5833_v35 = vsel %vm2310_vm2, %v4845_v54, 0.0  ;;  %v5847_v54 = vsel %vm2310_vm2, %v4852_v46, 0.0 }
 0x7fd   : > { %v5818_v59 = vadd.f32 %v5817_v42, %v5816_v26  ;;  %v5835_v42 = vsel %vm2310_vm2, %v4846_v47, 0.0 }
 0x7ff   : > { %v5820_v22 = vadd.f32 %v5819_v2, %v5818_v59  ;;  %v5837_v2 = vsel %vm2310_vm2, %v4847_v28, 0.0  ;;  %v4856_v28 = vmax.f32 %v4309_v10, 0.0  ;;  %v4867_v10 = vmax.f32 %v4336_v8, 0.0  ;;  %v8031_v8 = vld [vmem:[%s13236_s10] sm:$0xff] }
 0x801   : > { %v5822_v44 = vadd.f32 %v5821_v17, %v5820_v22  ;;  %v5839_v17 = vsel %vm2310_vm2, %v4848_v40, 0.0  ;;  %v5855_v31 = vsel %vm2310_vm2, %v4856_v28, 0.0 }
 0x803   : > { %v5824_v56 = vadd.f32 %v5823_v13, %v5822_v44  ;;  %v12149_v44 = vpop.f32.mrf.mxu3 }
 0x805   : > { %v5826_v23 = vadd.f32 %v5825_v15, %v5824_v56  ;;  %v4301_v56 = vadd.f32 %v11868_v11, %v13233_v36 }
 0x807   : > { %v5828_v34 = vadd.f32 %v5827_v50, %v5826_v23  ;;  %v4304_v23 = vadd.f32 %v11868_v11, %v13234_v5  ;;  %v4853_v14 = vmax.f32 %v4301_v56, 0.0  ;;  %v5865_v56 = vsel %vm2310_vm2, %v4861_v29, 0.0 }
 0x808   : > { %v4864_v5 = vmax.f32 %v4329_v30, 0.0 }
 0x809   : > { %v5830_v58 = vadd.f32 %v5829_v32, %v5828_v34  ;;  %v4306_v34 = vadd.f32 %v11868_v11, %v13235_v38  ;;  %v4854_v3 = vmax.f32 %v4304_v23, 0.0 }
 0x80b   : > { %v5832_v48 = vadd.f32 %v5831_v39, %v5830_v58  ;;  %v5849_v39 = vsel %vm2310_vm2, %v4853_v14, 0.0  ;;  %v4855_v47 = vmax.f32 %v4306_v34, 0.0  ;;  %v12166_v19 = vpop.f32.mrf.mxu3  ;;  %v5871_v34 = vsel %vm2310_vm2, %v4864_v5, 0.0 }
 0x80c   : > { %v4356_v9 = vadd.f32 %v11868_v11, %v12166_v19 }
 0x80d   : > { %v5834_v26 = vadd.f32 %v5833_v35, %v5832_v48  ;;  %v5851_v35 = vsel %vm2310_vm2, %v4854_v3, 0.0 }
 0x80f   : > { %v5836_v59 = vadd.f32 %v5835_v42, %v5834_v26  ;;  %v5853_v26 = vsel %vm2310_vm2, %v4855_v47, 0.0  ;;  %v4316_v42 = vadd.f32 %v11868_v11, %v11853_v18  ;;  %v4324_v18 = vadd.f32 %v11868_v11, %v11909_v16 }
 0x810   : > { %v4331_v16 = vadd.f32 %v11868_v11, %v11960_v21  ;;  %v4339_v21 = vadd.f32 %v11868_v11, %v12047_v25  ;;  %v4346_v25 = vadd.f32 %v11868_v11, %v12098_v60  ;;  %v4354_v60 = vadd.f32 %v11868_v11, %v12149_v44  ;;  %v8034_v44 = vld [vmem:[%s13236_s10 + $0x18] sm:$0xff] }
 0x811   : > { %v5838_v22 = vadd.f32 %v5837_v2, %v5836_v59  ;;  %v5857_v2 = vsel %vm2310_vm2, %v4857_v49, 0.0  ;;  %v4859_v12 = vmax.f32 %v4316_v42, 0.0  ;;  %v4862_v41 = vmax.f32 %v4324_v18, 0.0  ;;  %6001 = vmatpush.bf16.msra.mxu3 %v8034_v44 }
 0x812   : > { %v4868_v47 = vmax.f32 %v4339_v21, 0.0 }
 0x813   : > { %v5840_v13 = vadd.f32 %v5839_v17, %v5838_v22  ;;  %v4860_v22 = vmax.f32 %v4319_v62, 0.0  ;;  %v4358_v17 = vpop.f32.mrf.mxu3  ;;  %v5861_v37 = vsel %vm2310_vm2, %v4859_v12, 0.0  ;;  %v5867_v46 = vsel %vm2310_vm2, %v4862_v41, 0.0 }
 0x814   : > { %v5879_v55 = vsel %vm2310_vm2, %v4868_v47, 0.0  ;;  %v4872_v62 = vmax.f32 %v4349_v20, 0.0  ;;  %v4873_v12 = vmax.f32 %v4351_v61, 0.0  ;;  %v4359_v18 = vadd.f32 %v11868_v11, %v4358_v17  ;;  %v8082_v20 = vld [vmem:[%s12625_s12 + $0x178] sm:$0xff]  ;;  %v8071_v61 = vld [vmem:[%s12625_s12 + $0x120] sm:$0xff] }
 0x815   : > { %v5842_v15 = vadd.f32 %v5841_v6, %v5840_v13  ;;  %v5863_v6 = vsel %vm2310_vm2, %v4860_v22, 0.0  ;;  %v4874_v22 = vmax.f32 %v4354_v60, 0.0  ;;  %6885 = vmatpush.bf16.msrb.mxu1 %v8082_v20  ;;  %v8069_v60 = vld [vmem:[%s12625_s12 + $0x110] sm:$0xff]  ;;  %v8088_v20 = vld [vmem:[%s12625_s12 + $0x1a8] sm:$0xff] }
 0x816   : > { %v5889_v19 = vsel %vm2310_vm2, %v4873_v12, 0.0  ;;  %v4876_v30 = vmax.f32 %v4359_v18, 0.0  ;;  %v12323_v12 = vld [vmem:[%s12311_s8] sm:$0xff]  ;;  %v8066_v18 = vld [vmem:[%s12625_s12 + $0xf8] sm:$0xff] }
 0x817   : > { %v5844_v50 = vadd.f32 %v5843_v24, %v5842_v15  ;;  %v4863_v15 = vmax.f32 %v4326_v63, 0.0  ;;  %v8033_v63 = vld [vmem:[%s13236_s10 + $0x10] sm:$0xff]  ;;  %v5891_v41 = vsel %vm2310_vm2, %v4874_v22, 0.0  ;;  %v6016_v45 = vperm.slane %v12323_v12, 1 }
 0x818   : > { %6002 = vmatpush.bf16.msra.mxu3 %v8033_v63  ;;  %v5895_v5 = vsel %vm2310_vm2, %v4876_v30, 0.0  ;;  %v8075_v63 = vld [vmem:[%s12625_s12 + $0x140] sm:$0xff]  ;;  %v8065_v30 = vld [vmem:[%s12625_s12 + $0xf0] sm:$0xff] }
 0x819   : > { %v5846_v32 = vadd.f32 %v5845_v57, %v5844_v50  ;;  %v5869_v50 = vsel %vm2310_vm2, %v4863_v15, 0.0  ;;  %v4865_v57 = vmax.f32 %v4331_v16, 0.0 }
 0x81b   : > { %v5848_v58 = vadd.f32 %v5847_v54, %v5846_v32  ;;  %v4360_v14 = vpop.f32.mrf.mxu3  ;;  %v4866_v32 = vmax.f32 %v4334_v53, 0.0  ;;  %v5873_v3 = vsel %vm2310_vm2, %v4865_v57, 0.0 }
 0x81c   : > { %v4361_v29 = vadd.f32 %v11868_v11, %v4360_v14 }
 0x81d   : > { %v5850_v48 = vadd.f32 %v5849_v39, %v5848_v58  ;;  %v5875_v39 = vsel %vm2310_vm2, %v4866_v32, 0.0 }
 0x81e   : > { %v4877_v15 = vmax.f32 %v4361_v29, 0.0  ;;  %v8098_v29 = vld [vmem:[%s12625_s12 + $0x1f8] sm:$0xff] }
 0x81f   : > { %v5852_v27 = vadd.f32 %v5851_v35, %v5850_v48  ;;  %v5877_v48 = vsel %vm2310_vm2, %v4867_v10, 0.0  ;;  %v4869_v35 = vmax.f32 %v4341_v43, 0.0 }
 0x821   : > { %v5854_v40 = vadd.f32 %v5853_v26, %v5852_v27  ;;  %v4870_v27 = vmax.f32 %v4344_v51, 0.0  ;;  %v5881_v42 = vsel %vm2310_vm2, %v4869_v35, 0.0  ;;  %v8041_v51 = vld [vmem:[%s12625_s12 + $0x30] sm:$0xff]  ;;  %v8038_v35 = vld [vmem:[%s12625_s12 + $0x18] sm:$0xff] }
 0x823   : > { %v5856_v59 = vadd.f32 %v5855_v31, %v5854_v40  ;;  %v4363_v26 = vpop.f32.mrf.mxu3  ;;  %v4871_v40 = vmax.f32 %v4346_v25, 0.0  ;;  %v5883_v4 = vsel %vm2310_vm2, %v4870_v27, 0.0  ;;  %v8037_v25 = vld [vmem:[%s12625_s12 + $0x10] sm:$0xff]  ;;  %v8074_v27 = vld [vmem:[%s12625_s12 + $0x138] sm:$0xff] }
 0x824   : > { %v4364_v17 = vadd.f32 %v11868_v11, %v4363_v26  ;;  %v8073_v26 = vld [vmem:[%s12625_s12 + $0x130] sm:$0xff] }
 0x825   : > { %v5858_v52 = vadd.f32 %v5857_v2, %v5856_v59  ;;  %v5885_v2 = vsel %vm2310_vm2, %v4871_v40, 0.0  ;;  %v8080_v40 = vld [vmem:[%s12625_s12 + $0x168] sm:$0xff] }
 0x826   : > { %v4878_v53 = vmax.f32 %v4364_v17, 0.0  ;;  %v8097_v17 = vld [vmem:[%s12625_s12 + $0x1f0] sm:$0xff] }
 0x827   : > { %v5860_v7 = vadd.f32 %v5859_v0, %v5858_v52  ;;  %v8043_v52 = vld [vmem:[%s12625_s12 + $0x40] sm:$0xff]  ;;  %v5887_v0 = vsel %vm2310_vm2, %v4872_v62, 0.0  ;;  %v8078_v62 = vld [vmem:[%s12625_s12 + $0x158] sm:$0xff] }
 0x828   : > { %6840 = vmatpush.bf16.msra.mxu0 %v8043_v52  ;;  %v8076_v52 = vld [vmem:[%s12625_s12 + $0x148] sm:$0xff] }
 0x829   : > { %v5862_v13 = vadd.f32 %v5861_v37, %v5860_v7  ;;  %v4875_v37 = vmax.f32 %v4356_v9, 0.0 }
 0x82b   : > { %v5864_v36 = vadd.f32 %v5863_v6, %v5862_v13  ;;  %v4365_v13 = vpop.f32.mrf.mxu3 }
 0x82c   : > { %v4366_v16 = vadd.f32 %v11868_v11, %v4365_v13  ;;  %v5899_v11 = vsel %vm2310_vm2, %v4878_v53, 0.0  ;;  %6872 = vmatpush.bf16.msrb.mxu0 %v8074_v27  ;;  %v6019_v53 = vperm.slane %v12323_v12, 4  ;;  %v8129_v27 = vld [vmem:[%s12625_s12 + $0x2f0] sm:$0xff] }
 0x82d   : > { %v5866_v24 = vadd.f32 %v5865_v56, %v5864_v36  ;;  %v5893_v56 = vsel %vm2310_vm2, %v4875_v37, 0.0 }
 0x82e   : > { %v4879_v57 = vmax.f32 %v4366_v16, 0.0  ;;  %v8104_v16 = vld [vmem:[%s12625_s12 + $0x228] sm:$0xff] }
 0x82f   : > { %v5868_v23 = vadd.f32 %v5867_v46, %v5866_v24  ;;  %v8032_v24 = vld [vmem:[%s13236_s10 + $0x8] sm:$0xff]  ;;  %s8221_s10 = scalar_lea.hbm %s8220_s28, 1 }
 0x830   : > { %6003 = vmatpush.bf16.msra.mxu3 %v8032_v24  ;;  %6873 = vmatpush.bf16.msrb.mxu0 %v8073_v26  ;;  %v6015_v24 = vperm.slane %v12323_v12, 0  ;;  %v8120_v26 = vld [vmem:[%s12625_s12 + $0x2a8] sm:$0xff]  ;;  %p8222_p11 = scmp.ne.s32.totalorder %s8220_s28, %s8221_s10  ;;  %p8227_p1 = scmp.lt.s32.totalorder %s8225_s27, %s8221_s10 }
 0x831   : > { %v5870_v38 = vadd.f32 %v5869_v50, %v5868_v23  ;;  %v5897_v50 = vsel %vm2310_vm2, %v4877_v15, 0.0  ;;  %v8096_v15 = vld [vmem:[%s12625_s12 + $0x1e8] sm:$0xff] }
 0x832   : > { %p8223_p12 = pnand %p8222_p11, %p8417_p5  ;;  %p8228_p2 = por %p8227_p1, %p8226_p0 }
 0x833   : > { %v5872_v54 = vadd.f32 %v5871_v34, %v5870_v38  ;;  %v5901_v34 = vsel %vm2310_vm2, %v4879_v57, 0.0  ;;  %v6039_v57 = vpack.c.bf16 %v6015_v24, %v6015_v24  ;;  %v8108_v24 = vld [vmem:[%s12625_s12 + $0x248] sm:$0xff] }
 0x834   : > { %6004 = vmatpush.bf16.msra.mxu3 %v8031_v8  ;;  %v6043_v8 = vpack.c.bf16 %v6019_v53, %v6019_v53  ;;  %p8224_p13 = pneg %p8223_p12 }
 0x835   : > { %v5874_v58 = vadd.f32 %v5873_v3, %v5872_v54 }
 0x836   : > { %p8229_p3 = pnand %p8228_p2, %p8224_p13 }
 0x837   : > { %v5876_v33 = vadd.f32 %v5875_v39, %v5874_v58  ;;  %v8042_v39 = vld [vmem:[%s12625_s12 + $0x38] sm:$0xff] }
 0x839   : > { %v5878_v28 = vadd.f32 %v5877_v48, %v5876_v33  ;;  %v8040_v33 = vld [vmem:[%s12625_s12 + $0x28] sm:$0xff]  ;;  %v8039_v48 = vld [vmem:[%s12625_s12 + $0x20] sm:$0xff] }
 0x83b   : > { %v5880_v49 = vadd.f32 %v5879_v55, %v5878_v28  ;;  %v8036_v28 = vld [vmem:[%s12625_s12 + $0x8] sm:$0xff]  ;;  %v8035_v55 = vld [vmem:[%s12625_s12] sm:$0xff] }
 0x83d   : > { %v5882_v31 = vadd.f32 %v5881_v42, %v5880_v49  ;;  %v8081_v49 = vld [vmem:[%s12625_s12 + $0x170] sm:$0xff]  ;;  %v8072_v42 = vld [vmem:[%s12625_s12 + $0x128] sm:$0xff] }
 0x83e   : > { %6886 = vmatpush.bf16.msrb.mxu1 %v8081_v49  ;;  %6874 = vmatpush.bf16.msrb.mxu0 %v8072_v42  ;;  %v6022_v49 = vperm.slane %v12323_v12, 7  ;;  %v12442_v42 = vld [vmem:[%s12311_s8 + $0x8] sm:$0xf]  ;;  %s660_s8 = sand.u32 1, %s8259_s25  }
 0x83f   : > { %v5884_v59 = vadd.f32 %v5883_v4, %v5882_v31  ;;  %v8079_v31 = vld [vmem:[%s12625_s12 + $0x160] sm:$0xff]  ;;  %v8070_v4 = vld [vmem:[%s12625_s12 + $0x118] sm:$0xff]  ;;  %s661_s26 = scalar_lea.vmem [#allocation2], %s660_s8  ;;  %s7167_s4 = scalar_lea.sflag [#allocation3], %s660_s8 }
 0x840   : > { %s7177_s23 = sshll.u32 %s661_s26, 4  ;;  %s7178_s23 = int_to_ptr.vmem [resolvable:$true] %s7177_s23 }
 0x841   : > { %v5886_v1 = vadd.f32 %v5885_v2, %v5884_v59  ;;  %v8077_v59 = vld [vmem:[%s12625_s12 + $0x150] sm:$0xff]  ;;  %v5918_v2 = vld [vmem:[%s12622_s9] sm:$0x1] }
 0x842   : > { %6887 = vmatpush.bf16.msrb.mxu1 %v8080_v40  ;;  %6875 = vmatpush.bf16.msrb.mxu0 %v8071_v61  ;;  %v8128_v40 = vld [vmem:[%s12625_s12 + $0x2e8] sm:$0xff]  ;;  %v6023_v61 = vperm.slane %v12442_v42, 0 }
 0x843   : > { %v5888_v7 = vadd.f32 %v5887_v0, %v5886_v1  ;;  %v8068_v1 = vld [vmem:[%s12625_s12 + $0x108] sm:$0xff]  ;;  %v6040_v0 = vpack.c.bf16 %v6016_v45, %v6016_v45  ;;  %v8117_v45 = vld [vmem:[%s12625_s12 + $0x290] sm:$0xff] }
 0x845   : > { %v5890_v6 = vadd.f32 %v5889_v19, %v5888_v7  ;;  %6841 = vmatmul.bf16.vlgmr.msra.gmra.mxu0 %v6040_v0  ;;  %v8067_v7 = vld [vmem:[%s12625_s12 + $0x100] sm:$0xff]  ;;  %v6017_v19 = vperm.slane %v12323_v12, 2  ;;  %v8084_v0 = vld [vmem:[%s12625_s12 + $0x188] sm:$0xff] }
 0x846   : > { %6888 = vmatpush.bf16.msrb.mxu1 %v8079_v31  ;;  %6876 = vmatpush.bf16.msrb.mxu0 %v8070_v4  ;;  %v6046_v31 = vpack.c.bf16 %v6022_v49, %v6022_v49  ;;  %v8087_v4 = vld [vmem:[%s12625_s12 + $0x1a0] sm:$0xff] }
 0x847   : > { %v5892_v36 = vadd.f32 %v5891_v41, %v5890_v6  ;;  %v6041_v13 = vpack.c.bf16 %v6017_v19, %v6017_v19  ;;  %v8106_v6 = vld [vmem:[%s12625_s12 + $0x238] sm:$0xff]  ;;  %v8083_v19 = vld [vmem:[%s12625_s12 + $0x180] sm:$0xff] }
 0x849   : > { %v5894_v46 = vadd.f32 %v5893_v56, %v5892_v36  ;;  %6854 = vmatmul.bf16.vlgmr.msra.gmra.mxu1 %v6041_v13  ;;  %v8105_v36 = vld [vmem:[%s12625_s12 + $0x230] sm:$0xff]  ;;  %v8064_v56 = vld [vmem:[%s12625_s12 + $0xe8] sm:$0xff]  ;;  %v6025_v13 = vperm.slane %v12442_v42, 2 }
 0x84a   : > { %6889 = vmatpush.bf16.msrb.mxu1 %v8078_v62  ;;  %6877 = vmatpush.bf16.msrb.mxu0 %v8069_v60  ;;  %v6047_v62 = vpack.c.bf16 %v6023_v61, %v6023_v61  ;;  %v8119_v60 = vld [vmem:[%s12625_s12 + $0x2a0] sm:$0xff] }
 0x84b   : > { %v5896_v23 = vadd.f32 %v5895_v5, %v5894_v46  ;;  %v8063_v46 = vld [vmem:[%s12625_s12 + $0xe0] sm:$0xff] }
 0x84c   : > { %v8095_v5 = vld [vmem:[%s12625_s12 + $0x1e0] sm:$0xff] }
 0x84d   : > { %v5898_v14 = vadd.f32 %v5897_v50, %v5896_v23  ;;  %v6020_v23 = vperm.slane %v12323_v12, 5  ;;  %v8103_v50 = vld [vmem:[%s12625_s12 + $0x220] sm:$0xff] }
 0x84e   : > { %6890 = vmatpush.bf16.msrb.mxu1 %v8077_v59  ;;  %6878 = vmatpush.bf16.msrb.mxu0 %v8068_v1  ;;  %v8127_v59 = vld [vmem:[%s12625_s12 + $0x2e0] sm:$0xff]  ;;  %v8126_v1 = vld [vmem:[%s12625_s12 + $0x2d8] sm:$0xff] }
 0x84f   : > { %v5900_v38 = vadd.f32 %v5899_v11, %v5898_v14  ;;  %v8062_v14 = vld [vmem:[%s12625_s12 + $0xd8] sm:$0xff]  ;;  %v6044_v11 = vpack.c.bf16 %v6020_v23, %v6020_v23 }
 0x851   : > { %v5902_v32 = vadd.f32 %v5901_v34, %v5900_v38  ;;  %v8094_v38 = vld [vmem:[%s12625_s12 + $0x1d8] sm:$0xff] }
 0x852   : > { %6891 = vmatpush.bf16.msrb.mxu1 %v8076_v52  ;;  %6879 = vmatpush.bf16.msrb.mxu0 %v8067_v7  ;;  %v8102_v34 = vld [vmem:[%s12625_s12 + $0x218] sm:$0xff]  ;;  %v8085_v52 = vld [vmem:[%s12625_s12 + $0x190] sm:$0xff]  ;;  %v6021_v7 = vperm.slane %v12323_v12, 6 }
 0x853   : > { %v5903_v21 = vrot.slane %v5902_v32, 4 }
 0x855   : > { %v5904_v54 = vadd.f32 %v5903_v21, %v5902_v32  ;;  %6880 = vmatmul.bf16.vlgmr.msrb.gmra.mxu0 %v6043_v8  ;;  %v8061_v32 = vld [vmem:[%s12625_s12 + $0xd0] sm:$0xff] }
 0x856   : > { %6911 = vmatpush.bf16.msra.mxu0 %v8098_v29  ;;  %6892 = vmatpush.bf16.msrb.mxu1 %v8075_v63  ;;  %v8093_v21 = vld [vmem:[%s12625_s12 + $0x1d0] sm:$0xff]  ;;  %v8115_v29 = vld [vmem:[%s12625_s12 + $0x280] sm:$0xff] }
 0x857   : > { %v5905_v3 = vrot.slane %v5904_v54, 2  ;;  %v8123_v63 = vld [vmem:[%s12625_s12 + $0x2c0] sm:$0xff] }
 0x859   : > { %v5906_v10 = vadd.f32 %v5905_v3, %v5904_v54  ;;  %6893 = vmatmul.bf16.vlgmr.msrb.gmra.mxu1 %v6044_v11  ;;  %v8101_v54 = vld [vmem:[%s12625_s12 + $0x210] sm:$0xff]  ;;  %v8060_v3 = vld [vmem:[%s12625_s12 + $0xc8] sm:$0xff] }
 0x85a   : > { %6924 = vmatpush.bf16.msra.mxu1 %v8106_v6  ;;  %6912 = vmatpush.bf16.msra.mxu0 %v8097_v17  ;;  %v6026_v6 = vperm.slane %v12442_v42, 3 }
 0x85b   : > { %v5907_v43 = vrot.slane %v5906_v10, 1 }
 0x85c   : > { %v6050_v17 = vpack.c.bf16 %v6026_v6, %v6026_v6 }
 0x85d   : > { %v5908_v58 = vadd.f32 %v5907_v43, %v5906_v10  ;;  %v8092_v10 = vld [vmem:[%s12625_s12 + $0x1c8] sm:$0xff] }
 0x85e   : > { %6925 = vmatpush.bf16.msra.mxu1 %v8105_v36  ;;  %6913 = vmatpush.bf16.msra.mxu0 %v8096_v15  ;;  %v8100_v43 = vld [vmem:[%s12625_s12 + $0x208] sm:$0xff]  ;;  %v8110_v15 = vld [vmem:[%s12625_s12 + $0x258] sm:$0xff] }
 0x85f   : > { %v5909_v47 = vpack.c.bf16 %v5908_v58, %v5908_v58  ;;  %v6018_v58 = vperm.slane %v12323_v12, 3  ;;  %v6045_v12 = vpack.c.bf16 %v6021_v7, %v6021_v7  ;;  %v8112_v36 = vld [vmem:[%s12625_s12 + $0x268] sm:$0xff] }
 0x861   : > { %7556 = vmatmul.msk.bf16.vlgmr.msrb.gmra.mxu3 %vm2310_vm2, %v5909_v47  ;;  %v8090_v47 = vld [vmem:[%s12625_s12 + $0x1b8] sm:$0xff] }
 0x862   : > { %6820 = vmatpush.bf16.msrb.mxu3 %v8042_v39  ;;  %6926 = vmatpush.bf16.msra.mxu1 %v8104_v16  ;;  %v8059_v39 = vld [vmem:[%s12625_s12 + $0xc0] sm:$0xff]  ;;  %v8109_v16 = vld [vmem:[%s12625_s12 + $0x250] sm:$0xff] }
 0x863   : > { %6914 = vmatpush.bf16.msra.mxu0 %v8095_v5  ;;  %v8107_v5 = vld [vmem:[%s12625_s12 + $0x240] sm:$0xff] }
 0x866   : > { %6821 = vmatpush.bf16.msrb.mxu3 %v8041_v51  ;;  %6927 = vmatpush.bf16.msra.mxu1 %v8103_v50  ;;  %v8091_v51 = vld [vmem:[%s12625_s12 + $0x1c0] sm:$0xff] }
 0x867   : > { %6915 = vmatpush.bf16.msra.mxu0 %v8094_v38 }
 0x86a   : > { %6822 = vmatpush.bf16.msrb.mxu3 %v8040_v33  ;;  %6928 = vmatpush.bf16.msra.mxu1 %v8102_v34  ;;  %v8122_v33 = vld [vmem:[%s12625_s12 + $0x2b8] sm:$0xff] }
 0x86b   : > { %6916 = vmatpush.bf16.msra.mxu0 %v8093_v21 }
 0x86e   : > { %6823 = vmatpush.bf16.msrb.mxu3 %v8039_v48  ;;  %6929 = vmatpush.bf16.msra.mxu1 %v8101_v54  ;;  %v8099_v48 = vld [vmem:[%s12625_s12 + $0x200] sm:$0xff] }
 0x86f   : > { %6917 = vmatpush.bf16.msra.mxu0 %v8092_v10 }
 0x872   : > { %6824 = vmatpush.bf16.msrb.mxu3 %v8038_v35  ;;  %6930 = vmatpush.bf16.msra.mxu1 %v8100_v43  ;;  %v6042_v35 = vpack.c.bf16 %v6018_v58, %v6018_v58 }
 0x873   : > { %6918 = vmatpush.bf16.msra.mxu0 %v8091_v51 }
 0x876   : > { %6825 = vmatpush.bf16.msrb.mxu3 %v8037_v25  ;;  %v8130_v25 = vld [vmem:[%s12625_s12 + $0x2f8] sm:$0xff]  ;;  %6931 = vmatpush.bf16.msra.mxu1 %v8099_v48 }
 0x877   : > { %6950 = vmatpush.bf16.msrb.mxu0 %v8122_v33 }
 0x878   : > { %6919 = vmatmul.bf16.vlgmr.msra.gmra.mxu0 %v6046_v31 }
 0x879   : > { %6932 = vmatmul.bf16.vlgmr.msra.gmra.mxu1 %v6047_v62 }
 0x87a   : > { %6826 = vmatpush.bf16.msrb.mxu3 %v8036_v28  ;;  %v8089_v28 = vld [vmem:[%s12625_s12 + $0x1b0] sm:$0xff]  ;;  %6963 = vmatpush.bf16.msrb.mxu1 %v8130_v25 }
 0x87e   : > { %6827 = vmatpush.bf16.msrb.mxu3 %v8035_v55  ;;  %v8121_v55 = vld [vmem:[%s12625_s12 + $0x2b0] sm:$0xff]  ;;  %6964 = vmatpush.bf16.msrb.mxu1 %v8129_v27 }
 0x87f   : > { %6951 = vmatpush.bf16.msrb.mxu0 %v8121_v55  ;;  %v8137_v55 = vld [vmem:[%s12628_s15 + $0x10] sm:$0xff] }
 0x882   : > { %6965 = vmatpush.bf16.msrb.mxu1 %v8128_v40 }
 0x883   : > { %6952 = vmatpush.bf16.msrb.mxu0 %v8120_v26 }
 0x886   : > { %6966 = vmatpush.bf16.msrb.mxu1 %v8127_v59  ;;  %v8134_v59 = vld [vmem:[%s12627_s14 + $0x18] sm:$0xff] }
 0x887   : > { %6953 = vmatpush.bf16.msrb.mxu0 %v8119_v60  ;;  %v8135_v60 = vld [vmem:[%s12628_s15] sm:$0xff] }
 0x88a   : > { %6967 = vmatpush.bf16.msrb.mxu1 %v8126_v1 }
 0x8c2   : > { %v6842_v23 = vpop.f32.mrf.mxu0 }
 0x8c6   : > { %v6855_v50 = vpop.f32.mrf.mxu1 }
 0x8e4   : > { %v5955_v9 = vpop.f32.mrf.mxu3 }
 0x8e5   : > { %v5956_v44 = vadd.f32 %v5955_v9, %v5918_v2  ;;  %v8086_v2 = vld [vmem:[%s12625_s12 + $0x198] sm:$0xff] }
 0x8e6   : > { %v8118_v9 = vld [vmem:[%s12625_s12 + $0x298] sm:$0xff] }
 0x8e7   : > { %v5959_v22 = vmax.f32 %v5956_v44, 0.0  ;;  %6954 = vmatpush.bf16.msrb.mxu0 %v8118_v9  ;;  %v8125_v44 = vld [vmem:[%s12625_s12 + $0x2d0] sm:$0xff]  ;;  %v8132_v9 = vld [vmem:[%s12627_s14 + $0x8] sm:$0xff] }
 0x8e8   : > { %6968 = vmatpush.bf16.msrb.mxu1 %v8125_v44 }
 0x8e9   : > { %v5960_v37 = vpack.c.bf16 %v5959_v22, %v5959_v22  ;;  %v8116_v22 = vld [vmem:[%s12625_s12 + $0x288] sm:$0xff] }
 0x8eb   : > { %7573 = vmatmul.msk.bf16.vlgmr.msra.gmra.mxu3 %vm2310_vm2, %v5960_v37  ;;  %6955 = vmatpush.bf16.msrb.mxu0 %v8117_v45  ;;  %v8114_v37 = vld [vmem:[%s12625_s12 + $0x278] sm:$0xff] }
 0x8ec   : > { %6859 = vmatpush.bf16.msra.mxu3 %v8066_v18  ;;  %v5957_v41 = vpop.f32.mrf.mxu3  ;;  %v8124_v18 = vld [vmem:[%s12625_s12 + $0x2c8] sm:$0xff] }
 0x8ed   : > { %6969 = vmatpush.bf16.msrb.mxu1 %v8124_v18  ;;  %v8113_v41 = vld [vmem:[%s12625_s12 + $0x270] sm:$0xff] }
 0x8ef   : > { %6956 = vmatpush.bf16.msrb.mxu0 %v8116_v22 }
 0x8f0   : > { %6860 = vmatpush.bf16.msra.mxu3 %v8065_v30  ;;  %v6049_v30 = vpack.c.bf16 %v6025_v13, %v6025_v13 }
 0x8f1   : > { %6970 = vmatpush.bf16.msrb.mxu1 %v8123_v63  ;;  %v5969_v63 = vld [vmem:[%s12624_s11] sm:$0x1] }
 0x8f3   : > { %6957 = vmatpush.bf16.msrb.mxu0 %v8115_v29 }
 0x8f4   : > { %6861 = vmatpush.bf16.msra.mxu3 %v8064_v56  ;;  %6971 = vmatmul.bf16.vlgmr.msrb.gmra.mxu1 %v6050_v17  ;;  %v8111_v56 = vld [vmem:[%s12625_s12 + $0x260] sm:$0xff]  ;;  %v8140_v17 = vld [vmem:[%s12630_s17 + $0x8] sm:$0xff] }
 0x8f6   : > { %6958 = vmatmul.bf16.vlgmr.msrb.gmra.mxu0 %v6049_v30  ;;  %v8141_v30 = vld [vmem:[%s12630_s17 + $0x10] sm:$0xff] }
 0x8f8   : > { %6862 = vmatpush.bf16.msra.mxu3 %v8063_v46  ;;  %v6024_v46 = vperm.slane %v12442_v42, 1 }
 0x8fa   : > { %v6048_v53 = vpack.c.bf16 %v6024_v46, %v6024_v46 }
 0x8fb   : > { %6828 = vmatmul.bf16.vlgmr.msrb.gmra.mxu3 %v6039_v57  ;;  %v6844_v57 = vpop.f32.mrf.mxu0 }
 0x8fc   : > { %6863 = vmatpush.bf16.msra.mxu3 %v8062_v14  ;;  %v6857_v14 = vpop.f32.mrf.mxu1 }
 0x8fd   : > { %v7087_v14 = vld [vmem:[%s12631_s18] sm:$0x1] }
 0x900   : > { %6864 = vmatpush.bf16.msra.mxu3 %v8061_v32  ;;  %v6243_v32 = vld [vmem:[%s12626_s13] sm:$0x1] }
 0x903   : > { %v6881_v38 = vpop.f32.mrf.mxu0 }
 0x904   : > { %6865 = vmatpush.bf16.msra.mxu3 %v8060_v3  ;;  %v6894_v34 = vpop.f32.mrf.mxu1 }
 0x908   : > { %6866 = vmatpush.bf16.msra.mxu3 %v8059_v39 }
 0x90b   : > { %6867 = vmatmul.bf16.vlgmr.msra.gmra.mxu3 %v6042_v35  ;;  %v6883_v54 = vpop.f32.mrf.mxu0 }
 0x90c   : > { %6898 = vmatpush.bf16.msrb.mxu3 %v8090_v47  ;;  %v6896_v43 = vpop.f32.mrf.mxu1  ;;  %v7134_v54 = vld [vmem:[%s12633_s20] sm:$0x1] }
 0x910   : > { %6899 = vmatpush.bf16.msrb.mxu3 %v8089_v28  ;;  %v8138_v28 = vld [vmem:[%s12628_s15 + $0x18] sm:$0xff] }
 0x913   : > { %v6920_v33 = vpop.f32.mrf.mxu0 }
 0x914   : > { %6900 = vmatpush.bf16.msrb.mxu3 %v8088_v20  ;;  %v6933_v35 = vpop.f32.mrf.mxu1 }
 0x918   : > { %6901 = vmatpush.bf16.msrb.mxu3 %v8087_v4  ;;  %v8136_v4 = vld [vmem:[%s12628_s15 + $0x8] sm:$0xff] }
 0x91b   : > { %v6922_v20 = vpop.f32.mrf.mxu0 }
 0x91c   : > { %6902 = vmatpush.bf16.msrb.mxu3 %v8086_v2  ;;  %v6935_v26 = vpop.f32.mrf.mxu1  ;;  %v8133_v2 = vld [vmem:[%s12627_s14 + $0x10] sm:$0xff] }
 0x920   : > { %6903 = vmatpush.bf16.msrb.mxu3 %v8085_v52  ;;  %v8131_v52 = vld [vmem:[%s12627_s14] sm:$0xff] }
 0x924   : > { %6904 = vmatpush.bf16.msrb.mxu3 %v8084_v0 }
 0x928   : > { %6905 = vmatpush.bf16.msrb.mxu3 %v8083_v19 }
 0x92b   : > { %6906 = vmatmul.bf16.vlgmr.msrb.gmra.mxu3 %v6045_v12 }
 0x92c   : > { %6937 = vmatpush.bf16.msra.mxu3 %v8114_v37 }
 0x930   : > { %6938 = vmatpush.bf16.msra.mxu3 %v8113_v41  ;;  %v8142_v41 = vld [vmem:[%s12630_s17 + $0x18] sm:$0xff] }
 0x934   : > { %6939 = vmatpush.bf16.msra.mxu3 %v8112_v36  ;;  %v8139_v36 = vld [vmem:[%s12630_s17] sm:$0xff] }
 0x938   : > { %6940 = vmatpush.bf16.msra.mxu3 %v8111_v56  ;;  %v8144_v56 = vld [vmem:[%s12632_s19 + $0x8] sm:$0xff] }
 0x93c   : > { %6941 = vmatpush.bf16.msra.mxu3 %v8110_v15  ;;  %v8143_v15 = vld [vmem:[%s12632_s19] sm:$0xff] }
 0x940   : > { %6942 = vmatpush.bf16.msra.mxu3 %v8109_v16 }
 0x944   : > { %6943 = vmatpush.bf16.msra.mxu3 %v8108_v24 }
 0x948   : > { %6944 = vmatpush.bf16.msra.mxu3 %v8107_v5  ;;  %v7075_v5 = vld [vmem:[%s12629_s16] sm:$0x1] }
 0x94b   : > { %6945 = vmatmul.bf16.vlgmr.msra.gmra.mxu3 %v6048_v53 }
 0x94c   : > { %7026 = vmatpush.bf16.msrb.mxu3 %v8138_v28 }
 0x950   : > { %7027 = vmatpush.bf16.msrb.mxu3 %v8137_v55 }
 0x954   : > { %7028 = vmatpush.bf16.msrb.mxu3 %v8136_v4 }
 0x958   : > { %7029 = vmatpush.bf16.msrb.mxu3 %v8135_v60 }
 0x95c   : > { %7066 = vmatpush.bf16.msra.mxu3 %v8134_v59 }
 0x960   : > { %7067 = vmatpush.bf16.msra.mxu3 %v8133_v2 }
 0x964   : > { %7068 = vmatpush.bf16.msra.mxu3 %v8132_v9 }
 0x968   : > { %7069 = vmatpush.bf16.msra.mxu3 %v8131_v52 }
 0x96e   : > { %v6006_v8 = vpop.f32.mrf.mxu3 }
 0x96f   : > { %v6007_v12 = vadd.f32 %v6006_v8, %v5969_v63 }
 0x971   : > { %v6972_v42 = vpop.f32.mrf.mxu1  ;;  %v6010_v13 = vmax.f32 %v6007_v12, 0.0 }
 0x973   : > { %v6959_v49 = vpop.f32.mrf.mxu0  ;;  %v6977_v6 = vpack.c.bf16 %v6010_v13, %v6010_v13 }
 0x976   : > { %v6008_v11 = vpop.f32.mrf.mxu3 }
 0x979   : > { %v6974_v31 = vpop.f32.mrf.mxu1 }
 0x97b   : > { %v6961_v61 = vpop.f32.mrf.mxu0 }
 0x97e   : > { %v6829_v21 = vpop.f32.mrf.mxu3 }
 0x97f   : > { %v6830_v3 = vadd.f32 %v6829_v21, %v6243_v32 }
 0x981   : > { %v6843_v10 = vadd.f32 %v6842_v23, %v6830_v3 }
 0x983   : > { %v6856_v58 = vadd.f32 %v6855_v50, %v6843_v10 }
 0x986   : > { %v6831_v39 = vpop.f32.mrf.mxu3 }
 0x98e   : > { %v6868_v47 = vpop.f32.mrf.mxu3 }
 0x98f   : > { %v6869_v51 = vadd.f32 %v6868_v47, %v6856_v58 }
 0x991   : > { %v6882_v48 = vadd.f32 %v6881_v38, %v6869_v51 }
 0x993   : > { %v6895_v25 = vadd.f32 %v6894_v34, %v6882_v48 }
 0x996   : > { %v6870_v27 = vpop.f32.mrf.mxu3 }
 0x9ae   : > { %v6907_v40 = vpop.f32.mrf.mxu3 }
 0x9af   : > { %v6908_v1 = vadd.f32 %v6907_v40, %v6895_v25 }
 0x9b1   : > { %v6921_v45 = vadd.f32 %v6920_v33, %v6908_v1 }
 0x9b3   : > { %v6934_v44 = vadd.f32 %v6933_v35, %v6921_v45 }
 0x9b6   : > { %v6909_v62 = vpop.f32.mrf.mxu3 }
 0x9ce   : > { %v6946_v0 = vpop.f32.mrf.mxu3 }
 0x9cf   : > { %v6947_v22 = vadd.f32 %v6946_v0, %v6934_v44 }
 0x9d1   : > { %v6960_v18 = vadd.f32 %v6959_v49, %v6947_v22 }
 0x9d3   : > { %v6973_v7 = vadd.f32 %v6972_v42, %v6960_v18 }
 0x9d5   : > { %v6976_v19 = vmax.f32 %v6973_v7, 0.0 }
 0x9d6   : > { %v6948_v37 = vpop.f32.mrf.mxu3 }
 0x9d7   : > { %v6986_v29 = vpack.c.bf16 %v6976_v19, %v6976_v19 }
 0x9d9   : > { %7974 = vmatmul.msk.bf16.vlgmr.msrb.gmra.mxu3 %vm2310_vm2, %v6986_v29 }
 0x9da   : > { %7119 = vmatpush.bf16.msrb.mxu3 %v8142_v41 }
 0x9de   : > { %7120 = vmatpush.bf16.msrb.mxu3 %v8141_v30 }
 0x9e2   : > { %7121 = vmatpush.bf16.msrb.mxu3 %v8140_v17 }
 0x9e6   : > { %7122 = vmatpush.bf16.msrb.mxu3 %v8139_v36 }
 0x9e9   : > { %7991 = vmatmul.msk.bf16.vlgmr.msra.gmra.mxu3 %vm2310_vm2, %v6977_v6 }
 0x9ea   : > { %7157 = vmatpush.bf16.msra.mxu3 %v8144_v56 }
 0x9ee   : > { %7158 = vmatpush.bf16.msra.mxu3 %v8143_v15 }
 0xa5c   : > { %v7031_v16 = vpop.f32.mrf.mxu3 }
 0xa64   : > { %v7033_v24 = vpop.f32.mrf.mxu3 }
 0xa6c   : > { %v7071_v46 = vpop.f32.mrf.mxu3 }
 0xa6d   : > { %v7072_v53 = vadd.f32 %v7071_v46, %v7031_v16 }
 0xa6f   : > { %v7076_v23 = vadd.f32 %v7075_v5, %v7072_v53 }
 0xa71   : > { %v7077_v50 = vmax.f32 %v7076_v23, 0.0 }
 0xa73   : > { %v7078_v57 = vpack.c.bf16 %v7077_v50, %v7077_v50 }
 0xa74   : > { %v7073_v8 = vpop.f32.mrf.mxu3 }
 0xa75   : > { %8008 = vmatmul.msk.bf16.vlgmr.msrb.gmra.mxu3 %vm2310_vm2, %v7078_v57 }
 0xaf8   : > { %v7124_v11 = vpop.f32.mrf.mxu3 }
 0xaf9   : > { %v7125_v38 = vadd.f32 %v7124_v11, %v7087_v14 }
 0xafb   : > { %v7128_v34 = vmax.f32 %v7125_v38, 0.0 }
 0xafd   : > { %v7129_v32 = vpack.c.bf16 %v7128_v34, %v7128_v34 }
 0xaff   : > { %8017 = vmatmul.msk.bf16.vlgmr.msra.gmra.mxu3 %vm7147_vm3, %v7129_v32 }
 0xb00   : > { %v7126_v21 = vpop.f32.mrf.mxu3 }
 0xb82   : > { %v7160_v3 = vpop.f32.mrf.mxu3 }
 0xb83   : > { %v7161_v10 = vadd.f32 %v7160_v3, %v7134_v54 }
 0xb85   : > { %7165 = vst.msk [vmem:[%s661_s26] sm:$0x1] %vm7164_vm4, %v7161_v10 }
 0xb86   : > { %8232 = shalt.err (!%p8229_p3)
}
 0xb87   : > { %8158 = dma.vmem_to_hbm [thread:$0]  (%p8417_p5), %s7178_s23, 16, %s7180_s1, %s7167_s4  }
 0xb8a   : > { %v7162_v43 = vpop.f32.mrf.mxu3 }
 0xb8b PF: > { %s13238_s8 = sld [smem:[#allocation7_spill]] }
 0xb8c   : > { %s13239_s30 = sld [smem:[#allocation5_spill]] }
 0xb91   : > { %p8164_p4 = scmp.ge.s32.totalorder %s13238_s8, 2 }
 0xb92   : > { %s7191_s26 = sand.u32 1, %s13239_s30  }
 0xb93   : > { %p8161_p7 = pnand %p8164_p4, %p8421_p6  ;;  %s7192_s3 = scalar_lea.sflag [#allocation3], %s7191_s26 }
 0xb95   : > { %p8162_p8 = pneg %p8161_p7 }
 0xb97   : > { %8250 = dma.done.wait (%p8162_p8), %s7192_s3, 16  }
 0xb98   : > { %8252 = vsyncadd (%p8162_p8), %s7192_s3, 4294967280  ;;  %s13241_s27 = sld [smem:[#allocation8_spill]]  ;;  %s13244_s2 = smov %s8259_s25 }
 0xb99   : > { %s13242_s28 = sld [smem:[#allocation6_spill]] }
 0xb9a   : > { %s13243_s26 = sld [smem:[#allocation9_spill]] }
 0xb9e   : > { %p31_p9 = scmp.ge.s32.totalorder %s13241_s27, 4  }
 0xb9f   : > { %s13245_s25 = smov %s13242_s28 }
 0xba0   :  { %33 = sbr.rel (!%p31_p9) target bundleno = 14 (0xe), region = 142 }
 0xba5   :  { %7197 = vsyncpa [#allocation3], 1 }
 0xba6   :  { %7199 = vsyncpa [#allocation3 + $0x1], 1 }

</bundles_post_ra>
